<compile_context>
chip_gen: v7x
topology: tpu7x:2x2x1
jax: 0.10.0
libtpu: 0.0.40
codegen_flags: <defaults>
</compile_context>

<pallas_src>
import functools
import math

import jax
import jax.numpy as jnp
from jax.experimental import pallas as pl
from jax.experimental.pallas import tpu as pltpu

NEG_INF = -1e9
_VMEM = pl.BlockSpec(memory_space=pltpu.MemorySpace.VMEM)


# ----------------------------- in-kernel helpers -----------------------------


def _layer_norm(x, g, b, eps=1e-5):
    mu = jnp.mean(x, axis=-1, keepdims=True)
    var = jnp.mean((x - mu) ** 2, axis=-1, keepdims=True)
    return (x - mu) * jax.lax.rsqrt(var + eps) * g + b


def _gelu(x):
    # tanh-approximation GELU (jax.nn.gelu(approximate=True) form): transcendental on the
    # EUP slot, ~half the VALU work of the erf polynomial.
    c = math.sqrt(2.0 / math.pi)
    return 0.5 * x * (1.0 + jnp.tanh(c * (x + 0.044715 * x * x * x)))


def _matmul(x, w, b):
    # (M, K) @ (K, N) + (1, N): bf16 MXU inputs, f32 accumulate.
    return jax.lax.dot_general(
        x.astype(jnp.bfloat16), w.astype(jnp.bfloat16),
        (((1,), (0,)), ((), ())), preferred_element_type=jnp.float32,
    ) + b


def _split_heads(t, n_heads):
    # (N, L, H) -> (N*nH, L, Dh); head h = contiguous columns [h*Dh:(h+1)*Dh].
    N, L, H = t.shape
    Dh = H // n_heads
    t = jnp.swapaxes(t, 1, 2)                 # (N, H, L)      last-two-dim swap
    t = t.reshape(N * n_heads, Dh, L)         # contiguous leading split/merge
    return jnp.swapaxes(t, 1, 2)              # (N*nH, L, Dh)  last-two-dim swap


def _merge_heads(o, N, n_heads):
    # (N*nH, L, Dh) -> (N, L, H)
    NH, L, Dh = o.shape
    o = jnp.swapaxes(o, 1, 2)                 # (N*nH, Dh, L)
    o = o.reshape(N, n_heads * Dh, L)         # (N, H, L)
    return jnp.swapaxes(o, 1, 2)              # (N, L, H)


def _attention(q, k, v, bias, n_heads, scale):
    """q: (N, Lq, H), k/v: (N, Lk, H); bias broadcastable to (N*n_heads, Lq, Lk)."""
    N = q.shape[0]
    qm = _split_heads(q, n_heads).astype(jnp.bfloat16)       # (N*nH, Lq, Dh)
    km = _split_heads(k, n_heads).astype(jnp.bfloat16)       # (N*nH, Lk, Dh)
    vm = _split_heads(v, n_heads).astype(jnp.bfloat16)
    s = jnp.einsum('bqd,bkd->bqk', qm, km,
                   preferred_element_type=jnp.float32) * scale + bias
    m = jnp.max(s, axis=-1, keepdims=True)
    p = jnp.exp(s - m)
    denom = jnp.sum(p, axis=-1, keepdims=True)               # (N*nH, Lq, 1)
    o = jnp.einsum('bqk,bkd->bqd', p.astype(jnp.bfloat16), vm,
                   preferred_element_type=jnp.float32)       # unnormalized
    o = o * pl.reciprocal(denom, approx=True)                # deferred normalization
    return _merge_heads(o, N, n_heads)                       # (N, Lq, H)


# ----------------------------- fused layer kernels -----------------------------


def _encoder_layer_kernel(x_ref, kbias_ref,
                          s0g_ref, s0b_ref, w_in_ref, b_in_ref, w_out_ref, b_out_ref,
                          s1g_ref, s1b_ref, w1_ref, b1_ref, w2_ref, b2_ref,
                          o_ref, *, n_heads):
    x = x_ref[...]                                           # (N, L, H) f32
    N, L, H = x.shape
    scale = 1.0 / math.sqrt(H // n_heads)

    # sublayer 0: pre-norm self-attention, fused QKV projection
    xn = _layer_norm(x, s0g_ref[...].reshape(1, 1, H), s0b_ref[...].reshape(1, 1, H))
    qkv = _matmul(xn.reshape(N * L, H), w_in_ref[...], b_in_ref[...]).reshape(N, L, 3 * H)
    q, k, v = qkv[..., :H], qkv[..., H:2 * H], qkv[..., 2 * H:]
    bias = kbias_ref[...].reshape(N * n_heads, 1, L)         # key-padding additive mask
    attn = _attention(q, k, v, bias, n_heads, scale)
    attn = _matmul(attn.reshape(N * L, H), w_out_ref[...], b_out_ref[...]).reshape(N, L, H)
    x = x + attn

    # sublayer 1: pre-norm feed-forward (ReLU — canonical PositionwiseFeedForward)
    xn = _layer_norm(x, s1g_ref[...].reshape(1, 1, H), s1b_ref[...].reshape(1, 1, H))
    h = jnp.maximum(_matmul(xn.reshape(N * L, H), w1_ref[...], b1_ref[...]), 0.0)
    ff = _matmul(h, w2_ref[...], b2_ref[...]).reshape(N, L, H)
    o_ref[...] = (x + ff).reshape(N, L * H)                  # lane-dense output slab


def _decoder_layer_kernel(x_ref, mem_ref, membias_ref,
                          n1g_ref, n1b_ref, sa_win_ref, sa_bin_ref, sa_wout_ref, sa_bout_ref,
                          n2g_ref, n2b_ref, ca_wq_ref, ca_bq_ref, ca_wkv_ref, ca_bkv_ref,
                          ca_wout_ref, ca_bout_ref,
                          n3g_ref, n3b_ref, w1_ref, b1_ref, w2_ref, b2_ref,
                          o_ref, *, n_heads):
    x = x_ref[...]                                           # (B, T, H)
    mem = mem_ref[...]                                       # (B, S, H)
    B, T, H = x.shape
    S = mem.shape[1]
    scale = 1.0 / math.sqrt(H // n_heads)

    # self-attention block (causal mask built in-kernel, fused QKV)
    xn = _layer_norm(x, n1g_ref[...].reshape(1, 1, H), n1b_ref[...].reshape(1, 1, H))
    qkv = _matmul(xn.reshape(B * T, H), sa_win_ref[...], sa_bin_ref[...]).reshape(B, T, 3 * H)
    q, k, v = qkv[..., :H], qkv[..., H:2 * H], qkv[..., 2 * H:]
    row = jax.lax.broadcasted_iota(jnp.int32, (1, T, T), 1)
    col = jax.lax.broadcasted_iota(jnp.int32, (1, T, T), 2)
    causal_bias = jnp.where(col > row, NEG_INF, 0.0)
    attn = _attention(q, k, v, causal_bias, n_heads, scale)
    attn = _matmul(attn.reshape(B * T, H), sa_wout_ref[...], sa_bout_ref[...]).reshape(B, T, H)
    x = x + attn

    # cross-attention block (memory key-padding mask), pre-split Wq / Wkv
    xn = _layer_norm(x, n2g_ref[...].reshape(1, 1, H), n2b_ref[...].reshape(1, 1, H))
    q = _matmul(xn.reshape(B * T, H), ca_wq_ref[...], ca_bq_ref[...]).reshape(B, T, H)
    kv = _matmul(mem.reshape(B * S, H), ca_wkv_ref[...], ca_bkv_ref[...]).reshape(B, S, 2 * H)
    k, v = kv[..., :H], kv[..., H:]
    mbias = membias_ref[...].reshape(B * n_heads, 1, S)
    attn = _attention(q, k, v, mbias, n_heads, scale)
    attn = _matmul(attn.reshape(B * T, H), ca_wout_ref[...], ca_bout_ref[...]).reshape(B, T, H)
    x = x + attn

    # feed-forward block (GELU — TransformerDecoderLayer(activation='gelu'))
    xn = _layer_norm(x, n3g_ref[...].reshape(1, 1, H), n3b_ref[...].reshape(1, 1, H))
    h = _gelu(_matmul(xn.reshape(B * T, H), w1_ref[...], b1_ref[...]))
    ff = _matmul(h, w2_ref[...], b2_ref[...]).reshape(B, T, H)
    o_ref[...] = (x + ff).reshape(B, T * H)                  # lane-dense output slab


def _gen_ce_kernel(x_ref, lbl_ref, w_ref, b_ref, logit_ref, loss_ref, *, vocab):
    x = x_ref[...]                                           # (M, H)
    logits = _matmul(x, w_ref[...], b_ref[...])              # (M, Vp) lane-dense f32
    logit_ref[...] = logits
    col = jax.lax.broadcasted_iota(jnp.int32, logits.shape, 1)
    masked = jnp.where(col < vocab, logits, NEG_INF)         # ignore padded vocab columns
    m = jnp.max(masked, axis=-1, keepdims=True)
    lse = jnp.log(jnp.sum(jnp.exp(masked - m), axis=-1, keepdims=True)) + m
    labels = lbl_ref[...]                                    # (M, 1) int32
    tgt = jnp.sum(jnp.where(col == labels, logits, 0.0), axis=-1, keepdims=True)
    # nn.CrossEntropyLoss() default: mean over all M tokens, no ignore_index.
    loss_ref[...] = jnp.sum(lse - tgt, axis=0, keepdims=True) / x.shape[0]


# ----------------------------- pallas_call wrappers -----------------------------


def encoder_layer(p, x, mask, n_heads):
    is_lower = x.ndim == 4
    if is_lower:
        B, S, L, H = x.shape
        x = x.reshape(B * S, L, H)
        mask = mask.reshape(B * S, L)
    N, L, H = x.shape
    kbias = jnp.where(mask, NEG_INF, 0.0).astype(jnp.float32)     # (N, L)
    kbias = jnp.repeat(kbias, n_heads, axis=0)                    # (N*nH, L), n-major / h-minor
    out = pl.pallas_call(
        functools.partial(_encoder_layer_kernel, n_heads=n_heads),
        out_shape=jax.ShapeDtypeStruct((N, L * H), jnp.float32),
        in_specs=[_VMEM] * 14,
        out_specs=_VMEM,
    )(x, kbias,
      p["sub0_g"], p["sub0_b"],
      p["attn"]["w_in"], p["attn"]["b_in"],
      p["attn"]["w_out"], p["attn"]["b_out"],
      p["sub1_g"], p["sub1_b"],
      p["pff"]["w1"], p["pff"]["b1"], p["pff"]["w2"], p["pff"]["b2"])
    out = out.reshape(N, L, H)
    if is_lower:
        out = out.reshape(B, S, L, H)
    return out


def decoder_layer(p, x, memory, mem_bias_h, n_heads):
    B, T, H = x.shape
    out = pl.pallas_call(
        functools.partial(_decoder_layer_kernel, n_heads=n_heads),
        out_shape=jax.ShapeDtypeStruct((B, T * H), jnp.float32),
        in_specs=[_VMEM] * 23,
        out_specs=_VMEM,
    )(x, memory, mem_bias_h,
      p["n1_g"], p["n1_b"],
      p["self_attn"]["w_in"], p["self_attn"]["b_in"],
      p["self_attn"]["w_out"], p["self_attn"]["b_out"],
      p["n2_g"], p["n2_b"],
      p["cross_attn"]["w_q"], p["cross_attn"]["b_q"],
      p["cross_attn"]["w_kv"], p["cross_attn"]["b_kv"],
      p["cross_attn"]["w_out"], p["cross_attn"]["b_out"],
      p["n3_g"], p["n3_b"],
      p["w1"], p["b1"], p["w2"], p["b2"])
    return out.reshape(B, T, H)


def generator_ce(x2, w_pad, b_pad, labels, vocab):
    # w_pad / b_pad are pre-padded (lane-dense Vp) at init time — no per-call jnp.pad.
    M, H = x2.shape
    Vp = w_pad.shape[1]
    logits_p, loss = pl.pallas_call(
        functools.partial(_gen_ce_kernel, vocab=vocab),
        out_shape=(jax.ShapeDtypeStruct((M, Vp), jnp.float32),
                   jax.ShapeDtypeStruct((1, 1), jnp.float32)),
        in_specs=[_VMEM] * 4,
        out_specs=(_VMEM, _VMEM),
    )(x2, labels.reshape(M, 1).astype(jnp.int32), w_pad, b_pad)
    return logits_p[:, :vocab], loss[0, 0]


# ----------------------------- model glue (plain JAX) -----------------------------


def sinusoid_pe(L, D):
    pos = jnp.arange(L, dtype=jnp.float32)[:, None]
    div = jnp.exp(jnp.arange(0, D, 2, dtype=jnp.float32) * (-math.log(10000.0) / D))
    pe = jnp.zeros((L, D), jnp.float32)
    pe = pe.at[:, 0::2].set(jnp.sin(pos * div))
    pe = pe.at[:, 1::2].set(jnp.cos(pos * div))
    return pe


def embeddings(emb_table, ids):
    # token lookup * sqrt(H) + sinusoidal positional encoding (dropout = 0)
    H = emb_table.shape[1]
    x = jnp.take(emb_table, ids, axis=0) * math.sqrt(H)
    return x + sinusoid_pe(ids.shape[-1], H)


def encoder(p, x_ids, sent_mask, text_mask, n_heads):
    x = embeddings(p["emb"], x_ids)                 # (B, Snum, Slen, H)
    for lp in p["layers"]:
        x = encoder_layer(lp, x, sent_mask, n_heads)
    x = x[:, :, 0, :]                               # first-token sentence vectors
    x = x + sinusoid_pe(x.shape[1], x.shape[2])     # PositionalEncoding over sentences
    for lp in p["high_layers"]:                     # model_type == 'hier_attn'
        x = encoder_layer(lp, x, text_mask, n_heads)
    return x


def decoder(p, y_ids, memory, text_mask, n_heads):
    x = embeddings(p["emb"], y_ids)
    mem_bias = jnp.where(text_mask, NEG_INF, 0.0).astype(jnp.float32)   # (B, Snum)
    mem_bias_h = jnp.repeat(mem_bias, n_heads, axis=0)                  # (B*nH, Snum)
    for lp in p["layers"]:
        x = decoder_layer(lp, x, memory, mem_bias_h, n_heads)
    return x


def hier_model_forward(params, x_ids, y_full, cfg):
    pad_id = cfg["pad_id"]
    n_heads = cfg["n_heads"]
    V = cfg["vocab_size"]
    # shift_y
    y_in, label = y_full[:, :-1], y_full[:, 1:]
    # enc_mask  (dec_mask / causal is built inside the decoder kernel)
    sent_mask = x_ids == pad_id                     # (B, Snum, Slen)
    text_mask = jnp.all(sent_mask, axis=-1)         # (B, Snum)

    memory = encoder(params["enc"], x_ids, sent_mask, text_mask, n_heads)
    dec_out = decoder(params["dec"], y_in, memory, text_mask, n_heads)
    B, T, H = dec_out.shape
    logits2d, loss = generator_ce(dec_out.reshape(B * T, H),
                                  params["gen_w"], params["gen_b"],
                                  label.reshape(-1), V)
    return logits2d.reshape(B, T, V), loss


# ----------------------------- deterministic params -----------------------------


def init_params(key, cfg):
    H, P, V = cfg["hidden_dim"], cfg["pff_dim"], cfg["vocab_size"]
    Vp = max(128, ((V + 127) // 128) * 128)
    keys = iter(jax.random.split(key, 64))

    def w(*shape, scale=0.05, dtype=jnp.bfloat16):
        # MXU weights stored bf16 (halves residency/DMA); embeddings kept f32.
        return (jax.random.normal(next(keys), shape, jnp.float32) * scale).astype(dtype)

    def zeros(*shape):
        return jnp.zeros(shape, jnp.float32)

    def ones(*shape):
        return jnp.ones(shape, jnp.float32)

    def enc_layer_p():
        return dict(
            attn=dict(w_in=w(H, 3 * H), b_in=zeros(1, 3 * H),
                      w_out=w(H, H), b_out=zeros(1, H)),
            pff=dict(w1=w(H, P), b1=zeros(1, P), w2=w(P, H), b2=zeros(1, H)),
            sub0_g=ones(1, H), sub0_b=zeros(1, H),
            sub1_g=ones(1, H), sub1_b=zeros(1, H),
        )

    def dec_layer_p():
        return dict(
            self_attn=dict(w_in=w(H, 3 * H), b_in=zeros(1, 3 * H),
                           w_out=w(H, H), b_out=zeros(1, H)),
            cross_attn=dict(w_q=w(H, H), b_q=zeros(1, H),            # pre-split Wq / Wkv
                            w_kv=w(H, 2 * H), b_kv=zeros(1, 2 * H),
                            w_out=w(H, H), b_out=zeros(1, H)),
            w1=w(H, P), b1=zeros(1, P), w2=w(P, H), b2=zeros(1, H),
            n1_g=ones(1, H), n1_b=zeros(1, H),
            n2_g=ones(1, H), n2_b=zeros(1, H),
            n3_g=ones(1, H), n3_b=zeros(1, H),
        )

    gen_w_f32 = jax.random.normal(next(keys), (H, V), jnp.float32) * 0.05
    gen_w = jnp.pad(gen_w_f32, ((0, 0), (0, Vp - V))).astype(jnp.bfloat16)  # padded once
    gen_b = jnp.zeros((1, Vp), jnp.float32)

    return dict(
        enc=dict(
            emb=w(V, H, scale=1.0, dtype=jnp.float32),
            layers=[enc_layer_p() for _ in range(cfg["n_layers"])],
            high_layers=[enc_layer_p() for _ in range(cfg["n_layers"])],
        ),
        dec=dict(
            emb=w(V, H, scale=1.0, dtype=jnp.float32),
            layers=[dec_layer_p() for _ in range(cfg["n_layers"])],
        ),
        gen_w=gen_w,
        gen_b=gen_b,
    )


# ----------------------------- main -----------------------------

if __name__ == "__main__":
    cfg = dict(
        hidden_dim=32, n_heads=4, pff_dim=64, n_layers=2,
        vocab_size=50, pad_id=0, model_type="hier_attn", dropout_ratio=0.0,
    )
    B, SNUM, SLEN, TP1 = 2, 3, 8, 9

    key = jax.random.PRNGKey(0)
    kx, ky, kp = jax.random.split(key, 3)
    x_ids = jax.random.randint(kx, (B, SNUM, SLEN), 1, cfg["vocab_size"], dtype=jnp.int32)
    # pad the tail of a couple of sentences (never a fully-padded sentence -> no NaN rows)
    x_ids = x_ids.at[0, 1, 5:].set(cfg["pad_id"])
    x_ids = x_ids.at[1, 2, 6:].set(cfg["pad_id"])
    y_ids = jax.random.randint(ky, (B, TP1), 1, cfg["vocab_size"], dtype=jnp.int32)

    params = init_params(kp, cfg)

    fwd = jax.jit(lambda p, x, y: hier_model_forward(p, x, y, cfg))
    logit, loss = fwd(params, x_ids, y_ids)
    jax.block_until_ready((logit, loss))

    assert logit.shape == (B, TP1 - 1, cfg["vocab_size"])
    assert bool(jnp.isfinite(loss))
    print("KERNEL_OK")
</pallas_src>

<mosaic_0001>
module attributes {stable_mosaic.version = 11 : i64} {
  func.func @_encoder_layer_kernel(%arg0: memref<6x8x32xf32, #tpu.memory_space<vmem>>, %arg1: memref<24x8xf32, #tpu.memory_space<vmem>>, %arg2: memref<1x32xf32, #tpu.memory_space<vmem>>, %arg3: memref<1x32xf32, #tpu.memory_space<vmem>>, %arg4: memref<32x96xbf16, #tpu.memory_space<vmem>>, %arg5: memref<1x96xf32, #tpu.memory_space<vmem>>, %arg6: memref<32x32xbf16, #tpu.memory_space<vmem>>, %arg7: memref<1x32xf32, #tpu.memory_space<vmem>>, %arg8: memref<1x32xf32, #tpu.memory_space<vmem>>, %arg9: memref<1x32xf32, #tpu.memory_space<vmem>>, %arg10: memref<32x64xbf16, #tpu.memory_space<vmem>>, %arg11: memref<1x64xf32, #tpu.memory_space<vmem>>, %arg12: memref<64x32xbf16, #tpu.memory_space<vmem>>, %arg13: memref<1x32xf32, #tpu.memory_space<vmem>>, %arg14: memref<6x256xf32, #tpu.memory_space<vmem>>) attributes {dimension_semantics = [], scalar_prefetch = 0 : i64, scratch_operands = 0 : i64, tpu.core_type = #tpu.core_type<tc>} {
    %c0 = arith.constant 0 : index
    %c0_0 = arith.constant 0 : index
    %c0_1 = arith.constant 0 : index
    %0 = vector.load %arg0[%c0, %c0_0, %c0_1] : memref<6x8x32xf32, #tpu.memory_space<vmem>>, vector<6x8x32xf32>
    %c0_2 = arith.constant 0 : index
    %c0_3 = arith.constant 0 : index
    %1 = vector.load %arg2[%c0_2, %c0_3] : memref<1x32xf32, #tpu.memory_space<vmem>>, vector<1x32xf32>
    %2 = vector.shape_cast %1 : vector<1x32xf32> to vector<1x1x32xf32>
    %c0_4 = arith.constant 0 : index
    %c0_5 = arith.constant 0 : index
    %3 = vector.load %arg3[%c0_4, %c0_5] : memref<1x32xf32, #tpu.memory_space<vmem>>, vector<1x32xf32>
    %4 = vector.shape_cast %3 : vector<1x32xf32> to vector<1x1x32xf32>
    %cst = arith.constant dense<0.000000e+00> : vector<6x8xf32>
    %5 = vector.multi_reduction <add>, %0, %cst [2] : vector<6x8x32xf32> to vector<6x8xf32>
    %6 = vector.shape_cast %5 : vector<6x8xf32> to vector<6x8x1xf32>
    %cst_6 = arith.constant 3.200000e+01 : f32
    %7 = vector.broadcast %cst_6 : f32 to vector<6x8x1xf32>
    %8 = arith.divf %6, %7 : vector<6x8x1xf32>
    %9 = vector.broadcast %8 : vector<6x8x1xf32> to vector<6x8x32xf32>
    %10 = arith.subf %0, %9 : vector<6x8x32xf32>
    %11 = arith.mulf %10, %10 : vector<6x8x32xf32>
    %cst_7 = arith.constant dense<0.000000e+00> : vector<6x8xf32>
    %12 = vector.multi_reduction <add>, %11, %cst_7 [2] : vector<6x8x32xf32> to vector<6x8xf32>
    %13 = vector.shape_cast %12 : vector<6x8xf32> to vector<6x8x1xf32>
    %cst_8 = arith.constant 3.200000e+01 : f32
    %14 = vector.broadcast %cst_8 : f32 to vector<6x8x1xf32>
    %15 = arith.divf %13, %14 : vector<6x8x1xf32>
    %16 = vector.broadcast %8 : vector<6x8x1xf32> to vector<6x8x32xf32>
    %17 = arith.subf %0, %16 : vector<6x8x32xf32>
    %cst_9 = arith.constant 9.99999974E-6 : f32
    %18 = vector.broadcast %cst_9 : f32 to vector<6x8x1xf32>
    %19 = arith.addf %15, %18 : vector<6x8x1xf32>
    %20 = math.rsqrt %19 : vector<6x8x1xf32>
    %21 = vector.broadcast %20 : vector<6x8x1xf32> to vector<6x8x32xf32>
    %22 = arith.mulf %17, %21 : vector<6x8x32xf32>
    %23 = vector.broadcast %2 : vector<1x1x32xf32> to vector<6x8x32xf32>
    %24 = arith.mulf %22, %23 : vector<6x8x32xf32>
    %25 = vector.broadcast %4 : vector<1x1x32xf32> to vector<6x8x32xf32>
    %26 = arith.addf %24, %25 : vector<6x8x32xf32>
    %27 = vector.shape_cast %26 : vector<6x8x32xf32> to vector<48x32xf32>
    %c0_10 = arith.constant 0 : index
    %c0_11 = arith.constant 0 : index
    %28 = vector.load %arg4[%c0_10, %c0_11] : memref<32x96xbf16, #tpu.memory_space<vmem>>, vector<32x96xbf16>
    %c0_12 = arith.constant 0 : index
    %c0_13 = arith.constant 0 : index
    %29 = vector.load %arg5[%c0_12, %c0_13] : memref<1x96xf32, #tpu.memory_space<vmem>>, vector<1x96xf32>
    %30 = arith.truncf %27 : vector<48x32xf32> to vector<48x32xbf16>
    %cst_14 = arith.constant dense<0.000000e+00> : vector<48x96xf32>
    %31 = tpu.matmul %30, %28, %cst_14 {dimension_numbers = #tpu.dot_dimension_numbers<[1], [0], [0], [1], [0, 0, 1, 1], [], []>} : vector<48x32xbf16>, vector<32x96xbf16>, vector<48x96xf32> -> vector<48x96xf32>
    %32 = vector.broadcast %29 : vector<1x96xf32> to vector<48x96xf32>
    %33 = arith.addf %31, %32 : vector<48x96xf32>
    %34 = vector.shape_cast %33 : vector<48x96xf32> to vector<6x8x96xf32>
    %35 = vector.extract_strided_slice %34 {offsets = [0, 0, 0], sizes = [6, 8, 32], strides = [1, 1, 1]} : vector<6x8x96xf32> to vector<6x8x32xf32>
    %36 = vector.extract_strided_slice %34 {offsets = [0, 0, 32], sizes = [6, 8, 32], strides = [1, 1, 1]} : vector<6x8x96xf32> to vector<6x8x32xf32>
    %37 = vector.extract_strided_slice %34 {offsets = [0, 0, 64], sizes = [6, 8, 32], strides = [1, 1, 1]} : vector<6x8x96xf32> to vector<6x8x32xf32>
    %c0_15 = arith.constant 0 : index
    %c0_16 = arith.constant 0 : index
    %38 = vector.load %arg1[%c0_15, %c0_16] : memref<24x8xf32, #tpu.memory_space<vmem>>, vector<24x8xf32>
    %39 = vector.shape_cast %38 : vector<24x8xf32> to vector<24x1x8xf32>
    %40 = tpu.transpose %35, [0, 2, 1] : vector<6x8x32xf32> -> vector<6x32x8xf32>
    %41 = vector.shape_cast %40 : vector<6x32x8xf32> to vector<24x8x8xf32>
    %42 = tpu.transpose %41, [0, 2, 1] : vector<24x8x8xf32> -> vector<24x8x8xf32>
    %43 = arith.truncf %42 : vector<24x8x8xf32> to vector<24x8x8xbf16>
    %44 = tpu.transpose %36, [0, 2, 1] : vector<6x8x32xf32> -> vector<6x32x8xf32>
    %45 = vector.shape_cast %44 : vector<6x32x8xf32> to vector<24x8x8xf32>
    %46 = tpu.transpose %45, [0, 2, 1] : vector<24x8x8xf32> -> vector<24x8x8xf32>
    %47 = arith.truncf %46 : vector<24x8x8xf32> to vector<24x8x8xbf16>
    %48 = tpu.transpose %37, [0, 2, 1] : vector<6x8x32xf32> -> vector<6x32x8xf32>
    %49 = vector.shape_cast %48 : vector<6x32x8xf32> to vector<24x8x8xf32>
    %50 = tpu.transpose %49, [0, 2, 1] : vector<24x8x8xf32> -> vector<24x8x8xf32>
    %51 = arith.truncf %50 : vector<24x8x8xf32> to vector<24x8x8xbf16>
    "tpu.trace_start"() <{level = 10 : i32, message = "bqd,bkd->bqk"}> : () -> ()
    %cst_17 = arith.constant dense<0.000000e+00> : vector<24x8x8xf32>
    %52 = tpu.matmul %43, %47, %cst_17 {dimension_numbers = #tpu.dot_dimension_numbers<[2], [2], [1], [1], [0, 0, 0, 1, 1, 1], [0], [0]>} : vector<24x8x8xbf16>, vector<24x8x8xbf16>, vector<24x8x8xf32> -> vector<24x8x8xf32>
    "tpu.trace_stop"() : () -> ()
    %cst_18 = arith.constant 0.353553385 : f32
    %53 = vector.broadcast %cst_18 : f32 to vector<24x8x8xf32>
    %54 = arith.mulf %52, %53 : vector<24x8x8xf32>
    %55 = vector.broadcast %39 : vector<24x1x8xf32> to vector<24x8x8xf32>
    %56 = arith.addf %54, %55 : vector<24x8x8xf32>
    %cst_19 = arith.constant dense<0xFF800000> : vector<24x8xf32>
    %57 = vector.multi_reduction <maximumf>, %56, %cst_19 [2] : vector<24x8x8xf32> to vector<24x8xf32>
    %58 = vector.shape_cast %57 : vector<24x8xf32> to vector<24x8x1xf32>
    %59 = vector.broadcast %58 : vector<24x8x1xf32> to vector<24x8x8xf32>
    %60 = arith.subf %56, %59 : vector<24x8x8xf32>
    %61 = math.exp %60 : vector<24x8x8xf32>
    %cst_20 = arith.constant dense<0.000000e+00> : vector<24x8xf32>
    %62 = vector.multi_reduction <add>, %61, %cst_20 [2] : vector<24x8x8xf32> to vector<24x8xf32>
    %63 = vector.shape_cast %62 : vector<24x8xf32> to vector<24x8x1xf32>
    %64 = arith.truncf %61 : vector<24x8x8xf32> to vector<24x8x8xbf16>
    "tpu.trace_start"() <{level = 10 : i32, message = "bqk,bkd->bqd"}> : () -> ()
    %cst_21 = arith.constant dense<0.000000e+00> : vector<24x8x8xf32>
    %65 = tpu.matmul %64, %51, %cst_21 {dimension_numbers = #tpu.dot_dimension_numbers<[2], [1], [1], [2], [0, 0, 0, 1, 1, 2], [0], [0]>} : vector<24x8x8xbf16>, vector<24x8x8xbf16>, vector<24x8x8xf32> -> vector<24x8x8xf32>
    "tpu.trace_stop"() : () -> ()
    %66 = tpu.reciprocal %63 {approx = true} : vector<24x8x1xf32> -> vector<24x8x1xf32>
    %67 = vector.broadcast %66 : vector<24x8x1xf32> to vector<24x8x8xf32>
    %68 = arith.mulf %65, %67 : vector<24x8x8xf32>
    %69 = tpu.transpose %68, [0, 2, 1] : vector<24x8x8xf32> -> vector<24x8x8xf32>
    %70 = vector.shape_cast %69 : vector<24x8x8xf32> to vector<6x32x8xf32>
    %71 = tpu.transpose %70, [0, 2, 1] : vector<6x32x8xf32> -> vector<6x8x32xf32>
    %72 = vector.shape_cast %71 : vector<6x8x32xf32> to vector<48x32xf32>
    %c0_22 = arith.constant 0 : index
    %c0_23 = arith.constant 0 : index
    %73 = vector.load %arg6[%c0_22, %c0_23] : memref<32x32xbf16, #tpu.memory_space<vmem>>, vector<32x32xbf16>
    %c0_24 = arith.constant 0 : index
    %c0_25 = arith.constant 0 : index
    %74 = vector.load %arg7[%c0_24, %c0_25] : memref<1x32xf32, #tpu.memory_space<vmem>>, vector<1x32xf32>
    %75 = arith.truncf %72 : vector<48x32xf32> to vector<48x32xbf16>
    %cst_26 = arith.constant dense<0.000000e+00> : vector<48x32xf32>
    %76 = tpu.matmul %75, %73, %cst_26 {dimension_numbers = #tpu.dot_dimension_numbers<[1], [0], [0], [1], [0, 0, 1, 1], [], []>} : vector<48x32xbf16>, vector<32x32xbf16>, vector<48x32xf32> -> vector<48x32xf32>
    %77 = vector.broadcast %74 : vector<1x32xf32> to vector<48x32xf32>
    %78 = arith.addf %76, %77 : vector<48x32xf32>
    %79 = vector.shape_cast %78 : vector<48x32xf32> to vector<6x8x32xf32>
    %80 = arith.addf %0, %79 : vector<6x8x32xf32>
    %c0_27 = arith.constant 0 : index
    %c0_28 = arith.constant 0 : index
    %81 = vector.load %arg8[%c0_27, %c0_28] : memref<1x32xf32, #tpu.memory_space<vmem>>, vector<1x32xf32>
    %82 = vector.shape_cast %81 : vector<1x32xf32> to vector<1x1x32xf32>
    %c0_29 = arith.constant 0 : index
    %c0_30 = arith.constant 0 : index
    %83 = vector.load %arg9[%c0_29, %c0_30] : memref<1x32xf32, #tpu.memory_space<vmem>>, vector<1x32xf32>
    %84 = vector.shape_cast %83 : vector<1x32xf32> to vector<1x1x32xf32>
    %cst_31 = arith.constant dense<0.000000e+00> : vector<6x8xf32>
    %85 = vector.multi_reduction <add>, %80, %cst_31 [2] : vector<6x8x32xf32> to vector<6x8xf32>
    %86 = vector.shape_cast %85 : vector<6x8xf32> to vector<6x8x1xf32>
    %cst_32 = arith.constant 3.200000e+01 : f32
    %87 = vector.broadcast %cst_32 : f32 to vector<6x8x1xf32>
    %88 = arith.divf %86, %87 : vector<6x8x1xf32>
    %89 = vector.broadcast %88 : vector<6x8x1xf32> to vector<6x8x32xf32>
    %90 = arith.subf %80, %89 : vector<6x8x32xf32>
    %91 = arith.mulf %90, %90 : vector<6x8x32xf32>
    %cst_33 = arith.constant dense<0.000000e+00> : vector<6x8xf32>
    %92 = vector.multi_reduction <add>, %91, %cst_33 [2] : vector<6x8x32xf32> to vector<6x8xf32>
    %93 = vector.shape_cast %92 : vector<6x8xf32> to vector<6x8x1xf32>
    %cst_34 = arith.constant 3.200000e+01 : f32
    %94 = vector.broadcast %cst_34 : f32 to vector<6x8x1xf32>
    %95 = arith.divf %93, %94 : vector<6x8x1xf32>
    %96 = vector.broadcast %88 : vector<6x8x1xf32> to vector<6x8x32xf32>
    %97 = arith.subf %80, %96 : vector<6x8x32xf32>
    %cst_35 = arith.constant 9.99999974E-6 : f32
    %98 = vector.broadcast %cst_35 : f32 to vector<6x8x1xf32>
    %99 = arith.addf %95, %98 : vector<6x8x1xf32>
    %100 = math.rsqrt %99 : vector<6x8x1xf32>
    %101 = vector.broadcast %100 : vector<6x8x1xf32> to vector<6x8x32xf32>
    %102 = arith.mulf %97, %101 : vector<6x8x32xf32>
    %103 = vector.broadcast %82 : vector<1x1x32xf32> to vector<6x8x32xf32>
    %104 = arith.mulf %102, %103 : vector<6x8x32xf32>
    %105 = vector.broadcast %84 : vector<1x1x32xf32> to vector<6x8x32xf32>
    %106 = arith.addf %104, %105 : vector<6x8x32xf32>
    %107 = vector.shape_cast %106 : vector<6x8x32xf32> to vector<48x32xf32>
    %c0_36 = arith.constant 0 : index
    %c0_37 = arith.constant 0 : index
    %108 = vector.load %arg10[%c0_36, %c0_37] : memref<32x64xbf16, #tpu.memory_space<vmem>>, vector<32x64xbf16>
    %c0_38 = arith.constant 0 : index
    %c0_39 = arith.constant 0 : index
    %109 = vector.load %arg11[%c0_38, %c0_39] : memref<1x64xf32, #tpu.memory_space<vmem>>, vector<1x64xf32>
    %110 = arith.truncf %107 : vector<48x32xf32> to vector<48x32xbf16>
    %cst_40 = arith.constant dense<0.000000e+00> : vector<48x64xf32>
    %111 = tpu.matmul %110, %108, %cst_40 {dimension_numbers = #tpu.dot_dimension_numbers<[1], [0], [0], [1], [0, 0, 1, 1], [], []>} : vector<48x32xbf16>, vector<32x64xbf16>, vector<48x64xf32> -> vector<48x64xf32>
    %112 = vector.broadcast %109 : vector<1x64xf32> to vector<48x64xf32>
    %113 = arith.addf %111, %112 : vector<48x64xf32>
    %cst_41 = arith.constant 0.000000e+00 : f32
    %114 = vector.broadcast %cst_41 : f32 to vector<48x64xf32>
    %115 = arith.maximumf %113, %114 : vector<48x64xf32>
    %c0_42 = arith.constant 0 : index
    %c0_43 = arith.constant 0 : index
    %116 = vector.load %arg12[%c0_42, %c0_43] : memref<64x32xbf16, #tpu.memory_space<vmem>>, vector<64x32xbf16>
    %c0_44 = arith.constant 0 : index
    %c0_45 = arith.constant 0 : index
    %117 = vector.load %arg13[%c0_44, %c0_45] : memref<1x32xf32, #tpu.memory_space<vmem>>, vector<1x32xf32>
    %118 = arith.truncf %115 : vector<48x64xf32> to vector<48x64xbf16>
    %cst_46 = arith.constant dense<0.000000e+00> : vector<48x32xf32>
    %119 = tpu.matmul %118, %116, %cst_46 {dimension_numbers = #tpu.dot_dimension_numbers<[1], [0], [0], [1], [0, 0, 1, 1], [], []>} : vector<48x64xbf16>, vector<64x32xbf16>, vector<48x32xf32> -> vector<48x32xf32>
    %120 = vector.broadcast %117 : vector<1x32xf32> to vector<48x32xf32>
    %121 = arith.addf %119, %120 : vector<48x32xf32>
    %122 = vector.shape_cast %121 : vector<48x32xf32> to vector<6x8x32xf32>
    %123 = arith.addf %80, %122 : vector<6x8x32xf32>
    %124 = vector.shape_cast %123 : vector<6x8x32xf32> to vector<6x256xf32>
    %c0_47 = arith.constant 0 : index
    %c0_48 = arith.constant 0 : index
    %125 = vector.load %arg14[%c0_47, %c0_48] : memref<6x256xf32, #tpu.memory_space<vmem>>, vector<6x256xf32>
    tpu.vector_store %arg14[%c0_47, %c0_48], %124 {strides = array<i32>} : memref<6x256xf32, #tpu.memory_space<vmem>>, vector<6x256xf32>,
    return
  }
}

module attributes {stable_mosaic.version = 11 : i64} {
  func.func @_encoder_layer_kernel(%arg0: memref<2x3x32xf32, #tpu.memory_space<vmem>>, %arg1: memref<8x3xf32, #tpu.memory_space<vmem>>, %arg2: memref<1x32xf32, #tpu.memory_space<vmem>>, %arg3: memref<1x32xf32, #tpu.memory_space<vmem>>, %arg4: memref<32x96xbf16, #tpu.memory_space<vmem>>, %arg5: memref<1x96xf32, #tpu.memory_space<vmem>>, %arg6: memref<32x32xbf16, #tpu.memory_space<vmem>>, %arg7: memref<1x32xf32, #tpu.memory_space<vmem>>, %arg8: memref<1x32xf32, #tpu.memory_space<vmem>>, %arg9: memref<1x32xf32, #tpu.memory_space<vmem>>, %arg10: memref<32x64xbf16, #tpu.memory_space<vmem>>, %arg11: memref<1x64xf32, #tpu.memory_space<vmem>>, %arg12: memref<64x32xbf16, #tpu.memory_space<vmem>>, %arg13: memref<1x32xf32, #tpu.memory_space<vmem>>, %arg14: memref<2x96xf32, #tpu.memory_space<vmem>>) attributes {dimension_semantics = [], scalar_prefetch = 0 : i64, scratch_operands = 0 : i64, tpu.core_type = #tpu.core_type<tc>} {
    %c0 = arith.constant 0 : index
    %c0_0 = arith.constant 0 : index
    %c0_1 = arith.constant 0 : index
    %0 = vector.load %arg0[%c0, %c0_0, %c0_1] : memref<2x3x32xf32, #tpu.memory_space<vmem>>, vector<2x3x32xf32>
    %c0_2 = arith.constant 0 : index
    %c0_3 = arith.constant 0 : index
    %1 = vector.load %arg2[%c0_2, %c0_3] : memref<1x32xf32, #tpu.memory_space<vmem>>, vector<1x32xf32>
    %2 = vector.shape_cast %1 : vector<1x32xf32> to vector<1x1x32xf32>
    %c0_4 = arith.constant 0 : index
    %c0_5 = arith.constant 0 : index
    %3 = vector.load %arg3[%c0_4, %c0_5] : memref<1x32xf32, #tpu.memory_space<vmem>>, vector<1x32xf32>
    %4 = vector.shape_cast %3 : vector<1x32xf32> to vector<1x1x32xf32>
    %cst = arith.constant dense<0.000000e+00> : vector<2x3xf32>
    %5 = vector.multi_reduction <add>, %0, %cst [2] : vector<2x3x32xf32> to vector<2x3xf32>
    %6 = vector.shape_cast %5 : vector<2x3xf32> to vector<2x3x1xf32>
    %cst_6 = arith.constant 3.200000e+01 : f32
    %7 = vector.broadcast %cst_6 : f32 to vector<2x3x1xf32>
    %8 = arith.divf %6, %7 : vector<2x3x1xf32>
    %9 = vector.broadcast %8 : vector<2x3x1xf32> to vector<2x3x32xf32>
    %10 = arith.subf %0, %9 : vector<2x3x32xf32>
    %11 = arith.mulf %10, %10 : vector<2x3x32xf32>
    %cst_7 = arith.constant dense<0.000000e+00> : vector<2x3xf32>
    %12 = vector.multi_reduction <add>, %11, %cst_7 [2] : vector<2x3x32xf32> to vector<2x3xf32>
    %13 = vector.shape_cast %12 : vector<2x3xf32> to vector<2x3x1xf32>
    %cst_8 = arith.constant 3.200000e+01 : f32
    %14 = vector.broadcast %cst_8 : f32 to vector<2x3x1xf32>
    %15 = arith.divf %13, %14 : vector<2x3x1xf32>
    %16 = vector.broadcast %8 : vector<2x3x1xf32> to vector<2x3x32xf32>
    %17 = arith.subf %0, %16 : vector<2x3x32xf32>
    %cst_9 = arith.constant 9.99999974E-6 : f32
    %18 = vector.broadcast %cst_9 : f32 to vector<2x3x1xf32>
    %19 = arith.addf %15, %18 : vector<2x3x1xf32>
    %20 = math.rsqrt %19 : vector<2x3x1xf32>
    %21 = vector.broadcast %20 : vector<2x3x1xf32> to vector<2x3x32xf32>
    %22 = arith.mulf %17, %21 : vector<2x3x32xf32>
    %23 = vector.broadcast %2 : vector<1x1x32xf32> to vector<2x3x32xf32>
    %24 = arith.mulf %22, %23 : vector<2x3x32xf32>
    %25 = vector.broadcast %4 : vector<1x1x32xf32> to vector<2x3x32xf32>
    %26 = arith.addf %24, %25 : vector<2x3x32xf32>
    %27 = vector.shape_cast %26 : vector<2x3x32xf32> to vector<6x32xf32>
    %c0_10 = arith.constant 0 : index
    %c0_11 = arith.constant 0 : index
    %28 = vector.load %arg4[%c0_10, %c0_11] : memref<32x96xbf16, #tpu.memory_space<vmem>>, vector<32x96xbf16>
    %c0_12 = arith.constant 0 : index
    %c0_13 = arith.constant 0 : index
    %29 = vector.load %arg5[%c0_12, %c0_13] : memref<1x96xf32, #tpu.memory_space<vmem>>, vector<1x96xf32>
    %30 = arith.truncf %27 : vector<6x32xf32> to vector<6x32xbf16>
    %cst_14 = arith.constant dense<0.000000e+00> : vector<6x96xf32>
    %31 = tpu.matmul %30, %28, %cst_14 {dimension_numbers = #tpu.dot_dimension_numbers<[1], [0], [0], [1], [0, 0, 1, 1], [], []>} : vector<6x32xbf16>, vector<32x96xbf16>, vector<6x96xf32> -> vector<6x96xf32>
    %32 = vector.broadcast %29 : vector<1x96xf32> to vector<6x96xf32>
    %33 = arith.addf %31, %32 : vector<6x96xf32>
    %34 = vector.shape_cast %33 : vector<6x96xf32> to vector<2x3x96xf32>
    %35 = vector.extract_strided_slice %34 {offsets = [0, 0, 0], sizes = [2, 3, 32], strides = [1, 1, 1]} : vector<2x3x96xf32> to vector<2x3x32xf32>
    %36 = vector.extract_strided_slice %34 {offsets = [0, 0, 32], sizes = [2, 3, 32], strides = [1, 1, 1]} : vector<2x3x96xf32> to vector<2x3x32xf32>
    %37 = vector.extract_strided_slice %34 {offsets = [0, 0, 64], sizes = [2, 3, 32], strides = [1, 1, 1]} : vector<2x3x96xf32> to vector<2x3x32xf32>
    %c0_15 = arith.constant 0 : index
    %c0_16 = arith.constant 0 : index
    %38 = vector.load %arg1[%c0_15, %c0_16] : memref<8x3xf32, #tpu.memory_space<vmem>>, vector<8x3xf32>
    %39 = vector.shape_cast %38 : vector<8x3xf32> to vector<8x1x3xf32>
    %40 = tpu.transpose %35, [0, 2, 1] : vector<2x3x32xf32> -> vector<2x32x3xf32>
    %41 = vector.shape_cast %40 : vector<2x32x3xf32> to vector<8x8x3xf32>
    %42 = tpu.transpose %41, [0, 2, 1] : vector<8x8x3xf32> -> vector<8x3x8xf32>
    %43 = arith.truncf %42 : vector<8x3x8xf32> to vector<8x3x8xbf16>
    %44 = tpu.transpose %36, [0, 2, 1] : vector<2x3x32xf32> -> vector<2x32x3xf32>
    %45 = vector.shape_cast %44 : vector<2x32x3xf32> to vector<8x8x3xf32>
    %46 = tpu.transpose %45, [0, 2, 1] : vector<8x8x3xf32> -> vector<8x3x8xf32>
    %47 = arith.truncf %46 : vector<8x3x8xf32> to vector<8x3x8xbf16>
    %48 = tpu.transpose %37, [0, 2, 1] : vector<2x3x32xf32> -> vector<2x32x3xf32>
    %49 = vector.shape_cast %48 : vector<2x32x3xf32> to vector<8x8x3xf32>
    %50 = tpu.transpose %49, [0, 2, 1] : vector<8x8x3xf32> -> vector<8x3x8xf32>
    %51 = arith.truncf %50 : vector<8x3x8xf32> to vector<8x3x8xbf16>
    "tpu.trace_start"() <{level = 10 : i32, message = "bqd,bkd->bqk"}> : () -> ()
    %cst_17 = arith.constant dense<0.000000e+00> : vector<8x3x3xf32>
    %52 = tpu.matmul %43, %47, %cst_17 {dimension_numbers = #tpu.dot_dimension_numbers<[2], [2], [1], [1], [0, 0, 0, 1, 1, 1], [0], [0]>} : vector<8x3x8xbf16>, vector<8x3x8xbf16>, vector<8x3x3xf32> -> vector<8x3x3xf32>
    "tpu.trace_stop"() : () -> ()
    %cst_18 = arith.constant 0.353553385 : f32
    %53 = vector.broadcast %cst_18 : f32 to vector<8x3x3xf32>
    %54 = arith.mulf %52, %53 : vector<8x3x3xf32>
    %55 = vector.broadcast %39 : vector<8x1x3xf32> to vector<8x3x3xf32>
    %56 = arith.addf %54, %55 : vector<8x3x3xf32>
    %cst_19 = arith.constant dense<0xFF800000> : vector<8x3xf32>
    %57 = vector.multi_reduction <maximumf>, %56, %cst_19 [2] : vector<8x3x3xf32> to vector<8x3xf32>
    %58 = vector.shape_cast %57 : vector<8x3xf32> to vector<8x3x1xf32>
    %59 = vector.broadcast %58 : vector<8x3x1xf32> to vector<8x3x3xf32>
    %60 = arith.subf %56, %59 : vector<8x3x3xf32>
    %61 = math.exp %60 : vector<8x3x3xf32>
    %cst_20 = arith.constant dense<0.000000e+00> : vector<8x3xf32>
    %62 = vector.multi_reduction <add>, %61, %cst_20 [2] : vector<8x3x3xf32> to vector<8x3xf32>
    %63 = vector.shape_cast %62 : vector<8x3xf32> to vector<8x3x1xf32>
    %64 = arith.truncf %61 : vector<8x3x3xf32> to vector<8x3x3xbf16>
    "tpu.trace_start"() <{level = 10 : i32, message = "bqk,bkd->bqd"}> : () -> ()
    %cst_21 = arith.constant dense<0.000000e+00> : vector<8x3x8xf32>
    %65 = tpu.matmul %64, %51, %cst_21 {dimension_numbers = #tpu.dot_dimension_numbers<[2], [1], [1], [2], [0, 0, 0, 1, 1, 2], [0], [0]>} : vector<8x3x3xbf16>, vector<8x3x8xbf16>, vector<8x3x8xf32> -> vector<8x3x8xf32>
    "tpu.trace_stop"() : () -> ()
    %66 = tpu.reciprocal %63 {approx = true} : vector<8x3x1xf32> -> vector<8x3x1xf32>
    %67 = vector.broadcast %66 : vector<8x3x1xf32> to vector<8x3x8xf32>
    %68 = arith.mulf %65, %67 : vector<8x3x8xf32>
    %69 = tpu.transpose %68, [0, 2, 1] : vector<8x3x8xf32> -> vector<8x8x3xf32>
    %70 = vector.shape_cast %69 : vector<8x8x3xf32> to vector<2x32x3xf32>
    %71 = tpu.transpose %70, [0, 2, 1] : vector<2x32x3xf32> -> vector<2x3x32xf32>
    %72 = vector.shape_cast %71 : vector<2x3x32xf32> to vector<6x32xf32>
    %c0_22 = arith.constant 0 : index
    %c0_23 = arith.constant 0 : index
    %73 = vector.load %arg6[%c0_22, %c0_23] : memref<32x32xbf16, #tpu.memory_space<vmem>>, vector<32x32xbf16>
    %c0_24 = arith.constant 0 : index
    %c0_25 = arith.constant 0 : index
    %74 = vector.load %arg7[%c0_24, %c0_25] : memref<1x32xf32, #tpu.memory_space<vmem>>, vector<1x32xf32>
    %75 = arith.truncf %72 : vector<6x32xf32> to vector<6x32xbf16>
    %cst_26 = arith.constant dense<0.000000e+00> : vector<6x32xf32>
    %76 = tpu.matmul %75, %73, %cst_26 {dimension_numbers = #tpu.dot_dimension_numbers<[1], [0], [0], [1], [0, 0, 1, 1], [], []>} : vector<6x32xbf16>, vector<32x32xbf16>, vector<6x32xf32> -> vector<6x32xf32>
    %77 = vector.broadcast %74 : vector<1x32xf32> to vector<6x32xf32>
    %78 = arith.addf %76, %77 : vector<6x32xf32>
    %79 = vector.shape_cast %78 : vector<6x32xf32> to vector<2x3x32xf32>
    %80 = arith.addf %0, %79 : vector<2x3x32xf32>
    %c0_27 = arith.constant 0 : index
    %c0_28 = arith.constant 0 : index
    %81 = vector.load %arg8[%c0_27, %c0_28] : memref<1x32xf32, #tpu.memory_space<vmem>>, vector<1x32xf32>
    %82 = vector.shape_cast %81 : vector<1x32xf32> to vector<1x1x32xf32>
    %c0_29 = arith.constant 0 : index
    %c0_30 = arith.constant 0 : index
    %83 = vector.load %arg9[%c0_29, %c0_30] : memref<1x32xf32, #tpu.memory_space<vmem>>, vector<1x32xf32>
    %84 = vector.shape_cast %83 : vector<1x32xf32> to vector<1x1x32xf32>
    %cst_31 = arith.constant dense<0.000000e+00> : vector<2x3xf32>
    %85 = vector.multi_reduction <add>, %80, %cst_31 [2] : vector<2x3x32xf32> to vector<2x3xf32>
    %86 = vector.shape_cast %85 : vector<2x3xf32> to vector<2x3x1xf32>
    %cst_32 = arith.constant 3.200000e+01 : f32
    %87 = vector.broadcast %cst_32 : f32 to vector<2x3x1xf32>
    %88 = arith.divf %86, %87 : vector<2x3x1xf32>
    %89 = vector.broadcast %88 : vector<2x3x1xf32> to vector<2x3x32xf32>
    %90 = arith.subf %80, %89 : vector<2x3x32xf32>
    %91 = arith.mulf %90, %90 : vector<2x3x32xf32>
    %cst_33 = arith.constant dense<0.000000e+00> : vector<2x3xf32>
    %92 = vector.multi_reduction <add>, %91, %cst_33 [2] : vector<2x3x32xf32> to vector<2x3xf32>
    %93 = vector.shape_cast %92 : vector<2x3xf32> to vector<2x3x1xf32>
    %cst_34 = arith.constant 3.200000e+01 : f32
    %94 = vector.broadcast %cst_34 : f32 to vector<2x3x1xf32>
    %95 = arith.divf %93, %94 : vector<2x3x1xf32>
    %96 = vector.broadcast %88 : vector<2x3x1xf32> to vector<2x3x32xf32>
    %97 = arith.subf %80, %96 : vector<2x3x32xf32>
    %cst_35 = arith.constant 9.99999974E-6 : f32
    %98 = vector.broadcast %cst_35 : f32 to vector<2x3x1xf32>
    %99 = arith.addf %95, %98 : vector<2x3x1xf32>
    %100 = math.rsqrt %99 : vector<2x3x1xf32>
    %101 = vector.broadcast %100 : vector<2x3x1xf32> to vector<2x3x32xf32>
    %102 = arith.mulf %97, %101 : vector<2x3x32xf32>
    %103 = vector.broadcast %82 : vector<1x1x32xf32> to vector<2x3x32xf32>
    %104 = arith.mulf %102, %103 : vector<2x3x32xf32>
    %105 = vector.broadcast %84 : vector<1x1x32xf32> to vector<2x3x32xf32>
    %106 = arith.addf %104, %105 : vector<2x3x32xf32>
    %107 = vector.shape_cast %106 : vector<2x3x32xf32> to vector<6x32xf32>
    %c0_36 = arith.constant 0 : index
    %c0_37 = arith.constant 0 : index
    %108 = vector.load %arg10[%c0_36, %c0_37] : memref<32x64xbf16, #tpu.memory_space<vmem>>, vector<32x64xbf16>
    %c0_38 = arith.constant 0 : index
    %c0_39 = arith.constant 0 : index
    %109 = vector.load %arg11[%c0_38, %c0_39] : memref<1x64xf32, #tpu.memory_space<vmem>>, vector<1x64xf32>
    %110 = arith.truncf %107 : vector<6x32xf32> to vector<6x32xbf16>
    %cst_40 = arith.constant dense<0.000000e+00> : vector<6x64xf32>
    %111 = tpu.matmul %110, %108, %cst_40 {dimension_numbers = #tpu.dot_dimension_numbers<[1], [0], [0], [1], [0, 0, 1, 1], [], []>} : vector<6x32xbf16>, vector<32x64xbf16>, vector<6x64xf32> -> vector<6x64xf32>
    %112 = vector.broadcast %109 : vector<1x64xf32> to vector<6x64xf32>
    %113 = arith.addf %111, %112 : vector<6x64xf32>
    %cst_41 = arith.constant 0.000000e+00 : f32
    %114 = vector.broadcast %cst_41 : f32 to vector<6x64xf32>
    %115 = arith.maximumf %113, %114 : vector<6x64xf32>
    %c0_42 = arith.constant 0 : index
    %c0_43 = arith.constant 0 : index
    %116 = vector.load %arg12[%c0_42, %c0_43] : memref<64x32xbf16, #tpu.memory_space<vmem>>, vector<64x32xbf16>
    %c0_44 = arith.constant 0 : index
    %c0_45 = arith.constant 0 : index
    %117 = vector.load %arg13[%c0_44, %c0_45] : memref<1x32xf32, #tpu.memory_space<vmem>>, vector<1x32xf32>
    %118 = arith.truncf %115 : vector<6x64xf32> to vector<6x64xbf16>
    %cst_46 = arith.constant dense<0.000000e+00> : vector<6x32xf32>
    %119 = tpu.matmul %118, %116, %cst_46 {dimension_numbers = #tpu.dot_dimension_numbers<[1], [0], [0], [1], [0, 0, 1, 1], [], []>} : vector<6x64xbf16>, vector<64x32xbf16>, vector<6x32xf32> -> vector<6x32xf32>
    %120 = vector.broadcast %117 : vector<1x32xf32> to vector<6x32xf32>
    %121 = arith.addf %119, %120 : vector<6x32xf32>
    %122 = vector.shape_cast %121 : vector<6x32xf32> to vector<2x3x32xf32>
    %123 = arith.addf %80, %122 : vector<2x3x32xf32>
    %124 = vector.shape_cast %123 : vector<2x3x32xf32> to vector<2x96xf32>
    %c0_47 = arith.constant 0 : index
    %c0_48 = arith.constant 0 : index
    %125 = vector.load %arg14[%c0_47, %c0_48] : memref<2x96xf32, #tpu.memory_space<vmem>>, vector<2x96xf32>
    tpu.vector_store %arg14[%c0_47, %c0_48], %124 {strides = array<i32>} : memref<2x96xf32, #tpu.memory_space<vmem>>, vector<2x96xf32>,
    return
  }
}

module attributes {stable_mosaic.version = 11 : i64} {
  func.func @_decoder_layer_kernel(%arg0: memref<2x8x32xf32, #tpu.memory_space<vmem>>, %arg1: memref<2x3x32xf32, #tpu.memory_space<vmem>>, %arg2: memref<8x3xf32, #tpu.memory_space<vmem>>, %arg3: memref<1x32xf32, #tpu.memory_space<vmem>>, %arg4: memref<1x32xf32, #tpu.memory_space<vmem>>, %arg5: memref<32x96xbf16, #tpu.memory_space<vmem>>, %arg6: memref<1x96xf32, #tpu.memory_space<vmem>>, %arg7: memref<32x32xbf16, #tpu.memory_space<vmem>>, %arg8: memref<1x32xf32, #tpu.memory_space<vmem>>, %arg9: memref<1x32xf32, #tpu.memory_space<vmem>>, %arg10: memref<1x32xf32, #tpu.memory_space<vmem>>, %arg11: memref<32x32xbf16, #tpu.memory_space<vmem>>, %arg12: memref<1x32xf32, #tpu.memory_space<vmem>>, %arg13: memref<32x64xbf16, #tpu.memory_space<vmem>>, %arg14: memref<1x64xf32, #tpu.memory_space<vmem>>, %arg15: memref<32x32xbf16, #tpu.memory_space<vmem>>, %arg16: memref<1x32xf32, #tpu.memory_space<vmem>>, %arg17: memref<1x32xf32, #tpu.memory_space<vmem>>, %arg18: memref<1x32xf32, #tpu.memory_space<vmem>>, %arg19: memref<32x64xbf16, #tpu.memory_space<vmem>>, %arg20: memref<1x64xf32, #tpu.memory_space<vmem>>, %arg21: memref<64x32xbf16, #tpu.memory_space<vmem>>, %arg22: memref<1x32xf32, #tpu.memory_space<vmem>>, %arg23: memref<2x256xf32, #tpu.memory_space<vmem>>) attributes {dimension_semantics = [], scalar_prefetch = 0 : i64, scratch_operands = 0 : i64, tpu.core_type = #tpu.core_type<tc>} {
    %c0 = arith.constant 0 : index
    %c0_0 = arith.constant 0 : index
    %c0_1 = arith.constant 0 : index
    %0 = vector.load %arg0[%c0, %c0_0, %c0_1] : memref<2x8x32xf32, #tpu.memory_space<vmem>>, vector<2x8x32xf32>
    %c0_2 = arith.constant 0 : index
    %c0_3 = arith.constant 0 : index
    %c0_4 = arith.constant 0 : index
    %1 = vector.load %arg1[%c0_2, %c0_3, %c0_4] : memref<2x3x32xf32, #tpu.memory_space<vmem>>, vector<2x3x32xf32>
    %c0_5 = arith.constant 0 : index
    %c0_6 = arith.constant 0 : index
    %2 = vector.load %arg3[%c0_5, %c0_6] : memref<1x32xf32, #tpu.memory_space<vmem>>, vector<1x32xf32>
    %3 = vector.shape_cast %2 : vector<1x32xf32> to vector<1x1x32xf32>
    %c0_7 = arith.constant 0 : index
    %c0_8 = arith.constant 0 : index
    %4 = vector.load %arg4[%c0_7, %c0_8] : memref<1x32xf32, #tpu.memory_space<vmem>>, vector<1x32xf32>
    %5 = vector.shape_cast %4 : vector<1x32xf32> to vector<1x1x32xf32>
    %cst = arith.constant dense<0.000000e+00> : vector<2x8xf32>
    %6 = vector.multi_reduction <add>, %0, %cst [2] : vector<2x8x32xf32> to vector<2x8xf32>
    %7 = vector.shape_cast %6 : vector<2x8xf32> to vector<2x8x1xf32>
    %cst_9 = arith.constant 3.200000e+01 : f32
    %8 = vector.broadcast %cst_9 : f32 to vector<2x8x1xf32>
    %9 = arith.divf %7, %8 : vector<2x8x1xf32>
    %10 = vector.broadcast %9 : vector<2x8x1xf32> to vector<2x8x32xf32>
    %11 = arith.subf %0, %10 : vector<2x8x32xf32>
    %12 = arith.mulf %11, %11 : vector<2x8x32xf32>
    %cst_10 = arith.constant dense<0.000000e+00> : vector<2x8xf32>
    %13 = vector.multi_reduction <add>, %12, %cst_10 [2] : vector<2x8x32xf32> to vector<2x8xf32>
    %14 = vector.shape_cast %13 : vector<2x8xf32> to vector<2x8x1xf32>
    %cst_11 = arith.constant 3.200000e+01 : f32
    %15 = vector.broadcast %cst_11 : f32 to vector<2x8x1xf32>
    %16 = arith.divf %14, %15 : vector<2x8x1xf32>
    %17 = vector.broadcast %9 : vector<2x8x1xf32> to vector<2x8x32xf32>
    %18 = arith.subf %0, %17 : vector<2x8x32xf32>
    %cst_12 = arith.constant 9.99999974E-6 : f32
    %19 = vector.broadcast %cst_12 : f32 to vector<2x8x1xf32>
    %20 = arith.addf %16, %19 : vector<2x8x1xf32>
    %21 = math.rsqrt %20 : vector<2x8x1xf32>
    %22 = vector.broadcast %21 : vector<2x8x1xf32> to vector<2x8x32xf32>
    %23 = arith.mulf %18, %22 : vector<2x8x32xf32>
    %24 = vector.broadcast %3 : vector<1x1x32xf32> to vector<2x8x32xf32>
    %25 = arith.mulf %23, %24 : vector<2x8x32xf32>
    %26 = vector.broadcast %5 : vector<1x1x32xf32> to vector<2x8x32xf32>
    %27 = arith.addf %25, %26 : vector<2x8x32xf32>
    %28 = vector.shape_cast %27 : vector<2x8x32xf32> to vector<16x32xf32>
    %c0_13 = arith.constant 0 : index
    %c0_14 = arith.constant 0 : index
    %29 = vector.load %arg5[%c0_13, %c0_14] : memref<32x96xbf16, #tpu.memory_space<vmem>>, vector<32x96xbf16>
    %c0_15 = arith.constant 0 : index
    %c0_16 = arith.constant 0 : index
    %30 = vector.load %arg6[%c0_15, %c0_16] : memref<1x96xf32, #tpu.memory_space<vmem>>, vector<1x96xf32>
    %31 = arith.truncf %28 : vector<16x32xf32> to vector<16x32xbf16>
    %cst_17 = arith.constant dense<0.000000e+00> : vector<16x96xf32>
    %32 = tpu.matmul %31, %29, %cst_17 {dimension_numbers = #tpu.dot_dimension_numbers<[1], [0], [0], [1], [0, 0, 1, 1], [], []>} : vector<16x32xbf16>, vector<32x96xbf16>, vector<16x96xf32> -> vector<16x96xf32>
    %33 = vector.broadcast %30 : vector<1x96xf32> to vector<16x96xf32>
    %34 = arith.addf %32, %33 : vector<16x96xf32>
    %35 = vector.shape_cast %34 : vector<16x96xf32> to vector<2x8x96xf32>
    %36 = vector.extract_strided_slice %35 {offsets = [0, 0, 0], sizes = [2, 8, 32], strides = [1, 1, 1]} : vector<2x8x96xf32> to vector<2x8x32xf32>
    %37 = vector.extract_strided_slice %35 {offsets = [0, 0, 32], sizes = [2, 8, 32], strides = [1, 1, 1]} : vector<2x8x96xf32> to vector<2x8x32xf32>
    %38 = vector.extract_strided_slice %35 {offsets = [0, 0, 64], sizes = [2, 8, 32], strides = [1, 1, 1]} : vector<2x8x96xf32> to vector<2x8x32xf32>
    %39 = tpu.iota {dimensions = array<i32: 1>} : vector<1x8x8xi32>
    %40 = tpu.iota {dimensions = array<i32: 2>} : vector<1x8x8xi32>
    %41 = arith.cmpi sgt, %40, %39 : vector<1x8x8xi32>
    %cst_18 = arith.constant -1.000000e+09 : f32
    %cst_19 = arith.constant 0.000000e+00 : f32
    %42 = vector.broadcast %cst_18 : f32 to vector<1x8x8xf32>
    %43 = vector.broadcast %cst_19 : f32 to vector<1x8x8xf32>
    %44 = arith.select %41, %42, %43 : vector<1x8x8xi1>, vector<1x8x8xf32>
    %45 = tpu.transpose %36, [0, 2, 1] : vector<2x8x32xf32> -> vector<2x32x8xf32>
    %46 = vector.shape_cast %45 : vector<2x32x8xf32> to vector<8x8x8xf32>
    %47 = tpu.transpose %46, [0, 2, 1] : vector<8x8x8xf32> -> vector<8x8x8xf32>
    %48 = arith.truncf %47 : vector<8x8x8xf32> to vector<8x8x8xbf16>
    %49 = tpu.transpose %37, [0, 2, 1] : vector<2x8x32xf32> -> vector<2x32x8xf32>
    %50 = vector.shape_cast %49 : vector<2x32x8xf32> to vector<8x8x8xf32>
    %51 = tpu.transpose %50, [0, 2, 1] : vector<8x8x8xf32> -> vector<8x8x8xf32>
    %52 = arith.truncf %51 : vector<8x8x8xf32> to vector<8x8x8xbf16>
    %53 = tpu.transpose %38, [0, 2, 1] : vector<2x8x32xf32> -> vector<2x32x8xf32>
    %54 = vector.shape_cast %53 : vector<2x32x8xf32> to vector<8x8x8xf32>
    %55 = tpu.transpose %54, [0, 2, 1] : vector<8x8x8xf32> -> vector<8x8x8xf32>
    %56 = arith.truncf %55 : vector<8x8x8xf32> to vector<8x8x8xbf16>
    "tpu.trace_start"() <{level = 10 : i32, message = "bqd,bkd->bqk"}> : () -> ()
    %cst_20 = arith.constant dense<0.000000e+00> : vector<8x8x8xf32>
    %57 = tpu.matmul %48, %52, %cst_20 {dimension_numbers = #tpu.dot_dimension_numbers<[2], [2], [1], [1], [0, 0, 0, 1, 1, 1], [0], [0]>} : vector<8x8x8xbf16>, vector<8x8x8xbf16>, vector<8x8x8xf32> -> vector<8x8x8xf32>
    "tpu.trace_stop"() : () -> ()
    %cst_21 = arith.constant 0.353553385 : f32
    %58 = vector.broadcast %cst_21 : f32 to vector<8x8x8xf32>
    %59 = arith.mulf %57, %58 : vector<8x8x8xf32>
    %60 = vector.broadcast %44 : vector<1x8x8xf32> to vector<8x8x8xf32>
    %61 = arith.addf %59, %60 : vector<8x8x8xf32>
    %cst_22 = arith.constant dense<0xFF800000> : vector<8x8xf32>
    %62 = vector.multi_reduction <maximumf>, %61, %cst_22 [2] : vector<8x8x8xf32> to vector<8x8xf32>
    %63 = vector.shape_cast %62 : vector<8x8xf32> to vector<8x8x1xf32>
    %64 = vector.broadcast %63 : vector<8x8x1xf32> to vector<8x8x8xf32>
    %65 = arith.subf %61, %64 : vector<8x8x8xf32>
    %66 = math.exp %65 : vector<8x8x8xf32>
    %cst_23 = arith.constant dense<0.000000e+00> : vector<8x8xf32>
    %67 = vector.multi_reduction <add>, %66, %cst_23 [2] : vector<8x8x8xf32> to vector<8x8xf32>
    %68 = vector.shape_cast %67 : vector<8x8xf32> to vector<8x8x1xf32>
    %69 = arith.truncf %66 : vector<8x8x8xf32> to vector<8x8x8xbf16>
    "tpu.trace_start"() <{level = 10 : i32, message = "bqk,bkd->bqd"}> : () -> ()
    %cst_24 = arith.constant dense<0.000000e+00> : vector<8x8x8xf32>
    %70 = tpu.matmul %69, %56, %cst_24 {dimension_numbers = #tpu.dot_dimension_numbers<[2], [1], [1], [2], [0, 0, 0, 1, 1, 2], [0], [0]>} : vector<8x8x8xbf16>, vector<8x8x8xbf16>, vector<8x8x8xf32> -> vector<8x8x8xf32>
    "tpu.trace_stop"() : () -> ()
    %71 = tpu.reciprocal %68 {approx = true} : vector<8x8x1xf32> -> vector<8x8x1xf32>
    %72 = vector.broadcast %71 : vector<8x8x1xf32> to vector<8x8x8xf32>
    %73 = arith.mulf %70, %72 : vector<8x8x8xf32>
    %74 = tpu.transpose %73, [0, 2, 1] : vector<8x8x8xf32> -> vector<8x8x8xf32>
    %75 = vector.shape_cast %74 : vector<8x8x8xf32> to vector<2x32x8xf32>
    %76 = tpu.transpose %75, [0, 2, 1] : vector<2x32x8xf32> -> vector<2x8x32xf32>
    %77 = vector.shape_cast %76 : vector<2x8x32xf32> to vector<16x32xf32>
    %c0_25 = arith.constant 0 : index
    %c0_26 = arith.constant 0 : index
    %78 = vector.load %arg7[%c0_25, %c0_26] : memref<32x32xbf16, #tpu.memory_space<vmem>>, vector<32x32xbf16>
    %c0_27 = arith.constant 0 : index
    %c0_28 = arith.constant 0 : index
    %79 = vector.load %arg8[%c0_27, %c0_28] : memref<1x32xf32, #tpu.memory_space<vmem>>, vector<1x32xf32>
    %80 = arith.truncf %77 : vector<16x32xf32> to vector<16x32xbf16>
    %cst_29 = arith.constant dense<0.000000e+00> : vector<16x32xf32>
    %81 = tpu.matmul %80, %78, %cst_29 {dimension_numbers = #tpu.dot_dimension_numbers<[1], [0], [0], [1], [0, 0, 1, 1], [], []>} : vector<16x32xbf16>, vector<32x32xbf16>, vector<16x32xf32> -> vector<16x32xf32>
    %82 = vector.broadcast %79 : vector<1x32xf32> to vector<16x32xf32>
    %83 = arith.addf %81, %82 : vector<16x32xf32>
    %84 = vector.shape_cast %83 : vector<16x32xf32> to vector<2x8x32xf32>
    %85 = arith.addf %0, %84 : vector<2x8x32xf32>
    %c0_30 = arith.constant 0 : index
    %c0_31 = arith.constant 0 : index
    %86 = vector.load %arg9[%c0_30, %c0_31] : memref<1x32xf32, #tpu.memory_space<vmem>>, vector<1x32xf32>
    %87 = vector.shape_cast %86 : vector<1x32xf32> to vector<1x1x32xf32>
    %c0_32 = arith.constant 0 : index
    %c0_33 = arith.constant 0 : index
    %88 = vector.load %arg10[%c0_32, %c0_33] : memref<1x32xf32, #tpu.memory_space<vmem>>, vector<1x32xf32>
    %89 = vector.shape_cast %88 : vector<1x32xf32> to vector<1x1x32xf32>
    %cst_34 = arith.constant dense<0.000000e+00> : vector<2x8xf32>
    %90 = vector.multi_reduction <add>, %85, %cst_34 [2] : vector<2x8x32xf32> to vector<2x8xf32>
    %91 = vector.shape_cast %90 : vector<2x8xf32> to vector<2x8x1xf32>
    %cst_35 = arith.constant 3.200000e+01 : f32
    %92 = vector.broadcast %cst_35 : f32 to vector<2x8x1xf32>
    %93 = arith.divf %91, %92 : vector<2x8x1xf32>
    %94 = vector.broadcast %93 : vector<2x8x1xf32> to vector<2x8x32xf32>
    %95 = arith.subf %85, %94 : vector<2x8x32xf32>
    %96 = arith.mulf %95, %95 : vector<2x8x32xf32>
    %cst_36 = arith.constant dense<0.000000e+00> : vector<2x8xf32>
    %97 = vector.multi_reduction <add>, %96, %cst_36 [2] : vector<2x8x32xf32> to vector<2x8xf32>
    %98 = vector.shape_cast %97 : vector<2x8xf32> to vector<2x8x1xf32>
    %cst_37 = arith.constant 3.200000e+01 : f32
    %99 = vector.broadcast %cst_37 : f32 to vector<2x8x1xf32>
    %100 = arith.divf %98, %99 : vector<2x8x1xf32>
    %101 = vector.broadcast %93 : vector<2x8x1xf32> to vector<2x8x32xf32>
    %102 = arith.subf %85, %101 : vector<2x8x32xf32>
    %cst_38 = arith.constant 9.99999974E-6 : f32
    %103 = vector.broadcast %cst_38 : f32 to vector<2x8x1xf32>
    %104 = arith.addf %100, %103 : vector<2x8x1xf32>
    %105 = math.rsqrt %104 : vector<2x8x1xf32>
    %106 = vector.broadcast %105 : vector<2x8x1xf32> to vector<2x8x32xf32>
    %107 = arith.mulf %102, %106 : vector<2x8x32xf32>
    %108 = vector.broadcast %87 : vector<1x1x32xf32> to vector<2x8x32xf32>
    %109 = arith.mulf %107, %108 : vector<2x8x32xf32>
    %110 = vector.broadcast %89 : vector<1x1x32xf32> to vector<2x8x32xf32>
    %111 = arith.addf %109, %110 : vector<2x8x32xf32>
    %112 = vector.shape_cast %111 : vector<2x8x32xf32> to vector<16x32xf32>
    %c0_39 = arith.constant 0 : index
    %c0_40 = arith.constant 0 : index
    %113 = vector.load %arg11[%c0_39, %c0_40] : memref<32x32xbf16, #tpu.memory_space<vmem>>, vector<32x32xbf16>
    %c0_41 = arith.constant 0 : index
    %c0_42 = arith.constant 0 : index
    %114 = vector.load %arg12[%c0_41, %c0_42] : memref<1x32xf32, #tpu.memory_space<vmem>>, vector<1x32xf32>
    %115 = arith.truncf %112 : vector<16x32xf32> to vector<16x32xbf16>
    %cst_43 = arith.constant dense<0.000000e+00> : vector<16x32xf32>
    %116 = tpu.matmul %115, %113, %cst_43 {dimension_numbers = #tpu.dot_dimension_numbers<[1], [0], [0], [1], [0, 0, 1, 1], [], []>} : vector<16x32xbf16>, vector<32x32xbf16>, vector<16x32xf32> -> vector<16x32xf32>
    %117 = vector.broadcast %114 : vector<1x32xf32> to vector<16x32xf32>
    %118 = arith.addf %116, %117 : vector<16x32xf32>
    %119 = vector.shape_cast %118 : vector<16x32xf32> to vector<2x8x32xf32>
    %120 = vector.shape_cast %1 : vector<2x3x32xf32> to vector<6x32xf32>
    %c0_44 = arith.constant 0 : index
    %c0_45 = arith.constant 0 : index
    %121 = vector.load %arg13[%c0_44, %c0_45] : memref<32x64xbf16, #tpu.memory_space<vmem>>, vector<32x64xbf16>
    %c0_46 = arith.constant 0 : index
    %c0_47 = arith.constant 0 : index
    %122 = vector.load %arg14[%c0_46, %c0_47] : memref<1x64xf32, #tpu.memory_space<vmem>>, vector<1x64xf32>
    %123 = arith.truncf %120 : vector<6x32xf32> to vector<6x32xbf16>
    %cst_48 = arith.constant dense<0.000000e+00> : vector<6x64xf32>
    %124 = tpu.matmul %123, %121, %cst_48 {dimension_numbers = #tpu.dot_dimension_numbers<[1], [0], [0], [1], [0, 0, 1, 1], [], []>} : vector<6x32xbf16>, vector<32x64xbf16>, vector<6x64xf32> -> vector<6x64xf32>
    %125 = vector.broadcast %122 : vector<1x64xf32> to vector<6x64xf32>
    %126 = arith.addf %124, %125 : vector<6x64xf32>
    %127 = vector.shape_cast %126 : vector<6x64xf32> to vector<2x3x64xf32>
    %128 = vector.extract_strided_slice %127 {offsets = [0, 0, 0], sizes = [2, 3, 32], strides = [1, 1, 1]} : vector<2x3x64xf32> to vector<2x3x32xf32>
    %129 = vector.extract_strided_slice %127 {offsets = [0, 0, 32], sizes = [2, 3, 32], strides = [1, 1, 1]} : vector<2x3x64xf32> to vector<2x3x32xf32>
    %c0_49 = arith.constant 0 : index
    %c0_50 = arith.constant 0 : index
    %130 = vector.load %arg2[%c0_49, %c0_50] : memref<8x3xf32, #tpu.memory_space<vmem>>, vector<8x3xf32>
    %131 = vector.shape_cast %130 : vector<8x3xf32> to vector<8x1x3xf32>
    %132 = tpu.transpose %119, [0, 2, 1] : vector<2x8x32xf32> -> vector<2x32x8xf32>
    %133 = vector.shape_cast %132 : vector<2x32x8xf32> to vector<8x8x8xf32>
    %134 = tpu.transpose %133, [0, 2, 1] : vector<8x8x8xf32> -> vector<8x8x8xf32>
    %135 = arith.truncf %134 : vector<8x8x8xf32> to vector<8x8x8xbf16>
    %136 = tpu.transpose %128, [0, 2, 1] : vector<2x3x32xf32> -> vector<2x32x3xf32>
    %137 = vector.shape_cast %136 : vector<2x32x3xf32> to vector<8x8x3xf32>
    %138 = tpu.transpose %137, [0, 2, 1] : vector<8x8x3xf32> -> vector<8x3x8xf32>
    %139 = arith.truncf %138 : vector<8x3x8xf32> to vector<8x3x8xbf16>
    %140 = tpu.transpose %129, [0, 2, 1] : vector<2x3x32xf32> -> vector<2x32x3xf32>
    %141 = vector.shape_cast %140 : vector<2x32x3xf32> to vector<8x8x3xf32>
    %142 = tpu.transpose %141, [0, 2, 1] : vector<8x8x3xf32> -> vector<8x3x8xf32>
    %143 = arith.truncf %142 : vector<8x3x8xf32> to vector<8x3x8xbf16>
    "tpu.trace_start"() <{level = 10 : i32, message = "bqd,bkd->bqk"}> : () -> ()
    %cst_51 = arith.constant dense<0.000000e+00> : vector<8x8x3xf32>
    %144 = tpu.matmul %135, %139, %cst_51 {dimension_numbers = #tpu.dot_dimension_numbers<[2], [2], [1], [1], [0, 0, 0, 1, 1, 1], [0], [0]>} : vector<8x8x8xbf16>, vector<8x3x8xbf16>, vector<8x8x3xf32> -> vector<8x8x3xf32>
    "tpu.trace_stop"() : () -> ()
    %cst_52 = arith.constant 0.353553385 : f32
    %145 = vector.broadcast %cst_52 : f32 to vector<8x8x3xf32>
    %146 = arith.mulf %144, %145 : vector<8x8x3xf32>
    %147 = vector.broadcast %131 : vector<8x1x3xf32> to vector<8x8x3xf32>
    %148 = arith.addf %146, %147 : vector<8x8x3xf32>
    %cst_53 = arith.constant dense<0xFF800000> : vector<8x8xf32>
    %149 = vector.multi_reduction <maximumf>, %148, %cst_53 [2] : vector<8x8x3xf32> to vector<8x8xf32>
    %150 = vector.shape_cast %149 : vector<8x8xf32> to vector<8x8x1xf32>
    %151 = vector.broadcast %150 : vector<8x8x1xf32> to vector<8x8x3xf32>
    %152 = arith.subf %148, %151 : vector<8x8x3xf32>
    %153 = math.exp %152 : vector<8x8x3xf32>
    %cst_54 = arith.constant dense<0.000000e+00> : vector<8x8xf32>
    %154 = vector.multi_reduction <add>, %153, %cst_54 [2] : vector<8x8x3xf32> to vector<8x8xf32>
    %155 = vector.shape_cast %154 : vector<8x8xf32> to vector<8x8x1xf32>
    %156 = arith.truncf %153 : vector<8x8x3xf32> to vector<8x8x3xbf16>
    "tpu.trace_start"() <{level = 10 : i32, message = "bqk,bkd->bqd"}> : () -> ()
    %cst_55 = arith.constant dense<0.000000e+00> : vector<8x8x8xf32>
    %157 = tpu.matmul %156, %143, %cst_55 {dimension_numbers = #tpu.dot_dimension_numbers<[2], [1], [1], [2], [0, 0, 0, 1, 1, 2], [0], [0]>} : vector<8x8x3xbf16>, vector<8x3x8xbf16>, vector<8x8x8xf32> -> vector<8x8x8xf32>
    "tpu.trace_stop"() : () -> ()
    %158 = tpu.reciprocal %155 {approx = true} : vector<8x8x1xf32> -> vector<8x8x1xf32>
    %159 = vector.broadcast %158 : vector<8x8x1xf32> to vector<8x8x8xf32>
    %160 = arith.mulf %157, %159 : vector<8x8x8xf32>
    %161 = tpu.transpose %160, [0, 2, 1] : vector<8x8x8xf32> -> vector<8x8x8xf32>
    %162 = vector.shape_cast %161 : vector<8x8x8xf32> to vector<2x32x8xf32>
    %163 = tpu.transpose %162, [0, 2, 1] : vector<2x32x8xf32> -> vector<2x8x32xf32>
    %164 = vector.shape_cast %163 : vector<2x8x32xf32> to vector<16x32xf32>
    %c0_56 = arith.constant 0 : index
    %c0_57 = arith.constant 0 : index
    %165 = vector.load %arg15[%c0_56, %c0_57] : memref<32x32xbf16, #tpu.memory_space<vmem>>, vector<32x32xbf16>
    %c0_58 = arith.constant 0 : index
    %c0_59 = arith.constant 0 : index
    %166 = vector.load %arg16[%c0_58, %c0_59] : memref<1x32xf32, #tpu.memory_space<vmem>>, vector<1x32xf32>
    %167 = arith.truncf %164 : vector<16x32xf32> to vector<16x32xbf16>
    %cst_60 = arith.constant dense<0.000000e+00> : vector<16x32xf32>
    %168 = tpu.matmul %167, %165, %cst_60 {dimension_numbers = #tpu.dot_dimension_numbers<[1], [0], [0], [1], [0, 0, 1, 1], [], []>} : vector<16x32xbf16>, vector<32x32xbf16>, vector<16x32xf32> -> vector<16x32xf32>
    %169 = vector.broadcast %166 : vector<1x32xf32> to vector<16x32xf32>
    %170 = arith.addf %168, %169 : vector<16x32xf32>
    %171 = vector.shape_cast %170 : vector<16x32xf32> to vector<2x8x32xf32>
    %172 = arith.addf %85, %171 : vector<2x8x32xf32>
    %c0_61 = arith.constant 0 : index
    %c0_62 = arith.constant 0 : index
    %173 = vector.load %arg17[%c0_61, %c0_62] : memref<1x32xf32, #tpu.memory_space<vmem>>, vector<1x32xf32>
    %174 = vector.shape_cast %173 : vector<1x32xf32> to vector<1x1x32xf32>
    %c0_63 = arith.constant 0 : index
    %c0_64 = arith.constant 0 : index
    %175 = vector.load %arg18[%c0_63, %c0_64] : memref<1x32xf32, #tpu.memory_space<vmem>>, vector<1x32xf32>
    %176 = vector.shape_cast %175 : vector<1x32xf32> to vector<1x1x32xf32>
    %cst_65 = arith.constant dense<0.000000e+00> : vector<2x8xf32>
    %177 = vector.multi_reduction <add>, %172, %cst_65 [2] : vector<2x8x32xf32> to vector<2x8xf32>
    %178 = vector.shape_cast %177 : vector<2x8xf32> to vector<2x8x1xf32>
    %cst_66 = arith.constant 3.200000e+01 : f32
    %179 = vector.broadcast %cst_66 : f32 to vector<2x8x1xf32>
    %180 = arith.divf %178, %179 : vector<2x8x1xf32>
    %181 = vector.broadcast %180 : vector<2x8x1xf32> to vector<2x8x32xf32>
    %182 = arith.subf %172, %181 : vector<2x8x32xf32>
    %183 = arith.mulf %182, %182 : vector<2x8x32xf32>
    %cst_67 = arith.constant dense<0.000000e+00> : vector<2x8xf32>
    %184 = vector.multi_reduction <add>, %183, %cst_67 [2] : vector<2x8x32xf32> to vector<2x8xf32>
    %185 = vector.shape_cast %184 : vector<2x8xf32> to vector<2x8x1xf32>
    %cst_68 = arith.constant 3.200000e+01 : f32
    %186 = vector.broadcast %cst_68 : f32 to vector<2x8x1xf32>
    %187 = arith.divf %185, %186 : vector<2x8x1xf32>
    %188 = vector.broadcast %180 : vector<2x8x1xf32> to vector<2x8x32xf32>
    %189 = arith.subf %172, %188 : vector<2x8x32xf32>
    %cst_69 = arith.constant 9.99999974E-6 : f32
    %190 = vector.broadcast %cst_69 : f32 to vector<2x8x1xf32>
    %191 = arith.addf %187, %190 : vector<2x8x1xf32>
    %192 = math.rsqrt %191 : vector<2x8x1xf32>
    %193 = vector.broadcast %192 : vector<2x8x1xf32> to vector<2x8x32xf32>
    %194 = arith.mulf %189, %193 : vector<2x8x32xf32>
    %195 = vector.broadcast %174 : vector<1x1x32xf32> to vector<2x8x32xf32>
    %196 = arith.mulf %194, %195 : vector<2x8x32xf32>
    %197 = vector.broadcast %176 : vector<1x1x32xf32> to vector<2x8x32xf32>
    %198 = arith.addf %196, %197 : vector<2x8x32xf32>
    %199 = vector.shape_cast %198 : vector<2x8x32xf32> to vector<16x32xf32>
    %c0_70 = arith.constant 0 : index
    %c0_71 = arith.constant 0 : index
    %200 = vector.load %arg19[%c0_70, %c0_71] : memref<32x64xbf16, #tpu.memory_space<vmem>>, vector<32x64xbf16>
    %c0_72 = arith.constant 0 : index
    %c0_73 = arith.constant 0 : index
    %201 = vector.load %arg20[%c0_72, %c0_73] : memref<1x64xf32, #tpu.memory_space<vmem>>, vector<1x64xf32>
    %202 = arith.truncf %199 : vector<16x32xf32> to vector<16x32xbf16>
    %cst_74 = arith.constant dense<0.000000e+00> : vector<16x64xf32>
    %203 = tpu.matmul %202, %200, %cst_74 {dimension_numbers = #tpu.dot_dimension_numbers<[1], [0], [0], [1], [0, 0, 1, 1], [], []>} : vector<16x32xbf16>, vector<32x64xbf16>, vector<16x64xf32> -> vector<16x64xf32>
    %204 = vector.broadcast %201 : vector<1x64xf32> to vector<16x64xf32>
    %205 = arith.addf %203, %204 : vector<16x64xf32>
    %cst_75 = arith.constant 5.000000e-01 : f32
    %206 = vector.broadcast %cst_75 : f32 to vector<16x64xf32>
    %207 = arith.mulf %206, %205 : vector<16x64xf32>
    %cst_76 = arith.constant 4.471500e-02 : f32
    %208 = vector.broadcast %cst_76 : f32 to vector<16x64xf32>
    %209 = arith.mulf %208, %205 : vector<16x64xf32>
    %210 = arith.mulf %209, %205 : vector<16x64xf32>
    %211 = arith.mulf %210, %205 : vector<16x64xf32>
    %212 = arith.addf %205, %211 : vector<16x64xf32>
    %cst_77 = arith.constant 0.797884583 : f32
    %213 = vector.broadcast %cst_77 : f32 to vector<16x64xf32>
    %214 = arith.mulf %213, %212 : vector<16x64xf32>
    %215 = math.tanh %214 : vector<16x64xf32>
    %cst_78 = arith.constant 1.000000e+00 : f32
    %216 = vector.broadcast %cst_78 : f32 to vector<16x64xf32>
    %217 = arith.addf %216, %215 : vector<16x64xf32>
    %218 = arith.mulf %207, %217 : vector<16x64xf32>
    %c0_79 = arith.constant 0 : index
    %c0_80 = arith.constant 0 : index
    %219 = vector.load %arg21[%c0_79, %c0_80] : memref<64x32xbf16, #tpu.memory_space<vmem>>, vector<64x32xbf16>
    %c0_81 = arith.constant 0 : index
    %c0_82 = arith.constant 0 : index
    %220 = vector.load %arg22[%c0_81, %c0_82] : memref<1x32xf32, #tpu.memory_space<vmem>>, vector<1x32xf32>
    %221 = arith.truncf %218 : vector<16x64xf32> to vector<16x64xbf16>
    %cst_83 = arith.constant dense<0.000000e+00> : vector<16x32xf32>
    %222 = tpu.matmul %221, %219, %cst_83 {dimension_numbers = #tpu.dot_dimension_numbers<[1], [0], [0], [1], [0, 0, 1, 1], [], []>} : vector<16x64xbf16>, vector<64x32xbf16>, vector<16x32xf32> -> vector<16x32xf32>
    %223 = vector.broadcast %220 : vector<1x32xf32> to vector<16x32xf32>
    %224 = arith.addf %222, %223 : vector<16x32xf32>
    %225 = vector.shape_cast %224 : vector<16x32xf32> to vector<2x8x32xf32>
    %226 = arith.addf %172, %225 : vector<2x8x32xf32>
    %227 = vector.shape_cast %226 : vector<2x8x32xf32> to vector<2x256xf32>
    %c0_84 = arith.constant 0 : index
    %c0_85 = arith.constant 0 : index
    %228 = vector.load %arg23[%c0_84, %c0_85] : memref<2x256xf32, #tpu.memory_space<vmem>>, vector<2x256xf32>
    tpu.vector_store %arg23[%c0_84, %c0_85], %227 {strides = array<i32>} : memref<2x256xf32, #tpu.memory_space<vmem>>, vector<2x256xf32>,
    return
  }
}

module attributes {stable_mosaic.version = 11 : i64} {
  func.func @_gen_ce_kernel(%arg0: memref<16x32xf32, #tpu.memory_space<vmem>>, %arg1: memref<16x1xi32, #tpu.memory_space<vmem>>, %arg2: memref<32x128xbf16, #tpu.memory_space<vmem>>, %arg3: memref<1x128xf32, #tpu.memory_space<vmem>>, %arg4: memref<16x128xf32, #tpu.memory_space<vmem>>, %arg5: memref<1x1xf32, #tpu.memory_space<vmem>>) attributes {dimension_semantics = [], scalar_prefetch = 0 : i64, scratch_operands = 0 : i64, tpu.core_type = #tpu.core_type<tc>} {
    %c0 = arith.constant 0 : index
    %c0_0 = arith.constant 0 : index
    %0 = vector.load %arg0[%c0, %c0_0] : memref<16x32xf32, #tpu.memory_space<vmem>>, vector<16x32xf32>
    %c0_1 = arith.constant 0 : index
    %c0_2 = arith.constant 0 : index
    %1 = vector.load %arg2[%c0_1, %c0_2] : memref<32x128xbf16, #tpu.memory_space<vmem>>, vector<32x128xbf16>
    %c0_3 = arith.constant 0 : index
    %c0_4 = arith.constant 0 : index
    %2 = vector.load %arg3[%c0_3, %c0_4] : memref<1x128xf32, #tpu.memory_space<vmem>>, vector<1x128xf32>
    %3 = arith.truncf %0 : vector<16x32xf32> to vector<16x32xbf16>
    %cst = arith.constant dense<0.000000e+00> : vector<16x128xf32>
    %4 = tpu.matmul %3, %1, %cst {dimension_numbers = #tpu.dot_dimension_numbers<[1], [0], [0], [1], [0, 0, 1, 1], [], []>} : vector<16x32xbf16>, vector<32x128xbf16>, vector<16x128xf32> -> vector<16x128xf32>
    %5 = vector.broadcast %2 : vector<1x128xf32> to vector<16x128xf32>
    %6 = arith.addf %4, %5 : vector<16x128xf32>
    %c0_5 = arith.constant 0 : index
    %c0_6 = arith.constant 0 : index
    %7 = vector.load %arg4[%c0_5, %c0_6] : memref<16x128xf32, #tpu.memory_space<vmem>>, vector<16x128xf32>
    tpu.vector_store %arg4[%c0_5, %c0_6], %6 {strides = array<i32>} : memref<16x128xf32, #tpu.memory_space<vmem>>, vector<16x128xf32>,
    %8 = tpu.iota {dimensions = array<i32: 1>} : vector<16x128xi32>
    %c50_i32 = arith.constant 50 : i32
    %9 = vector.broadcast %c50_i32 : i32 to vector<16x128xi32>
    %10 = arith.cmpi slt, %8, %9 : vector<16x128xi32>
    %cst_7 = arith.constant -1.000000e+09 : f32
    %11 = vector.broadcast %cst_7 : f32 to vector<16x128xf32>
    %12 = arith.select %10, %6, %11 : vector<16x128xi1>, vector<16x128xf32>
    %cst_8 = arith.constant dense<0xFF800000> : vector<16xf32>
    %13 = vector.multi_reduction <maximumf>, %12, %cst_8 [1] : vector<16x128xf32> to vector<16xf32>
    %14 = vector.shape_cast %13 : vector<16xf32> to vector<16x1xf32>
    %15 = vector.broadcast %14 : vector<16x1xf32> to vector<16x128xf32>
    %16 = arith.subf %12, %15 : vector<16x128xf32>
    %17 = math.exp %16 : vector<16x128xf32>
    %cst_9 = arith.constant dense<0.000000e+00> : vector<16xf32>
    %18 = vector.multi_reduction <add>, %17, %cst_9 [1] : vector<16x128xf32> to vector<16xf32>
    %19 = vector.shape_cast %18 : vector<16xf32> to vector<16x1xf32>
    %20 = math.log %19 : vector<16x1xf32>
    %21 = arith.addf %20, %14 : vector<16x1xf32>
    %c0_10 = arith.constant 0 : index
    %c0_11 = arith.constant 0 : index
    %22 = vector.load %arg1[%c0_10, %c0_11] : memref<16x1xi32, #tpu.memory_space<vmem>>, vector<16x1xi32>
    %23 = vector.broadcast %22 : vector<16x1xi32> to vector<16x128xi32>
    %24 = arith.cmpi eq, %8, %23 : vector<16x128xi32>
    %cst_12 = arith.constant 0.000000e+00 : f32
    %25 = vector.broadcast %cst_12 : f32 to vector<16x128xf32>
    %26 = arith.select %24, %6, %25 : vector<16x128xi1>, vector<16x128xf32>
    %cst_13 = arith.constant dense<0.000000e+00> : vector<16xf32>
    %27 = vector.multi_reduction <add>, %26, %cst_13 [1] : vector<16x128xf32> to vector<16xf32>
    %28 = vector.shape_cast %27 : vector<16xf32> to vector<16x1xf32>
    %29 = arith.subf %21, %28 : vector<16x1xf32>
    %cst_14 = arith.constant dense<0.000000e+00> : vector<1xf32>
    %30 = vector.multi_reduction <add>, %29, %cst_14 [0] : vector<16x1xf32> to vector<1xf32>
    %31 = vector.shape_cast %30 : vector<1xf32> to vector<1x1xf32>
    %cst_15 = arith.constant 1.600000e+01 : f32
    %32 = vector.broadcast %cst_15 : f32 to vector<1x1xf32>
    %33 = arith.divf %31, %32 : vector<1x1xf32>
    %c0_16 = arith.constant 0 : index
    %c0_17 = arith.constant 0 : index
    %34 = vector.load %arg5[%c0_16, %c0_17] : memref<1x1xf32, #tpu.memory_space<vmem>>, vector<1x1xf32>
    tpu.vector_store %arg5[%c0_16, %c0_17], %33 {strides = array<i32>} : memref<1x1xf32, #tpu.memory_space<vmem>>, vector<1x1xf32>,
    return
  }
}

</mosaic_0001>

<bundles_post_ra>
// kernel: _lambda_.13
= control target key start
LH: loop header
LB: loop body
LE: loop exit
PB: predicated region body
PF: predicated region fallthrough
CT: control target
= control target key end

     0   :  { %v221_v1 = vmov 0.0   ;;  %vm222_vm0 = vmmov 0   ;;  %v223_v6 = vmov 0   ;;  %s294_s0 = inlined_call_operand.vmem [shape: f32[16,32], index: 0, kind: input, shape index: {}]   ;;  %s295_s1 = inlined_call_operand.vmem [shape: s32[16,1], index: 1, kind: input, shape index: {}]   ;;  %s296_s2 = inlined_call_operand.vmem [shape: bf16[32,128], index: 2, kind: input, shape index: {}]   ;;  %s297_s3 = inlined_call_operand.vmem [shape: f32[1,128], index: 3, kind: input, shape index: {}]   ;;  %s298_s4 = inlined_call_operand.vmem [shape: f32[16,128], index: 4, kind: output, shape index: {0}]   ;;  %s299_s5 = inlined_call_operand.hbm [shape: f32[1,1], index: 5, kind: output, shape index: {1}]  }
   0x1   :  { %v187_v0 = vld [vmem:[%s296_s2] sm:$0xff]   ;;  %173 = vmatprep.subr.bf16.mxu0 %v221_v1  ;;  %v188_v2 = vld [vmem:[%s296_s2 + $0x8] sm:$0xff]   ;;  %177 = vmatprep.mubr.msk.bf16.mxu0 %vm222_vm0, %v221_v1 }
   0x2   :  { %174 = vmatpush3.bf16.msra.mxu0 %v187_v0  ;;  %v21_v3 = vld [vmem:[%s294_s0] sm:$0xff]  ;;  %v22_v4 = vld [vmem:[%s294_s0 + $0x8] sm:$0xff]  ;;  %185 = vset.pattern.permute.xlu1 %v223_v6 }
   0x3   :  { %v119_v5 = vld [vmem:[%s295_s1] sm:$0xff]  ;;  %175 = vmatprep.subr.bf16.mxu0 %v221_v1 }
   0x4   :  { %11 = vsyncpa [#allocation3], 0  ;;  %122 = vperm.xlu1 %185, %v119_v5   ;;  %186 = vset.pattern.permute.xlu0 %v223_v6  ;;  %v28_v7 = vpack.c.bf16 %v22_v4, %v21_v3  ;;  %v120_v8 = vld [vmem:[%s295_s1 + $0x8] sm:$0xff]  ;;  %vm47_vm1 = vcmask 261120   ;;  %v94_v9 = vlaneseq  ;;  %v166_v12 = vld [vmem:[%s297_s3] ss:$0 sm:$0xff] }
   0x5   :  { %s224_s3 = smov [#allocation2]   ;;  %vm146_vm5 = vcmask 0  }
   0x6   :  { %176 = vmatpush3.bf16.msra.mxu0 %v188_v2  ;;  %v95_v11 = vand.u32 127, %v94_v9 }
   0x8   :  { %125 = vperm.xlu1 %185, %v120_v8   ;;  %vm96_vm3 = vcmp.lt.s32.totalorder %v95_v11, 50 }
   0x9   :  { %178 = vmatmul.mubr.msk.bf16.vlgmr.msra.gmra.mrb[0].mxu0 %vm47_vm1, %v28_v7 }
  0x83   :  { %v123_v10 = vpop.permute.xlu1 %122 }
  0x84   :  { %vm127_vm2 = vcmp.eq.s32.totalorder %v95_v11, %v123_v10 }
  0x87   :  { %v126_v13 = vpop.permute.xlu1 %125 }
  0x88   :  { %vm128_vm4 = vcmp.eq.s32.totalorder %v95_v11, %v126_v13 }
  0xdc   :  { %v85_v14 = vpop.f32.mrb[0].mxu0 }
  0xdd   :  { %v86_v15 = vadd.f32 %v166_v12, %v85_v14  ;;  %v179_v16 = vpop.f32.mrb[1].mxu0 }
  0xde   :  { %v88_v17 = vpop.f32.mrb[2].mxu0 }
  0xdf   :  { %92 = vst [vmem:[%s298_s4] sm:$0xff] %v86_v15  ;;  %v89_v18 = vadd.f32 %v166_v12, %v88_v17  ;;  %v180_v19 = vpop.f32.mrb[3].mxu0  ;;  %v97_v20 = vsel %vm96_vm3, %v86_v15, -1e+09  ;;  %v129_v21 = vsel %vm127_vm2, %v86_v15, 0.0 }
  0xe0   :  { %99 = vmax.xlane.f32.xlu0 %v97_v20 }
  0xe1   :  { %93 = vst [vmem:[%s298_s4 + $0x8] sm:$0xff] %v89_v18  ;;  %v130_v22 = vsel %vm128_vm4, %v89_v18, 0.0  ;;  %v98_v23 = vsel %vm96_vm3, %v89_v18, -1e+09  ;;  %s156_s4 = sshll.u32 %s224_s3, 4  ;;  %s157_s4 = int_to_ptr.vmem [resolvable:$true] %s156_s4 }
  0xe2   :  { %s197_s8 = scalar_lea.vmem %s157_s4, 16  ;;  %s201_s9 = scalar_lea.vmem %s157_s4, 32 }
  0xe3   :  { %p198_p0 = scmp.ne.s32.totalorder %s157_s4, %s197_s8  ;;  %p202_p1 = scmp.lt.s32.totalorder %s157_s4, %s157_s4 }
  0xe4   :  { %101 = vmax.xlane.f32.xlu0 %v98_v23  ;;  %p203_p2 = scmp.lt.s32.totalorder %s201_s9, %s197_s8 }
  0xe6   :  { %p204_p3 = por %p203_p2, %p202_p1 }
  0xe8   :  { %p205_p4 = pnand %p204_p3, %p198_p0 }
 0x16d   :  { %v100_v24 = vpop.xlane.xlu0 %99 }
 0x16e   :  { %v103_v25 = vsub.f32 %v97_v20, %v100_v24 }
 0x170   :  { %v105_v26 = vmul.f32 1.442695, %v103_v25 }
 0x171   :  { %v102_v27 = vpop.xlane.xlu0 %101 }
 0x172   :  { %189 = vpow2.f32 %v105_v26  ;;  %v104_v28 = vsub.f32 %v98_v23, %v102_v27 }
 0x174   :  { %v107_v29 = vmul.f32 1.442695, %v104_v28 }
 0x176   :  { %191 = vpow2.f32 %v107_v29 }
 0x17c   :  { %v190_v30 = vpop.eup %189 }
 0x17d   :  { %109 = vadd.xlane.f32.xlu0 %v190_v30 }
 0x180   :  { %v192_v31 = vpop.eup %191 }
 0x181   :  { %131 = vadd.xlane.f32.xlu0 %v129_v21  ;;  %111 = vadd.xlane.f32.xlu1 %v192_v31 }
 0x185   :  { %133 = vadd.xlane.f32.xlu0 %v130_v22 }
 0x20a   :  { %v110_v32 = vpop.xlane.xlu0 %109 }
 0x20b   :  { %193 = vlog2.f32 %v110_v32 }
 0x20e   :  { %v112_v33 = vpop.xlane.xlu1 %111  ;;  %v132_v36 = vpop.xlane.xlu0 %131 }
 0x20f   :  { %195 = vlog2.f32 %v112_v33 }
 0x212   :  { %v134_v41 = vpop.xlane.xlu0 %133 }
 0x215   :  { %v194_v34 = vpop.eup %193 }
 0x216   :  { %v114_v35 = vmul.f32 0.6931472, %v194_v34 }
 0x218   :  { %v117_v39 = vadd.f32 %v114_v35, %v100_v24 }
 0x219   :  { %v196_v37 = vpop.eup %195 }
 0x21a   :  { %v116_v38 = vmul.f32 0.6931472, %v196_v37  ;;  %v135_v42 = vsub.f32 %v117_v39, %v132_v36 }
 0x21c   :  { %v118_v40 = vadd.f32 %v116_v38, %v102_v27 }
 0x21e   :  { %v136_v43 = vsub.f32 %v118_v40, %v134_v41 }
 0x220   :  { %v137_v44 = vadd.f32 %v136_v43, %v135_v42 }
 0x222   :  { %v138_v45 = vrot.slane %v137_v44, 4 }
 0x224   :  { %v139_v46 = vadd.f32 %v138_v45, %v137_v44 }
 0x226   :  { %v140_v47 = vrot.slane %v139_v46, 2 }
 0x228   :  { %v141_v48 = vadd.f32 %v140_v47, %v139_v46 }
 0x22a   :  { %v142_v49 = vrot.slane %v141_v48, 1 }
 0x22c   :  { %v143_v50 = vadd.f32 %v142_v49, %v141_v48 }
 0x22e   :  { %v145_v51 = vmul.f32 0.0625, %v143_v50 }
 0x230   :  { %147 = vst.msk [vmem:[#allocation2] sm:$0x1] %vm146_vm5, %v145_v51 }
 0x231   :  { %208 = shalt.err (!%p205_p4)
}
 0x232   :  { %s209_s12 = scalar_lea.hbm %s299_s5, 16 }
 0x233   :  { %p210_p5 = scmp.ne.s32.totalorder %s299_s5, %s209_s12  ;;  %p213_p6 = scmp.lt.u32.totalorder %s209_s12, %s299_s5 }
 0x235   :  { %p215_p7 = pnand %p213_p6, %p210_p5 }
 0x237   :  { %218 = shalt.err (!%p215_p7)
}
 0x238   :  { %159 = dma.vmem_to_hbm [thread:$0]  %s157_s4, 16, %s299_s5, [#allocation3]  }
 0x239   :  { %219 = dma.done.wait [#allocation3], 16  }
 0x23a   :  { %220 = vsyncadd [#allocation3], 4294967280 }
 0x23b   :  { %165 = vsyncpa [#allocation3], 1 }

// kernel: _lambda_.9
= control target key start
LH: loop header
LB: loop body
LE: loop exit
PB: predicated region body
PF: predicated region fallthrough
CT: control target
= control target key end

     0   :  { %vm52_vm0 = vcmask 256000   ;;  %v3642_v14 = vmov 0.0   ;;  %vm3643_vm1 = vmmov 0   ;;  %v3644_v23 = vmov 1966171168   ;;  %s3646_s24 = smov 64   ;;  %s4084_s0 = inlined_call_operand.vmem [shape: f32[2,3,32], index: 0, kind: input, shape index: {}]   ;;  %s4085_s4 = inlined_call_operand.vmem [shape: bf16[32,96], index: 4, kind: input, shape index: {}]   ;;  %s4086_s2 = inlined_call_operand.vmem [shape: f32[1,32], index: 2, kind: input, shape index: {}]   ;;  %s4087_s3 = inlined_call_operand.vmem [shape: f32[1,32], index: 3, kind: input, shape index: {}]   ;;  %s4088_s5 = inlined_call_operand.vmem [shape: f32[1,96], index: 5, kind: input, shape index: {}]   ;;  %s4089_s1 = inlined_call_operand.vmem [shape: f32[8,3], index: 1, kind: input, shape index: {}]   ;;  %s4090_s6 = inlined_call_operand.vmem [shape: bf16[32,32], index: 6, kind: input, shape index: {}]   ;;  %s4091_s7 = inlined_call_operand.vmem [shape: f32[1,32], index: 7, kind: input, shape index: {}]   ;;  %s4092_s10 = inlined_call_operand.vmem [shape: bf16[32,64], index: 10, kind: input, shape index: {}]   ;;  %s4093_s12 = inlined_call_operand.vmem [shape: bf16[64,32], index: 12, kind: input, shape index: {}]   ;;  %s4094_s8 = inlined_call_operand.vmem [shape: f32[1,32], index: 8, kind: input, shape index: {}]   ;;  %s4095_s9 = inlined_call_operand.vmem [shape: f32[1,32], index: 9, kind: input, shape index: {}]   ;;  %s4096_s11 = inlined_call_operand.vmem [shape: f32[1,64], index: 11, kind: input, shape index: {}]   ;;  %s4097_s13 = inlined_call_operand.vmem [shape: f32[1,32], index: 13, kind: input, shape index: {}]   ;;  %s4098_s14 = inlined_call_operand.vmem [shape: f32[2,96], index: 14, kind: output, shape index: {}]  }
   0x1   :  { %v48_v0 = vld [vmem:[%s4084_s0] sm:$0x7]  ;;  %v49_v1 = vld [vmem:[%s4084_s0 + $0x4] sm:$0x7]  ;;  %3379 = vmatprep.subr.bf16.mxu0 %v3642_v14  ;;  %3383 = vmatprep.mubr.msk.bf16.mxu0 %vm3643_vm1, %v3642_v14  ;;  %v3590_v16 = vld [vmem:[%s4085_s4 + $0x8] sm:$0xff]   ;;  %v99_v24 = vunpack.c.l.s4 %v3644_v23  ;;  %v101_v25 = vlaneseq  ;;  %vm209_vm2 = vcmask 261120  }
   0x2   :  { %v53_v2 = vsel %vm52_vm0, %v48_v0, 0.0  ;;  %v56_v3 = vsel %vm52_vm0, %v49_v1, 0.0  ;;  %v3589_v15 = vld [vmem:[%s4085_s4] sm:$0xff]   ;;  %3387 = vmatprep.subr.bf16.mxu1 %v3642_v14  ;;  %3389 = vmatprep.mubr.msk.bf16.mxu1 %vm3643_vm1, %v3642_v14  ;;  %vm1396_vm3 = vcmask 64512   ;;  %vm1821_vm4 = vcmask 18432  }
   0x3   :  { %54 = vadd.xlane.f32.xlu0 %v53_v2  ;;  %3380 = vmatpush3.bf16.msra.mxu0 %v3589_v15  ;;  %v100_v26 = vunpack.c.0.s8 %v99_v24  ;;  %v3750_v27 = vshrl.u32 %v101_v25, 7  ;;  %v3295_v29 = vld [vmem:[%s4086_s2] ss:$0 sm:$0xff]  ;;  %vm1906_vm5 = vcmask 1040384   ;;  %vm1907_vm6 = vcmask 1041408  }
   0x4   :  { %3381 = vmatprep.subr.bf16.mxu0 %v3642_v14  ;;  %v3296_v31 = vld [vmem:[%s4087_s3] ss:$0 sm:$0xff]  ;;  %vm1902_vm7 = vcmask 23552   ;;  %vm3106_vm8 = vcmask 523264   ;;  %vm3289_vm9 = vcmask 779264  }
   0x5   :  { %v3759_v32 = vsub.s32 %v100_v26, %v3750_v27  ;;  %v3297_v60 = vld [vmem:[%s4088_s5] ss:$0 sm:$0xff]  ;;  %s3645_s5 = smov 96  }
   0x7   :  { %57 = vadd.xlane.f32.xlu0 %v56_v3  ;;  %3382 = vmatpush3.bf16.msra.mxu0 %v3590_v16 }
   0x8   :  { %3393 = vmatprep.subr.bf16.mxu0 %v3642_v14 }
  0x90   :  { %v55_v4 = vpop.xlane.xlu0 %54 }
  0x91   :  { %v60_v5 = vmul.f32 0.03125, %v55_v4 }
  0x93   :  { %v62_v6 = vsub.f32 %v48_v0, %v60_v5 }
  0x94   :  { %v58_v7 = vpop.xlane.xlu0 %57 }
  0x95   :  { %v61_v8 = vmul.f32 0.03125, %v58_v7  ;;  %v64_v9 = vmul.f32 %v62_v6, %v62_v6 }
  0x97   :  { %v63_v10 = vsub.f32 %v49_v1, %v61_v8  ;;  %v66_v11 = vsel %vm52_vm0, %v64_v9, 0.0 }
  0x98   :  { %67 = vadd.xlane.f32.xlu1 %v66_v11 }
  0x99   :  { %v65_v12 = vmul.f32 %v63_v10, %v63_v10 }
  0x9b   :  { %v69_v13 = vsel %vm52_vm0, %v65_v12, 0.0 }
  0x9c   :  { %70 = vadd.xlane.f32.xlu1 %v69_v13 }
 0x125   :  { %v68_v17 = vpop.xlane.xlu1 %67 }
 0x126   :  { %v72_v18 = vmul.f32 0.03125, %v68_v17 }
 0x128   :  { %v74_v19 = vadd.f32 1e-05, %v72_v18 }
 0x129   :  { %v71_v20 = vpop.xlane.xlu1 %70 }
 0x12a   :  { %3600 = vrsqrt.f32 %v74_v19  ;;  %v73_v21 = vmul.f32 0.03125, %v71_v20 }
 0x12c   :  { %v75_v22 = vadd.f32 1e-05, %v73_v21 }
 0x12e   :  { %3602 = vrsqrt.f32 %v75_v22 }
 0x134   :  { %v3601_v28 = vpop.eup %3600 }
 0x135   :  { %v78_v30 = vmul.f32 %v3601_v28, %v62_v6 }
 0x137   :  { %v86_v33 = vmul.f32 %v3295_v29, %v78_v30 }
 0x138   :  { %v3603_v34 = vpop.eup %3602 }
 0x139   :  { %v94_v35 = vadd.f32 %v3296_v31, %v86_v33  ;;  %v79_v36 = vmul.f32 %v3603_v34, %v63_v10 }
 0x13b   :  { %v104_v37 = vrot.slane %v94_v35, %v3759_v32  ;;  %v87_v38 = vmul.f32 %v3295_v29, %v79_v36 }
 0x13d   :  { %v95_v39 = vadd.f32 %v3296_v31, %v87_v38  ;;  %v105_v40 = vcombine.high %v104_v37, %v104_v37  ;;  %v112_v41 = vrot.slane %v104_v37, %v3759_v32 }
 0x13f   :  { %v127_v42 = vrot.slane %v95_v39, %v3759_v32  ;;  %v119_v43 = vrot.slane %v105_v40, %v3759_v32  ;;  %v120_v44 = vcombine.high %v112_v41, %v112_v41 }
 0x141   :  { %v128_v45 = vcombine.high %v127_v42, %v127_v42  ;;  %v135_v46 = vrot.slane %v127_v42, %v3759_v32  ;;  %v149_v47 = vcombine.low %v112_v41, %v119_v43 }
 0x143   :  { %v142_v48 = vrot.slane %v128_v45, %v3759_v32  ;;  %v143_v49 = vcombine.high %v135_v46, %v135_v46  ;;  %v150_v50 = vcombine.low %v120_v44, %v135_v46  ;;  %v158_v52 = vrot.slane %v149_v47, %v3759_v32 }
 0x145   :  { %v151_v51 = vcombine.low %v142_v48, %v143_v49  ;;  %v165_v53 = vrot.slane %v150_v50, %v3759_v32 }
 0x147   :  { %v172_v54 = vrot.slane %v151_v51, %v3759_v32  ;;  %v173_v55 = vcombine.low %v158_v52, %v165_v53 }
 0x149   :  { %v180_v56 = vrot.slane %v173_v55, %v3759_v32  ;;  %v187_v57 = vrot.slane %v172_v54, %v3759_v32 }
 0x14b   :  { %v188_v58 = vcombine.low %v180_v56, %v187_v57 }
 0x14d   :  { %v190_v59 = vpack.c.bf16 %v188_v58, %v188_v58 }
 0x14f   :  { %3384 = vmatmul.mubr.msk.bf16.vlgmr.msra.gmra.mrb[0].mxu0 %vm209_vm2, %v190_v59 }
 0x150   :  { %3395 = vmatprep.mubr.msk.bf16.mxu0 %vm3643_vm1, %v3642_v14 }
 0x222   :  { %v247_v61 = vpop.f32.mrb[0].mxu0 }
 0x223   :  { %v248_v62 = vadd.f32 %v3297_v60, %v247_v61  ;;  %v3385_v63 = vpop.f32.mrb[1].mxu0 }
 0x224   :  { %v250_v0 = vpop.f32.mrb[2].mxu0 }
 0x225   :  { %v254_v1 = vcombine.high %v248_v62, %v248_v62  ;;  %v261_v2 = vrot.slane %v248_v62, %v3759_v32  ;;  %v3386_v3 = vpop.f32.mrb[3].mxu0 }
 0x227   :  { %v268_v4 = vrot.slane %v254_v1, %v3759_v32  ;;  %v269_v5 = vcombine.high %v261_v2, %v261_v2  ;;  %v277_v6 = vrot.slane %v261_v2, %v3759_v32 }
 0x229   :  { %v270_v7 = vcombine.high %v268_v4, %v268_v4  ;;  %v291_v8 = vrot.slane %v269_v5, %v3759_v32  ;;  %v299_v9 = vcombine.high %v277_v6, %v277_v6  ;;  %v284_v10 = vrot.slane %v268_v4, %v3759_v32 }
 0x22b   :  { %v298_v11 = vrot.slane %v270_v7, %v3759_v32  ;;  %v300_v12 = vcombine.high %v291_v8, %v291_v8  ;;  %v352_v13 = vcombine.low %v277_v6, %v291_v8  ;;  %v366_v17 = vrot.slane %v299_v9, %v3759_v32 }
 0x22d   :  { %v375_v15 = vcombine.low %v300_v12, %v284_v10  ;;  %v359_v16 = vrot.slane %v352_v13, %v3759_v32  ;;  %v389_v20 = vrot.slane %v298_v11, %v3759_v32 }
 0x22f   :  { %v367_v18 = vcombine.low %v359_v16, %v366_v17  ;;  %v382_v19 = vrot.slane %v375_v15, %v3759_v32 }
 0x231   :  { %v374_v21 = vrot.slane %v367_v18, %v3759_v32  ;;  %v390_v22 = vcombine.low %v382_v19, %v389_v20 }
 0x233   :  { %728 = vrot.lane.b32.xlu0 %v374_v21, %s3645_s5  ;;  %v397_v23 = vrot.slane %v390_v22, %v3759_v32 }
 0x235   :  { %730 = vrot.lane.b32.xlu1 %v397_v23, %s3645_s5  ;;  %v3562_v50 = vpack.i.bf16 %v397_v23, %v374_v21 }
 0x251   :  { %400 = vxpose.xlu0.b32.start.end [1/1] (short) (narrow) %v374_v21, 32 }
 0x2a5   :  { %v729_v24 = vpop.permute.xlu0 %728 }
 0x2a6   :  { %734 = vxpose.xlu1.b32.start.end [1/1] (short) (narrow) %v729_v24, 32 }
 0x2a7   :  { %v731_v25 = vpop.permute.xlu1 %730 }
 0x2a8   :  { %766 = vxpose.xlu0.b32.start.end [1/1] (short) (narrow) %v731_v25, 32 }
 0x2b3   :  { %432 = vxpose.xlu1.b32.start.end [1/1] (short) (narrow) %v397_v23, 32 }
 0x2d1   :  { %v416_v26 = vpop.trf.xlu0 }
 0x2d5   :  { %v417_v28 = vpop.trf.xlu0 }
 0x2d9   :  { %v418_v29 = vpop.trf.xlu0 }
 0x2dd   :  { %v419_v30 = vpop.trf.xlu0 }
 0x326   :  { %v750_v31 = vpop.trf.xlu1 }
 0x327   :  { %798 = vxpose.xlu0.b32.start.end [1/1] (short) (narrow) %v750_v31, 8 }
 0x328   :  { %v782_v33 = vpop.trf.xlu0 }
 0x329   :  { %v3534_v35 = vpack.i.bf16 %v782_v33, %v418_v29 }
 0x32a   :  { %v751_v34 = vpop.trf.xlu1 }
 0x32b   :  { %830 = vxpose.xlu1.b32.start.end [1/1] (short) (narrow) %v751_v34, 8 }
 0x32c   :  { %v783_v38 = vpop.trf.xlu0 }
 0x32d   :  { %v3541_v43 = vpack.i.bf16 %v783_v38, %v419_v30 }
 0x32e   :  { %v752_v36 = vpop.trf.xlu1 }
 0x32f   :  { %v3520_v37 = vpack.i.bf16 %v752_v36, %v416_v26  ;;  %3535 = vxpose.xlu1.b32.start.end [1/1] (short) (narrow) %v3534_v35, 8 }
 0x330   :  { %v784_v41 = vpop.trf.xlu0 }
 0x331   :  { %3521 = vxpose.xlu0.b32.start.end [1/1] (short) (narrow) %v3520_v37, 8 }
 0x332   :  { %v753_v39 = vpop.trf.xlu1 }
 0x333   :  { %v3527_v40 = vpack.i.bf16 %v753_v39, %v417_v28 }
 0x334   :  { %v785_v45 = vpop.trf.xlu0 }
 0x335   :  { %3528 = vxpose.xlu0.b32.start.end [1/1] (short) (narrow) %v3527_v40, 8 }
 0x336   :  { %v448_v42 = vpop.trf.xlu1 }
 0x337   :  { %v3548_v44 = vpack.i.bf16 %v784_v41, %v448_v42  ;;  %v301_v41 = vld [vmem:[%s4089_s1] sm:$0xff] }
 0x338   :  { %v310_v42 = vrot.slane %v301_v41, %v3759_v32 }
 0x339   :  { %3542 = vxpose.xlu0.b32.start.end [1/1] (short) (narrow) %v3541_v43, 8  ;;  %3549 = vxpose.xlu1.b32.start.end [1/1] (short) (narrow) %v3548_v44, 8  ;;  %v3845_v44 = vsub.s32 0, %v3750_v27 }
 0x33a   :  { %v449_v46 = vpop.trf.xlu1  ;;  %v326_v43 = vrot.slane %v310_v42, %v3759_v32 }
 0x33b   :  { %v3555_v47 = vpack.i.bf16 %v785_v45, %v449_v46  ;;  %v318_v45 = vcombine.high %v310_v42, %v310_v42 }
 0x33c   :  { %v1776_v46 = vrot.slane %v326_v43, %v3845_v44 }
 0x33d   :  { %3556 = vxpose.xlu0.b32.start.end [1/1] (short) (narrow) %v3555_v47, 8  ;;  %v340_v47 = vrot.slane %v318_v45, %v3759_v32 }
 0x33e   :  { %v450_v48 = vpop.trf.xlu1 }
 0x33f   :  { %656 = vxpose.xlu1.b32.start.end [1/1] (short) (narrow) %v450_v48, 8 }
 0x342   :  { %v451_v49 = vpop.trf.xlu1 }
 0x343   :  { %688 = vxpose.xlu0.b32.start.end [1/1] (short) (narrow) %v451_v49, 8 }
 0x35d   :  { %3563 = vrot.lane.b32.xlu1 %v3562_v50, %s3646_s24 }
 0x3a7   :  { %v814_v51 = vpop.trf.xlu0 }
 0x3a8   :  { %v1054_v52 = vpack.c.bf16 %v814_v51, %v814_v51 }
 0x3aa   :  { %v1401_v53 = vsel %vm1396_vm3, %v1054_v52, 0 }
 0x3ab   :  { %3388 = vmatpush3.bf16.xpose.msra.mxu1 %v1401_v53  ;;  %v846_v54 = vpop.trf.xlu1 }
 0x3ac   :  { %v1055_v55 = vpack.c.bf16 %v846_v54, %v846_v54  ;;  %3399 = vmatprep.subr.bf16.mxu1 %v3642_v14  ;;  %v1780_v54 = vrot.slane %v340_v47, %v3845_v44 }
 0x3ae   :  { %v1447_v56 = vsel %vm1396_vm3, %v1055_v55, 0 }
 0x3af   :  { %3394 = vmatpush3.bf16.xpose.msra.mxu0 %v1447_v56  ;;  %v3536_v57 = vpop.trf.xlu1  ;;  %v348_v56 = vcombine.high %v326_v43, %v326_v43 }
 0x3b0   :  { %3405 = vmatprep.subr.bf16.mxu0 %v3642_v14  ;;  %v3540_v0 = vunpack.i.h.bf16 %v3536_v57  ;;  %v3537_v4 = vunpack.i.l.bf16 %v3536_v57  ;;  %v303_v57 = vcombine.high %v301_v41, %v301_v41 }
 0x3b1   :  { %v3522_v58 = vpop.trf.xlu0 }
 0x3b2   :  { %v3526_v59 = vunpack.i.h.bf16 %v3522_v58  ;;  %v3523_v60 = vunpack.i.l.bf16 %v3522_v58  ;;  %v1058_v8 = vpack.c.bf16 %v3540_v0, %v3540_v0  ;;  %v722_v12 = vpack.c.bf16 %v3537_v4, %v3537_v4 }
 0x3b3   :  { %v350_v0 = vcombine.high %v340_v47, %v340_v47 }
 0x3b4   :  { %v720_v61 = vpack.c.bf16 %v3523_v60, %v3523_v60  ;;  %v1056_v62 = vpack.c.bf16 %v3526_v59, %v3526_v59  ;;  %v1585_v16 = vsel %vm1396_vm3, %v1058_v8, 0 }
 0x3b5   :  { %v3529_v63 = vpop.trf.xlu0  ;;  %v1788_v8 = vrot.slane %v350_v0, %v3845_v44 }
 0x3b6   :  { %v3533_v1 = vunpack.i.h.bf16 %v3529_v63  ;;  %v3530_v2 = vunpack.i.l.bf16 %v3529_v63  ;;  %3390 = vmatmul.mubr.msk.bf16.vlgmr.msra.gmra.mrb[0].mxu1 %vm1396_vm3, %v720_v61  ;;  %v1493_v3 = vsel %vm1396_vm3, %v1056_v62, 0 }
 0x3b7   :  { %3401 = vmatprep.mubr.msk.bf16.mxu1 %vm3643_vm1, %v3642_v14  ;;  %3400 = vmatpush3.bf16.xpose.msra.mxu1 %v1493_v3 }
 0x3b8   :  { %v721_v5 = vpack.c.bf16 %v3530_v2, %v3530_v2  ;;  %v1057_v6 = vpack.c.bf16 %v3533_v1, %v3533_v1  ;;  %3411 = vmatprep.subr.bf16.mxu1 %v3642_v14  ;;  %v1784_v1 = vrot.slane %v348_v56, %v3845_v44  ;;  %v317_v2 = vrot.slane %v303_v57, %v3759_v32 }
 0x3b9   :  { %v3543_v7 = vpop.trf.xlu0  ;;  %v3550_v9 = vpop.trf.xlu1 }
 0x3ba   :  { %3396 = vmatmul.mubr.msk.bf16.vlgmr.msra.gmra.mrb[4].mxu0 %vm1396_vm3, %v721_v5  ;;  %v1539_v10 = vsel %vm1396_vm3, %v1057_v6, 0  ;;  %v3547_v11 = vunpack.i.h.bf16 %v3543_v7  ;;  %v3544_v13 = vunpack.i.l.bf16 %v3543_v7  ;;  %v3554_v17 = vunpack.i.h.bf16 %v3550_v9 }
 0x3bb   :  { %3406 = vmatpush3.bf16.xpose.msra.mxu0 %v1539_v10  ;;  %3407 = vmatprep.mubr.msk.bf16.mxu0 %vm3643_vm1, %v3642_v14  ;;  %v3551_v20 = vunpack.i.l.bf16 %v3550_v9  ;;  %v319_v9 = vcombine.high %v317_v2, %v317_v2 }
 0x3bc   :  { %3417 = vmatprep.subr.bf16.mxu0 %v3642_v14  ;;  %v1059_v15 = vpack.c.bf16 %v3547_v11, %v3547_v11  ;;  %v723_v19 = vpack.c.bf16 %v3544_v13, %v3544_v13  ;;  %v1060_v23 = vpack.c.bf16 %v3554_v17, %v3554_v17  ;;  %v333_v13 = vrot.slane %v317_v2, %v3759_v32 }
 0x3bd   :  { %v3557_v18 = vpop.trf.xlu0  ;;  %v724_v25 = vpack.c.bf16 %v3551_v20, %v3551_v20 }
 0x3be   :  { %3402 = vmatmul.mubr.msk.bf16.vlgmr.msra.gmra.mrb[4].mxu1 %vm1396_vm3, %v722_v12  ;;  %v1631_v21 = vsel %vm1396_vm3, %v1059_v15, 0  ;;  %v3561_v22 = vunpack.i.h.bf16 %v3557_v18  ;;  %v3558_v24 = vunpack.i.l.bf16 %v3557_v18  ;;  %v1677_v28 = vsel %vm1396_vm3, %v1060_v23, 0 }
 0x3bf   :  { %3412 = vmatpush3.bf16.xpose.msra.mxu1 %v1585_v16  ;;  %3413 = vmatprep.mubr.msk.bf16.mxu1 %vm3643_vm1, %v3642_v14  ;;  %v672_v31 = vpop.trf.xlu1 }
 0x3c0   :  { %3423 = vmatprep.subr.bf16.mxu1 %v3642_v14  ;;  %v1061_v26 = vpack.c.bf16 %v3561_v22, %v3561_v22  ;;  %v725_v29 = vpack.c.bf16 %v3558_v24, %v3558_v24  ;;  %v726_v33 = vpack.c.bf16 %v672_v31, %v672_v31  ;;  %v1792_v22 = vrot.slane %v333_v13, %v3845_v44 }
 0x3c2   :  { %3408 = vmatmul.mubr.msk.bf16.vlgmr.msra.gmra.mrb[8].mxu0 %vm1396_vm3, %v723_v19  ;;  %v1723_v30 = vsel %vm1396_vm3, %v1061_v26, 0 }
 0x3c3   :  { %3418 = vmatpush3.bf16.xpose.msra.mxu0 %v1631_v21  ;;  %3419 = vmatprep.mubr.msk.bf16.mxu0 %vm3643_vm1, %v3642_v14  ;;  %v704_v34 = vpop.trf.xlu0  ;;  %v347_v21 = vrot.slane %v319_v9, %v3759_v32 }
 0x3c4   :  { %3429 = vmatprep.subr.bf16.mxu0 %v3642_v14  ;;  %v727_v35 = vpack.c.bf16 %v704_v34, %v704_v34  ;;  %v349_v34 = vcombine.high %v333_v13, %v333_v13 }
 0x3c6   :  { %3414 = vmatmul.mubr.msk.bf16.vlgmr.msra.gmra.mrb[8].mxu1 %vm1396_vm3, %v724_v25  ;;  %v1800_v47 = vrot.slane %v349_v34, %v3845_v44 }
 0x3c7   :  { %3424 = vmatpush3.bf16.xpose.msra.mxu1 %v1677_v28  ;;  %3425 = vmatprep.mubr.msk.bf16.mxu1 %vm3643_vm1, %v3642_v14 }
 0x3c8   :  { %3435 = vmatprep.subr.bf16.mxu1 %v3642_v14 }
 0x3ca   :  { %3420 = vmatmul.mubr.msk.bf16.vlgmr.msra.gmra.mrb[12].mxu0 %vm1396_vm3, %v725_v29  ;;  %v1796_v29 = vrot.slane %v347_v21, %v3845_v44 }
 0x3cb   :  { %3430 = vmatpush3.bf16.xpose.msra.mxu0 %v1723_v30  ;;  %3431 = vmatprep.mubr.msk.bf16.mxu0 %vm3643_vm1, %v3642_v14 }
 0x3cc   :  { %3441 = vmatprep.subr.bf16.mxu0 %v3642_v14 }
 0x3ce   :  { %3426 = vmatmul.mubr.msk.bf16.vlgmr.msra.gmra.mrb[12].mxu1 %vm1396_vm3, %v726_v33 }
 0x3cf   :  { %v3564_v36 = vpop.permute.xlu1 %3563  ;;  %3437 = vmatprep.mubr.msk.bf16.mxu1 %vm3643_vm1, %v3642_v14 }
 0x3d0   :  { %3568 = vxpose.xlu0.b32.start.end [1/1] (short) (narrow) %v3564_v36, 32 }
 0x3d2   :  { %3432 = vmatmul.mubr.msk.bf16.vlgmr.msra.gmra.mrb[16].mxu0 %vm1396_vm3, %v727_v35 }
 0x3d3   :  { %3443 = vmatprep.mubr.msk.bf16.mxu0 %vm3643_vm1, %v3642_v14 }
 0x450   :  { %v3831_v37 = vpop.trf.xlu0 }
 0x454   :  { %v3833_v38 = vpop.trf.xlu0 }
 0x455   :  { %v3575_v2 = vunpack.i.l.bf16 %v3833_v38 }
 0x458   :  { %v3835_v39 = vpop.trf.xlu0 }
 0x45c   :  { %v3837_v40 = vpop.trf.xlu0 }
 0x489   :  { %v1437_v48 = vpop.f32.mrb[0].mxu1 }
 0x48a   :  { %v1765_v49 = vmul.f32 0.35355338, %v1437_v48  ;;  %v3391_v50 = vpop.f32.mrb[1].mxu1 }
 0x48b   :  { %v1440_v51 = vpop.f32.mrb[2].mxu1 }
 0x48c   :  { %v3392_v52 = vpop.f32.mrb[3].mxu1  ;;  %v3849_v53 = vadd.f32 %v1776_v46, %v1765_v49  ;;  %v351_v46 = vcombine.high %v347_v21, %v347_v21 }
 0x48d   :  { %v1483_v55 = vpop.f32.mrb[4].mxu0 }
 0x48e   :  { %v1766_v58 = vmul.f32 0.35355338, %v1483_v55  ;;  %v3397_v59 = vpop.f32.mrb[5].mxu0  ;;  %v1822_v60 = vsel %vm1821_vm4, %v3849_v53, -inf }
 0x48f   :  { %1823 = vmax.xlane.f32.xlu0 %v1822_v60  ;;  %v1486_v61 = vpop.f32.mrb[6].mxu0 }
 0x490   :  { %v3398_v62 = vpop.f32.mrb[7].mxu0  ;;  %v3854_v63 = vadd.f32 %v1780_v54, %v1766_v58  ;;  %v1804_v54 = vrot.slane %v351_v46, %v3845_v44  ;;  %v3585_v44 = vunpack.i.l.bf16 %v3837_v40 }
 0x491   :  { %v1529_v3 = vpop.f32.mrb[4].mxu1 }
 0x492   :  { %v1825_v4 = vsel %vm1821_vm4, %v3854_v63, -inf  ;;  %v1767_v5 = vmul.f32 0.35355338, %v1529_v3  ;;  %v3403_v6 = vpop.f32.mrb[5].mxu1  ;;  %v3580_v3 = vunpack.i.l.bf16 %v3835_v39 }
 0x493   :  { %1826 = vmax.xlane.f32.xlu1 %v1825_v4  ;;  %v1532_v7 = vpop.f32.mrb[6].mxu1  ;;  %v3573_v4 = vunpack.i.h.bf16 %v3831_v37  ;;  %v3583_v6 = vunpack.i.h.bf16 %v3835_v39 }
 0x494   :  { %v3404_v10 = vpop.f32.mrb[7].mxu1  ;;  %v3861_v12 = vadd.f32 %v1784_v1, %v1767_v5  ;;  %v3578_v5 = vunpack.i.h.bf16 %v3833_v38  ;;  %v3570_v7 = vunpack.i.l.bf16 %v3831_v37 }
 0x495   :  { %v1575_v11 = vpop.f32.mrb[8].mxu0 }
 0x496   :  { %v1768_v15 = vmul.f32 0.35355338, %v1575_v11  ;;  %v3409_v16 = vpop.f32.mrb[9].mxu0  ;;  %v1828_v17 = vsel %vm1821_vm4, %v3861_v12, -inf }
 0x497   :  { %v1578_v18 = vpop.f32.mrb[10].mxu0  ;;  %1829 = vmax.xlane.f32.xlu0 %v1828_v17 }
 0x498   :  { %v3410_v19 = vpop.f32.mrb[11].mxu0  ;;  %v3866_v20 = vadd.f32 %v1788_v8, %v1768_v15  ;;  %v3588_v8 = vunpack.i.h.bf16 %v3837_v40 }
 0x499   :  { %v1621_v23 = vpop.f32.mrb[8].mxu1 }
 0x49a   :  { %v1831_v24 = vsel %vm1821_vm4, %v3866_v20, -inf  ;;  %v1769_v25 = vmul.f32 0.35355338, %v1621_v23  ;;  %v3415_v26 = vpop.f32.mrb[9].mxu1 }
 0x49b   :  { %v1624_v28 = vpop.f32.mrb[10].mxu1  ;;  %1832 = vmax.xlane.f32.xlu0 %v1831_v24 }
 0x49c   :  { %v3416_v30 = vpop.f32.mrb[11].mxu1  ;;  %v3873_v33 = vadd.f32 %v1792_v22, %v1769_v25 }
 0x49d   :  { %v1667_v31 = vpop.f32.mrb[12].mxu0 }
 0x49e   :  { %v1770_v35 = vmul.f32 0.35355338, %v1667_v31  ;;  %v3421_v36 = vpop.f32.mrb[13].mxu0  ;;  %v1834_v41 = vsel %vm1821_vm4, %v3873_v33, -inf }
 0x49f   :  { %v1670_v42 = vpop.f32.mrb[14].mxu0  ;;  %1835 = vmax.xlane.f32.xlu1 %v1834_v41 }
 0x4a0   :  { %v3422_v43 = vpop.f32.mrb[15].mxu0  ;;  %v3877_v45 = vadd.f32 %v1796_v29, %v1770_v35 }
 0x4a1   :  { %v1713_v48 = vpop.f32.mrb[12].mxu1 }
 0x4a2   :  { %v1837_v49 = vsel %vm1821_vm4, %v3877_v45, -inf  ;;  %v1771_v50 = vmul.f32 0.35355338, %v1713_v48  ;;  %v3427_v51 = vpop.f32.mrb[13].mxu1 }
 0x4a3   :  { %v1716_v52 = vpop.f32.mrb[14].mxu1  ;;  %1838 = vmax.xlane.f32.xlu1 %v1837_v49  ;;  %v3647_v49 = vmov 65535  }
 0x4a4   :  { %v3428_v55 = vpop.f32.mrb[15].mxu1  ;;  %v1819_v57 = vadd.f32 %v1800_v47, %v1771_v50  ;;  %v1908_v50 = vsel %vm1906_vm5, 4294967295, %v3647_v49 }
 0x4a5   :  { %v1759_v56 = vpop.f32.mrb[16].mxu0  ;;  %v1909_v52 = vsel %vm1907_vm6, %v1908_v50, 0 }
 0x4a6   :  { %v1772_v58 = vmul.f32 0.35355338, %v1759_v56  ;;  %v3433_v59 = vpop.f32.mrb[17].mxu0  ;;  %v1840_v60 = vsel %vm1821_vm4, %v1819_v57, -inf }
 0x4a7   :  { %v1762_v61 = vpop.f32.mrb[18].mxu0  ;;  %1841 = vmax.xlane.f32.xlu1 %v1840_v60 }
 0x4a8   :  { %v3434_v62 = vpop.f32.mrb[19].mxu0  ;;  %v1820_v0 = vadd.f32 %v1804_v54, %v1772_v58 }
 0x4aa   :  { %v1843_v1 = vsel %vm1821_vm4, %v1820_v0, -inf }
 0x4ab   :  { %1844 = vmax.xlane.f32.xlu1 %v1843_v1 }
 0x4c8   :  { %1164 = vxpose.xlu0.b32.start.end [1/1] (short) (narrow) %v3575_v2, 8 }
 0x4cc   :  { %1196 = vxpose.xlu0.b32.start.end [1/1] (short) (narrow) %v3580_v3, 8 }
 0x4d0   :  { %1228 = vxpose.xlu0.b32.start.end [1/1] (short) (narrow) %v3585_v44, 8 }
 0x4d4   :  { %1260 = vxpose.xlu0.b32.start.end [1/1] (short) (narrow) %v3573_v4, 8 }
 0x4d8   :  { %1292 = vxpose.xlu0.b32.start.end [1/1] (short) (narrow) %v3578_v5, 8 }
 0x4dc   :  { %1324 = vxpose.xlu0.b32.start.end [1/1] (short) (narrow) %v3583_v6, 8 }
 0x4de   :  { %1132 = vxpose.xlu1.b32.start.end [1/1] (short) (narrow) %v3570_v7, 8 }
 0x4e0   :  { %1356 = vxpose.xlu0.b32.start.end [1/1] (short) (narrow) %v3588_v8, 8 }
 0x51c   :  { %v1824_v9 = vpop.xlane.xlu0 %1823 }
 0x51d   :  { %v1846_v10 = vsub.f32 %v3849_v53, %v1824_v9 }
 0x51f   :  { %v1854_v11 = vmul.f32 1.442695, %v1846_v10 }
 0x520   :  { %v1827_v13 = vpop.xlane.xlu1 %1826 }
 0x521   :  { %3604 = vpow2.f32 %v1854_v11  ;;  %v1847_v15 = vsub.f32 %v3854_v63, %v1827_v13 }
 0x523   :  { %v1856_v16 = vmul.f32 1.442695, %v1847_v15 }
 0x524   :  { %v1830_v38 = vpop.xlane.xlu0 %1829 }
 0x525   :  { %3606 = vpow2.f32 %v1856_v16  ;;  %v1848_v39 = vsub.f32 %v3861_v12, %v1830_v38 }
 0x527   :  { %v1858_v17 = vmul.f32 1.442695, %v1848_v39 }
 0x528   :  { %v1833_v37 = vpop.xlane.xlu0 %1832 }
 0x529   :  { %3608 = vpow2.f32 %v1858_v17  ;;  %v1849_v40 = vsub.f32 %v3866_v20, %v1833_v37 }
 0x52b   :  { %v3897_v18 = vpop.eup %3604  ;;  %v1860_v19 = vmul.f32 1.442695, %v1849_v40 }
 0x52c   :  { %v1870_v53 = vsel %vm1821_vm4, %v3897_v18, 0.0  ;;  %v1836_v21 = vpop.xlane.xlu1 %1835  ;;  %v1894_v16 = vpack.c.bf16 %v3897_v18, %v3897_v18 }
 0x52d   :  { %1871 = vadd.xlane.f32.xlu1 %v1870_v53  ;;  %3610 = vpow2.f32 %v1860_v19  ;;  %v1850_v63 = vsub.f32 %v3873_v33, %v1836_v21 }
 0x52f   :  { %v3607_v22 = vpop.eup %3606  ;;  %v1862_v23 = vmul.f32 1.442695, %v1850_v63 }
 0x530   :  { %v1873_v12 = vsel %vm1821_vm4, %v3607_v22, 0.0  ;;  %v1839_v24 = vpop.xlane.xlu1 %1838  ;;  %v1895_v59 = vpack.c.bf16 %v3607_v22, %v3607_v22 }
 0x531   :  { %1874 = vadd.xlane.f32.xlu0 %v1873_v12  ;;  %3612 = vpow2.f32 %v1862_v23  ;;  %v1851_v20 = vsub.f32 %v3877_v45, %v1839_v24 }
 0x533   :  { %v3904_v25 = vpop.eup %3608  ;;  %v1864_v26 = vmul.f32 1.442695, %v1851_v20 }
 0x534   :  { %v1842_v28 = vpop.xlane.xlu1 %1841  ;;  %v1876_v29 = vsel %vm1821_vm4, %v3904_v25, 0.0  ;;  %v1896_v37 = vpack.c.bf16 %v3904_v25, %v3904_v25 }
 0x535   :  { %3614 = vpow2.f32 %v1864_v26  ;;  %v1852_v30 = vsub.f32 %v1819_v57, %v1842_v28  ;;  %1877 = vadd.xlane.f32.xlu1 %v1876_v29 }
 0x537   :  { %v3611_v31 = vpop.eup %3610  ;;  %v1866_v33 = vmul.f32 1.442695, %v1852_v30 }
 0x538   :  { %v1845_v34 = vpop.xlane.xlu1 %1844  ;;  %v1879_v35 = vsel %vm1821_vm4, %v3611_v31, 0.0  ;;  %v1897_v1 = vpack.c.bf16 %v3611_v31, %v3611_v31 }
 0x539   :  { %3616 = vpow2.f32 %v1866_v33  ;;  %v1853_v36 = vsub.f32 %v1820_v0, %v1845_v34  ;;  %1880 = vadd.xlane.f32.xlu0 %v1879_v35 }
 0x53b   :  { %v3909_v41 = vpop.eup %3612  ;;  %v1868_v42 = vmul.f32 1.442695, %v1853_v36 }
 0x53c   :  { %v1882_v43 = vsel %vm1821_vm4, %v3909_v41, 0.0  ;;  %v1898_v19 = vpack.c.bf16 %v3909_v41, %v3909_v41 }
 0x53d   :  { %3618 = vpow2.f32 %v1868_v42  ;;  %1883 = vadd.xlane.f32.xlu1 %v1882_v43 }
 0x53f   :  { %v3615_v45 = vpop.eup %3614 }
 0x540   :  { %v1885_v46 = vsel %vm1821_vm4, %v3615_v45, 0.0  ;;  %v1899_v6 = vpack.c.bf16 %v3615_v45, %v3615_v45 }
 0x541   :  { %1886 = vadd.xlane.f32.xlu1 %v1885_v46 }
 0x543   :  { %v3914_v47 = vpop.eup %3616 }
 0x544   :  { %v1888_v48 = vsel %vm1821_vm4, %v3914_v47, 0.0  ;;  %v1900_v53 = vpack.c.bf16 %v3914_v47, %v3914_v47 }
 0x545   :  { %1889 = vadd.xlane.f32.xlu1 %v1888_v48 }
 0x547   :  { %v3619_v51 = vpop.eup %3618 }
 0x548   :  { %v1180_v54 = vpop.trf.xlu0  ;;  %v1891_v55 = vsel %vm1821_vm4, %v3619_v51, 0.0  ;;  %v1901_v38 = vpack.c.bf16 %v3619_v51, %v3619_v51 }
 0x549   :  { %v1389_v56 = vpack.c.bf16 %v1180_v54, %v1180_v54  ;;  %1892 = vadd.xlane.f32.xlu0 %v1891_v55 }
 0x54b   :  { %v1957_v57 = vand.u32 %v1909_v52, %v1389_v56 }
 0x54c   :  { %v1212_v58 = vpop.trf.xlu0 }
 0x54d   :  { %3442 = vmatpush3.bf16.msra.mxu0 %v1957_v57  ;;  %v1390_v7 = vpack.c.bf16 %v1212_v58, %v1212_v58 }
 0x54e   :  { %3453 = vmatprep.subr.bf16.mxu0 %v3642_v14 }
 0x54f   :  { %v2003_v13 = vand.u32 %v1909_v52, %v1390_v7 }
 0x550   :  { %3444 = vmatmul.mubr.msk.bf16.vlgmr.msra.gmra.mrb[20].mxu0 %vm1902_vm7, %v1895_v59  ;;  %v1244_v60 = vpop.trf.xlu0 }
 0x551   :  { %v1391_v61 = vpack.c.bf16 %v1244_v60, %v1244_v60  ;;  %3455 = vmatprep.mubr.msk.bf16.mxu0 %vm3643_vm1, %v3642_v14 }
 0x553   :  { %v2049_v62 = vand.u32 %v1909_v52, %v1391_v61 }
 0x554   :  { %v1276_v0 = vpop.trf.xlu0 }
 0x555   :  { %3454 = vmatpush3.bf16.msra.mxu0 %v2049_v62  ;;  %v1392_v39 = vpack.c.bf16 %v1276_v0, %v1276_v0 }
 0x556   :  { %3465 = vmatprep.subr.bf16.mxu0 %v3642_v14 }
 0x557   :  { %v2095_v17 = vand.u32 %v1909_v52, %v1392_v39 }
 0x558   :  { %3456 = vmatmul.mubr.msk.bf16.vlgmr.msra.gmra.mrb[24].mxu0 %vm1902_vm7, %v1897_v1  ;;  %v1308_v2 = vpop.trf.xlu0 }
 0x559   :  { %v1393_v3 = vpack.c.bf16 %v1308_v2, %v1308_v2  ;;  %3467 = vmatprep.mubr.msk.bf16.mxu0 %vm3643_vm1, %v3642_v14 }
 0x55b   :  { %v2141_v44 = vand.u32 %v1909_v52, %v1393_v3 }
 0x55c   :  { %v1340_v4 = vpop.trf.xlu0 }
 0x55d   :  { %3466 = vmatpush3.bf16.msra.mxu0 %v2141_v44  ;;  %v1394_v40 = vpack.c.bf16 %v1340_v4, %v1340_v4 }
 0x55e   :  { %v1148_v5 = vpop.trf.xlu1  ;;  %3477 = vmatprep.subr.bf16.mxu0 %v3642_v14 }
 0x55f   :  { %v1388_v8 = vpack.c.bf16 %v1148_v5, %v1148_v5  ;;  %v2187_v18 = vand.u32 %v1909_v52, %v1394_v40 }
 0x560   :  { %v1372_v9 = vpop.trf.xlu0  ;;  %3468 = vmatmul.mubr.msk.bf16.vlgmr.msra.gmra.mrb[28].mxu0 %vm1902_vm7, %v1899_v6 }
 0x561   :  { %v1911_v10 = vand.u32 %v1909_v52, %v1388_v8  ;;  %v1395_v11 = vpack.c.bf16 %v1372_v9, %v1372_v9  ;;  %3479 = vmatprep.mubr.msk.bf16.mxu0 %vm3643_vm1, %v3642_v14 }
 0x563   :  { %v2233_v15 = vand.u32 %v1909_v52, %v1395_v11  ;;  %3436 = vmatpush3.bf16.msra.mxu1 %v1911_v10 }
 0x564   :  { %3447 = vmatprep.subr.bf16.mxu1 %v3642_v14 }
 0x565   :  { %3478 = vmatpush3.bf16.msra.mxu0 %v2233_v15 }
 0x566   :  { %3438 = vmatmul.mubr.msk.bf16.vlgmr.msra.gmra.mrb[16].mxu1 %vm1902_vm7, %v1894_v16  ;;  %3491 = vmatprep.subr.bf16.mxu0 %v3642_v14 }
 0x567   :  { %3448 = vmatpush3.bf16.msra.mxu1 %v2003_v13  ;;  %3449 = vmatprep.mubr.msk.bf16.mxu1 %vm3643_vm1, %v3642_v14 }
 0x568   :  { %3480 = vmatmul.mubr.msk.bf16.vlgmr.msra.gmra.mrb[32].mxu0 %vm1902_vm7, %v1901_v38  ;;  %3459 = vmatprep.subr.bf16.mxu1 %v3642_v14 }
 0x569   :  { %3495 = vmatprep.mubr.msk.bf16.mxu0 %vm3643_vm1, %v3642_v14 }
 0x56e   :  { %3450 = vmatmul.mubr.msk.bf16.vlgmr.msra.gmra.mrb[20].mxu1 %vm1902_vm7, %v1896_v37 }
 0x56f   :  { %3460 = vmatpush3.bf16.msra.mxu1 %v2095_v17  ;;  %3461 = vmatprep.mubr.msk.bf16.mxu1 %vm3643_vm1, %v3642_v14 }
 0x570   :  { %3471 = vmatprep.subr.bf16.mxu1 %v3642_v14 }
 0x576   :  { %3462 = vmatmul.mubr.msk.bf16.vlgmr.msra.gmra.mrb[24].mxu1 %vm1902_vm7, %v1898_v19 }
 0x577   :  { %3472 = vmatpush3.bf16.msra.mxu1 %v2187_v18  ;;  %3473 = vmatprep.mubr.msk.bf16.mxu1 %vm3643_vm1, %v3642_v14 }
 0x578   :  { %3483 = vmatprep.subr.bf16.mxu1 %v3642_v14 }
 0x57e   :  { %3474 = vmatmul.mubr.msk.bf16.vlgmr.msra.gmra.mrb[28].mxu1 %vm1902_vm7, %v1900_v53 }
 0x57f   :  { %3487 = vmatprep.mubr.msk.bf16.mxu1 %vm3643_vm1, %v3642_v14 }
 0x5ba   :  { %v1872_v63 = vpop.xlane.xlu1 %1871 }
 0x5be   :  { %v1875_v21 = vpop.xlane.xlu0 %1874 }
 0x5bf   :  { %3620 = vrcp.f32 %v1875_v21 }
 0x5c0   :  { %3622 = vrcp.f32 %v1872_v63 }
 0x5c2   :  { %v1878_v25 = vpop.xlane.xlu1 %1877 }
 0x5c6   :  { %v1881_v57 = vpop.xlane.xlu0 %1880 }
 0x5c9   :  { %v3621_v22 = vpop.eup %3620 }
 0x5ca   :  { %v1884_v28 = vpop.xlane.xlu1 %1883  ;;  %v3623_v43 = vpop.eup %3622 }
 0x5ce   :  { %v1887_v34 = vpop.xlane.xlu1 %1886 }
 0x5cf   :  { %3624 = vrcp.f32 %v1887_v34 }
 0x5d0   :  { %3626 = vrcp.f32 %v1878_v25 }
 0x5d1   :  { %3628 = vrcp.f32 %v1884_v28 }
 0x5d2   :  { %3630 = vrcp.f32 %v1881_v57  ;;  %v1890_v62 = vpop.xlane.xlu1 %1889 }
 0x5d3   :  { %3632 = vrcp.f32 %v1890_v62 }
 0x5d6   :  { %v1893_v1 = vpop.xlane.xlu0 %1892 }
 0x5d7   :  { %3634 = vrcp.f32 %v1893_v1 }
 0x5d9   :  { %v3625_v52 = vpop.eup %3624 }
 0x5da   :  { %v3627_v58 = vpop.eup %3626 }
 0x5db   :  { %v3629_v3 = vpop.eup %3628 }
 0x5dc   :  { %v3631_v8 = vpop.eup %3630 }
 0x5dd   :  { %v3633_v10 = vpop.eup %3632 }
 0x5e1   :  { %v3635_v11 = vpop.eup %3634 }
 0x623   :  { %v1993_v23 = vpop.f32.mrb[20].mxu0 }
 0x624   :  { %v2284_v12 = vmul.f32 %v3621_v22, %v1993_v23  ;;  %v3445_v24 = vpop.f32.mrb[21].mxu0  ;;  %v3592_v22 = vld [vmem:[%s4090_s6] sm:$0xff]  }
 0x625   :  { %v1996_v20 = vpop.f32.mrb[22].mxu0  ;;  %3484 = vmatpush3.bf16.msra.mxu1 %v3592_v22 }
 0x626   :  { %2323 = vxpose.xlu0.b32.start.end [1/1] (short) (narrow) %v2284_v12, 8  ;;  %v3446_v26 = vpop.f32.mrb[23].mxu0  ;;  %3485 = vmatprep.subr.bf16.mxu1 %v3642_v14  ;;  %v3593_v12 = vld [vmem:[%s4090_s6 + $0x8] sm:$0xff]  }
 0x629   :  { %3486 = vmatpush3.bf16.msra.mxu1 %v3593_v12 }
 0x62a   :  { %3499 = vmatprep.subr.bf16.mxu1 %v3642_v14 }
 0x62b   :  { %v2085_v29 = vpop.f32.mrb[24].mxu0 }
 0x62c   :  { %v3457_v30 = vpop.f32.mrb[25].mxu0  ;;  %v2286_v9 = vmul.f32 %v3631_v8, %v2085_v29 }
 0x62d   :  { %v2088_v31 = vpop.f32.mrb[26].mxu0 }
 0x62e   :  { %v3458_v33 = vpop.f32.mrb[27].mxu0 }
 0x633   :  { %v2177_v35 = vpop.f32.mrb[28].mxu0 }
 0x634   :  { %v3469_v36 = vpop.f32.mrb[29].mxu0  ;;  %v2288_v55 = vmul.f32 %v3625_v52, %v2177_v35 }
 0x635   :  { %v2180_v41 = vpop.f32.mrb[30].mxu0 }
 0x636   :  { %v3470_v42 = vpop.f32.mrb[31].mxu0 }
 0x639   :  { %v1947_v45 = vpop.f32.mrb[16].mxu1 }
 0x63a   :  { %v2283_v46 = vmul.f32 %v3623_v43, %v1947_v45  ;;  %v3439_v47 = vpop.f32.mrb[17].mxu1 }
 0x63b   :  { %v1950_v48 = vpop.f32.mrb[18].mxu1  ;;  %v2269_v49 = vpop.f32.mrb[32].mxu0 }
 0x63c   :  { %v3440_v50 = vpop.f32.mrb[19].mxu1  ;;  %2291 = vxpose.xlu1.b32.start.end [1/1] (short) (narrow) %v2283_v46, 8  ;;  %v3481_v51 = vpop.f32.mrb[33].mxu0  ;;  %v2290_v15 = vmul.f32 %v3635_v11, %v2269_v49 }
 0x63d   :  { %v2272_v54 = vpop.f32.mrb[34].mxu0 }
 0x63e   :  { %v3482_v56 = vpop.f32.mrb[35].mxu0  ;;  %v3317_v54 = vld [vmem:[%s4091_s7] ss:$0 sm:$0xff] }
 0x640   :  { %2451 = vxpose.xlu1.b32.start.end [1/1] (short) (narrow) %v2288_v55, 8 }
 0x641   :  { %v2039_v59 = vpop.f32.mrb[20].mxu1 }
 0x642   :  { %v2285_v60 = vmul.f32 %v3627_v58, %v2039_v59  ;;  %v3451_v61 = vpop.f32.mrb[21].mxu1 }
 0x643   :  { %v2042_v0 = vpop.f32.mrb[22].mxu1 }
 0x644   :  { %v3452_v2 = vpop.f32.mrb[23].mxu1  ;;  %2355 = vxpose.xlu0.b32.start.end [1/1] (short) (narrow) %v2285_v60, 8 }
 0x649   :  { %v2131_v44 = vpop.f32.mrb[24].mxu1 }
 0x64a   :  { %v2287_v4 = vmul.f32 %v3629_v3, %v2131_v44  ;;  %v3463_v5 = vpop.f32.mrb[25].mxu1 }
 0x64b   :  { %v2134_v6 = vpop.f32.mrb[26].mxu1 }
 0x64c   :  { %v3464_v7 = vpop.f32.mrb[27].mxu1  ;;  %2419 = vxpose.xlu0.b32.start.end [1/1] (short) (narrow) %v2287_v4, 8 }
 0x650   :  { %2387 = vxpose.xlu0.b32.start.end [1/1] (short) (narrow) %v2286_v9, 8 }
 0x651   :  { %v2223_v13 = vpop.f32.mrb[28].mxu1 }
 0x652   :  { %v2289_v16 = vmul.f32 %v3633_v10, %v2223_v13  ;;  %v3475_v38 = vpop.f32.mrb[29].mxu1 }
 0x653   :  { %v2226_v39 = vpop.f32.mrb[30].mxu1 }
 0x654   :  { %v3476_v17 = vpop.f32.mrb[31].mxu1  ;;  %2483 = vxpose.xlu1.b32.start.end [1/1] (short) (narrow) %v2289_v16, 8  ;;  %2515 = vxpose.xlu0.b32.start.end [1/1] (short) (narrow) %v2290_v15, 8  ;;  %v3640_v39 = vld [vmem:[%s4084_s0] sm:$0x7] }
 0x6a6   :  { %v2339_v40 = vpop.trf.xlu0 }
 0x6bc   :  { %v2307_v37 = vpop.trf.xlu1 }
 0x6bd   :  { %2547 = vxpose.xlu1.b32.start [1/4] (short) (narrow) %v2307_v37, 8 }
 0x6c0   :  { %v2467_v53 = vpop.trf.xlu1 }
 0x6c1   :  { %2548 = vxpose.xlu1.b32.cont [2/4] (short) (narrow) %v2339_v40, 8 }
 0x6c4   :  { %v2371_v18 = vpop.trf.xlu0 }
 0x6c5   :  { %2549 = vxpose.xlu1.b32.cont [3/4] (short) (narrow) %v2371_v18, 8  ;;  %v3641_v18 = vld [vmem:[%s4084_s0 + $0x4] sm:$0x7] }
 0x6cc   :  { %v2435_v19 = vpop.trf.xlu0 }
 0x6cd   :  { %2579 = vxpose.xlu0.b32.start [1/4] (short) (narrow) %v2435_v19, 8 }
 0x6d0   :  { %v2403_v21 = vpop.trf.xlu0 }
 0x6d1   :  { %2580 = vxpose.xlu0.b32.cont [2/4] (short) (narrow) %v2467_v53, 8  ;;  %2550 = vxpose.xlu1.b32.end [4/4] (short) (narrow) %v2403_v21, 8 }
 0x6d4   :  { %v2499_v63 = vpop.trf.xlu1  ;;  %v2531_v23 = vpop.trf.xlu0 }
 0x6d5   :  { %2581 = vxpose.xlu0.b32.cont [3/4] (short) (narrow) %v2499_v63, 8 }
 0x6d9   :  { %2582 = vxpose.xlu0.b32.end [4/4] (short) (narrow) %v2531_v23, 8 }
 0x745   :  { %v2563_v24 = vpop.trf.xlu1 }
 0x746   :  { %v2619_v20 = vrot.slane %v2563_v24, %v3759_v32 }
 0x748   :  { %v2620_v25 = vcombine.high %v2619_v20, %v2619_v20  ;;  %v2627_v26 = vrot.slane %v2619_v20, %v3759_v32 }
 0x74a   :  { %v2634_v28 = vrot.slane %v2620_v25, %v3759_v32  ;;  %v2635_v30 = vcombine.high %v2627_v26, %v2627_v26 }
 0x74c   :  { %v2664_v33 = vcombine.low %v2627_v26, %v2634_v28 }
 0x74d   :  { %v2595_v29 = vpop.trf.xlu0 }
 0x74e   :  { %v2642_v31 = vrot.slane %v2595_v29, %v3759_v32  ;;  %v2673_v43 = vrot.slane %v2664_v33, %v3759_v32  ;;  %v3594_v29 = vld [vmem:[%s4092_s10] sm:$0xff]   ;;  %v3597_v33 = vld [vmem:[%s4093_s12 + $0x8] sm:$0xff]  }
 0x74f   :  { %3492 = vmatpush3.bf16.msra.mxu0 %v3594_v29 }
 0x750   :  { %v2643_v34 = vcombine.high %v2642_v31, %v2642_v31  ;;  %v2650_v35 = vrot.slane %v2642_v31, %v3759_v32  ;;  %3493 = vmatprep.subr.bf16.mxu0 %v3642_v14  ;;  %v3596_v31 = vld [vmem:[%s4093_s12] sm:$0xff]  }
 0x752   :  { %v2657_v36 = vrot.slane %v2643_v34, %v3759_v32  ;;  %v2658_v41 = vcombine.high %v2650_v35, %v2650_v35  ;;  %v2665_v42 = vcombine.low %v2635_v30, %v2650_v35  ;;  %v3595_v30 = vld [vmem:[%s4092_s10 + $0x8] sm:$0xff]  }
 0x753   :  { %3494 = vmatpush3.bf16.msra.mxu0 %v3595_v30 }
 0x754   :  { %v2666_v45 = vcombine.low %v2657_v36, %v2658_v41  ;;  %v2680_v46 = vrot.slane %v2665_v42, %v3759_v32 }
 0x756   :  { %v2687_v47 = vrot.slane %v2666_v45, %v3759_v32  ;;  %v2688_v48 = vcombine.low %v2673_v43, %v2680_v46  ;;  %v3321_v46 = vld [vmem:[%s4094_s8] ss:$0 sm:$0xff] }
 0x758   :  { %v2695_v49 = vrot.slane %v2688_v48, %v3759_v32  ;;  %v2702_v50 = vrot.slane %v2687_v47, %v3759_v32  ;;  %v3322_v48 = vld [vmem:[%s4095_s9] ss:$0 sm:$0xff] }
 0x75a   :  { %v2703_v51 = vcombine.low %v2695_v49, %v2702_v50 }
 0x75c   :  { %v2705_v52 = vpack.c.bf16 %v2703_v51, %v2703_v51 }
 0x75e   :  { %3488 = vmatmul.mubr.msk.bf16.vlgmr.msra.gmra.mrb[32].mxu1 %vm209_vm2, %v2705_v52 }
 0x75f   :  { %3507 = vmatprep.mubr.msk.bf16.mxu1 %vm3643_vm1, %v3642_v14  ;;  %3500 = vmatpush3.bf16.msra.mxu1 %v3596_v31 }
 0x760   :  { %3501 = vmatprep.subr.bf16.mxu1 %v3642_v14 }
 0x763   :  { %3502 = vmatpush3.bf16.msra.mxu1 %v3597_v33 }
 0x764   :  { %3503 = vmatprep.subr.bf16.mxu1 %v3642_v14 }
 0x831   :  { %v2761_v55 = vpop.f32.mrb[32].mxu1 }
 0x832   :  { %v2762_v56 = vadd.f32 %v3317_v54, %v2761_v55  ;;  %v3489_v57 = vpop.f32.mrb[33].mxu1 }
 0x833   :  { %v2764_v58 = vpop.f32.mrb[34].mxu1 }
 0x834   :  { %v2768_v59 = vcombine.high %v2762_v56, %v2762_v56  ;;  %v2775_v60 = vrot.slane %v2762_v56, %v3759_v32  ;;  %v3490_v61 = vpop.f32.mrb[35].mxu1 }
 0x836   :  { %v2782_v62 = vrot.slane %v2768_v59, %v3759_v32  ;;  %v2783_v0 = vcombine.high %v2775_v60, %v2775_v60  ;;  %v2791_v1 = vrot.slane %v2775_v60, %v3759_v32 }
 0x838   :  { %v2784_v2 = vcombine.high %v2782_v62, %v2782_v62  ;;  %v2805_v3 = vrot.slane %v2783_v0, %v3759_v32  ;;  %v2813_v44 = vcombine.high %v2791_v1, %v2791_v1  ;;  %v2798_v4 = vrot.slane %v2782_v62, %v3759_v32 }
 0x83a   :  { %v2812_v5 = vrot.slane %v2784_v2, %v3759_v32  ;;  %v2814_v6 = vcombine.high %v2805_v3, %v2805_v3  ;;  %v2815_v7 = vcombine.low %v2791_v1, %v2805_v3  ;;  %v2829_v9 = vrot.slane %v2813_v44, %v3759_v32 }
 0x83c   :  { %v2822_v8 = vrot.slane %v2815_v7, %v3759_v32  ;;  %v2838_v10 = vcombine.low %v2814_v6, %v2798_v4  ;;  %v2852_v13 = vrot.slane %v2812_v5, %v3759_v32 }
 0x83e   :  { %v2845_v11 = vrot.slane %v2838_v10, %v3759_v32  ;;  %v2830_v15 = vcombine.low %v2822_v8, %v2829_v9 }
 0x840   :  { %v2837_v16 = vrot.slane %v2830_v15, %v3759_v32  ;;  %v2853_v38 = vcombine.low %v2845_v11, %v2852_v13  ;;  %v3598_v15 = vld [vmem:[%s4093_s12 + $0x10] sm:$0xff]  }
 0x841   :  { %3504 = vmatpush3.bf16.msra.mxu1 %v3598_v15 }
 0x842   :  { %v3998_v17 = vadd.f32 %v3640_v39, %v2837_v16  ;;  %v2860_v37 = vrot.slane %v2853_v38, %v3759_v32  ;;  %3505 = vmatprep.subr.bf16.mxu1 %v3642_v14  ;;  %v3599_v16 = vld [vmem:[%s4093_s12 + $0x18] sm:$0xff]   ;;  %v3323_v38 = vld [vmem:[%s4096_s11] ss:$0 sm:$0xff]  ;;  %s3650_s11 = smov 32  }
 0x844   :  { %v2867_v40 = vsel %vm52_vm0, %v3998_v17, 0.0  ;;  %v4006_v19 = vadd.f32 %v3641_v18, %v2860_v37 }
 0x845   :  { %2868 = vadd.xlane.f32.xlu1 %v2867_v40  ;;  %3506 = vmatpush3.bf16.msra.mxu1 %v3599_v16 }
 0x846   :  { %v2870_v53 = vsel %vm52_vm0, %v4006_v19, 0.0 }
 0x847   :  { %2871 = vadd.xlane.f32.xlu0 %v2870_v53 }
 0x8d2   :  { %v2869_v21 = vpop.xlane.xlu1 %2868 }
 0x8d3   :  { %v2873_v63 = vmul.f32 0.03125, %v2869_v21 }
 0x8d4   :  { %v2872_v22 = vpop.xlane.xlu0 %2871 }
 0x8d5   :  { %v2875_v23 = vsub.f32 %v3998_v17, %v2873_v63  ;;  %v2874_v12 = vmul.f32 0.03125, %v2872_v22  ;;  %v3327_v22 = vld [vmem:[%s4097_s13] ss:$0 sm:$0xff] }
 0x8d7   :  { %v2876_v24 = vsub.f32 %v4006_v19, %v2874_v12  ;;  %v2877_v20 = vmul.f32 %v2875_v23, %v2875_v23 }
 0x8d9   :  { %v2879_v25 = vsel %vm52_vm0, %v2877_v20, 0.0  ;;  %v2878_v26 = vmul.f32 %v2876_v24, %v2876_v24 }
 0x8da   :  { %2880 = vadd.xlane.f32.xlu1 %v2879_v25 }
 0x8db   :  { %v2882_v28 = vsel %vm52_vm0, %v2878_v26, 0.0 }
 0x8de   :  { %2883 = vadd.xlane.f32.xlu1 %v2882_v28 }
 0x967   :  { %v2881_v34 = vpop.xlane.xlu1 %2880 }
 0x968   :  { %v2885_v35 = vmul.f32 0.03125, %v2881_v34 }
 0x96a   :  { %v2887_v36 = vadd.f32 1e-05, %v2885_v35 }
 0x96b   :  { %v2884_v41 = vpop.xlane.xlu1 %2883 }
 0x96c   :  { %3636 = vrsqrt.f32 %v2887_v36  ;;  %v2886_v42 = vmul.f32 0.03125, %v2884_v41  ;;  %v3648_v36 = vmov 1983009808  }
 0x96d   :  { %v3248_v41 = vunpack.c.l.s4 %v3648_v36 }
 0x96e   :  { %v2888_v43 = vadd.f32 1e-05, %v2886_v42 }
 0x970   :  { %3638 = vrsqrt.f32 %v2888_v43 }
 0x976   :  { %v3637_v45 = vpop.eup %3636 }
 0x977   :  { %v2891_v47 = vmul.f32 %v3637_v45, %v2875_v23 }
 0x979   :  { %v2899_v49 = vmul.f32 %v3321_v46, %v2891_v47 }
 0x97a   :  { %v3639_v50 = vpop.eup %3638 }
 0x97b   :  { %v2907_v51 = vadd.f32 %v3322_v48, %v2899_v49  ;;  %v2892_v52 = vmul.f32 %v3639_v50, %v2876_v24  ;;  %v3249_v50 = vunpack.c.0.s8 %v3248_v41 }
 0x97d   :  { %v2917_v54 = vrot.slane %v2907_v51, %v3759_v32  ;;  %v2900_v55 = vmul.f32 %v3321_v46, %v2892_v52 }
 0x97f   :  { %v2918_v56 = vcombine.high %v2917_v54, %v2917_v54  ;;  %v2925_v57 = vrot.slane %v2917_v54, %v3759_v32  ;;  %v2908_v58 = vadd.f32 %v3322_v48, %v2900_v55  ;;  %v3649_v55 = vmov 1934713408  }
 0x981   :  { %v2940_v59 = vrot.slane %v2908_v58, %v3759_v32  ;;  %v2932_v60 = vrot.slane %v2918_v56, %v3759_v32  ;;  %v2933_v0 = vcombine.high %v2925_v57, %v2925_v57  ;;  %v3265_v56 = vunpack.c.l.s4 %v3649_v55 }
 0x983   :  { %v2941_v61 = vcombine.high %v2940_v59, %v2940_v59  ;;  %v2948_v62 = vrot.slane %v2940_v59, %v3759_v32  ;;  %v2962_v1 = vcombine.low %v2925_v57, %v2932_v60 }
 0x985   :  { %v2955_v2 = vrot.slane %v2941_v61, %v3759_v32  ;;  %v2956_v3 = vcombine.high %v2948_v62, %v2948_v62  ;;  %v2963_v44 = vcombine.low %v2933_v0, %v2948_v62  ;;  %v2971_v5 = vrot.slane %v2962_v1, %v3759_v32 }
 0x986   :  { %v3252_v61 = vsub.s32 %v3249_v50, %v3750_v27  ;;  %v3266_v62 = vunpack.c.0.s8 %v3265_v56 }
 0x987   :  { %v2964_v4 = vcombine.low %v2955_v2, %v2956_v3  ;;  %v2978_v6 = vrot.slane %v2963_v44, %v3759_v32 }
 0x988   :  { %v3269_v3 = vsub.s32 %v3266_v62, %v3750_v27 }
 0x989   :  { %v2985_v7 = vrot.slane %v2964_v4, %v3759_v32  ;;  %v2986_v8 = vcombine.low %v2971_v5, %v2978_v6 }
 0x98b   :  { %v2993_v9 = vrot.slane %v2986_v8, %v3759_v32  ;;  %v3000_v10 = vrot.slane %v2985_v7, %v3759_v32 }
 0x98d   :  { %v3001_v11 = vcombine.low %v2993_v9, %v3000_v10 }
 0x98f   :  { %v3003_v13 = vpack.c.bf16 %v3001_v11, %v3001_v11 }
 0x991   :  { %3496 = vmatmul.mubr.msk.bf16.vlgmr.msra.gmra.mrb[36].mxu0 %vm209_vm2, %v3003_v13 }
 0xa64   :  { %v3059_v39 = vpop.f32.mrb[36].mxu0 }
 0xa65   :  { %v3060_v37 = vadd.f32 %v3323_v38, %v3059_v39  ;;  %v3497_v40 = vpop.f32.mrb[37].mxu0 }
 0xa66   :  { %v3062_v18 = vpop.f32.mrb[38].mxu0 }
 0xa67   :  { %v3065_v53 = vmax.f32 %v3060_v37, 0.0  ;;  %v3498_v21 = vpop.f32.mrb[39].mxu0 }
 0xa69   :  { %v3075_v63 = vpack.c.bf16 %v3065_v53, %v3065_v53 }
 0xa6b   :  { %3508 = vmatmul.mubr.msk.bf16.vlgmr.msra.gmra.mrb[36].mxu1 %vm3106_vm8, %v3075_v63 }
 0xb3e   :  { %v3144_v23 = vpop.f32.mrb[36].mxu1 }
 0xb3f   :  { %v3145_v12 = vadd.f32 %v3327_v22, %v3144_v23  ;;  %v3509_v24 = vpop.f32.mrb[37].mxu1 }
 0xb40   :  { %v3147_v20 = vpop.f32.mrb[38].mxu1 }
 0xb41   :  { %v3151_v25 = vcombine.high %v3145_v12, %v3145_v12  ;;  %v3158_v26 = vrot.slane %v3145_v12, %v3759_v32  ;;  %v3510_v28 = vpop.f32.mrb[39].mxu1 }
 0xb43   :  { %v3165_v29 = vrot.slane %v3151_v25, %v3759_v32  ;;  %v3166_v30 = vcombine.high %v3158_v26, %v3158_v26  ;;  %v3174_v31 = vrot.slane %v3158_v26, %v3759_v32 }
 0xb45   :  { %v3167_v33 = vcombine.high %v3165_v29, %v3165_v29  ;;  %v3188_v34 = vrot.slane %v3166_v30, %v3759_v32  ;;  %v3196_v35 = vcombine.high %v3174_v31, %v3174_v31  ;;  %v3181_v42 = vrot.slane %v3165_v29, %v3759_v32 }
 0xb47   :  { %v3195_v43 = vrot.slane %v3167_v33, %v3759_v32  ;;  %v3197_v45 = vcombine.high %v3188_v34, %v3188_v34  ;;  %v3198_v46 = vcombine.low %v3174_v31, %v3188_v34  ;;  %v3212_v48 = vrot.slane %v3196_v35, %v3759_v32 }
 0xb49   :  { %v3205_v47 = vrot.slane %v3198_v46, %v3759_v32  ;;  %v3221_v49 = vcombine.low %v3197_v45, %v3181_v42  ;;  %v3235_v54 = vrot.slane %v3195_v43, %v3759_v32 }
 0xb4b   :  { %v3213_v51 = vcombine.low %v3205_v47, %v3212_v48  ;;  %v3228_v52 = vrot.slane %v3221_v49, %v3759_v32 }
 0xb4d   :  { %v3236_v57 = vcombine.low %v3228_v52, %v3235_v54  ;;  %v3220_v58 = vrot.slane %v3213_v51, %v3759_v32 }
 0xb4f   :  { %v3243_v59 = vrot.slane %v3236_v57, %v3759_v32  ;;  %v3246_v60 = vadd.f32 %v3220_v58, %v3998_v17 }
 0xb51   :  { %v3254_v0 = vadd.f32 %v3243_v59, %v4006_v19  ;;  %v3253_v1 = vrot.slane %v3246_v60, %v3252_v61 }
 0xb53   :  { %v3261_v2 = vrot.slane %v3254_v0, %v3252_v61 }
 0xb55   :  { %v3263_v44 = vcombine.high %v3253_v1, %v3261_v2  ;;  %v3262_v4 = vcombine.low %v3253_v1, %v3261_v2 }
 0xb57   :  { %v3278_v5 = vrot.slane %v3263_v44, %v3269_v3  ;;  %v3270_v6 = vrot.slane %v3262_v4, %v3269_v3 }
 0xb59   :  { %3284 = vrot.lane.b32.xlu0 %v3278_v5, %s3646_s24  ;;  %v3271_v7 = vcombine.high %v3270_v6, %v3642_v14 }
 0xb5b   :  { %3280 = vrot.lane.b32.xlu1 %v3271_v7, %s3650_s11 }
 0xbcb   :  { %v3285_v17 = vpop.permute.xlu0 %3284 }
 0xbcd   :  { %v3281_v32 = vpop.permute.xlu1 %3280 }
 0xbce   :  { %v3287_v8 = vsel %vm209_vm2, %v3270_v6, %v3281_v32 }
 0xbcf   :  { %v3288_v19 = vsel %vm3106_vm8, %v3287_v8, %v3285_v17 }
 0xbd0   :  { %3290 = vst.msk [vmem:[%s4098_s14] sm:$0x3] %vm3289_vm9, %v3288_v19 }

// kernel: _lambda_.7
= control target key start
LH: loop header
LB: loop body
LE: loop exit
PB: predicated region body
PF: predicated region fallthrough
CT: control target
= control target key end

     0   :  { %vm56_vm0 = vcmask 261120   ;;  %v8871_v42 = vmov 0.0   ;;  %vm8872_vm1 = vmmov 0   ;;  %s8873_s16 = smov 96   ;;  %vm3399_vm2 = vcmask 64512   ;;  %s9912_s0 = inlined_call_operand.vmem [shape: f32[6,8,32], index: 0, kind: input, shape index: {}]   ;;  %s9913_s4 = inlined_call_operand.vmem [shape: bf16[32,96], index: 4, kind: input, shape index: {}]   ;;  %s9914_s2 = inlined_call_operand.vmem [shape: f32[1,32], index: 2, kind: input, shape index: {}]   ;;  %s9915_s3 = inlined_call_operand.vmem [shape: f32[1,32], index: 3, kind: input, shape index: {}]   ;;  %s9916_s5 = inlined_call_operand.vmem [shape: f32[1,96], index: 5, kind: input, shape index: {}]   ;;  %s9917_s1 = inlined_call_operand.vmem [shape: f32[24,8], index: 1, kind: input, shape index: {}]   ;;  %s9918_s6 = inlined_call_operand.vmem [shape: bf16[32,32], index: 6, kind: input, shape index: {}]   ;;  %s9919_s7 = inlined_call_operand.vmem [shape: f32[1,32], index: 7, kind: input, shape index: {}]   ;;  %s9920_s10 = inlined_call_operand.vmem [shape: bf16[32,64], index: 10, kind: input, shape index: {}]   ;;  %s9921_s8 = inlined_call_operand.vmem [shape: f32[1,32], index: 8, kind: input, shape index: {}]   ;;  %s9922_s9 = inlined_call_operand.vmem [shape: f32[1,32], index: 9, kind: input, shape index: {}]   ;;  %s9923_s12 = inlined_call_operand.vmem [shape: bf16[64,32], index: 12, kind: input, shape index: {}]   ;;  %s9924_s11 = inlined_call_operand.vmem [shape: f32[1,64], index: 11, kind: input, shape index: {}]   ;;  %s9925_s13 = inlined_call_operand.vmem [shape: f32[1,32], index: 13, kind: input, shape index: {}]   ;;  %s9926_s14 = inlined_call_operand.vmem [shape: f32[6,256], index: 14, kind: output, shape index: {}]  }
   0x1   :  { %v48_v0 = vld [vmem:[%s9912_s0] sm:$0xff]  ;;  %v50_v1 = vld [vmem:[%s9912_s0 + $0x10] sm:$0xff]  ;;  %v49_v2 = vld [vmem:[%s9912_s0 + $0x8] sm:$0xff]  ;;  %7807 = vmatprep.subr.bf16.mxu0 %v8871_v42  ;;  %7811 = vmatprep.mubr.msk.bf16.mxu0 %vm8872_vm1, %v8871_v42  ;;  %vm4915_vm3 = vcmask 1043456   ;;  %vm7367_vm4 = vcmask 523264   ;;  %vm7600_vm5 = vcmask 785408  }
   0x2   :  { %v57_v3 = vsel %vm56_vm0, %v48_v0, 0.0  ;;  %v63_v4 = vsel %vm56_vm0, %v50_v1, 0.0  ;;  %v51_v5 = vld [vmem:[%s9912_s0 + $0x18] sm:$0xff]  ;;  %v60_v6 = vsel %vm56_vm0, %v49_v2, 0.0  ;;  %v52_v8 = vld [vmem:[%s9912_s0 + $0x20] sm:$0xff]  ;;  %v53_v9 = vld [vmem:[%s9912_s0 + $0x28] sm:$0xff]  ;;  %7829 = vmatprep.subr.bf16.mxu1 %v8871_v42  ;;  %7831 = vmatprep.mubr.msk.bf16.mxu1 %vm8872_vm1, %v8871_v42 }
   0x3   :  { %58 = vadd.xlane.f32.xlu0 %v57_v3  ;;  %64 = vadd.xlane.f32.xlu1 %v63_v4  ;;  %v66_v7 = vsel %vm56_vm0, %v51_v5, 0.0  ;;  %v69_v10 = vsel %vm56_vm0, %v52_v8, 0.0  ;;  %v72_v11 = vsel %vm56_vm0, %v53_v9, 0.0  ;;  %v8732_v43 = vld [vmem:[%s9913_s4] sm:$0xff]   ;;  %v8733_v44 = vld [vmem:[%s9913_s4 + $0x8] sm:$0xff]  }
   0x4   :  { %7808 = vmatpush3.bf16.msra.mxu0 %v8732_v43 }
   0x5   :  { %7809 = vmatprep.subr.bf16.mxu0 %v8871_v42 }
   0x7   :  { %61 = vadd.xlane.f32.xlu0 %v60_v6  ;;  %67 = vadd.xlane.f32.xlu1 %v66_v7  ;;  %v7612_v6 = vld [vmem:[%s9915_s3] ss:$0 sm:$0xff] }
   0x8   :  { %7810 = vmatpush3.bf16.msra.mxu0 %v8733_v44 }
   0x9   :  { %7823 = vmatprep.subr.bf16.mxu0 %v8871_v42 }
   0xb   :  { %70 = vadd.xlane.f32.xlu0 %v69_v10  ;;  %73 = vadd.xlane.f32.xlu1 %v72_v11 }
  0x90   :  { %v59_v12 = vpop.xlane.xlu0 %58  ;;  %v65_v13 = vpop.xlane.xlu1 %64 }
  0x91   :  { %v76_v14 = vmul.f32 0.03125, %v59_v12  ;;  %v78_v15 = vmul.f32 0.03125, %v65_v13 }
  0x93   :  { %v8978_v16 = vsub.f32 %v48_v0, %v76_v14  ;;  %v8980_v17 = vsub.f32 %v50_v1, %v78_v15  ;;  %v7611_v1 = vld [vmem:[%s9914_s2] ss:$0 sm:$0xff] }
  0x94   :  { %v62_v18 = vpop.xlane.xlu0 %61  ;;  %v68_v19 = vpop.xlane.xlu1 %67 }
  0x95   :  { %v77_v20 = vmul.f32 0.03125, %v62_v18  ;;  %v79_v21 = vmul.f32 0.03125, %v68_v19  ;;  %v88_v22 = vmul.f32 %v8978_v16, %v8978_v16  ;;  %v90_v23 = vmul.f32 %v8980_v17, %v8980_v17 }
  0x97   :  { %v8986_v24 = vsub.f32 %v49_v2, %v77_v20  ;;  %v8988_v25 = vsub.f32 %v51_v5, %v79_v21  ;;  %v94_v26 = vsel %vm56_vm0, %v88_v22, 0.0  ;;  %v100_v29 = vsel %vm56_vm0, %v90_v23, 0.0 }
  0x98   :  { %95 = vadd.xlane.f32.xlu0 %v94_v26  ;;  %v71_v27 = vpop.xlane.xlu0 %70  ;;  %v74_v28 = vpop.xlane.xlu1 %73 }
  0x99   :  { %v80_v30 = vmul.f32 0.03125, %v71_v27  ;;  %v81_v31 = vmul.f32 0.03125, %v74_v28  ;;  %v89_v32 = vmul.f32 %v8986_v24, %v8986_v24  ;;  %v91_v33 = vmul.f32 %v8988_v25, %v8988_v25  ;;  %v7613_v28 = vld [vmem:[%s9916_s5] ss:$0 sm:$0xff]  ;;  %s8874_s5 = smov 64  }
  0x9b   :  { %v8996_v34 = vsub.f32 %v52_v8, %v80_v30  ;;  %v8998_v35 = vsub.f32 %v53_v9, %v81_v31  ;;  %v97_v36 = vsel %vm56_vm0, %v89_v32, 0.0  ;;  %v103_v37 = vsel %vm56_vm0, %v91_v33, 0.0 }
  0x9c   :  { %101 = vadd.xlane.f32.xlu0 %v100_v29  ;;  %98 = vadd.xlane.f32.xlu1 %v97_v36 }
  0x9d   :  { %v92_v38 = vmul.f32 %v8996_v34, %v8996_v34  ;;  %v93_v39 = vmul.f32 %v8998_v35, %v8998_v35 }
  0x9f   :  { %v106_v40 = vsel %vm56_vm0, %v92_v38, 0.0  ;;  %v109_v41 = vsel %vm56_vm0, %v93_v39, 0.0 }
  0xa0   :  { %104 = vadd.xlane.f32.xlu1 %v103_v37  ;;  %107 = vadd.xlane.f32.xlu0 %v106_v40 }
  0xa4   :  { %110 = vadd.xlane.f32.xlu1 %v109_v41 }
 0x125   :  { %v96_v45 = vpop.xlane.xlu0 %95 }
 0x126   :  { %v112_v46 = vmul.f32 0.03125, %v96_v45 }
 0x128   :  { %v118_v47 = vadd.f32 1e-05, %v112_v46 }
 0x129   :  { %v99_v48 = vpop.xlane.xlu1 %98  ;;  %v102_v49 = vpop.xlane.xlu0 %101 }
 0x12a   :  { %8745 = vrsqrt.f32 %v118_v47  ;;  %v113_v50 = vmul.f32 0.03125, %v99_v48  ;;  %v114_v51 = vmul.f32 0.03125, %v102_v49 }
 0x12c   :  { %v119_v52 = vadd.f32 1e-05, %v113_v50  ;;  %v120_v53 = vadd.f32 1e-05, %v114_v51 }
 0x12d   :  { %v105_v54 = vpop.xlane.xlu1 %104  ;;  %v108_v55 = vpop.xlane.xlu0 %107 }
 0x12e   :  { %8747 = vrsqrt.f32 %v119_v52  ;;  %v115_v56 = vmul.f32 0.03125, %v105_v54  ;;  %v116_v58 = vmul.f32 0.03125, %v108_v55 }
 0x12f   :  { %8749 = vrsqrt.f32 %v120_v53 }
 0x130   :  { %v121_v57 = vadd.f32 1e-05, %v115_v56  ;;  %v122_v62 = vadd.f32 1e-05, %v116_v58 }
 0x131   :  { %v111_v59 = vpop.xlane.xlu1 %110 }
 0x132   :  { %8751 = vrsqrt.f32 %v121_v57  ;;  %v117_v60 = vmul.f32 0.03125, %v111_v59 }
 0x134   :  { %v8746_v61 = vpop.eup %8745  ;;  %v123_v63 = vadd.f32 1e-05, %v117_v60 }
 0x135   :  { %v130_v0 = vmul.f32 %v8746_v61, %v8978_v16 }
 0x136   :  { %8753 = vrsqrt.f32 %v123_v63 }
 0x137   :  { %8755 = vrsqrt.f32 %v122_v62  ;;  %v142_v4 = vmul.f32 %v7611_v1, %v130_v0 }
 0x138   :  { %v8748_v2 = vpop.eup %8747 }
 0x139   :  { %v131_v3 = vmul.f32 %v8748_v2, %v8986_v24  ;;  %v8750_v5 = vpop.eup %8749  ;;  %v154_v9 = vadd.f32 %v7612_v6, %v142_v4 }
 0x13a   :  { %v132_v11 = vmul.f32 %v8750_v5, %v8980_v17 }
 0x13b   :  { %v143_v7 = vmul.f32 %v7611_v1, %v131_v3 }
 0x13c   :  { %v8752_v8 = vpop.eup %8751  ;;  %v144_v16 = vmul.f32 %v7611_v1, %v132_v11 }
 0x13d   :  { %v155_v10 = vadd.f32 %v7612_v6, %v143_v7  ;;  %v133_v12 = vmul.f32 %v8752_v8, %v8988_v25 }
 0x13e   :  { %v156_v21 = vadd.f32 %v7612_v6, %v144_v16 }
 0x13f   :  { %v165_v13 = vpack.c.bf16 %v155_v10, %v154_v9  ;;  %v145_v14 = vmul.f32 %v7611_v1, %v133_v12 }
 0x140   :  { %v8754_v15 = vpop.eup %8753 }
 0x141   :  { %7812 = vmatmul.mubr.msk.bf16.vlgmr.msra.gmra.mrb[0].mxu0 %vm56_vm0, %v165_v13  ;;  %v8756_v18 = vpop.eup %8755  ;;  %v157_v19 = vadd.f32 %v7612_v6, %v145_v14  ;;  %v135_v20 = vmul.f32 %v8754_v15, %v8998_v35 }
 0x142   :  { %7815 = vmatprep.mubr.msk.bf16.mxu0 %vm8872_vm1, %v8871_v42  ;;  %v134_v22 = vmul.f32 %v8756_v18, %v8996_v34 }
 0x143   :  { %v166_v23 = vpack.c.bf16 %v157_v19, %v156_v21  ;;  %v147_v17 = vmul.f32 %v7611_v1, %v135_v20 }
 0x144   :  { %v146_v24 = vmul.f32 %v7611_v1, %v134_v22 }
 0x145   :  { %v159_v25 = vadd.f32 %v7612_v6, %v147_v17 }
 0x146   :  { %v158_v26 = vadd.f32 %v7612_v6, %v146_v24 }
 0x148   :  { %v167_v27 = vpack.c.bf16 %v159_v25, %v158_v26 }
 0x149   :  { %7816 = vmatmul.mubr.msk.bf16.gmra.mrb[4].mxu0 %vm56_vm0, %v166_v23 }
 0x14a   :  { %7819 = vmatprep.mubr.msk.bf16.mxu0 %vm8872_vm1, %v8871_v42 }
 0x151   :  { %7820 = vmatmul.mubr.msk.bf16.gmra.mrb[8].mxu0 %vm56_vm0, %v167_v27 }
 0x152   :  { %7825 = vmatprep.mubr.msk.bf16.mxu0 %vm8872_vm1, %v8871_v42 }
 0x214   :  { %v229_v29 = vpop.f32.mrb[0].mxu0 }
 0x215   :  { %v7813_v30 = vpop.f32.mrb[1].mxu0  ;;  %v230_v32 = vadd.f32 %v7613_v28, %v229_v29 }
 0x216   :  { %v232_v31 = vpop.f32.mrb[2].mxu0 }
 0x217   :  { %v233_v33 = vadd.f32 %v7613_v28, %v232_v31  ;;  %v7814_v34 = vpop.f32.mrb[3].mxu0 }
 0x219   :  { %v9046_v35 = vpack.i.bf16 %v233_v33, %v230_v32 }
 0x21b   :  { %8172 = vrot.lane.b32.xlu0 %v9046_v35, %s8873_s16 }
 0x21c   :  { %v237_v36 = vpop.f32.mrb[4].mxu0 }
 0x21d   :  { %v7817_v37 = vpop.f32.mrb[5].mxu0  ;;  %v238_v39 = vadd.f32 %v7613_v28, %v237_v36 }
 0x21e   :  { %v240_v38 = vpop.f32.mrb[6].mxu0 }
 0x21f   :  { %v241_v40 = vadd.f32 %v7613_v28, %v240_v38  ;;  %v7818_v41 = vpop.f32.mrb[7].mxu0 }
 0x221   :  { %v9050_v43 = vpack.i.bf16 %v241_v40, %v238_v39 }
 0x223   :  { %8177 = vrot.lane.b32.xlu1 %v9050_v43, %s8873_s16 }
 0x224   :  { %v245_v44 = vpop.f32.mrb[8].mxu0 }
 0x225   :  { %v7821_v45 = vpop.f32.mrb[9].mxu0  ;;  %v246_v47 = vadd.f32 %v7613_v28, %v245_v44 }
 0x226   :  { %v248_v46 = vpop.f32.mrb[10].mxu0 }
 0x227   :  { %v249_v48 = vadd.f32 %v7613_v28, %v248_v46  ;;  %v7822_v49 = vpop.f32.mrb[11].mxu0 }
 0x229   :  { %v9054_v50 = vpack.i.bf16 %v249_v48, %v246_v47 }
 0x22b   :  { %8182 = vrot.lane.b32.xlu0 %v9054_v50, %s8873_s16 }
 0x28d   :  { %v8173_v51 = vpop.permute.xlu0 %8172 }
 0x28e   :  { %v8174_v52 = vunpack.i.l.bf16 %v8173_v51  ;;  %v8175_v1 = vunpack.i.h.bf16 %v8173_v51 }
 0x290   :  { %v8186_v53 = vpack.i.bf16 %v230_v32, %v8174_v52  ;;  %v8215_v2 = vpack.i.bf16 %v233_v33, %v8175_v1 }
 0x292   :  { %8187 = vxpose.xlu1.b32.start.end [1/1] (short) (narrow) %v8186_v53, 32 }
 0x295   :  { %v8178_v54 = vpop.permute.xlu1 %8177 }
 0x296   :  { %v8180_v55 = vunpack.i.h.bf16 %v8178_v54  ;;  %v8179_v5 = vunpack.i.l.bf16 %v8178_v54 }
 0x298   :  { %v8259_v56 = vpack.i.bf16 %v241_v40, %v8180_v55  ;;  %v8237_v6 = vpack.i.bf16 %v238_v39, %v8179_v5 }
 0x29d   :  { %v8183_v57 = vpop.permute.xlu0 %8182 }
 0x29e   :  { %v8184_v58 = vunpack.i.l.bf16 %v8183_v57  ;;  %v8185_v7 = vunpack.i.h.bf16 %v8183_v57 }
 0x29f   :  { %8260 = vxpose.xlu1.b32.start.end [1/1] (short) (narrow) %v8259_v56, 32 }
 0x2a0   :  { %v8281_v59 = vpack.i.bf16 %v246_v47, %v8184_v58  ;;  %v8303_v9 = vpack.i.bf16 %v249_v48, %v8185_v7 }
 0x2ac   :  { %8282 = vxpose.xlu1.b32.start.end [1/1] (short) (narrow) %v8281_v59, 32 }
 0x312   :  { %v8188_v60 = vpop.trf.xlu1 }
 0x313   :  { %v8192_v63 = vunpack.i.h.bf16 %v8188_v60  ;;  %v8189_v26 = vunpack.i.l.bf16 %v8188_v60 }
 0x316   :  { %v8193_v61 = vpop.trf.xlu1 }
 0x317   :  { %v8197_v62 = vunpack.i.h.bf16 %v8193_v61  ;;  %v8194_v17 = vunpack.i.l.bf16 %v8193_v61 }
 0x319   :  { %v8208_v0 = vpack.i.bf16 %v8197_v62, %v8192_v63  ;;  %v8332_v28 = vpack.i.bf16 %v8194_v17, %v8189_v26 }
 0x31a   :  { %v8198_v3 = vpop.trf.xlu1 }
 0x31b   :  { %8209 = vxpose.xlu0.b32.start.end [1/1] (short) (narrow) %v8208_v0, 8  ;;  %v8202_v19 = vunpack.i.h.bf16 %v8198_v3  ;;  %v8199_v47 = vunpack.i.l.bf16 %v8198_v3 }
 0x31e   :  { %v8203_v4 = vpop.trf.xlu1 }
 0x31f   :  { %8216 = vxpose.xlu0.b32.start.end [1/1] (short) (narrow) %v8215_v2, 32  ;;  %v8207_v23 = vunpack.i.h.bf16 %v8203_v4  ;;  %v8204_v46 = vunpack.i.l.bf16 %v8203_v4 }
 0x321   :  { %v8367_v49 = vpack.i.bf16 %v8204_v46, %v8199_v47 }
 0x322   :  { %v9058_v8 = vpop.trf.xlu1 }
 0x323   :  { %v8262_v40 = vunpack.i.l.bf16 %v9058_v8  ;;  %v8265_v1 = vunpack.i.h.bf16 %v9058_v8 }
 0x326   :  { %v9060_v10 = vpop.trf.xlu1 }
 0x327   :  { %v8267_v26 = vunpack.i.l.bf16 %v9060_v10 }
 0x32a   :  { %v8271_v11 = vpop.trf.xlu1 }
 0x32b   :  { %v8275_v61 = vunpack.i.h.bf16 %v8271_v11  ;;  %v8272_v0 = vunpack.i.l.bf16 %v8271_v11 }
 0x32c   :  { %8238 = vxpose.xlu0.b32.start.end [1/1] (short) (narrow) %v8237_v6, 32  ;;  %v8270_v6 = vunpack.i.h.bf16 %v9060_v10 }
 0x32d   :  { %v8421_v2 = vpack.i.bf16 %v8272_v0, %v8265_v1 }
 0x32e   :  { %v9062_v12 = vpop.trf.xlu1 }
 0x32f   :  { %v8277_v5 = vunpack.i.l.bf16 %v9062_v12 }
 0x332   :  { %v9064_v13 = vpop.trf.xlu1 }
 0x333   :  { %v8284_v60 = vunpack.i.l.bf16 %v9064_v13 }
 0x335   :  { %v8414_v63 = vpack.i.bf16 %v8284_v60, %v8275_v61 }
 0x336   :  { %v9066_v14 = vpop.trf.xlu1 }
 0x339   :  { %8304 = vxpose.xlu0.b32.start.end [1/1] (short) (narrow) %v8303_v9, 32  ;;  %v8449_v9 = vpack.i.bf16 %v8277_v5, %v8270_v6 }
 0x33a   :  { %v9068_v15 = vpop.trf.xlu1 }
 0x33b   :  { %v8297_v3 = vunpack.i.h.bf16 %v9068_v15 }
 0x33e   :  { %v9070_v16 = vpop.trf.xlu1 }
 0x39b   :  { %v9072_v18 = vpop.trf.xlu0 }
 0x39f   :  { %v8217_v20 = vpop.trf.xlu0 }
 0x3a0   :  { %v8218_v21 = vunpack.i.l.bf16 %v8217_v20  ;;  %v8221_v38 = vunpack.i.h.bf16 %v8217_v20  ;;  %v8287_v20 = vunpack.i.h.bf16 %v9064_v13 }
 0x3a2   :  { %v8325_v22 = vpack.i.bf16 %v8218_v21, %v8202_v19  ;;  %v8294_v19 = vunpack.i.l.bf16 %v9068_v15 }
 0x3a3   :  { %v9074_v24 = vpop.trf.xlu0 }
 0x3a4   :  { %8326 = vxpose.xlu1.b32.start.end [1/1] (short) (narrow) %v8325_v22, 8  ;;  %v8223_v25 = vunpack.i.l.bf16 %v9074_v24  ;;  %v8463_v8 = vpack.i.bf16 %v8294_v19, %v8287_v20  ;;  %v8226_v17 = vunpack.i.h.bf16 %v9074_v24  ;;  %v8280_v24 = vunpack.i.h.bf16 %v9062_v12 }
 0x3a6   :  { %v8339_v27 = vpack.i.bf16 %v8223_v25, %v8207_v23 }
 0x3a7   :  { %v8227_v29 = vpop.trf.xlu0 }
 0x3a8   :  { %8340 = vxpose.xlu0.b32.start.end [1/1] (short) (narrow) %v8339_v27, 8  ;;  %8333 = vxpose.xlu1.b32.start.end [1/1] (short) (narrow) %v8332_v28, 8  ;;  %v8231_v33 = vunpack.i.h.bf16 %v8227_v29  ;;  %v8228_v36 = vunpack.i.l.bf16 %v8227_v29 }
 0x3aa   :  { %v8353_v39 = vpack.i.bf16 %v8228_v36, %v8221_v38  ;;  %v8299_v38 = vunpack.i.l.bf16 %v9070_v16 }
 0x3ab   :  { %v8232_v30 = vpop.trf.xlu0 }
 0x3ac   :  { %v8236_v59 = vunpack.i.h.bf16 %v8232_v30  ;;  %v8233_v23 = vunpack.i.l.bf16 %v8232_v30  ;;  %v8289_v30 = vunpack.i.l.bf16 %v9066_v14 }
 0x3ae   :  { %v8393_v25 = vpack.i.bf16 %v8233_v23, %v8226_v17  ;;  %v8442_v10 = vpack.i.bf16 %v8289_v30, %v8280_v24 }
 0x3af   :  { %v9077_v31 = vpop.trf.xlu0 }
 0x3b0   :  { %v8240_v32 = vunpack.i.l.bf16 %v9077_v31 }
 0x3b2   :  { %v8346_v34 = vpack.i.bf16 %v8240_v32, %v8231_v33 }
 0x3b3   :  { %v9080_v37 = vpop.trf.xlu0 }
 0x3b4   :  { %8347 = vxpose.xlu0.b32.start.end [1/1] (short) (narrow) %v8346_v34, 8  ;;  %v8245_v58 = vunpack.i.l.bf16 %v9080_v37  ;;  %v8248_v32 = vunpack.i.h.bf16 %v9080_v37  ;;  %v8302_v34 = vunpack.i.h.bf16 %v9070_v16  ;;  %v8292_v37 = vunpack.i.h.bf16 %v9066_v14 }
 0x3b6   :  { %v8386_v62 = vpack.i.bf16 %v8245_v58, %v8236_v59 }
 0x3b7   :  { %v8249_v41 = vpop.trf.xlu0 }
 0x3b8   :  { %8354 = vxpose.xlu0.b32.start.end [1/1] (short) (narrow) %v8353_v39, 8  ;;  %v8253_v44 = vunpack.i.h.bf16 %v8249_v41  ;;  %v8250_v27 = vunpack.i.l.bf16 %v8249_v41  ;;  %v8504_v39 = vpack.i.bf16 %v8299_v38, %v8292_v37 }
 0x3ba   :  { %v8360_v45 = vpack.i.bf16 %v8262_v40, %v8253_v44 }
 0x3bb   :  { %v8254_v48 = vpop.trf.xlu0 }
 0x3bc   :  { %8361 = vxpose.xlu1.b32.start.end [1/1] (short) (narrow) %v8360_v45, 8  ;;  %v8258_v15 = vunpack.i.h.bf16 %v8254_v48  ;;  %v8255_v29 = vunpack.i.l.bf16 %v8254_v48 }
 0x3be   :  { %v8400_v13 = vpack.i.bf16 %v8267_v26, %v8258_v15  ;;  %v8435_v33 = vpack.i.bf16 %v8255_v29, %v8248_v32 }
 0x3bf   :  { %v8305_v51 = vpop.trf.xlu0 }
 0x3c0   :  { %8368 = vxpose.xlu1.b32.start.end [1/1] (short) (narrow) %v8367_v49, 8  ;;  %v8306_v4 = vunpack.i.l.bf16 %v8305_v51  ;;  %v8309_v21 = vunpack.i.h.bf16 %v8305_v51  ;;  %v8211_v51 = vunpack.i.l.bf16 %v9072_v18 }
 0x3c2   :  { %v8428_v7 = vpack.i.bf16 %v8306_v4, %v8297_v3 }
 0x3c3   :  { %v9083_v52 = vpop.trf.xlu0 }
 0x3c4   :  { %v8311_v36 = vunpack.i.l.bf16 %v9083_v52  ;;  %v8314_v12 = vunpack.i.h.bf16 %v9083_v52  ;;  %v8214_v52 = vunpack.i.h.bf16 %v9072_v18 }
 0x3c7   :  { %v8315_v53 = vpop.trf.xlu0 }
 0x3c8   :  { %v8319_v54 = vunpack.i.h.bf16 %v8315_v53  ;;  %v8316_v11 = vunpack.i.l.bf16 %v8315_v53  ;;  %v1365_v53 = vpack.c.bf16 %v8211_v51, %v8211_v51 }
 0x3ca   :  { %v8470_v22 = vpack.i.bf16 %v8316_v11, %v8309_v21 }
 0x3cb   :  { %v9085_v55 = vpop.trf.xlu0 }
 0x3cc   :  { %v8324_v56 = vunpack.i.h.bf16 %v9085_v55  ;;  %v8321_v40 = vunpack.i.l.bf16 %v9085_v55 }
 0x3ce   :  { %v8374_v57 = vpack.i.bf16 %v8324_v56, %v8319_v54  ;;  %v1366_v54 = vpack.c.bf16 %v8214_v52, %v8214_v52 }
 0x3d0   :  { %8375 = vxpose.xlu1.b32.start.end [1/1] (short) (narrow) %v8374_v57, 8 }
 0x3d4   :  { %8387 = vxpose.xlu1.b32.start.end [1/1] (short) (narrow) %v8386_v62, 8 }
 0x3d8   :  { %8415 = vxpose.xlu1.b32.start.end [1/1] (short) (narrow) %v8414_v63, 8 }
 0x3dc   :  { %8422 = vxpose.xlu1.b32.start.end [1/1] (short) (narrow) %v8421_v2, 8 }
 0x3e0   :  { %8429 = vxpose.xlu1.b32.start.end [1/1] (short) (narrow) %v8428_v7, 8 }
 0x3e1   :  { %8382 = vrot.lane.b32.xlu0 %v9046_v35, %s8874_s5  ;;  %v8243_v35 = vunpack.i.h.bf16 %v9077_v31  ;;  %v8456_v31 = vpack.i.bf16 %v8311_v36, %v8302_v34 }
 0x3e3   :  { %v8407_v28 = vpack.i.bf16 %v8250_v27, %v8243_v35 }
 0x3e4   :  { %8450 = vxpose.xlu1.b32.start.end [1/1] (short) (narrow) %v8449_v9, 8 }
 0x3e8   :  { %8464 = vxpose.xlu1.b32.start.end [1/1] (short) (narrow) %v8463_v8, 8 }
 0x3ec   :  { %8471 = vxpose.xlu1.b32.start.end [1/1] (short) (narrow) %v8470_v22, 8 }
 0x3ff   :  { %8394 = vxpose.xlu0.b32.start.end [1/1] (short) (narrow) %v8393_v25, 8 }
 0x403   :  { %8401 = vxpose.xlu0.b32.start.end [1/1] (short) (narrow) %v8400_v13, 8 }
 0x407   :  { %8408 = vxpose.xlu0.b32.start.end [1/1] (short) (narrow) %v8407_v28, 8 }
 0x40a   :  { %8478 = vrot.lane.b32.xlu1 %v9050_v43, %s8874_s5  ;;  %v8511_v43 = vpack.i.bf16 %v8321_v40, %v8314_v12 }
 0x40b   :  { %8436 = vxpose.xlu0.b32.start.end [1/1] (short) (narrow) %v8435_v33, 8 }
 0x40f   :  { %8443 = vxpose.xlu0.b32.start.end [1/1] (short) (narrow) %v8442_v10, 8 }
 0x413   :  { %8457 = vxpose.xlu0.b32.start.end [1/1] (short) (narrow) %v8456_v31, 8 }
 0x417   :  { %8505 = vxpose.xlu0.b32.start.end [1/1] (short) (narrow) %v8504_v39, 8 }
 0x41b   :  { %8512 = vxpose.xlu0.b32.start.end [1/1] (short) (narrow) %v8511_v43, 8 }
 0x424   :  { %v8327_v41 = vpop.trf.xlu1 }
 0x425   :  { %v8331_v61 = vunpack.i.h.bf16 %v8327_v41  ;;  %v8328_v0 = vunpack.i.l.bf16 %v8327_v41 }
 0x427   :  { %v2377_v4 = vpack.c.bf16 %v8331_v61, %v8331_v61  ;;  %v1367_v6 = vpack.c.bf16 %v8328_v0, %v8328_v0 }
 0x428   :  { %v8334_v44 = vpop.trf.xlu1  ;;  %v8341_v47 = vpop.trf.xlu0 }
 0x429   :  { %v8335_v45 = vunpack.i.l.bf16 %v8334_v44  ;;  %v8338_v46 = vunpack.i.h.bf16 %v8334_v44  ;;  %v8345_v63 = vunpack.i.h.bf16 %v8341_v47  ;;  %v8342_v2 = vunpack.i.l.bf16 %v8341_v47 }
 0x42a   :  { %v3588_v9 = vsel %vm3399_vm2, %v2377_v4, 0 }
 0x42b   :  { %v2373_v48 = vpack.c.bf16 %v8335_v45, %v8335_v45  ;;  %v2374_v49 = vpack.c.bf16 %v8338_v46, %v8338_v46  ;;  %v2378_v5 = vpack.c.bf16 %v8345_v63, %v8345_v63  ;;  %v1368_v7 = vpack.c.bf16 %v8342_v2, %v8342_v2 }
 0x42d   :  { %v3404_v16 = vsel %vm3399_vm2, %v2373_v48, 0  ;;  %v3450_v14 = vsel %vm3399_vm2, %v2374_v49, 0  ;;  %v3634_v19 = vsel %vm3399_vm2, %v2378_v5, 0 }
 0x42e   :  { %7824 = vmatpush3.bf16.xpose.msra.mxu0 %v3404_v16  ;;  %7830 = vmatpush3.bf16.xpose.msra.mxu1 %v3450_v14 }
 0x42f   :  { %7835 = vmatprep.subr.bf16.mxu1 %v8871_v42  ;;  %7841 = vmatprep.subr.bf16.mxu0 %v8871_v42 }
 0x434   :  { %v8348_v55 = vpop.trf.xlu0 }
 0x435   :  { %7826 = vmatmul.mubr.msk.bf16.vlgmr.msra.gmra.mrb[12].mxu0 %vm3399_vm2, %v1365_v53  ;;  %7832 = vmatmul.mubr.msk.bf16.vlgmr.msra.gmra.mrb[0].mxu1 %vm3399_vm2, %v1366_v54  ;;  %v8352_v17 = vunpack.i.h.bf16 %v8348_v55  ;;  %v8349_v26 = vunpack.i.l.bf16 %v8348_v55 }
 0x436   :  { %7837 = vmatprep.mubr.msk.bf16.mxu1 %vm8872_vm1, %v8871_v42  ;;  %7843 = vmatprep.mubr.msk.bf16.mxu0 %vm8872_vm1, %v8871_v42 }
 0x437   :  { %v2381_v15 = vpack.c.bf16 %v8352_v17, %v8352_v17  ;;  %v1371_v27 = vpack.c.bf16 %v8349_v26, %v8349_v26 }
 0x438   :  { %v8355_v56 = vpop.trf.xlu0 }
 0x439   :  { %v8356_v20 = vunpack.i.l.bf16 %v8355_v56  ;;  %v3772_v35 = vsel %vm3399_vm2, %v2381_v15, 0 }
 0x43b   :  { %v1369_v21 = vpack.c.bf16 %v8356_v20, %v8356_v20 }
 0x43c   :  { %v9124_v57 = vpop.trf.xlu1 }
 0x43d   :  { %v8366_v14 = vunpack.i.h.bf16 %v9124_v57  ;;  %v8363_v54 = vunpack.i.l.bf16 %v9124_v57 }
 0x440   :  { %v8369_v18 = vpop.trf.xlu1 }
 0x441   :  { %v8370_v58 = vunpack.i.l.bf16 %v8369_v18  ;;  %v8373_v59 = vunpack.i.h.bf16 %v8369_v18 }
 0x443   :  { %v2375_v60 = vpack.c.bf16 %v8370_v58, %v8370_v58  ;;  %v2376_v62 = vpack.c.bf16 %v8373_v59, %v8373_v59  ;;  %v1375_v59 = vpack.c.bf16 %v8363_v54, %v8363_v54 }
 0x444   :  { %8519 = vrot.lane.b32.xlu0 %v9054_v50, %s8874_s5  ;;  %v8359_v50 = vunpack.i.h.bf16 %v8355_v56  ;;  %v2385_v56 = vpack.c.bf16 %v8366_v14, %v8366_v14 }
 0x445   :  { %v3496_v1 = vsel %vm3399_vm2, %v2375_v60, 0  ;;  %v3542_v3 = vsel %vm3399_vm2, %v2376_v62, 0 }
 0x446   :  { %7836 = vmatpush3.bf16.xpose.msra.mxu1 %v3496_v1  ;;  %7842 = vmatpush3.bf16.xpose.msra.mxu0 %v3542_v3  ;;  %v2379_v8 = vpack.c.bf16 %v8359_v50, %v8359_v50  ;;  %v3956_v57 = vsel %vm3399_vm2, %v2385_v56, 0 }
 0x447   :  { %7847 = vmatprep.subr.bf16.mxu1 %v8871_v42  ;;  %7853 = vmatprep.subr.bf16.mxu0 %v8871_v42 }
 0x448   :  { %v3680_v23 = vsel %vm3399_vm2, %v2379_v8, 0 }
 0x44d   :  { %7838 = vmatmul.mubr.msk.bf16.vlgmr.msra.gmra.mrb[4].mxu1 %vm3399_vm2, %v1367_v6  ;;  %7844 = vmatmul.mubr.msk.bf16.vlgmr.msra.gmra.mrb[16].mxu0 %vm3399_vm2, %v1368_v7 }
 0x44e   :  { %7848 = vmatpush3.bf16.xpose.msra.mxu1 %v3588_v9  ;;  %7849 = vmatprep.mubr.msk.bf16.mxu1 %vm8872_vm1, %v8871_v42 }
 0x44f   :  { %7859 = vmatprep.subr.bf16.mxu1 %v8871_v42  ;;  %7854 = vmatpush3.bf16.xpose.msra.mxu0 %v3634_v19 }
 0x450   :  { %v9139_v11 = vpop.trf.xlu1  ;;  %7855 = vmatprep.mubr.msk.bf16.mxu0 %vm8872_vm1, %v8871_v42  ;;  %7865 = vmatprep.subr.bf16.mxu0 %v8871_v42 }
 0x453   :  { %v8383_v22 = vpop.permute.xlu0 %8382 }
 0x454   :  { %v8388_v25 = vpop.trf.xlu1  ;;  %8483 = vxpose.xlu1.b32.start.end [1/1] (short) (narrow) %v8383_v22, 32 }
 0x455   :  { %7850 = vmatmul.mubr.msk.bf16.vlgmr.msra.gmra.mrb[8].mxu1 %vm3399_vm2, %v1369_v21  ;;  %v8392_v39 = vunpack.i.h.bf16 %v8388_v25  ;;  %v8389_v12 = vunpack.i.l.bf16 %v8388_v25 }
 0x456   :  { %7860 = vmatpush3.bf16.xpose.msra.mxu1 %v3680_v23  ;;  %7861 = vmatprep.mubr.msk.bf16.mxu1 %vm8872_vm1, %v8871_v42 }
 0x457   :  { %7871 = vmatprep.subr.bf16.mxu1 %v8871_v42  ;;  %v2382_v41 = vpack.c.bf16 %v8392_v39, %v8392_v39  ;;  %v1372_v46 = vpack.c.bf16 %v8389_v12, %v8389_v12 }
 0x458   :  { %v9149_v13 = vpop.trf.xlu1 }
 0x459   :  { %v3818_v49 = vsel %vm3399_vm2, %v2382_v41, 0  ;;  %v8420_v9 = vunpack.i.h.bf16 %v9149_v13  ;;  %v8417_v8 = vunpack.i.l.bf16 %v9149_v13 }
 0x45b   :  { %v2389_v23 = vpack.c.bf16 %v8420_v9, %v8420_v9  ;;  %v1379_v17 = vpack.c.bf16 %v8417_v8, %v8417_v8  ;;  %v8875_v8 = vmov 1966171168  }
 0x45c   :  { %v9152_v28 = vpop.trf.xlu1 }
 0x45d   :  { %7862 = vmatmul.mubr.msk.bf16.vlgmr.msra.gmra.mrb[12].mxu1 %vm3399_vm2, %v1371_v27  ;;  %v8427_v0 = vunpack.i.h.bf16 %v9152_v28  ;;  %v8424_v1 = vunpack.i.l.bf16 %v9152_v28  ;;  %v4140_v13 = vsel %vm3399_vm2, %v2389_v23, 0 }
 0x45e   :  { %7872 = vmatpush3.bf16.xpose.msra.mxu1 %v3772_v35  ;;  %7873 = vmatprep.mubr.msk.bf16.mxu1 %vm8872_vm1, %v8871_v42 }
 0x45f   :  { %7883 = vmatprep.subr.bf16.mxu1 %v8871_v42  ;;  %v2387_v5 = vpack.c.bf16 %v8427_v0, %v8427_v0  ;;  %v1377_v6 = vpack.c.bf16 %v8424_v1, %v8424_v1 }
 0x460   :  { %v9158_v29 = vpop.trf.xlu1 }
 0x461   :  { %v4048_v19 = vsel %vm3399_vm2, %v2387_v5, 0  ;;  %v8431_v39 = vunpack.i.l.bf16 %v9158_v29 }
 0x463   :  { %v1383_v41 = vpack.c.bf16 %v8431_v39, %v8431_v39 }
 0x464   :  { %v9160_v32 = vpop.trf.xlu1 }
 0x465   :  { %v8455_v20 = vunpack.i.h.bf16 %v9160_v32  ;;  %v8452_v21 = vunpack.i.l.bf16 %v9160_v32 }
 0x467   :  { %v2388_v22 = vpack.c.bf16 %v8455_v20, %v8455_v20  ;;  %v1378_v25 = vpack.c.bf16 %v8452_v21, %v8452_v21  ;;  %v260_v21 = vunpack.c.l.s4 %v8875_v8 }
 0x468   :  { %v9162_v33 = vpop.trf.xlu1 }
 0x469   :  { %v4094_v15 = vsel %vm3399_vm2, %v2388_v22, 0  ;;  %v8469_v35 = vunpack.i.h.bf16 %v9162_v33  ;;  %v8466_v28 = vunpack.i.l.bf16 %v9162_v33  ;;  %v262_v22 = vlaneseq }
 0x46a   :  { %v261_v23 = vunpack.c.0.s8 %v260_v21 }
 0x46c   :  { %v9164_v30 = vpop.trf.xlu1 }
 0x47c   :  { %v8479_v24 = vpop.permute.xlu1 %8478 }
 0x47d   :  { %8524 = vxpose.xlu0.b32.start.end [1/1] (short) (narrow) %v8479_v24, 32 }
 0x47f   :  { %v8395_v10 = vpop.trf.xlu0 }
 0x480   :  { %v8396_v34 = vunpack.i.l.bf16 %v8395_v10  ;;  %v8399_v36 = vunpack.i.h.bf16 %v8395_v10  ;;  %v2391_v10 = vpack.c.bf16 %v8469_v35, %v8469_v35 }
 0x482   :  { %v1370_v31 = vpack.c.bf16 %v8396_v34, %v8396_v34  ;;  %v2380_v38 = vpack.c.bf16 %v8399_v36, %v8399_v36  ;;  %v1381_v34 = vpack.c.bf16 %v8466_v28, %v8466_v28  ;;  %v4232_v33 = vsel %vm3399_vm2, %v2391_v10, 0 }
 0x483   :  { %v8402_v37 = vpop.trf.xlu0 }
 0x484   :  { %7856 = vmatmul.mubr.msk.bf16.vlgmr.msra.gmra.mrb[20].mxu0 %vm3399_vm2, %v1370_v31  ;;  %v3726_v40 = vsel %vm3399_vm2, %v2380_v38, 0  ;;  %v8406_v61 = vunpack.i.h.bf16 %v8402_v37  ;;  %v8403_v63 = vunpack.i.l.bf16 %v8402_v37  ;;  %v8434_v37 = vunpack.i.h.bf16 %v9158_v29 }
 0x485   :  { %7866 = vmatpush3.bf16.xpose.msra.mxu0 %v3726_v40  ;;  %7867 = vmatprep.mubr.msk.bf16.mxu0 %vm8872_vm1, %v8871_v42 }
 0x486   :  { %7877 = vmatprep.subr.bf16.mxu0 %v8871_v42  ;;  %v2386_v2 = vpack.c.bf16 %v8406_v61, %v8406_v61  ;;  %v1376_v4 = vpack.c.bf16 %v8403_v63, %v8403_v63 }
 0x487   :  { %v8409_v43 = vpop.trf.xlu0 }
 0x488   :  { %v8410_v44 = vunpack.i.l.bf16 %v8409_v43  ;;  %v8413_v45 = vunpack.i.h.bf16 %v8409_v43  ;;  %v4002_v7 = vsel %vm3399_vm2, %v2386_v2, 0  ;;  %v2393_v43 = vpack.c.bf16 %v8434_v37, %v8434_v37 }
 0x48a   :  { %v1373_v47 = vpack.c.bf16 %v8410_v44, %v8410_v44  ;;  %v2383_v48 = vpack.c.bf16 %v8413_v45, %v8413_v45 }
 0x48b   :  { %v8437_v16 = vpop.trf.xlu0 }
 0x48c   :  { %7868 = vmatmul.mubr.msk.bf16.vlgmr.msra.gmra.mrb[24].mxu0 %vm3399_vm2, %v1372_v46  ;;  %7874 = vmatmul.mubr.msk.bf16.vlgmr.msra.gmra.mrb[16].mxu1 %vm3399_vm2, %v1373_v47  ;;  %v3864_v51 = vsel %vm3399_vm2, %v2383_v48, 0  ;;  %v8438_v52 = vunpack.i.l.bf16 %v8437_v16  ;;  %v8441_v53 = vunpack.i.h.bf16 %v8437_v16  ;;  %v4324_v46 = vsel %vm3399_vm2, %v2393_v43, 0 }
 0x48d   :  { %7878 = vmatpush3.bf16.xpose.msra.mxu0 %v3818_v49  ;;  %7884 = vmatpush3.bf16.xpose.msra.mxu1 %v3864_v51  ;;  %v8476_v47 = vunpack.i.h.bf16 %v9164_v30  ;;  %v8473_v48 = vunpack.i.l.bf16 %v9164_v30 }
 0x48e   :  { %7879 = vmatprep.mubr.msk.bf16.mxu0 %vm8872_vm1, %v8871_v42  ;;  %7885 = vmatprep.mubr.msk.bf16.mxu1 %vm8872_vm1, %v8871_v42  ;;  %v2384_v55 = vpack.c.bf16 %v8441_v53, %v8441_v53  ;;  %v1374_v58 = vpack.c.bf16 %v8438_v52, %v8438_v52 }
 0x48f   :  { %7889 = vmatprep.subr.bf16.mxu0 %v8871_v42  ;;  %7895 = vmatprep.subr.bf16.mxu1 %v8871_v42  ;;  %v8444_v18 = vpop.trf.xlu0  ;;  %v2395_v14 = vpack.c.bf16 %v8476_v47, %v8476_v47  ;;  %v1385_v51 = vpack.c.bf16 %v8473_v48, %v8473_v48 }
 0x490   :  { %v3910_v60 = vsel %vm3399_vm2, %v2384_v55, 0  ;;  %v8448_v26 = vunpack.i.h.bf16 %v8444_v18  ;;  %v8445_v27 = vunpack.i.l.bf16 %v8444_v18  ;;  %v8377_v55 = vunpack.i.l.bf16 %v9139_v11 }
 0x491   :  { %v4416_v54 = vsel %vm3399_vm2, %v2395_v14, 0 }
 0x492   :  { %v2390_v32 = vpack.c.bf16 %v8448_v26, %v8448_v26  ;;  %v1380_v24 = vpack.c.bf16 %v8445_v27, %v8445_v27 }
 0x493   :  { %v9185_v62 = vpop.trf.xlu0 }
 0x494   :  { %7880 = vmatmul.mubr.msk.bf16.vlgmr.msra.gmra.mrb[28].mxu0 %vm3399_vm2, %v1374_v58  ;;  %7886 = vmatmul.mubr.msk.bf16.vlgmr.msra.gmra.mrb[20].mxu1 %vm3399_vm2, %v1375_v59  ;;  %v4186_v36 = vsel %vm3399_vm2, %v2390_v32, 0  ;;  %v8462_v45 = vunpack.i.h.bf16 %v9185_v62  ;;  %v8459_v29 = vunpack.i.l.bf16 %v9185_v62  ;;  %v1387_v58 = vpack.c.bf16 %v8377_v55, %v8377_v55 }
 0x495   :  { %7890 = vmatpush3.bf16.xpose.msra.mxu0 %v3910_v60  ;;  %7896 = vmatpush3.bf16.xpose.msra.mxu1 %v3956_v57  ;;  %v8380_v60 = vunpack.i.h.bf16 %v9139_v11 }
 0x496   :  { %7891 = vmatprep.mubr.msk.bf16.mxu0 %vm8872_vm1, %v8871_v42  ;;  %7897 = vmatprep.mubr.msk.bf16.mxu1 %vm8872_vm1, %v8871_v42  ;;  %v2394_v49 = vpack.c.bf16 %v8462_v45, %v8462_v45  ;;  %v1384_v16 = vpack.c.bf16 %v8459_v29, %v8459_v29 }
 0x497   :  { %7901 = vmatprep.subr.bf16.mxu0 %v8871_v42  ;;  %7907 = vmatprep.subr.bf16.mxu1 %v8871_v42  ;;  %v8506_v3 = vpop.trf.xlu0  ;;  %v1388_v61 = vpack.c.bf16 %v8380_v60, %v8380_v60 }
 0x498   :  { %v8510_v31 = vunpack.i.h.bf16 %v8506_v3  ;;  %v8507_v38 = vunpack.i.l.bf16 %v8506_v3  ;;  %v4370_v52 = vsel %vm3399_vm2, %v2394_v49, 0 }
 0x49a   :  { %v2392_v40 = vpack.c.bf16 %v8510_v31, %v8510_v31  ;;  %v1382_v12 = vpack.c.bf16 %v8507_v38, %v8507_v38 }
 0x49b   :  { %v9199_v50 = vpop.trf.xlu0 }
 0x49c   :  { %7892 = vmatmul.mubr.msk.bf16.vlgmr.msra.gmra.mrb[32].mxu0 %vm3399_vm2, %v1376_v4  ;;  %7898 = vmatmul.mubr.msk.bf16.vlgmr.msra.gmra.mrb[24].mxu1 %vm3399_vm2, %v1377_v6  ;;  %v4278_v44 = vsel %vm3399_vm2, %v2392_v40, 0  ;;  %v8517_v53 = vunpack.i.h.bf16 %v9199_v50  ;;  %v8514_v30 = vunpack.i.l.bf16 %v9199_v50 }
 0x49d   :  { %7902 = vmatpush3.bf16.xpose.msra.mxu0 %v4002_v7  ;;  %7908 = vmatpush3.bf16.xpose.msra.mxu1 %v4048_v19 }
 0x49e   :  { %7903 = vmatprep.mubr.msk.bf16.mxu0 %vm8872_vm1, %v8871_v42  ;;  %7909 = vmatprep.mubr.msk.bf16.mxu1 %vm8872_vm1, %v8871_v42  ;;  %v2396_v56 = vpack.c.bf16 %v8517_v53, %v8517_v53  ;;  %v1386_v18 = vpack.c.bf16 %v8514_v30, %v8514_v30 }
 0x49f   :  { %7913 = vmatprep.subr.bf16.mxu0 %v8871_v42  ;;  %7919 = vmatprep.subr.bf16.mxu1 %v8871_v42 }
 0x4a0   :  { %v4462_v59 = vsel %vm3399_vm2, %v2396_v56, 0 }
 0x4a4   :  { %7904 = vmatmul.mubr.msk.bf16.vlgmr.msra.gmra.mrb[36].mxu0 %vm3399_vm2, %v1378_v25  ;;  %7910 = vmatmul.mubr.msk.bf16.vlgmr.msra.gmra.mrb[28].mxu1 %vm3399_vm2, %v1379_v17  ;;  %v9276_v17 = vshrl.u32 %v262_v22, 7 }
 0x4a5   :  { %7914 = vmatpush3.bf16.xpose.msra.mxu0 %v4094_v15  ;;  %7920 = vmatpush3.bf16.xpose.msra.mxu1 %v4140_v13  ;;  %v252_v15 = vld [vmem:[%s9917_s1] sm:$0xff] }
 0x4a6   :  { %7915 = vmatprep.mubr.msk.bf16.mxu0 %vm8872_vm1, %v8871_v42  ;;  %7921 = vmatprep.mubr.msk.bf16.mxu1 %vm8872_vm1, %v8871_v42  ;;  %v9281_v26 = vsub.s32 %v261_v23, %v9276_v17  ;;  %v9291_v28 = vsub.s32 0, %v9276_v17 }
 0x4a7   :  { %7925 = vmatprep.subr.bf16.mxu0 %v8871_v42  ;;  %7931 = vmatprep.subr.bf16.mxu1 %v8871_v42 }
 0x4a8   :  { %v265_v27 = vrot.slane %v252_v15, %v9281_v26 }
 0x4aa   :  { %v281_v35 = vrot.slane %v265_v27, %v9281_v26 }
 0x4ac   :  { %7916 = vmatmul.mubr.msk.bf16.vlgmr.msra.gmra.mrb[40].mxu0 %vm3399_vm2, %v1380_v24  ;;  %7922 = vmatmul.mubr.msk.bf16.vlgmr.msra.gmra.mrb[32].mxu1 %vm3399_vm2, %v1381_v34  ;;  %v4531_v34 = vrot.slane %v281_v35, %v9291_v28  ;;  %v303_v47 = vcombine.high %v281_v35, %v281_v35 }
 0x4ad   :  { %7926 = vmatpush3.bf16.xpose.msra.mxu0 %v4186_v36  ;;  %7932 = vmatpush3.bf16.xpose.msra.mxu1 %v4232_v33 }
 0x4ae   :  { %7927 = vmatprep.mubr.msk.bf16.mxu0 %vm8872_vm1, %v8871_v42  ;;  %7933 = vmatprep.mubr.msk.bf16.mxu1 %vm8872_vm1, %v8871_v42  ;;  %v4539_v48 = vrot.slane %v303_v47, %v9291_v28 }
 0x4af   :  { %7937 = vmatprep.subr.bf16.mxu0 %v8871_v42  ;;  %7943 = vmatprep.subr.bf16.mxu1 %v8871_v42 }
 0x4b4   :  { %7928 = vmatmul.mubr.msk.bf16.vlgmr.msra.gmra.mrb[44].mxu0 %vm3399_vm2, %v1382_v12  ;;  %7934 = vmatmul.mubr.msk.bf16.vlgmr.msra.gmra.mrb[36].mxu1 %vm3399_vm2, %v1383_v41 }
 0x4b5   :  { %7938 = vmatpush3.bf16.xpose.msra.mxu0 %v4278_v44  ;;  %7944 = vmatpush3.bf16.xpose.msra.mxu1 %v4324_v46 }
 0x4b6   :  { %7939 = vmatprep.mubr.msk.bf16.mxu0 %vm8872_vm1, %v8871_v42  ;;  %7945 = vmatprep.mubr.msk.bf16.mxu1 %vm8872_vm1, %v8871_v42  ;;  %v9278_v25 = vpop.permute.xlu0 %8519 }
 0x4b7   :  { %7949 = vmatprep.subr.bf16.mxu0 %v8871_v42  ;;  %7955 = vmatprep.subr.bf16.mxu1 %v8871_v42 }
 0x4bc   :  { %7940 = vmatmul.mubr.msk.bf16.vlgmr.msra.gmra.mrb[48].mxu0 %vm3399_vm2, %v1384_v16  ;;  %7946 = vmatmul.mubr.msk.bf16.vlgmr.msra.gmra.mrb[40].mxu1 %vm3399_vm2, %v1385_v51 }
 0x4bd   :  { %7950 = vmatpush3.bf16.xpose.msra.mxu0 %v4370_v52  ;;  %7956 = vmatpush3.bf16.xpose.msra.mxu1 %v4416_v54 }
 0x4be   :  { %7951 = vmatprep.mubr.msk.bf16.mxu0 %vm8872_vm1, %v8871_v42  ;;  %7957 = vmatprep.mubr.msk.bf16.mxu1 %vm8872_vm1, %v8871_v42 }
 0x4bf   :  { %7961 = vmatprep.subr.bf16.mxu0 %v8871_v42  ;;  %7967 = vmatprep.subr.bf16.mxu1 %v8871_v42 }
 0x4c4   :  { %7952 = vmatmul.mubr.msk.bf16.vlgmr.msra.gmra.mrb[52].mxu0 %vm3399_vm2, %v1386_v18  ;;  %7958 = vmatmul.mubr.msk.bf16.vlgmr.msra.gmra.mrb[44].mxu1 %vm3399_vm2, %v1387_v58  ;;  %v273_v18 = vcombine.high %v265_v27, %v265_v27 }
 0x4c5   :  { %7962 = vmatpush3.bf16.xpose.msra.mxu0 %v4462_v59  ;;  %7963 = vmatprep.mubr.msk.bf16.mxu0 %vm8872_vm1, %v8871_v42  ;;  %v258_v59 = vcombine.high %v252_v15, %v252_v15 }
 0x4c6   :  { %7969 = vmatprep.mubr.msk.bf16.mxu1 %vm8872_vm1, %v8871_v42  ;;  %7973 = vmatprep.subr.bf16.mxu0 %v8871_v42 }
 0x4cc   :  { %7964 = vmatmul.mubr.msk.bf16.vlgmr.msra.gmra.mrb[56].mxu0 %vm3399_vm2, %v1388_v61  ;;  %v295_v61 = vrot.slane %v273_v18, %v9281_v26 }
 0x4cd   :  { %7975 = vmatprep.mubr.msk.bf16.mxu0 %vm8872_vm1, %v8871_v42 }
 0x4d4   :  { %v8484_v57 = vpop.trf.xlu1 }
 0x4d5   :  { %v8485_v62 = vunpack.i.l.bf16 %v8484_v57  ;;  %v8488_v0 = vunpack.i.h.bf16 %v8484_v57 }
 0x4d8   :  { %v8489_v63 = vpop.trf.xlu1 }
 0x4d9   :  { %v8490_v1 = vunpack.i.l.bf16 %v8489_v63  ;;  %v8493_v2 = vunpack.i.h.bf16 %v8489_v63  ;;  %v305_v63 = vcombine.high %v295_v61, %v295_v61 }
 0x4db   :  { %v8545_v3 = vpack.i.bf16 %v8490_v1, %v8485_v62  ;;  %v8559_v11 = vpack.i.bf16 %v8493_v2, %v8488_v0  ;;  %v272_v0 = vrot.slane %v258_v59, %v9281_v26  ;;  %v4535_v2 = vrot.slane %v295_v61, %v9291_v28 }
 0x4dc   :  { %v8494_v4 = vpop.trf.xlu1 }
 0x4dd   :  { %8546 = vxpose.xlu1.b32.start.end [1/1] (short) (narrow) %v8545_v3, 8  ;;  %v8495_v5 = vunpack.i.l.bf16 %v8494_v4  ;;  %v8498_v7 = vunpack.i.h.bf16 %v8494_v4  ;;  %v4543_v4 = vrot.slane %v305_v63, %v9291_v28  ;;  %v274_v27 = vcombine.high %v272_v0, %v272_v0 }
 0x4df   :  { %v9329_v35 = vrot.slane %v274_v27, %v9281_v26 }
 0x4e0   :  { %v8499_v6 = vpop.trf.xlu1 }
 0x4e1   :  { %8560 = vxpose.xlu1.b32.start.end [1/1] (short) (narrow) %v8559_v11, 8  ;;  %v8500_v9 = vunpack.i.l.bf16 %v8499_v6  ;;  %v8503_v50 = vunpack.i.h.bf16 %v8499_v6  ;;  %v288_v11 = vrot.slane %v272_v0, %v9281_v26 }
 0x4e3   :  { %v8552_v19 = vpack.i.bf16 %v8500_v9, %v8495_v5  ;;  %v8566_v20 = vpack.i.bf16 %v8503_v50, %v8498_v7  ;;  %v4547_v8 = vrot.slane %v288_v11, %v9291_v28 }
 0x4e5   :  { %8553 = vxpose.xlu0.b32.start.end [1/1] (short) (narrow) %v8552_v19, 8 }
 0x4e9   :  { %8567 = vxpose.xlu0.b32.start.end [1/1] (short) (narrow) %v8566_v20, 8 }
 0x4fd   :  { %v9286_v13 = vpop.trf.xlu0 }
 0x4fe   :  { %v8526_v32 = vunpack.i.l.bf16 %v9286_v13 }
 0x501   :  { %v9294_v24 = vpop.trf.xlu0 }
 0x502   :  { %v8531_v10 = vunpack.i.l.bf16 %v9294_v24 }
 0x504   :  { %v8595_v33 = vpack.i.bf16 %v8531_v10, %v8526_v32  ;;  %v304_v32 = vcombine.high %v288_v11, %v288_v11  ;;  %v253_v10 = vld [vmem:[%s9917_s1 + $0x8] sm:$0xff] }
 0x505   :  { %v9300_v45 = vpop.trf.xlu0 }
 0x506   :  { %8596 = vxpose.xlu0.b32.start.end [1/1] (short) (narrow) %v8595_v33, 8 }
 0x508   :  { %v3440_v36 = vpop.f32.mrb[12].mxu0  ;;  %v3486_v31 = vpop.f32.mrb[0].mxu1 }
 0x509   :  { %v4504_v38 = vmul.f32 0.35355338, %v3440_v36  ;;  %v7827_v37 = vpop.f32.mrb[13].mxu0  ;;  %v7833_v39 = vpop.f32.mrb[1].mxu1  ;;  %v4505_v1 = vmul.f32 0.35355338, %v3486_v31 }
 0x50a   :  { %v3443_v40 = vpop.f32.mrb[14].mxu0  ;;  %v3489_v12 = vpop.f32.mrb[2].mxu1  ;;  %v4555_v37 = vrot.slane %v304_v32, %v9291_v28 }
 0x50b   :  { %v7828_v43 = vpop.f32.mrb[15].mxu0  ;;  %v7834_v41 = vpop.f32.mrb[3].mxu1  ;;  %v9298_v44 = vadd.f32 %v4531_v34, %v4504_v38  ;;  %v9314_v7 = vadd.f32 %v4535_v2, %v4505_v1  ;;  %v4551_v34 = vrot.slane %v9329_v35, %v9291_v28 }
 0x50c   :  { %v9304_v46 = vpop.trf.xlu0 }
 0x50d   :  { %v4672_v29 = vsel %vm3399_vm2, %v9298_v44, -inf  ;;  %v4675_v21 = vsel %vm3399_vm2, %v9314_v7, -inf }
 0x50e   :  { %4673 = vmax.xlane.f32.xlu1 %v4672_v29 }
 0x520   :  { %v3532_v49 = vpop.f32.mrb[4].mxu1  ;;  %v3578_v16 = vpop.f32.mrb[16].mxu0 }
 0x521   :  { %v4506_v14 = vmul.f32 0.35355338, %v3532_v49  ;;  %v7839_v51 = vpop.f32.mrb[5].mxu1  ;;  %v7845_v52 = vpop.f32.mrb[17].mxu0  ;;  %v4507_v3 = vmul.f32 0.35355338, %v3578_v16 }
 0x522   :  { %v3535_v53 = vpop.f32.mrb[6].mxu1  ;;  %v3581_v30 = vpop.f32.mrb[18].mxu0 }
 0x523   :  { %v7840_v54 = vpop.f32.mrb[7].mxu1  ;;  %v7846_v55 = vpop.f32.mrb[19].mxu0  ;;  %v9307_v56 = vadd.f32 %v4539_v48, %v4506_v14  ;;  %v9316_v20 = vadd.f32 %v4543_v4, %v4507_v3 }
 0x524   :  { %v307_v55 = vcombine.high %v253_v10, %v253_v10 }
 0x525   :  { %v4681_v22 = vsel %vm3399_vm2, %v9316_v20, -inf }
 0x526   :  { %v321_v63 = vrot.slane %v307_v55, %v9281_v26 }
 0x528   :  { %v3624_v58 = vpop.f32.mrb[8].mxu1 }
 0x529   :  { %v7851_v60 = vpop.f32.mrb[9].mxu1  ;;  %v4508_v19 = vmul.f32 0.35355338, %v3624_v58 }
 0x52a   :  { %v3627_v57 = vpop.f32.mrb[10].mxu1 }
 0x52b   :  { %v7852_v62 = vpop.f32.mrb[11].mxu1  ;;  %v9323_v23 = vadd.f32 %v4547_v8, %v4508_v19 }
 0x52d   :  { %v4684_v15 = vsel %vm3399_vm2, %v9323_v23, -inf }
 0x530   :  { %v3716_v5 = vpop.f32.mrb[12].mxu1 }
 0x531   :  { %v7863_v6 = vpop.f32.mrb[13].mxu1  ;;  %v4510_v31 = vmul.f32 0.35355338, %v3716_v5 }
 0x532   :  { %v3719_v9 = vpop.f32.mrb[14].mxu1 }
 0x533   :  { %v7864_v50 = vpop.f32.mrb[15].mxu1  ;;  %4676 = vmax.xlane.f32.xlu0 %v4675_v21  ;;  %v9342_v41 = vadd.f32 %v4555_v37, %v4510_v31  ;;  %v337_v21 = vrot.slane %v321_v63, %v9281_v26 }
 0x535   :  { %v4690_v14 = vsel %vm3399_vm2, %v9342_v41, -inf }
 0x537   :  { %4682 = vmax.xlane.f32.xlu0 %v4681_v22 }
 0x53b   :  { %4685 = vmax.xlane.f32.xlu0 %v4684_v15 }
 0x541   :  { %8574 = vxpose.xlu1.b32.start.end [1/1] (short) (narrow) %v9278_v25, 32  ;;  %v314_v25 = vrot.slane %v253_v10, %v9281_v26 }
 0x543   :  { %v330_v29 = vrot.slane %v314_v25, %v9281_v26  ;;  %v322_v53 = vcombine.high %v314_v25, %v314_v25  ;;  %v4579_v25 = vrot.slane %v337_v21, %v9291_v28 }
 0x545   :  { %v4563_v47 = vrot.slane %v330_v29, %v9291_v28  ;;  %v352_v59 = vcombine.high %v330_v29, %v330_v29  ;;  %v344_v57 = vrot.slane %v322_v53, %v9281_v26 }
 0x547   :  { %v4571_v1 = vrot.slane %v352_v59, %v9291_v28  ;;  %v4567_v3 = vrot.slane %v344_v57, %v9291_v28 }
 0x557   :  { %v3670_v36 = vpop.f32.mrb[20].mxu0 }
 0x558   :  { %v4509_v33 = vmul.f32 0.35355338, %v3670_v36  ;;  %v7857_v38 = vpop.f32.mrb[21].mxu0  ;;  %v354_v36 = vcombine.high %v344_v57, %v344_v57  ;;  %v353_v57 = vcombine.high %v337_v21, %v337_v21 }
 0x559   :  { %v3673_v39 = vpop.f32.mrb[22].mxu0 }
 0x55a   :  { %v7858_v40 = vpop.f32.mrb[23].mxu0  ;;  %v9338_v12 = vadd.f32 %v4551_v34, %v4509_v33  ;;  %v306_v33 = vcombine.high %v9329_v35, %v9329_v35  ;;  %v4575_v39 = vrot.slane %v354_v36, %v9291_v28 }
 0x55b   :  { %v323_v40 = vcombine.high %v321_v63, %v321_v63 }
 0x55c   :  { %v4687_v43 = vsel %vm3399_vm2, %v9338_v12, -inf }
 0x55d   :  { %4688 = vmax.xlane.f32.xlu0 %v4687_v43  ;;  %v8547_v61 = vpop.trf.xlu1 }
 0x55e   :  { %v8548_v62 = vunpack.i.l.bf16 %v8547_v61  ;;  %v8551_v0 = vunpack.i.h.bf16 %v8547_v61  ;;  %v9384_v61 = vld [vmem:[%s9917_s1 + $0x10] sm:$0xff] }
 0x55f   :  { %v3762_v48 = vpop.f32.mrb[24].mxu0  ;;  %v3808_v49 = vpop.f32.mrb[16].mxu1 }
 0x560   :  { %v7869_v16 = vpop.f32.mrb[25].mxu0  ;;  %v4512_v51 = vmul.f32 0.35355338, %v3808_v49  ;;  %v7875_v52 = vpop.f32.mrb[17].mxu1  ;;  %v3375_v2 = vpack.c.bf16 %v8548_v62, %v8548_v62  ;;  %v3376_v5 = vpack.c.bf16 %v8551_v0, %v8551_v0  ;;  %v4511_v43 = vmul.f32 0.35355338, %v3762_v48 }
 0x561   :  { %4691 = vmax.xlane.f32.xlu0 %v4690_v14  ;;  %v3765_v30 = vpop.f32.mrb[26].mxu0  ;;  %v3811_v54 = vpop.f32.mrb[18].mxu1  ;;  %v4559_v49 = vrot.slane %v306_v33, %v9291_v28  ;;  %v4678_v48 = vsel %vm3399_vm2, %v9307_v56, -inf  ;;  %v363_v0 = vrot.slane %v9384_v61, %v9281_v26 }
 0x562   :  { %v7870_v18 = vpop.f32.mrb[27].mxu0  ;;  %v7876_v58 = vpop.f32.mrb[19].mxu1  ;;  %v9348_v60 = vadd.f32 %v4563_v47, %v4512_v51  ;;  %v4917_v15 = vsel %vm4915_vm3, %v3375_v2, 0  ;;  %v4963_v27 = vsel %vm4915_vm3, %v3376_v5, 0 }
 0x563   :  { %7968 = vmatpush3.bf16.msra.mxu1 %v4917_v15  ;;  %7974 = vmatpush3.bf16.msra.mxu0 %v4963_v27  ;;  %v9363_v38 = vpop.trf.xlu1  ;;  %v351_v58 = vrot.slane %v323_v40, %v9281_v26  ;;  %v9379_v59 = vadd.f32 %v4559_v49, %v4511_v43  ;;  %v379_v15 = vrot.slane %v363_v0, %v9281_v26 }
 0x564   :  { %7985 = vmatprep.subr.bf16.mxu0 %v8871_v42  ;;  %7979 = vmatprep.subr.bf16.mxu1 %v8871_v42 }
 0x565   :  { %v9367_v37 = vpop.trf.xlu0  ;;  %v4583_v63 = vrot.slane %v351_v58, %v9291_v28  ;;  %v355_v27 = vcombine.high %v351_v58, %v351_v58  ;;  %v4595_v36 = vrot.slane %v379_v15, %v9291_v28 }
 0x567   :  { %v3900_v4 = vpop.f32.mrb[20].mxu1  ;;  %v3854_v11 = vpop.f32.mrb[28].mxu0  ;;  %v4591_v33 = vrot.slane %v355_v27, %v9291_v28 }
 0x568   :  { %v4514_v6 = vmul.f32 0.35355338, %v3900_v4  ;;  %v7887_v9 = vpop.f32.mrb[21].mxu1  ;;  %v4513_v50 = vmul.f32 0.35355338, %v3854_v11  ;;  %v7881_v19 = vpop.f32.mrb[29].mxu0  ;;  %v4587_v4 = vrot.slane %v353_v57, %v9291_v28 }
 0x569   :  { %v3903_v8 = vpop.f32.mrb[22].mxu1  ;;  %v3857_v22 = vpop.f32.mrb[30].mxu0 }
 0x56a   :  { %v9357_v32 = vadd.f32 %v4571_v1, %v4514_v6  ;;  %v7888_v10 = vpop.f32.mrb[23].mxu1  ;;  %v7882_v34 = vpop.f32.mrb[31].mxu0  ;;  %v9359_v31 = vadd.f32 %v4567_v3, %v4513_v50  ;;  %v4693_v3 = vsel %vm3399_vm2, %v9379_v59, -inf }
 0x56b   :  { %v9386_v62 = vpop.trf.xlu0 }
 0x56f   :  { %v3992_v29 = vpop.f32.mrb[24].mxu1  ;;  %v3946_v47 = vpop.f32.mrb[32].mxu0 }
 0x570   :  { %v4516_v16 = vmul.f32 0.35355338, %v3992_v29  ;;  %v7899_v35 = vpop.f32.mrb[25].mxu1  ;;  %v4515_v14 = vmul.f32 0.35355338, %v3946_v47  ;;  %v7893_v51 = vpop.f32.mrb[33].mxu0 }
 0x571   :  { %v3995_v52 = vpop.f32.mrb[26].mxu1  ;;  %v3949_v53 = vpop.f32.mrb[34].mxu0 }
 0x572   :  { %v9372_v30 = vadd.f32 %v4579_v25, %v4516_v16  ;;  %v7900_v54 = vpop.f32.mrb[27].mxu1  ;;  %v9374_v55 = vadd.f32 %v4575_v39, %v4515_v14  ;;  %v7894_v18 = vpop.f32.mrb[35].mxu0  ;;  %v371_v25 = vcombine.high %v363_v0, %v363_v0 }
 0x574   :  { %4679 = vmax.xlane.f32.xlu1 %v4678_v48  ;;  %v393_v18 = vrot.slane %v371_v25, %v9281_v26  ;;  %v401_v48 = vcombine.high %v379_v15, %v379_v15 }
 0x576   :  { %v4599_v57 = vrot.slane %v393_v18, %v9291_v28  ;;  %v403_v27 = vcombine.high %v393_v18, %v393_v18 }
 0x577   :  { %v4038_v1 = vpop.f32.mrb[36].mxu0  ;;  %v4084_v2 = vpop.f32.mrb[28].mxu1 }
 0x578   :  { %v4517_v11 = vmul.f32 0.35355338, %v4038_v1  ;;  %v4518_v5 = vmul.f32 0.35355338, %v4084_v2  ;;  %v7911_v6 = vpop.f32.mrb[29].mxu1  ;;  %4694 = vmax.xlane.f32.xlu1 %v4693_v3  ;;  %v7905_v9 = vpop.f32.mrb[37].mxu0  ;;  %v8541_v1 = vunpack.i.l.bf16 %v9304_v46  ;;  %v8536_v2 = vunpack.i.l.bf16 %v9300_v45 }
 0x579   :  { %v4041_v50 = vpop.f32.mrb[38].mxu0  ;;  %v4087_v19 = vpop.f32.mrb[30].mxu1  ;;  %v356_v3 = vcombine.high %v9384_v61, %v9384_v61 }
 0x57a   :  { %v7906_v8 = vpop.f32.mrb[39].mxu0  ;;  %v7912_v21 = vpop.f32.mrb[31].mxu1  ;;  %v9394_v22 = vadd.f32 %v4583_v63, %v4517_v11  ;;  %v9397_v10 = vadd.f32 %v4587_v4, %v4518_v5  ;;  %v4603_v5 = vrot.slane %v401_v48, %v9291_v28 }
 0x57c   :  { %v4711_v34 = vsel %vm3399_vm2, %v9394_v22, -inf  ;;  %v4714_v43 = vsel %vm3399_vm2, %v9397_v10, -inf }
 0x57d   :  { %4712 = vmax.xlane.f32.xlu1 %v4711_v34  ;;  %v8602_v34 = vpack.i.bf16 %v8541_v1, %v8536_v2 }
 0x57f   :  { %v4130_v39 = vpop.f32.mrb[40].mxu0  ;;  %v4176_v40 = vpop.f32.mrb[32].mxu1 }
 0x580   :  { %v4519_v29 = vmul.f32 0.35355338, %v4130_v39  ;;  %v4520_v47 = vmul.f32 0.35355338, %v4176_v40  ;;  %v7923_v49 = vpop.f32.mrb[33].mxu1  ;;  %v7917_v16 = vpop.f32.mrb[41].mxu0  ;;  %v4607_v39 = vrot.slane %v403_v27, %v9291_v28 }
 0x581   :  { %v4179_v35 = vpop.f32.mrb[34].mxu1  ;;  %4715 = vmax.xlane.f32.xlu1 %v4714_v43  ;;  %v4133_v14 = vpop.f32.mrb[42].mxu0 }
 0x582   :  { %v9405_v51 = vadd.f32 %v4595_v36, %v4520_v47  ;;  %v7924_v52 = vpop.f32.mrb[35].mxu1  ;;  %v9407_v53 = vadd.f32 %v4591_v33, %v4519_v29  ;;  %v7918_v54 = vpop.f32.mrb[43].mxu0  ;;  %v370_v36 = vrot.slane %v356_v3, %v9281_v26 }
 0x584   :  { %v4717_v58 = vsel %vm3399_vm2, %v9407_v53, -inf  ;;  %v372_v40 = vcombine.high %v370_v36, %v370_v36  ;;  %v9435_v18 = vrot.slane %v370_v36, %v9281_v26 }
 0x585   :  { %4718 = vmax.xlane.f32.xlu1 %v4717_v58 }
 0x586   :  { %v9421_v33 = vpop.trf.xlu0 }
 0x587   :  { %v4222_v63 = vpop.f32.mrb[44].mxu0  ;;  %v4268_v0 = vpop.f32.mrb[36].mxu1 }
 0x588   :  { %v4521_v4 = vmul.f32 0.35355338, %v4222_v63  ;;  %v4522_v11 = vmul.f32 0.35355338, %v4268_v0  ;;  %v7935_v6 = vpop.f32.mrb[37].mxu1  ;;  %v7929_v9 = vpop.f32.mrb[45].mxu0  ;;  %v402_v0 = vcombine.high %v9435_v18, %v9435_v18 }
 0x589   :  { %v4271_v50 = vpop.f32.mrb[38].mxu1  ;;  %v4225_v19 = vpop.f32.mrb[46].mxu0 }
 0x58a   :  { %v7936_v8 = vpop.f32.mrb[39].mxu1  ;;  %v9418_v21 = vadd.f32 %v4599_v57, %v4521_v4  ;;  %v7930_v15 = vpop.f32.mrb[47].mxu0  ;;  %v9423_v25 = vadd.f32 %v4603_v5, %v4522_v11  ;;  %v400_v57 = vrot.slane %v372_v40, %v9281_v26  ;;  %v4619_v5 = vrot.slane %v402_v0, %v9291_v28 }
 0x58c   :  { %v4723_v61 = vsel %vm3399_vm2, %v9418_v21, -inf  ;;  %v4726_v16 = vsel %vm3399_vm2, %v9423_v25, -inf  ;;  %v4615_v1 = vrot.slane %v400_v57, %v9291_v28  ;;  %v404_v27 = vcombine.high %v400_v57, %v400_v57 }
 0x58d   :  { %4724 = vmax.xlane.f32.xlu1 %v4723_v61 }
 0x58e   :  { %8603 = vxpose.xlu0.b32.start.end [1/1] (short) (narrow) %v8602_v34, 8 }
 0x58f   :  { %v4314_v43 = vpop.f32.mrb[48].mxu0  ;;  %v9428_v29 = vpop.f32.mrb[40].mxu1 }
 0x590   :  { %v4523_v47 = vmul.f32 0.35355338, %v4314_v43  ;;  %v7947_v49 = vpop.f32.mrb[41].mxu1  ;;  %v7941_v35 = vpop.f32.mrb[49].mxu0  ;;  %v4623_v43 = vrot.slane %v404_v27, %v9291_v28 }
 0x591   :  { %v4363_v14 = vpop.f32.mrb[42].mxu1  ;;  %4727 = vmax.xlane.f32.xlu1 %v4726_v16  ;;  %v4317_v52 = vpop.f32.mrb[50].mxu0 }
 0x592   :  { %v9432_v54 = vadd.f32 %v4607_v39, %v4523_v47  ;;  %v7948_v58 = vpop.f32.mrb[43].mxu1  ;;  %v7942_v48 = vpop.f32.mrb[51].mxu0 }
 0x594   :  { %v4729_v63 = vsel %vm3399_vm2, %v9432_v54, -inf }
 0x595   :  { %4730 = vmax.xlane.f32.xlu1 %v4729_v63 }
 0x597   :  { %v4406_v2 = vpop.f32.mrb[52].mxu0  ;;  %v4452_v3 = vpop.f32.mrb[44].mxu1 }
 0x598   :  { %v4525_v4 = vmul.f32 0.35355338, %v4406_v2  ;;  %v4526_v11 = vmul.f32 0.35355338, %v4452_v3  ;;  %v7959_v6 = vpop.f32.mrb[45].mxu1  ;;  %v7953_v9 = vpop.f32.mrb[53].mxu0 }
 0x599   :  { %v4455_v50 = vpop.f32.mrb[46].mxu1  ;;  %v4409_v19 = vpop.f32.mrb[54].mxu0  ;;  %v4696_v2 = vsel %vm3399_vm2, %v9348_v60, -inf  ;;  %v4699_v3 = vsel %vm3399_vm2, %v9359_v31, -inf }
 0x59a   :  { %v9444_v26 = vadd.f32 %v4615_v1, %v4525_v4  ;;  %v7960_v8 = vpop.f32.mrb[47].mxu1  ;;  %v7954_v15 = vpop.f32.mrb[55].mxu0  ;;  %v9446_v36 = vadd.f32 %v4619_v5, %v4526_v11  ;;  %v4702_v11 = vsel %vm3399_vm2, %v9357_v32, -inf  ;;  %v4705_v50 = vsel %vm3399_vm2, %v9374_v55, -inf }
 0x59b   :  { %v4674_v34 = vpop.xlane.xlu1 %4673  ;;  %v4611_v15 = vrot.slane %v9435_v18, %v9291_v28  ;;  %v4720_v28 = vsel %vm3399_vm2, %v9405_v51, -inf }
 0x59c   :  { %v4744_v61 = vsub.f32 %v9298_v44, %v4674_v34  ;;  %v4735_v39 = vsel %vm3399_vm2, %v9444_v26, -inf  ;;  %v4738_v35 = vsel %vm3399_vm2, %v9446_v36, -inf  ;;  %v8555_v44 = vunpack.i.l.bf16 %v9367_v37 }
 0x59d   :  { %4736 = vmax.xlane.f32.xlu1 %v4735_v39 }
 0x59e   :  { %v4768_v40 = vmul.f32 1.442695, %v4744_v61  ;;  %v3377_v57 = vpack.c.bf16 %v8555_v44, %v8555_v44  ;;  %v4524_v61 = vmul.f32 0.35355338, %v9428_v29 }
 0x59f   :  { %v4498_v47 = vpop.f32.mrb[56].mxu0 }
 0x5a0   :  { %8757 = vpow2.f32 %v4768_v40  ;;  %v4527_v49 = vmul.f32 0.35355338, %v4498_v47  ;;  %v7965_v16 = vpop.f32.mrb[57].mxu0  ;;  %v5009_v1 = vsel %vm4915_vm3, %v3377_v57, 0  ;;  %v8558_v40 = vunpack.i.h.bf16 %v9367_v37 }
 0x5a1   :  { %4739 = vmax.xlane.f32.xlu1 %v4738_v35  ;;  %v4501_v14 = vpop.f32.mrb[58].mxu0  ;;  %v9492_v47 = vadd.f32 %v4611_v15, %v4524_v61  ;;  %v8529_v35 = vunpack.i.h.bf16 %v9286_v13  ;;  %v8539_v15 = vunpack.i.h.bf16 %v9300_v45 }
 0x5a2   :  { %v9454_v52 = vadd.f32 %v4623_v43, %v4527_v49  ;;  %v7966_v58 = vpop.f32.mrb[59].mxu0  ;;  %v8565_v49 = vunpack.i.h.bf16 %v9363_v38 }
 0x5a3   :  { %v4732_v29 = vsel %vm3399_vm2, %v9492_v47, -inf }
 0x5a4   :  { %v4741_v48 = vsel %vm3399_vm2, %v9454_v52, -inf  ;;  %v3380_v14 = vpack.c.bf16 %v8565_v49, %v8565_v49 }
 0x5a5   :  { %4742 = vmax.xlane.f32.xlu1 %v4741_v48 }
 0x5a6   :  { %v5147_v48 = vsel %vm4915_vm3, %v3380_v14, 0 }
 0x5aa   :  { %v9459_v63 = vpop.eup %8757 }
 0x5ab   :  { %v4888_v0 = vpack.c.bf16 %v9459_v63, %v9459_v63 }
 0x5ad   :  { %7970 = vmatmul.mubr.msk.bf16.vlgmr.msra.gmra.mrb[48].mxu1 %vm3399_vm2, %v4888_v0 }
 0x5ae   :  { %7980 = vmatpush3.bf16.msra.mxu1 %v5009_v1  ;;  %7981 = vmatprep.mubr.msk.bf16.mxu1 %vm8872_vm1, %v8871_v42 }
 0x5af   :  { %7991 = vmatprep.subr.bf16.mxu1 %v8871_v42 }
 0x5bb   :  { %4697 = vmax.xlane.f32.xlu0 %v4696_v2  ;;  %v8572_v2 = vunpack.i.h.bf16 %v9386_v62 }
 0x5bf   :  { %4700 = vmax.xlane.f32.xlu0 %v4699_v3  ;;  %v3382_v3 = vpack.c.bf16 %v8572_v2, %v8572_v2 }
 0x5c0   :  { %v4677_v5 = vpop.xlane.xlu0 %4676 }
 0x5c1   :  { %v9472_v4 = vpop.trf.xlu1  ;;  %v4745_v6 = vsub.f32 %v9314_v7, %v4677_v5  ;;  %v4708_v7 = vsel %vm3399_vm2, %v9372_v30, -inf }
 0x5c3   :  { %4703 = vmax.xlane.f32.xlu0 %v4702_v11  ;;  %v4770_v19 = vmul.f32 1.442695, %v4745_v6  ;;  %v5239_v6 = vsel %vm4915_vm3, %v3382_v3, 0 }
 0x5c4   :  { %v4683_v8 = vpop.xlane.xlu0 %4682 }
 0x5c5   :  { %v9477_v9 = vpop.trf.xlu1  ;;  %8759 = vpow2.f32 %v4770_v19  ;;  %v4747_v27 = vsub.f32 %v9316_v20, %v4683_v8  ;;  %v3378_v20 = vpack.c.bf16 %v8558_v40, %v8558_v40  ;;  %v8544_v40 = vunpack.i.h.bf16 %v9304_v46 }
 0x5c7   :  { %4706 = vmax.xlane.f32.xlu0 %v4705_v50  ;;  %v4774_v39 = vmul.f32 1.442695, %v4747_v27  ;;  %v5055_v37 = vsel %vm4915_vm3, %v3378_v20, 0  ;;  %v8534_v50 = vunpack.i.h.bf16 %v9294_v24  ;;  %v8576_v20 = vunpack.i.l.bf16 %v9472_v4 }
 0x5c8   :  { %v4686_v13 = vpop.xlane.xlu0 %4685 }
 0x5c9   :  { %v9484_v34 = vpop.trf.xlu1  ;;  %8761 = vpow2.f32 %v4774_v39  ;;  %v4748_v27 = vsub.f32 %v9323_v23, %v4686_v13  ;;  %v8581_v23 = vunpack.i.l.bf16 %v9477_v9 }
 0x5cb   :  { %4709 = vmax.xlane.f32.xlu0 %v4708_v7  ;;  %v4776_v24 = vmul.f32 1.442695, %v4748_v27  ;;  %v8589_v27 = vunpack.i.h.bf16 %v9484_v34 }
 0x5cd   :  { %v9490_v43 = vpop.trf.xlu1 }
 0x5ce   :  { %v8591_v13 = vunpack.i.l.bf16 %v9490_v43 }
 0x5cf   :  { %4721 = vmax.xlane.f32.xlu0 %v4720_v28  ;;  %v8760_v18 = vpop.eup %8759 }
 0x5d0   :  { %v4889_v16 = vpack.c.bf16 %v8760_v18, %v8760_v18 }
 0x5d2   :  { %7976 = vmatmul.mubr.msk.bf16.vlgmr.msra.gmra.mrb[60].mxu0 %vm3399_vm2, %v4889_v16 }
 0x5d3   :  { %4733 = vmax.xlane.f32.xlu0 %v4732_v29  ;;  %7986 = vmatpush3.bf16.msra.mxu0 %v5055_v37  ;;  %v9505_v58 = vpop.eup %8761  ;;  %v8586_v37 = vunpack.i.l.bf16 %v9484_v34 }
 0x5d4   :  { %7987 = vmatprep.mubr.msk.bf16.mxu0 %vm8872_vm1, %v8871_v42  ;;  %7997 = vmatprep.subr.bf16.mxu0 %v8871_v42  ;;  %v4891_v44 = vpack.c.bf16 %v9505_v58, %v9505_v58 }
 0x5d8   :  { %2991 = vxpose.xlu1.b32.start.end [1/1] (short) (narrow) %v8529_v35, 8 }
 0x5da   :  { %7988 = vmatmul.mubr.msk.bf16.vlgmr.msra.gmra.mrb[64].mxu0 %vm3399_vm2, %v4891_v44 }
 0x5db   :  { %7998 = vmatpush3.bf16.msra.mxu0 %v5147_v48  ;;  %7999 = vmatprep.mubr.msk.bf16.mxu0 %vm8872_vm1, %v8871_v42 }
 0x5dc   :  { %8009 = vmatprep.subr.bf16.mxu0 %v8871_v42 }
 0x5ea   :  { %v4689_v57 = vpop.xlane.xlu0 %4688 }
 0x5eb   :  { %v4749_v0 = vsub.f32 %v9338_v12, %v4689_v57  ;;  %v4819_v12 = vsel %vm3399_vm2, %v8760_v18, 0.0  ;;  %v8601_v18 = vunpack.i.h.bf16 %v9421_v33  ;;  %v4825_v57 = vsel %vm3399_vm2, %v9505_v58, 0.0 }
 0x5ed   :  { %v4778_v1 = vmul.f32 1.442695, %v4749_v0  ;;  %v3384_v44 = vpack.c.bf16 %v8601_v18, %v8601_v18 }
 0x5ee   :  { %v4692_v29 = vpop.xlane.xlu0 %4691 }
 0x5ef   :  { %8763 = vpow2.f32 %v4778_v1  ;;  %v4750_v45 = vsub.f32 %v9342_v41, %v4692_v29  ;;  %v5331_v1 = vsel %vm4915_vm3, %v3384_v44, 0 }
 0x5f1   :  { %v4780_v16 = vmul.f32 1.442695, %v4750_v45 }
 0x5f9   :  { %v9516_v11 = vpop.eup %8763 }
 0x5fa   :  { %v4893_v5 = vpack.c.bf16 %v9516_v11, %v9516_v11 }
 0x5fc   :  { %8000 = vmatmul.mubr.msk.bf16.vlgmr.msra.gmra.mrb[68].mxu0 %vm3399_vm2, %v4893_v5 }
 0x5fd   :  { %8010 = vmatpush3.bf16.msra.mxu0 %v5239_v6  ;;  %8011 = vmatprep.mubr.msk.bf16.mxu0 %vm8872_vm1, %v8871_v42  ;;  %v8598_v6 = vunpack.i.l.bf16 %v9421_v33  ;;  %v8584_v33 = vunpack.i.h.bf16 %v9477_v9 }
 0x5fe   :  { %8021 = vmatprep.subr.bf16.mxu0 %v8871_v42 }
 0x5ff   :  { %4820 = vadd.xlane.f32.xlu1 %v4819_v12  ;;  %v8579_v12 = vunpack.i.h.bf16 %v9472_v4  ;;  %v8594_v4 = vunpack.i.h.bf16 %v9490_v43 }
 0x600   :  { %3023 = vxpose.xlu0.b32.start.end [1/1] (short) (narrow) %v8534_v50, 8  ;;  %v3383_v50 = vpack.c.bf16 %v8598_v6, %v8598_v6 }
 0x601   :  { %v4680_v19 = vpop.xlane.xlu1 %4679 }
 0x602   :  { %v4746_v8 = vsub.f32 %v9307_v56, %v4680_v19  ;;  %v8562_v56 = vunpack.i.l.bf16 %v9363_v38  ;;  %v8569_v38 = vunpack.i.l.bf16 %v9386_v62 }
 0x604   :  { %v4772_v61 = vmul.f32 1.442695, %v4746_v8  ;;  %3055 = vxpose.xlu0.b32.start.end [1/1] (short) (narrow) %v8539_v15, 8  ;;  %v3379_v46 = vpack.c.bf16 %v8562_v56, %v8562_v56  ;;  %v3381_v62 = vpack.c.bf16 %v8569_v38, %v8569_v38  ;;  %v5285_v15 = vsel %vm4915_vm3, %v3383_v50, 0 }
 0x605   :  { %v4695_v7 = vpop.xlane.xlu1 %4694 }
 0x606   :  { %8765 = vpow2.f32 %v4772_v61  ;;  %v4751_v39 = vsub.f32 %v9379_v59, %v4695_v7  ;;  %v5101_v41 = vsel %vm4915_vm3, %v3379_v46, 0  ;;  %v5193_v5 = vsel %vm4915_vm3, %v3381_v62, 0 }
 0x608   :  { %v4782_v28 = vmul.f32 1.442695, %v4751_v39  ;;  %3087 = vxpose.xlu0.b32.start.end [1/1] (short) (narrow) %v8544_v40, 8 }
 0x60a   :  { %8767 = vpow2.f32 %v4782_v28  ;;  %v4713_v61 = vpop.xlane.xlu1 %4712 }
 0x60b   :  { %8769 = vpow2.f32 %v4776_v24 }
 0x60c   :  { %3119 = vxpose.xlu0.b32.start.end [1/1] (short) (narrow) %v8576_v20, 8  ;;  %8771 = vpow2.f32 %v4780_v16 }
 0x60e   :  { %v9537_v59 = vpop.trf.xlu0  ;;  %v4716_v9 = vpop.xlane.xlu1 %4715 }
 0x60f   :  { %v8605_v18 = vunpack.i.l.bf16 %v9537_v59 }
 0x610   :  { %v8766_v49 = vpop.eup %8765  ;;  %3151 = vxpose.xlu0.b32.start.end [1/1] (short) (narrow) %v8581_v23, 8 }
 0x611   :  { %v4822_v35 = vsel %vm3399_vm2, %v8766_v49, 0.0  ;;  %v4890_v14 = vpack.c.bf16 %v8766_v49, %v8766_v49 }
 0x612   :  { %4823 = vadd.xlane.f32.xlu1 %v4822_v35  ;;  %v9575_v7 = vpop.xlane.xlu1 %4718 }
 0x613   :  { %7982 = vmatmul.mubr.msk.bf16.vlgmr.msra.gmra.mrb[52].mxu1 %vm3399_vm2, %v4890_v14  ;;  %v3385_v14 = vpack.c.bf16 %v8605_v18, %v8605_v18 }
 0x614   :  { %v9544_v48 = vpop.eup %8767  ;;  %7992 = vmatpush3.bf16.msra.mxu1 %v5101_v41  ;;  %3183 = vxpose.xlu0.b32.start.end [1/1] (short) (narrow) %v8586_v37, 8  ;;  %v8608_v37 = vunpack.i.h.bf16 %v9537_v59  ;;  %v4757_v41 = vsub.f32 %v9394_v22, %v4713_v61 }
 0x615   :  { %v4895_v0 = vpack.c.bf16 %v9544_v48, %v9544_v48  ;;  %7993 = vmatprep.mubr.msk.bf16.mxu1 %vm8872_vm1, %v8871_v42  ;;  %8003 = vmatprep.subr.bf16.mxu1 %v8871_v42  ;;  %v8770_v2 = vpop.eup %8769  ;;  %v4837_v61 = vsel %vm3399_vm2, %v9544_v48, 0.0 }
 0x616   :  { %4826 = vadd.xlane.f32.xlu1 %v4825_v57  ;;  %v4828_v3 = vsel %vm3399_vm2, %v8770_v2, 0.0  ;;  %v4892_v58 = vpack.c.bf16 %v8770_v2, %v8770_v2  ;;  %v8772_v19 = vpop.eup %8771  ;;  %v3386_v62 = vpack.c.bf16 %v8608_v37, %v8608_v37  ;;  %v4758_v2 = vsub.f32 %v9397_v10, %v4716_v9 }
 0x617   :  { %8012 = vmatmul.mubr.msk.bf16.vlgmr.msra.gmra.mrb[72].mxu0 %vm3399_vm2, %v4895_v0  ;;  %v4894_v8 = vpack.c.bf16 %v8772_v19, %v8772_v19 }
 0x618   :  { %3215 = vxpose.xlu0.b32.start.end [1/1] (short) (narrow) %v8591_v13, 8  ;;  %8022 = vmatpush3.bf16.msra.mxu0 %v5331_v1  ;;  %v5423_v10 = vsel %vm4915_vm3, %v3386_v62, 0 }
 0x619   :  { %8023 = vmatprep.mubr.msk.bf16.mxu0 %vm8872_vm1, %v8871_v42  ;;  %8033 = vmatprep.subr.bf16.mxu0 %v8871_v42 }
 0x61a   :  { %4829 = vadd.xlane.f32.xlu1 %v4828_v3  ;;  %v9577_v39 = vpop.xlane.xlu1 %4724  ;;  %v4794_v3 = vmul.f32 1.442695, %v4757_v41 }
 0x61b   :  { %7994 = vmatmul.mubr.msk.bf16.vlgmr.msra.gmra.mrb[56].mxu1 %vm3399_vm2, %v4892_v58 }
 0x61c   :  { %3247 = vxpose.xlu0.b32.start.end [1/1] (short) (narrow) %v8579_v12, 8  ;;  %8004 = vmatpush3.bf16.msra.mxu1 %v5193_v5  ;;  %v4834_v5 = vsel %vm3399_vm2, %v8772_v19, 0.0  ;;  %v4759_v19 = vsub.f32 %v9407_v53, %v9575_v7 }
 0x61d   :  { %8005 = vmatprep.mubr.msk.bf16.mxu1 %vm8872_vm1, %v8871_v42  ;;  %8015 = vmatprep.subr.bf16.mxu1 %v8871_v42 }
 0x61e   :  { %v9579_v40 = vpop.xlane.xlu1 %4727 }
 0x620   :  { %3279 = vxpose.xlu0.b32.start.end [1/1] (short) (narrow) %v8584_v33, 8 }
 0x622   :  { %v9581_v34 = vpop.xlane.xlu1 %4730 }
 0x623   :  { %8006 = vmatmul.mubr.msk.bf16.vlgmr.msra.gmra.mrb[60].mxu1 %vm3399_vm2, %v4894_v8 }
 0x624   :  { %3311 = vxpose.xlu0.b32.start.end [1/1] (short) (narrow) %v8589_v27, 8  ;;  %8016 = vmatpush3.bf16.msra.mxu1 %v5285_v15  ;;  %v4762_v27 = vsub.f32 %v9423_v25, %v9579_v40  ;;  %v4798_v25 = vmul.f32 1.442695, %v4759_v19 }
 0x625   :  { %8017 = vmatprep.mubr.msk.bf16.mxu1 %vm8872_vm1, %v8871_v42  ;;  %8027 = vmatprep.subr.bf16.mxu1 %v8871_v42 }
 0x626   :  { %v4804_v48 = vmul.f32 1.442695, %v4762_v27 }
 0x628   :  { %3343 = vxpose.xlu0.b32.start.end [1/1] (short) (narrow) %v8594_v4, 8 }
 0x62a   :  { %v9583_v28 = vpop.xlane.xlu1 %4736 }
 0x62e   :  { %v9587_v45 = vpop.xlane.xlu1 %4739 }
 0x632   :  { %v9594_v38 = vpop.xlane.xlu1 %4742 }
 0x648   :  { %v4698_v24 = vpop.xlane.xlu0 %4697 }
 0x649   :  { %v4752_v20 = vsub.f32 %v9348_v60, %v4698_v24  ;;  %v4816_v60 = vsel %vm3399_vm2, %v9459_v63, 0.0  ;;  %v5377_v63 = vsel %vm4915_vm3, %v3385_v14, 0  ;;  %v4767_v14 = vsub.f32 %v9454_v52, %v9594_v38 }
 0x64b   :  { %v4784_v29 = vmul.f32 1.442695, %v4752_v20  ;;  %v4814_v41 = vmul.f32 1.442695, %v4767_v14 }
 0x64c   :  { %v4701_v56 = vpop.xlane.xlu0 %4700 }
 0x64d   :  { %8773 = vpow2.f32 %v4784_v29  ;;  %v4753_v43 = vsub.f32 %v9359_v31, %v4701_v56 }
 0x64f   :  { %v4786_v23 = vmul.f32 1.442695, %v4753_v43 }
 0x650   :  { %v4704_v46 = vpop.xlane.xlu0 %4703 }
 0x651   :  { %8775 = vpow2.f32 %v4786_v23  ;;  %v4754_v49 = vsub.f32 %v9357_v32, %v4704_v46  ;;  %v4831_v32 = vsel %vm3399_vm2, %v9516_v11, 0.0  ;;  %v4761_v11 = vsub.f32 %v9418_v21, %v9577_v39 }
 0x652   :  { %v4796_v21 = vmul.f32 1.442695, %v4758_v2  ;;  %v4763_v39 = vsub.f32 %v9432_v54, %v9581_v34  ;;  %v4765_v34 = vsub.f32 %v9444_v26, %v9583_v28 }
 0x653   :  { %v4788_v16 = vmul.f32 1.442695, %v4754_v49  ;;  %v4802_v15 = vmul.f32 1.442695, %v4761_v11 }
 0x654   :  { %v4707_v35 = vpop.xlane.xlu0 %4706  ;;  %v4806_v56 = vmul.f32 1.442695, %v4763_v39  ;;  %v4810_v49 = vmul.f32 1.442695, %v4765_v34 }
 0x655   :  { %8777 = vpow2.f32 %v4788_v16  ;;  %v4755_v31 = vsub.f32 %v9374_v55, %v4707_v35  ;;  %4817 = vadd.xlane.f32.xlu0 %v4816_v60  ;;  %v4766_v16 = vsub.f32 %v9446_v36, %v9587_v45 }
 0x657   :  { %v8774_v44 = vpop.eup %8773  ;;  %v4790_v13 = vmul.f32 1.442695, %v4755_v31  ;;  %v4812_v60 = vmul.f32 1.442695, %v4766_v16 }
 0x658   :  { %v4710_v57 = vpop.xlane.xlu0 %4709  ;;  %v4840_v59 = vsel %vm3399_vm2, %v8774_v44, 0.0  ;;  %v4896_v0 = vpack.c.bf16 %v8774_v44, %v8774_v44  ;;  %v3007_v55 = vpop.trf.xlu1 }
 0x659   :  { %8779 = vpow2.f32 %v4790_v13  ;;  %v4756_v1 = vsub.f32 %v9372_v30, %v4710_v57  ;;  %4832 = vadd.xlane.f32.xlu0 %v4831_v32  ;;  %4841 = vadd.xlane.f32.xlu1 %v4840_v59  ;;  %v3387_v50 = vpack.c.bf16 %v3007_v55, %v3007_v55 }
 0x65a   :  { %8018 = vmatmul.mubr.msk.bf16.vlgmr.msra.gmra.mrb[64].mxu1 %vm3399_vm2, %v4896_v0 }
 0x65b   :  { %v8776_v22 = vpop.eup %8775  ;;  %v4792_v58 = vmul.f32 1.442695, %v4756_v1  ;;  %8028 = vmatpush3.bf16.msra.mxu1 %v5377_v63  ;;  %8029 = vmatprep.mubr.msk.bf16.mxu1 %vm8872_vm1, %v8871_v42  ;;  %v5469_v7 = vsel %vm4915_vm3, %v3387_v50, 0 }
 0x65c   :  { %v4722_v30 = vpop.xlane.xlu0 %4721  ;;  %v4843_v6 = vsel %vm3399_vm2, %v8776_v22, 0.0  ;;  %v4897_v12 = vpack.c.bf16 %v8776_v22, %v8776_v22  ;;  %8039 = vmatprep.subr.bf16.mxu1 %v8871_v42 }
 0x65d   :  { %8781 = vpow2.f32 %v4792_v58  ;;  %v4760_v33 = vsub.f32 %v9405_v51, %v4722_v30  ;;  %4835 = vadd.xlane.f32.xlu0 %v4834_v5  ;;  %4844 = vadd.xlane.f32.xlu1 %v4843_v6 }
 0x65e   :  { %8024 = vmatmul.mubr.msk.bf16.vlgmr.msra.gmra.mrb[76].mxu0 %vm3399_vm2, %v4897_v12  ;;  %8783 = vpow2.f32 %v4794_v3 }
 0x65f   :  { %v8778_v8 = vpop.eup %8777  ;;  %v4800_v4 = vmul.f32 1.442695, %v4760_v33  ;;  %8034 = vmatpush3.bf16.msra.mxu0 %v5423_v10  ;;  %8035 = vmatprep.mubr.msk.bf16.mxu0 %vm8872_vm1, %v8871_v42 }
 0x660   :  { %v4734_v51 = vpop.xlane.xlu0 %4733  ;;  %v4846_v9 = vsel %vm3399_vm2, %v8778_v8, 0.0  ;;  %v4898_v53 = vpack.c.bf16 %v8778_v8, %v8778_v8  ;;  %8045 = vmatprep.subr.bf16.mxu0 %v8871_v42 }
 0x661   :  { %8785 = vpow2.f32 %v4800_v4  ;;  %4838 = vadd.xlane.f32.xlu0 %v4837_v61  ;;  %4847 = vadd.xlane.f32.xlu1 %v4846_v9  ;;  %v4764_v24 = vsub.f32 %v9492_v47, %v4734_v51 }
 0x662   :  { %8787 = vpow2.f32 %v4796_v21  ;;  %8030 = vmatmul.mubr.msk.bf16.vlgmr.msra.gmra.mrb[68].mxu1 %vm3399_vm2, %v4898_v53 }
 0x663   :  { %v8780_v40 = vpop.eup %8779  ;;  %8789 = vpow2.f32 %v4802_v15  ;;  %8040 = vmatpush3.bf16.msra.mxu1 %v5469_v7  ;;  %8041 = vmatprep.mubr.msk.bf16.mxu1 %vm8872_vm1, %v8871_v42  ;;  %v4808_v47 = vmul.f32 1.442695, %v4764_v24 }
 0x664   :  { %v4849_v20 = vsel %vm3399_vm2, %v8780_v40, 0.0  ;;  %v4899_v29 = vpack.c.bf16 %v8780_v40, %v8780_v40  ;;  %8051 = vmatprep.subr.bf16.mxu1 %v8871_v42  ;;  %8791 = vpow2.f32 %v4798_v25 }
 0x665   :  { %4850 = vadd.xlane.f32.xlu1 %v4849_v20  ;;  %8793 = vpow2.f32 %v4804_v48 }
 0x666   :  { %8036 = vmatmul.mubr.msk.bf16.vlgmr.msra.gmra.mrb[80].mxu0 %vm3399_vm2, %v4899_v29  ;;  %8795 = vpow2.f32 %v4806_v56 }
 0x667   :  { %v8782_v54 = vpop.eup %8781  ;;  %8047 = vmatprep.mubr.msk.bf16.mxu0 %vm8872_vm1, %v8871_v42  ;;  %8797 = vpow2.f32 %v4808_v47 }
 0x668   :  { %v4852_v43 = vsel %vm3399_vm2, %v8782_v54, 0.0  ;;  %v4900_v23 = vpack.c.bf16 %v8782_v54, %v8782_v54  ;;  %v8784_v18 = vpop.eup %8783  ;;  %8799 = vpow2.f32 %v4810_v49 }
 0x669   :  { %4853 = vadd.xlane.f32.xlu0 %v4852_v43  ;;  %v4855_v28 = vsel %vm3399_vm2, %v8784_v18, 0.0  ;;  %8801 = vpow2.f32 %v4812_v60  ;;  %v4901_v50 = vpack.c.bf16 %v8784_v18, %v8784_v18 }
 0x66a   :  { %8042 = vmatmul.mubr.msk.bf16.vlgmr.msra.gmra.mrb[72].mxu1 %vm3399_vm2, %v4900_v23  ;;  %8803 = vpow2.f32 %v4814_v41 }
 0x66b   :  { %v9641_v46 = vpop.eup %8785  ;;  %8053 = vmatprep.mubr.msk.bf16.mxu1 %vm8872_vm1, %v8871_v42 }
 0x66c   :  { %v8788_v26 = vpop.eup %8787  ;;  %v4864_v37 = vsel %vm3399_vm2, %v9641_v46, 0.0  ;;  %v4904_v7 = vpack.c.bf16 %v9641_v46, %v9641_v46 }
 0x66d   :  { %v9650_v35 = vpop.eup %8789  ;;  %4856 = vadd.xlane.f32.xlu0 %v4855_v28  ;;  %4865 = vadd.xlane.f32.xlu1 %v4864_v37  ;;  %v4858_v45 = vsel %vm3399_vm2, %v8788_v26, 0.0  ;;  %v4902_v8 = vpack.c.bf16 %v8788_v26, %v8788_v26 }
 0x66e   :  { %v8792_v36 = vpop.eup %8791  ;;  %v4867_v31 = vsel %vm3399_vm2, %v9650_v35, 0.0  ;;  %v4905_v48 = vpack.c.bf16 %v9650_v35, %v9650_v35 }
 0x66f   :  { %v9657_v44 = vpop.eup %8793  ;;  %v4861_v32 = vsel %vm3399_vm2, %v8792_v36, 0.0  ;;  %v4903_v51 = vpack.c.bf16 %v8792_v36, %v8792_v36 }
 0x670   :  { %v9659_v13 = vpop.eup %8795  ;;  %v4870_v57 = vsel %vm3399_vm2, %v9657_v44, 0.0  ;;  %v4906_v56 = vpack.c.bf16 %v9657_v44, %v9657_v44 }
 0x671   :  { %4859 = vadd.xlane.f32.xlu0 %v4858_v45  ;;  %4868 = vadd.xlane.f32.xlu1 %v4867_v31  ;;  %v9664_v52 = vpop.eup %8797  ;;  %v4873_v59 = vsel %vm3399_vm2, %v9659_v13, 0.0  ;;  %v4907_v43 = vpack.c.bf16 %v9659_v13, %v9659_v13 }
 0x672   :  { %v4876_v38 = vsel %vm3399_vm2, %v9664_v52, 0.0  ;;  %v9670_v0 = vpop.eup %8799  ;;  %v4908_v49 = vpack.c.bf16 %v9664_v52, %v9664_v52 }
 0x673   :  { %v4879_v63 = vsel %vm3399_vm2, %v9670_v0, 0.0  ;;  %v9674_v62 = vpop.eup %8801  ;;  %v4909_v37 = vpack.c.bf16 %v9670_v0, %v9670_v0 }
 0x674   :  { %v4882_v2 = vsel %vm3399_vm2, %v9674_v62, 0.0  ;;  %v9680_v22 = vpop.eup %8803  ;;  %v4910_v45 = vpack.c.bf16 %v9674_v62, %v9674_v62 }
 0x675   :  { %4862 = vadd.xlane.f32.xlu0 %v4861_v32  ;;  %4871 = vadd.xlane.f32.xlu1 %v4870_v57  ;;  %v4885_v12 = vsel %vm3399_vm2, %v9680_v22, 0.0  ;;  %v4911_v32 = vpack.c.bf16 %v9680_v22, %v9680_v22 }
 0x679   :  { %4877 = vadd.xlane.f32.xlu0 %v4876_v38  ;;  %4874 = vadd.xlane.f32.xlu1 %v4873_v59 }
 0x67d   :  { %4880 = vadd.xlane.f32.xlu0 %v4879_v63 }
 0x680   :  { %v9676_v1 = vpop.f32.mrb[48].mxu1  ;;  %v3039_v55 = vpop.trf.xlu0 }
 0x681   :  { %v3388_v3 = vpack.c.bf16 %v3039_v55, %v3039_v55  ;;  %v7971_v11 = vpop.f32.mrb[49].mxu1  ;;  %4883 = vadd.xlane.f32.xlu0 %v4882_v2 }
 0x682   :  { %v4956_v58 = vpop.f32.mrb[50].mxu1 }
 0x683   :  { %v5515_v5 = vsel %vm4915_vm3, %v3388_v3, 0  ;;  %v7972_v30 = vpop.f32.mrb[51].mxu1 }
 0x684   :  { %8046 = vmatpush3.bf16.msra.mxu0 %v5515_v5  ;;  %v3071_v6 = vpop.trf.xlu0 }
 0x685   :  { %v3389_v10 = vpack.c.bf16 %v3071_v6, %v3071_v6  ;;  %4886 = vadd.xlane.f32.xlu0 %v4885_v12  ;;  %8057 = vmatprep.subr.bf16.mxu0 %v8871_v42 }
 0x687   :  { %v5561_v33 = vsel %vm4915_vm3, %v3389_v10, 0  ;;  %8048 = vmatmul.mubr.msk.bf16.vlgmr.msra.gmra.mrb[84].mxu0 %vm3399_vm2, %v4901_v50 }
 0x688   :  { %v3103_v21 = vpop.trf.xlu0  ;;  %8052 = vmatpush3.bf16.msra.mxu1 %v5561_v33  ;;  %8059 = vmatprep.mubr.msk.bf16.mxu0 %vm8872_vm1, %v8871_v42 }
 0x689   :  { %v3390_v19 = vpack.c.bf16 %v3103_v21, %v3103_v21  ;;  %8063 = vmatprep.subr.bf16.mxu1 %v8871_v42 }
 0x68b   :  { %v5607_v15 = vsel %vm4915_vm3, %v3390_v19, 0  ;;  %8054 = vmatmul.mubr.msk.bf16.vlgmr.msra.gmra.mrb[76].mxu1 %vm3399_vm2, %v4902_v8 }
 0x68c   :  { %v3135_v27 = vpop.trf.xlu0  ;;  %8058 = vmatpush3.bf16.msra.mxu0 %v5607_v15  ;;  %8065 = vmatprep.mubr.msk.bf16.mxu1 %vm8872_vm1, %v8871_v42  ;;  %v4821_v62 = vpop.xlane.xlu1 %4820 }
 0x68d   :  { %v3391_v4 = vpack.c.bf16 %v3135_v27, %v3135_v27  ;;  %8069 = vmatprep.subr.bf16.mxu0 %v8871_v42 }
 0x68f   :  { %v5653_v61 = vsel %vm4915_vm3, %v3391_v4, 0  ;;  %8060 = vmatmul.mubr.msk.bf16.vlgmr.msra.gmra.mrb[88].mxu0 %vm3399_vm2, %v4903_v51 }
 0x690   :  { %v3167_v9 = vpop.trf.xlu0  ;;  %8064 = vmatpush3.bf16.msra.mxu1 %v5653_v61  ;;  %8071 = vmatprep.mubr.msk.bf16.mxu0 %vm8872_vm1, %v8871_v42 }
 0x691   :  { %v3392_v53 = vpack.c.bf16 %v3167_v9, %v3167_v9  ;;  %8075 = vmatprep.subr.bf16.mxu1 %v8871_v42 }
 0x693   :  { %v5699_v25 = vsel %vm4915_vm3, %v3392_v53, 0  ;;  %8066 = vmatmul.mubr.msk.bf16.vlgmr.msra.gmra.mrb[80].mxu1 %vm3399_vm2, %v4904_v7 }
 0x694   :  { %v3199_v39 = vpop.trf.xlu0  ;;  %8070 = vmatpush3.bf16.msra.mxu0 %v5699_v25  ;;  %8077 = vmatprep.mubr.msk.bf16.mxu1 %vm8872_vm1, %v8871_v42 }
 0x695   :  { %v3393_v40 = vpack.c.bf16 %v3199_v39, %v3199_v39  ;;  %8081 = vmatprep.subr.bf16.mxu0 %v8871_v42 }
 0x697   :  { %v5745_v24 = vsel %vm4915_vm3, %v3393_v40, 0  ;;  %8072 = vmatmul.mubr.msk.bf16.vlgmr.msra.gmra.mrb[92].mxu0 %vm3399_vm2, %v4905_v48 }
 0x698   :  { %v3231_v20 = vpop.trf.xlu0  ;;  %8076 = vmatpush3.bf16.msra.mxu1 %v5745_v24  ;;  %8083 = vmatprep.mubr.msk.bf16.mxu0 %vm8872_vm1, %v8871_v42 }
 0x699   :  { %v3394_v29 = vpack.c.bf16 %v3231_v20, %v3231_v20  ;;  %8087 = vmatprep.subr.bf16.mxu1 %v8871_v42 }
 0x69b   :  { %v5791_v54 = vsel %vm4915_vm3, %v3394_v29, 0  ;;  %8078 = vmatmul.mubr.msk.bf16.vlgmr.msra.gmra.mrb[84].mxu1 %vm3399_vm2, %v4906_v56 }
 0x69c   :  { %v3263_v34 = vpop.trf.xlu0  ;;  %8082 = vmatpush3.bf16.msra.mxu0 %v5791_v54  ;;  %8089 = vmatprep.mubr.msk.bf16.mxu1 %vm8872_vm1, %v8871_v42 }
 0x69d   :  { %v3395_v47 = vpack.c.bf16 %v3263_v34, %v3263_v34  ;;  %8093 = vmatprep.subr.bf16.mxu0 %v8871_v42 }
 0x69f   :  { %v5837_v23 = vsel %vm4915_vm3, %v3395_v47, 0  ;;  %8084 = vmatmul.mubr.msk.bf16.vlgmr.msra.gmra.mrb[96].mxu0 %vm3399_vm2, %v4907_v43  ;;  %v4824_v3 = vpop.xlane.xlu1 %4823 }
 0x6a0   :  { %v3295_v18 = vpop.trf.xlu0  ;;  %8088 = vmatpush3.bf16.msra.mxu1 %v5837_v23  ;;  %8095 = vmatprep.mubr.msk.bf16.mxu0 %vm8872_vm1, %v8871_v42 }
 0x6a1   :  { %v3396_v46 = vpack.c.bf16 %v3295_v18, %v3295_v18  ;;  %8099 = vmatprep.subr.bf16.mxu1 %v8871_v42 }
 0x6a3   :  { %v5883_v16 = vsel %vm4915_vm3, %v3396_v46, 0  ;;  %8090 = vmatmul.mubr.msk.bf16.vlgmr.msra.gmra.mrb[88].mxu1 %vm3399_vm2, %v4908_v49  ;;  %v4827_v11 = vpop.xlane.xlu1 %4826 }
 0x6a4   :  { %v3327_v26 = vpop.trf.xlu0  ;;  %8094 = vmatpush3.bf16.msra.mxu0 %v5883_v16  ;;  %8101 = vmatprep.mubr.msk.bf16.mxu1 %vm8872_vm1, %v8871_v42 }
 0x6a5   :  { %v3397_v28 = vpack.c.bf16 %v3327_v26, %v3327_v26  ;;  %8105 = vmatprep.subr.bf16.mxu0 %v8871_v42  ;;  %v4999_v36 = vpop.f32.mrb[60].mxu0 }
 0x6a6   :  { %v7977_v31 = vpop.f32.mrb[61].mxu0 }
 0x6a7   :  { %v5929_v35 = vsel %vm4915_vm3, %v3397_v28, 0  ;;  %8096 = vmatmul.mubr.msk.bf16.vlgmr.msra.gmra.mrb[100].mxu0 %vm3399_vm2, %v4909_v37  ;;  %v5002_v41 = vpop.f32.mrb[62].mxu0  ;;  %v4830_v58 = vpop.xlane.xlu1 %4829 }
 0x6a8   :  { %v3359_v60 = vpop.trf.xlu0  ;;  %8100 = vmatpush3.bf16.msra.mxu1 %v5929_v35  ;;  %8107 = vmatprep.mubr.msk.bf16.mxu0 %vm8872_vm1, %v8871_v42  ;;  %v7978_v13 = vpop.f32.mrb[63].mxu0 }
 0x6a9   :  { %v3398_v14 = vpack.c.bf16 %v3359_v60, %v3359_v60  ;;  %8111 = vmatprep.subr.bf16.mxu1 %v8871_v42 }
 0x6ab   :  { %v5975_v44 = vsel %vm4915_vm3, %v3398_v14, 0  ;;  %8102 = vmatmul.mubr.msk.bf16.vlgmr.msra.gmra.mrb[92].mxu1 %vm3399_vm2, %v4910_v45 }
 0x6ac   :  { %8106 = vmatpush3.bf16.msra.mxu0 %v5975_v44  ;;  %8115 = vmatprep.mubr.msk.bf16.mxu1 %vm8872_vm1, %v8871_v42 }
 0x6ad   :  { %8127 = vmatprep.subr.bf16.mxu0 %v8871_v42  ;;  %v5091_v57 = vpop.f32.mrb[64].mxu0 }
 0x6ae   :  { %v7989_v52 = vpop.f32.mrb[65].mxu0 }
 0x6af   :  { %8108 = vmatmul.mubr.msk.bf16.vlgmr.msra.gmra.mrb[104].mxu0 %vm3399_vm2, %v4911_v32  ;;  %v5094_v38 = vpop.f32.mrb[66].mxu0 }
 0x6b0   :  { %8131 = vmatprep.mubr.msk.bf16.mxu0 %vm8872_vm1, %v8871_v42  ;;  %v7990_v59 = vpop.f32.mrb[67].mxu0 }
 0x6cf   :  { %v5183_v0 = vpop.f32.mrb[68].mxu0 }
 0x6d0   :  { %v8001_v63 = vpop.f32.mrb[69].mxu0 }
 0x6d1   :  { %v5186_v55 = vpop.f32.mrb[70].mxu0 }
 0x6d2   :  { %v8002_v2 = vpop.f32.mrb[71].mxu0 }
 0x6e2   :  { %v4818_v22 = vpop.xlane.xlu0 %4817 }
 0x6e3   :  { %8805 = vrcp.f32 %v4818_v22 }
 0x6e4   :  { %8807 = vrcp.f32 %v4830_v58 }
 0x6e5   :  { %8809 = vrcp.f32 %v4821_v62 }
 0x6e6   :  { %v5045_v5 = vpop.f32.mrb[52].mxu1  ;;  %v4833_v30 = vpop.xlane.xlu0 %4832 }
 0x6e7   :  { %8811 = vrcp.f32 %v4833_v30  ;;  %v7983_v6 = vpop.f32.mrb[53].mxu1  ;;  %v4842_v14 = vpop.xlane.xlu1 %4841 }
 0x6e8   :  { %v5048_v12 = vpop.f32.mrb[54].mxu1 }
 0x6e9   :  { %v7984_v10 = vpop.f32.mrb[55].mxu1 }
 0x6ea   :  { %v4836_v50 = vpop.xlane.xlu0 %4835  ;;  %v5275_v33 = vpop.f32.mrb[72].mxu0 }
 0x6eb   :  { %8813 = vrcp.f32 %v4836_v50  ;;  %v8013_v21 = vpop.f32.mrb[73].mxu0  ;;  %v4845_v10 = vpop.xlane.xlu1 %4844 }
 0x6ec   :  { %8815 = vrcp.f32 %v4824_v3  ;;  %v5278_v19 = vpop.f32.mrb[74].mxu0 }
 0x6ed   :  { %v8806_v8 = vpop.eup %8805  ;;  %v8014_v15 = vpop.f32.mrb[75].mxu0  ;;  %8817 = vrcp.f32 %v4827_v11 }
 0x6ee   :  { %v8808_v27 = vpop.eup %8807  ;;  %v5137_v4 = vpop.f32.mrb[56].mxu1  ;;  %v6041_v51 = vmul.f32 %v8806_v8, %v9676_v1 }
 0x6ef   :  { %v4839_v61 = vpop.xlane.xlu0 %4838  ;;  %v6045_v9 = vmul.f32 %v8808_v27, %v5137_v4  ;;  %v7995_v53 = vpop.f32.mrb[57].mxu1 }
 0x6f0   :  { %8819 = vrcp.f32 %v4839_v61  ;;  %v8810_v7 = vpop.eup %8809  ;;  %v5140_v25 = vpop.f32.mrb[58].mxu1 }
 0x6f1   :  { %v8812_v39 = vpop.eup %8811  ;;  %v8609_v40 = vpack.i.bf16 %v6045_v9, %v6041_v51  ;;  %v7996_v48 = vpop.f32.mrb[59].mxu1  ;;  %v6042_v24 = vmul.f32 %v8810_v7, %v4999_v36  ;;  %8821 = vrcp.f32 %v4842_v14 }
 0x6f2   :  { %v6046_v20 = vmul.f32 %v8812_v39, %v5183_v0 }
 0x6f3   :  { %8610 = vxpose.xlu1.b32.start.end [1/1] (short) (narrow) %v8609_v40, 8 }
 0x6f4   :  { %v8616_v29 = vpack.i.bf16 %v6046_v20, %v6042_v24 }
 0x6f5   :  { %v8814_v56 = vpop.eup %8813 }
 0x6f6   :  { %v8816_v54 = vpop.eup %8815  ;;  %v5229_v34 = vpop.f32.mrb[60].mxu1  ;;  %8617 = vxpose.xlu0.b32.start.end [1/1] (short) (narrow) %v8616_v29, 8 }
 0x6f7   :  { %v6043_v47 = vmul.f32 %v8816_v54, %v5045_v5  ;;  %v6047_v43 = vmul.f32 %v8814_v56, %v5229_v34  ;;  %v8007_v1 = vpop.f32.mrb[61].mxu1  ;;  %v8818_v23 = vpop.eup %8817 }
 0x6f8   :  { %v5232_v18 = vpop.f32.mrb[62].mxu1  ;;  %v6044_v26 = vmul.f32 %v8818_v23, %v5091_v57  ;;  %v4854_v45 = vpop.xlane.xlu0 %4853 }
 0x6f9   :  { %v8623_v49 = vpack.i.bf16 %v6047_v43, %v6043_v47  ;;  %v8008_v16 = vpop.f32.mrb[63].mxu1  ;;  %8823 = vrcp.f32 %v4854_v45 }
 0x6fa   :  { %v8820_v46 = vpop.eup %8819  ;;  %8825 = vrcp.f32 %v4845_v10 }
 0x6fb   :  { %v6048_v28 = vmul.f32 %v8820_v46, %v5275_v33  ;;  %8624 = vxpose.xlu0.b32.start.end [1/1] (short) (narrow) %v8623_v49, 8  ;;  %v8822_v55 = vpop.eup %8821  ;;  %v4848_v33 = vpop.xlane.xlu1 %4847 }
 0x6fc   :  { %v4857_v50 = vpop.xlane.xlu0 %4856 }
 0x6fd   :  { %v8630_v37 = vpack.i.bf16 %v6048_v28, %v6044_v26  ;;  %8827 = vrcp.f32 %v4857_v50 }
 0x6fe   :  { %8829 = vrcp.f32 %v4848_v33 }
 0x6ff   :  { %8631 = vxpose.xlu1.b32.start.end [1/1] (short) (narrow) %v8630_v37, 8  ;;  %v4851_v19 = vpop.xlane.xlu1 %4850 }
 0x700   :  { %v4860_v21 = vpop.xlane.xlu0 %4859 }
 0x701   :  { %8831 = vrcp.f32 %v4860_v21 }
 0x702   :  { %8833 = vrcp.f32 %v4851_v19 }
 0x703   :  { %v8824_v3 = vpop.eup %8823  ;;  %v4866_v25 = vpop.xlane.xlu1 %4865 }
 0x704   :  { %v4863_v8 = vpop.xlane.xlu0 %4862  ;;  %v8826_v15 = vpop.eup %8825 }
 0x705   :  { %8835 = vrcp.f32 %v4863_v8 }
 0x706   :  { %8837 = vrcp.f32 %v4866_v25 }
 0x707   :  { %v8828_v27 = vpop.eup %8827  ;;  %v4869_v46 = vpop.xlane.xlu1 %4868 }
 0x708   :  { %v8830_v7 = vpop.eup %8829  ;;  %v4878_v54 = vpop.xlane.xlu0 %4877 }
 0x709   :  { %8839 = vrcp.f32 %v4878_v54 }
 0x70a   :  { %8841 = vrcp.f32 %v4869_v46 }
 0x70b   :  { %v8832_v48 = vpop.eup %8831 }
 0x70c   :  { %v8834_v47 = vpop.eup %8833 }
 0x70f   :  { %v8836_v23 = vpop.eup %8835 }
 0x72d   :  { %v5321_v35 = vpop.f32.mrb[64].mxu1 }
 0x72e   :  { %v8019_v60 = vpop.f32.mrb[65].mxu1  ;;  %v6049_v58 = vmul.f32 %v8822_v55, %v5321_v35 }
 0x72f   :  { %v5324_v36 = vpop.f32.mrb[66].mxu1  ;;  %v4881_v60 = vpop.xlane.xlu0 %4880 }
 0x730   :  { %v8020_v31 = vpop.f32.mrb[67].mxu1  ;;  %8843 = vrcp.f32 %v4881_v60  ;;  %v8738_v60 = vld [vmem:[%s9918_s6 + $0x8] sm:$0xff]  }
 0x731   :  { %v5367_v44 = vpop.f32.mrb[76].mxu0  ;;  %v4872_v31 = vpop.xlane.xlu1 %4871 }
 0x732   :  { %v8025_v41 = vpop.f32.mrb[77].mxu0  ;;  %v6050_v51 = vmul.f32 %v8826_v15, %v5367_v44  ;;  %8845 = vrcp.f32 %v4872_v31 }
 0x733   :  { %v5370_v13 = vpop.f32.mrb[78].mxu0 }
 0x734   :  { %v8026_v32 = vpop.f32.mrb[79].mxu0 }
 0x735   :  { %v5413_v52 = vpop.f32.mrb[68].mxu1  ;;  %v4884_v32 = vpop.xlane.xlu0 %4883 }
 0x736   :  { %v8031_v38 = vpop.f32.mrb[69].mxu1  ;;  %v6051_v20 = vmul.f32 %v8830_v7, %v5413_v52  ;;  %8847 = vrcp.f32 %v4884_v32 }
 0x737   :  { %v5416_v59 = vpop.f32.mrb[70].mxu1 }
 0x738   :  { %v8032_v57 = vpop.f32.mrb[71].mxu1 }
 0x739   :  { %v5459_v0 = vpop.f32.mrb[80].mxu0  ;;  %v4875_v57 = vpop.xlane.xlu1 %4874 }
 0x73a   :  { %v8037_v63 = vpop.f32.mrb[81].mxu0  ;;  %v6052_v49 = vmul.f32 %v8834_v47, %v5459_v0  ;;  %v4887_v55 = vpop.xlane.xlu0 %4886  ;;  %8849 = vrcp.f32 %v4875_v57 }
 0x73b   :  { %v5462_v62 = vpop.f32.mrb[82].mxu0  ;;  %8851 = vrcp.f32 %v4887_v55 }
 0x73c   :  { %v8038_v2 = vpop.f32.mrb[83].mxu0 }
 0x73d   :  { %v5505_v11 = vpop.f32.mrb[72].mxu1 }
 0x73e   :  { %v6053_v22 = vmul.f32 %v8824_v3, %v5505_v11  ;;  %v8043_v5 = vpop.f32.mrb[73].mxu1 }
 0x73f   :  { %v5508_v30 = vpop.f32.mrb[74].mxu1 }
 0x740   :  { %v8637_v6 = vpack.i.bf16 %v6053_v22, %v6049_v58  ;;  %v8044_v12 = vpop.f32.mrb[75].mxu1  ;;  %v8838_v22 = vpop.eup %8837 }
 0x741   :  { %v8840_v30 = vpop.eup %8839 }
 0x742   :  { %8638 = vxpose.xlu0.b32.start.end [1/1] (short) (narrow) %v8637_v6, 8  ;;  %v8842_v19 = vpop.eup %8841 }
 0x75a   :  { %v5551_v4 = vpop.f32.mrb[84].mxu0 }
 0x75b   :  { %v6054_v61 = vmul.f32 %v8828_v27, %v5551_v4  ;;  %v8049_v9 = vpop.f32.mrb[85].mxu0  ;;  %v8844_v27 = vpop.eup %8843 }
 0x75c   :  { %v5554_v53 = vpop.f32.mrb[86].mxu0  ;;  %v8846_v25 = vpop.eup %8845 }
 0x75d   :  { %v8644_v39 = vpack.i.bf16 %v6054_v61, %v6050_v51  ;;  %v8050_v40 = vpop.f32.mrb[87].mxu0 }
 0x75e   :  { %v5597_v24 = vpop.f32.mrb[76].mxu1 }
 0x75f   :  { %v6055_v29 = vmul.f32 %v8832_v48, %v5597_v24  ;;  %v8055_v56 = vpop.f32.mrb[77].mxu1  ;;  %8645 = vxpose.xlu1.b32.start.end [1/1] (short) (narrow) %v8644_v39, 8  ;;  %v8848_v48 = vpop.eup %8847 }
 0x760   :  { %v5600_v34 = vpop.f32.mrb[78].mxu1 }
 0x761   :  { %v8651_v43 = vpack.i.bf16 %v6055_v29, %v6051_v20  ;;  %v8056_v1 = vpop.f32.mrb[79].mxu1  ;;  %v8850_v34 = vpop.eup %8849 }
 0x762   :  { %v5643_v18 = vpop.f32.mrb[88].mxu0 }
 0x763   :  { %v6056_v16 = vmul.f32 %v8836_v23, %v5643_v18  ;;  %8652 = vxpose.xlu0.b32.start.end [1/1] (short) (narrow) %v8651_v43, 8  ;;  %v8061_v26 = vpop.f32.mrb[89].mxu0  ;;  %v8852_v23 = vpop.eup %8851 }
 0x764   :  { %v5646_v28 = vpop.f32.mrb[90].mxu0 }
 0x765   :  { %v8658_v37 = vpack.i.bf16 %v6056_v16, %v6052_v49  ;;  %v8062_v35 = vpop.f32.mrb[91].mxu0  ;;  %v8737_v28 = vld [vmem:[%s9918_s6] sm:$0xff]  }
 0x766   :  { %v5689_v14 = vpop.f32.mrb[80].mxu1  ;;  %8112 = vmatpush3.bf16.msra.mxu1 %v8737_v28 }
 0x767   :  { %v8067_v36 = vpop.f32.mrb[81].mxu1  ;;  %8659 = vxpose.xlu1.b32.start.end [1/1] (short) (narrow) %v8658_v37, 8  ;;  %v6057_v10 = vmul.f32 %v8838_v22, %v5689_v14  ;;  %8113 = vmatprep.subr.bf16.mxu1 %v8871_v42  ;;  %v7667_v22 = vld [vmem:[%s9919_s7] ss:$0 sm:$0xff] }
 0x768   :  { %v5692_v45 = vpop.f32.mrb[82].mxu1 }
 0x769   :  { %v8068_v44 = vpop.f32.mrb[83].mxu1 }
 0x76a   :  { %v5735_v41 = vpop.f32.mrb[92].mxu0  ;;  %8114 = vmatpush3.bf16.msra.mxu1 %v8738_v60 }
 0x76b   :  { %v8073_v13 = vpop.f32.mrb[93].mxu0  ;;  %v6058_v51 = vmul.f32 %v8842_v19, %v5735_v41  ;;  %8143 = vmatprep.subr.bf16.mxu1 %v8871_v42  ;;  %v8866_v19 = vld [vmem:[%s9912_s0 + $0x8] sm:$0xff] }
 0x76c   :  { %v5738_v52 = vpop.f32.mrb[94].mxu0 }
 0x76d   :  { %v8074_v38 = vpop.f32.mrb[95].mxu0 }
 0x76e   :  { %v5781_v59 = vpop.f32.mrb[84].mxu1 }
 0x76f   :  { %v8079_v0 = vpop.f32.mrb[85].mxu1  ;;  %v6059_v24 = vmul.f32 %v8846_v25, %v5781_v59 }
 0x770   :  { %v5784_v63 = vpop.f32.mrb[86].mxu1 }
 0x771   :  { %v8080_v62 = vpop.f32.mrb[87].mxu1 }
 0x772   :  { %v5827_v2 = vpop.f32.mrb[96].mxu0 }
 0x773   :  { %v8085_v3 = vpop.f32.mrb[97].mxu0  ;;  %v8611_v11 = vpop.trf.xlu1  ;;  %v6060_v18 = vmul.f32 %v8850_v34, %v5827_v2 }
 0x774   :  { %v5830_v58 = vpop.f32.mrb[98].mxu0 }
 0x775   :  { %v8086_v5 = vpop.f32.mrb[99].mxu0 }
 0x776   :  { %v5873_v6 = vpop.f32.mrb[88].mxu1  ;;  %v8618_v12 = vpop.trf.xlu0 }
 0x777   :  { %v6061_v50 = vmul.f32 %v8840_v30, %v5873_v6  ;;  %v8091_v33 = vpop.f32.mrb[89].mxu1 }
 0x778   :  { %v5876_v21 = vpop.f32.mrb[90].mxu1 }
 0x779   :  { %v8665_v8 = vpack.i.bf16 %v6061_v50, %v6057_v10  ;;  %v8092_v15 = vpop.f32.mrb[91].mxu1  ;;  %v8865_v10 = vld [vmem:[%s9912_s0] sm:$0xff] }
 0x77a   :  { %v5919_v4 = vpop.f32.mrb[100].mxu0 }
 0x77b   :  { %v6062_v61 = vmul.f32 %v8844_v27, %v5919_v4  ;;  %8666 = vxpose.xlu0.b32.start.end [1/1] (short) (narrow) %v8665_v8, 8  ;;  %v8097_v9 = vpop.f32.mrb[101].mxu0  ;;  %v8625_v53 = vpop.trf.xlu0 }
 0x77c   :  { %v5922_v7 = vpop.f32.mrb[102].mxu0 }
 0x77d   :  { %v8672_v39 = vpack.i.bf16 %v6062_v61, %v6058_v51  ;;  %v8098_v40 = vpop.f32.mrb[103].mxu0 }
 0x77e   :  { %v5965_v20 = vpop.f32.mrb[92].mxu1  ;;  %v8868_v40 = vld [vmem:[%s9912_s0 + $0x18] sm:$0xff] }
 0x77f   :  { %v8632_v29 = vpop.trf.xlu1  ;;  %v6063_v56 = vmul.f32 %v8848_v48, %v5965_v20  ;;  %v8103_v54 = vpop.f32.mrb[93].mxu1  ;;  %8673 = vxpose.xlu1.b32.start.end [1/1] (short) (narrow) %v8672_v39, 8 }
 0x780   :  { %v5968_v47 = vpop.f32.mrb[94].mxu1 }
 0x781   :  { %v8679_v43 = vpack.i.bf16 %v6063_v56, %v6059_v24  ;;  %v8104_v1 = vpop.f32.mrb[95].mxu1  ;;  %v8869_v47 = vld [vmem:[%s9912_s0 + $0x20] sm:$0xff] }
 0x782   :  { %v6011_v46 = vpop.f32.mrb[104].mxu0 }
 0x783   :  { %v6064_v49 = vmul.f32 %v8852_v23, %v6011_v46  ;;  %8680 = vxpose.xlu0.b32.start.end [1/1] (short) (narrow) %v8679_v43, 8  ;;  %v8109_v16 = vpop.f32.mrb[105].mxu0 }
 0x784   :  { %v6014_v26 = vpop.f32.mrb[106].mxu0 }
 0x785   :  { %v8686_v37 = vpack.i.bf16 %v6064_v49, %v6060_v18  ;;  %v8110_v35 = vpop.f32.mrb[107].mxu0  ;;  %v8870_v18 = vld [vmem:[%s9912_s0 + $0x28] sm:$0xff] }
 0x787   :  { %8694 = vxpose.xlu0.b32.start [1/4] (short) (narrow) %v8611_v11, 8  ;;  %8687 = vxpose.xlu1.b32.start.end [1/1] (short) (narrow) %v8686_v37, 8 }
 0x78b   :  { %8696 = vxpose.xlu0.b32.cont [2/4] (short) (narrow) %v8618_v12, 8 }
 0x78f   :  { %8698 = vxpose.xlu0.b32.cont [3/4] (short) (narrow) %v8625_v53, 8  ;;  %v8867_v53 = vld [vmem:[%s9912_s0 + $0x10] sm:$0xff] }
 0x793   :  { %8700 = vxpose.xlu0.b32.end [4/4] (short) (narrow) %v8632_v29, 8 }
 0x7c2   :  { %v8639_v14 = vpop.trf.xlu0 }
 0x7c3   :  { %8707 = vxpose.xlu1.b32.start [1/4] (short) (narrow) %v8639_v14, 8 }
 0x7df   :  { %v8646_v36 = vpop.trf.xlu1 }
 0x7e0   :  { %8709 = vxpose.xlu1.b32.cont [2/4] (short) (narrow) %v8646_v36, 8 }
 0x7e3   :  { %v8653_v45 = vpop.trf.xlu0 }
 0x7e4   :  { %8711 = vxpose.xlu1.b32.cont [3/4] (short) (narrow) %v8653_v45, 8 }
 0x7e7   :  { %v8660_v31 = vpop.trf.xlu1 }
 0x7e8   :  { %8713 = vxpose.xlu1.b32.end [4/4] (short) (narrow) %v8660_v31, 8 }
 0x7fb   :  { %v8667_v44 = vpop.trf.xlu0 }
 0x7fc   :  { %8720 = vxpose.xlu0.b32.start [1/4] (short) (narrow) %v8667_v44, 8 }
 0x7ff   :  { %v8674_v41 = vpop.trf.xlu1 }
 0x800   :  { %8722 = vxpose.xlu0.b32.cont [2/4] (short) (narrow) %v8674_v41, 8  ;;  %v8739_v41 = vld [vmem:[%s9920_s10] sm:$0xff]  }
 0x801   :  { %8128 = vmatpush3.bf16.msra.mxu0 %v8739_v41  ;;  %v8744_v41 = vld [vmem:[%s9923_s12 + $0x18] sm:$0xff]  }
 0x802   :  { %8129 = vmatprep.subr.bf16.mxu0 %v8871_v42 }
 0x803   :  { %v8681_v13 = vpop.trf.xlu0 }
 0x804   :  { %8724 = vxpose.xlu0.b32.cont [3/4] (short) (narrow) %v8681_v13, 8  ;;  %v8740_v13 = vld [vmem:[%s9920_s10 + $0x8] sm:$0xff]  }
 0x805   :  { %8130 = vmatpush3.bf16.msra.mxu0 %v8740_v13 }
 0x807   :  { %v8701_v32 = vpop.trf.xlu0  ;;  %v8688_v52 = vpop.trf.xlu1 }
 0x808   :  { %v8705_v38 = vunpack.i.h.bf16 %v8701_v32  ;;  %v8702_v59 = vunpack.i.l.bf16 %v8701_v32  ;;  %8726 = vxpose.xlu0.b32.end [4/4] (short) (narrow) %v8688_v52, 8 }
 0x80a   :  { %v7030_v57 = vpack.c.bf16 %v8705_v38, %v8702_v59 }
 0x80c   :  { %8116 = vmatmul.mubr.msk.bf16.vlgmr.msra.gmra.mrb[96].mxu1 %vm56_vm0, %v7030_v57 }
 0x80d   :  { %8119 = vmatprep.mubr.msk.bf16.mxu1 %vm8872_vm1, %v8871_v42 }
 0x85c   :  { %v8714_v0 = vpop.trf.xlu1 }
 0x85d   :  { %v8718_v63 = vunpack.i.h.bf16 %v8714_v0  ;;  %v8715_v62 = vunpack.i.l.bf16 %v8714_v0 }
 0x85f   :  { %v7031_v55 = vpack.c.bf16 %v8718_v63, %v8715_v62 }
 0x861   :  { %8120 = vmatmul.mubr.msk.bf16.gmra.mrb[100].mxu1 %vm56_vm0, %v7031_v55 }
 0x862   :  { %8123 = vmatprep.mubr.msk.bf16.mxu1 %vm8872_vm1, %v8871_v42 }
 0x87c   :  { %v8727_v2 = vpop.trf.xlu0 }
 0x87d   :  { %v8731_v3 = vunpack.i.h.bf16 %v8727_v2  ;;  %v8728_v11 = vunpack.i.l.bf16 %v8727_v2 }
 0x87f   :  { %v7032_v58 = vpack.c.bf16 %v8731_v3, %v8728_v11 }
 0x881   :  { %8124 = vmatmul.mubr.msk.bf16.gmra.mrb[104].mxu1 %vm56_vm0, %v7032_v58 }
 0x882   :  { %8151 = vmatprep.mubr.msk.bf16.mxu1 %vm8872_vm1, %v8871_v42 }
 0x8df   :  { %v7094_v5 = vpop.f32.mrb[96].mxu1 }
 0x8e0   :  { %v7095_v30 = vadd.f32 %v7667_v22, %v7094_v5  ;;  %v8117_v6 = vpop.f32.mrb[97].mxu1 }
 0x8e1   :  { %v7097_v12 = vpop.f32.mrb[98].mxu1 }
 0x8e2   :  { %v9779_v50 = vadd.f32 %v8865_v10, %v7095_v30  ;;  %v7098_v33 = vadd.f32 %v7667_v22, %v7097_v12  ;;  %v8118_v21 = vpop.f32.mrb[99].mxu1 }
 0x8e4   :  { %v9784_v8 = vadd.f32 %v8866_v19, %v7098_v33  ;;  %v7125_v15 = vsel %vm56_vm0, %v9779_v50, 0.0 }
 0x8e5   :  { %7126 = vadd.xlane.f32.xlu1 %v7125_v15 }
 0x8e6   :  { %v7128_v27 = vsel %vm56_vm0, %v9784_v8, 0.0 }
 0x8e7   :  { %7129 = vadd.xlane.f32.xlu0 %v7128_v27 }
 0x934   :  { %v7102_v4 = vpop.f32.mrb[100].mxu1 }
 0x935   :  { %v7103_v51 = vadd.f32 %v7667_v22, %v7102_v4  ;;  %v8121_v61 = vpop.f32.mrb[101].mxu1 }
 0x936   :  { %v7105_v9 = vpop.f32.mrb[102].mxu1 }
 0x937   :  { %v9793_v7 = vadd.f32 %v8867_v53, %v7103_v51  ;;  %v7106_v25 = vadd.f32 %v7667_v22, %v7105_v9  ;;  %v8122_v39 = vpop.f32.mrb[103].mxu1  ;;  %v7673_v9 = vld [vmem:[%s9921_s8] ss:$0 sm:$0xff] }
 0x939   :  { %v9798_v48 = vadd.f32 %v8868_v40, %v7106_v25  ;;  %v7131_v24 = vsel %vm56_vm0, %v9793_v7, 0.0 }
 0x93a   :  { %7132 = vadd.xlane.f32.xlu1 %v7131_v24  ;;  %v7674_v24 = vld [vmem:[%s9922_s9] ss:$0 sm:$0xff] }
 0x93b   :  { %v7134_v20 = vsel %vm56_vm0, %v9798_v48, 0.0 }
 0x93e   :  { %7135 = vadd.xlane.f32.xlu1 %v7134_v20 }
 0x954   :  { %v7110_v29 = vpop.f32.mrb[104].mxu1 }
 0x955   :  { %v7111_v56 = vadd.f32 %v7667_v22, %v7110_v29  ;;  %v8125_v54 = vpop.f32.mrb[105].mxu1 }
 0x956   :  { %v7113_v34 = vpop.f32.mrb[106].mxu1  ;;  %v8741_v54 = vld [vmem:[%s9923_s12] sm:$0xff]  }
 0x957   :  { %v9807_v43 = vadd.f32 %v8869_v47, %v7111_v56  ;;  %v7114_v1 = vadd.f32 %v7667_v22, %v7113_v34  ;;  %v8126_v23 = vpop.f32.mrb[107].mxu1  ;;  %8144 = vmatpush3.bf16.msra.mxu1 %v8741_v54  ;;  %v8742_v47 = vld [vmem:[%s9923_s12 + $0x8] sm:$0xff]  }
 0x958   :  { %8145 = vmatprep.subr.bf16.mxu1 %v8871_v42 }
 0x959   :  { %v9812_v46 = vadd.f32 %v8870_v18, %v7114_v1  ;;  %v7137_v49 = vsel %vm56_vm0, %v9807_v43, 0.0 }
 0x95a   :  { %7138 = vadd.xlane.f32.xlu1 %v7137_v49 }
 0x95b   :  { %v7140_v16 = vsel %vm56_vm0, %v9812_v46, 0.0  ;;  %8146 = vmatpush3.bf16.msra.mxu1 %v8742_v47 }
 0x95c   :  { %8147 = vmatprep.subr.bf16.mxu1 %v8871_v42 }
 0x95e   :  { %7141 = vadd.xlane.f32.xlu1 %v7140_v16 }
 0x972   :  { %v7127_v26 = vpop.xlane.xlu1 %7126 }
 0x973   :  { %v7143_v28 = vmul.f32 0.03125, %v7127_v26 }
 0x974   :  { %v7130_v37 = vpop.xlane.xlu0 %7129 }
 0x975   :  { %v7149_v35 = vsub.f32 %v9779_v50, %v7143_v28  ;;  %v7144_v60 = vmul.f32 0.03125, %v7130_v37 }
 0x977   :  { %v7150_v14 = vsub.f32 %v9784_v8, %v7144_v60  ;;  %v7155_v36 = vmul.f32 %v7149_v35, %v7149_v35 }
 0x979   :  { %v7161_v45 = vsel %vm56_vm0, %v7155_v36, 0.0  ;;  %v7156_v31 = vmul.f32 %v7150_v14, %v7150_v14  ;;  %v8743_v36 = vld [vmem:[%s9923_s12 + $0x10] sm:$0xff]  }
 0x97a   :  { %7162 = vadd.xlane.f32.xlu1 %v7161_v45  ;;  %8148 = vmatpush3.bf16.msra.mxu1 %v8743_v36 }
 0x97b   :  { %v7164_v44 = vsel %vm56_vm0, %v7156_v31, 0.0  ;;  %8149 = vmatprep.subr.bf16.mxu1 %v8871_v42 }
 0x97c   :  { %7165 = vadd.xlane.f32.xlu0 %v7164_v44 }
 0x97e   :  { %8150 = vmatpush3.bf16.msra.mxu1 %v8744_v41 }
 0x9c7   :  { %v7133_v32 = vpop.xlane.xlu1 %7132 }
 0x9c8   :  { %v7145_v52 = vmul.f32 0.03125, %v7133_v32 }
 0x9ca   :  { %v7151_v38 = vsub.f32 %v9793_v7, %v7145_v52 }
 0x9cb   :  { %v7136_v59 = vpop.xlane.xlu1 %7135 }
 0x9cc   :  { %v7146_v57 = vmul.f32 0.03125, %v7136_v59  ;;  %v7157_v0 = vmul.f32 %v7151_v38, %v7151_v38 }
 0x9ce   :  { %v7152_v63 = vsub.f32 %v9798_v48, %v7146_v57  ;;  %v7167_v62 = vsel %vm56_vm0, %v7157_v0, 0.0 }
 0x9cf   :  { %7168 = vadd.xlane.f32.xlu1 %v7167_v62 }
 0x9d0   :  { %v7158_v55 = vmul.f32 %v7152_v63, %v7152_v63 }
 0x9d2   :  { %v7170_v2 = vsel %vm56_vm0, %v7158_v55, 0.0 }
 0x9d3   :  { %7171 = vadd.xlane.f32.xlu0 %v7170_v2 }
 0x9e7   :  { %v7139_v3 = vpop.xlane.xlu1 %7138 }
 0x9e8   :  { %v7147_v11 = vmul.f32 0.03125, %v7139_v3 }
 0x9ea   :  { %v9834_v58 = vsub.f32 %v9807_v43, %v7147_v11 }
 0x9eb   :  { %v7142_v22 = vpop.xlane.xlu1 %7141 }
 0x9ec   :  { %v7148_v5 = vmul.f32 0.03125, %v7142_v22  ;;  %v7159_v30 = vmul.f32 %v9834_v58, %v9834_v58 }
 0x9ee   :  { %v9839_v6 = vsub.f32 %v9812_v46, %v7148_v5  ;;  %v7173_v12 = vsel %vm56_vm0, %v7159_v30, 0.0 }
 0x9ef   :  { %7174 = vadd.xlane.f32.xlu1 %v7173_v12  ;;  %v7675_v12 = vld [vmem:[%s9924_s11] ss:$0 sm:$0xff] }
 0x9f0   :  { %v7160_v10 = vmul.f32 %v9839_v6, %v9839_v6 }
 0x9f2   :  { %v7176_v33 = vsel %vm56_vm0, %v7160_v10, 0.0 }
 0x9f3   :  { %7177 = vadd.xlane.f32.xlu0 %v7176_v33 }
 0xa07   :  { %v7163_v21 = vpop.xlane.xlu1 %7162 }
 0xa08   :  { %v7179_v19 = vmul.f32 0.03125, %v7163_v21 }
 0xa09   :  { %v7166_v15 = vpop.xlane.xlu0 %7165 }
 0xa0a   :  { %v7185_v27 = vadd.f32 1e-05, %v7179_v19  ;;  %v7180_v4 = vmul.f32 0.03125, %v7166_v15 }
 0xa0c   :  { %8853 = vrsqrt.f32 %v7185_v27  ;;  %v7186_v51 = vadd.f32 1e-05, %v7180_v4 }
 0xa0e   :  { %8855 = vrsqrt.f32 %v7186_v51 }
 0xa16   :  { %v8854_v61 = vpop.eup %8853 }
 0xa17   :  { %v7197_v53 = vmul.f32 %v8854_v61, %v7149_v35 }
 0xa18   :  { %v8856_v25 = vpop.eup %8855 }
 0xa19   :  { %v7209_v39 = vmul.f32 %v7673_v9, %v7197_v53  ;;  %v7198_v40 = vmul.f32 %v8856_v25, %v7150_v14 }
 0xa1b   :  { %v7210_v20 = vmul.f32 %v7673_v9, %v7198_v40  ;;  %v7221_v29 = vadd.f32 %v7674_v24, %v7209_v39 }
 0xa1d   :  { %v7222_v56 = vadd.f32 %v7674_v24, %v7210_v20 }
 0xa1f   :  { %v7232_v34 = vpack.c.bf16 %v7222_v56, %v7221_v29 }
 0xa21   :  { %8132 = vmatmul.mubr.msk.bf16.vlgmr.msra.gmra.mrb[108].mxu0 %vm56_vm0, %v7232_v34 }
 0xa22   :  { %8135 = vmatprep.mubr.msk.bf16.mxu0 %vm8872_vm1, %v8871_v42 }
 0xa5c   :  { %v7169_v1 = vpop.xlane.xlu1 %7168 }
 0xa5d   :  { %v7181_v23 = vmul.f32 0.03125, %v7169_v1 }
 0xa5f   :  { %v7187_v18 = vadd.f32 1e-05, %v7181_v23 }
 0xa60   :  { %v7172_v49 = vpop.xlane.xlu0 %7171 }
 0xa61   :  { %8857 = vrsqrt.f32 %v7187_v18  ;;  %v7182_v16 = vmul.f32 0.03125, %v7172_v49 }
 0xa63   :  { %v7188_v26 = vadd.f32 1e-05, %v7182_v16 }
 0xa65   :  { %8859 = vrsqrt.f32 %v7188_v26 }
 0xa6b   :  { %v8858_v28 = vpop.eup %8857 }
 0xa6c   :  { %v7199_v37 = vmul.f32 %v8858_v28, %v7151_v38 }
 0xa6e   :  { %v7211_v14 = vmul.f32 %v7673_v9, %v7199_v37 }
 0xa6f   :  { %v8860_v35 = vpop.eup %8859 }
 0xa70   :  { %v7200_v60 = vmul.f32 %v8860_v35, %v7152_v63  ;;  %v7223_v31 = vadd.f32 %v7674_v24, %v7211_v14  ;;  %v7681_v35 = vld [vmem:[%s9925_s13] ss:$0 sm:$0xff]  ;;  %s8878_s13 = smov 32  }
 0xa72   :  { %v7212_v45 = vmul.f32 %v7673_v9, %v7200_v60  ;;  %v8876_v60 = vmov 1983009808  }
 0xa73   :  { %v7443_v14 = vunpack.c.l.s4 %v8876_v60 }
 0xa74   :  { %v7224_v44 = vadd.f32 %v7674_v24, %v7212_v45 }
 0xa76   :  { %v7233_v13 = vpack.c.bf16 %v7224_v44, %v7223_v31  ;;  %v7444_v31 = vunpack.c.0.s8 %v7443_v14 }
 0xa78   :  { %8136 = vmatmul.mubr.msk.bf16.gmra.mrb[112].mxu0 %vm56_vm0, %v7233_v13 }
 0xa79   :  { %8139 = vmatprep.mubr.msk.bf16.mxu0 %vm8872_vm1, %v8871_v42 }
 0xa7c   :  { %v7175_v32 = vpop.xlane.xlu1 %7174 }
 0xa7d   :  { %v7183_v52 = vmul.f32 0.03125, %v7175_v32 }
 0xa7f   :  { %v7189_v38 = vadd.f32 1e-05, %v7183_v52 }
 0xa80   :  { %v7178_v59 = vpop.xlane.xlu0 %7177 }
 0xa81   :  { %8861 = vrsqrt.f32 %v7189_v38  ;;  %v7184_v57 = vmul.f32 0.03125, %v7178_v59 }
 0xa83   :  { %v7190_v0 = vadd.f32 1e-05, %v7184_v57 }
 0xa85   :  { %8863 = vrsqrt.f32 %v7190_v0  ;;  %v7447_v0 = vsub.s32 %v7444_v31, %v9276_v17 }
 0xa8b   :  { %v8862_v63 = vpop.eup %8861 }
 0xa8c   :  { %v7201_v62 = vmul.f32 %v8862_v63, %v9834_v58 }
 0xa8e   :  { %v7213_v3 = vmul.f32 %v7673_v9, %v7201_v62 }
 0xa8f   :  { %v8864_v55 = vpop.eup %8863 }
 0xa90   :  { %v7202_v2 = vmul.f32 %v8864_v55, %v9839_v6  ;;  %v7225_v22 = vadd.f32 %v7674_v24, %v7213_v3 }
 0xa92   :  { %v7214_v11 = vmul.f32 %v7673_v9, %v7202_v2 }
 0xa94   :  { %v7226_v5 = vadd.f32 %v7674_v24, %v7214_v11 }
 0xa96   :  { %v7234_v30 = vpack.c.bf16 %v7226_v5, %v7225_v22 }
 0xa98   :  { %8140 = vmatmul.mubr.msk.bf16.gmra.mrb[116].mxu0 %vm56_vm0, %v7234_v30 }
 0xaf4   :  { %v7296_v10 = vpop.f32.mrb[108].mxu0 }
 0xaf5   :  { %v7297_v33 = vadd.f32 %v7675_v12, %v7296_v10  ;;  %v8133_v21 = vpop.f32.mrb[109].mxu0 }
 0xaf6   :  { %v7299_v19 = vpop.f32.mrb[110].mxu0  ;;  %v8877_v21 = vmov 1934713408  }
 0xaf7   :  { %v7300_v15 = vadd.f32 %v7675_v12, %v7299_v19  ;;  %v8134_v58 = vpop.f32.mrb[111].mxu0  ;;  %v7319_v27 = vmax.f32 %v7297_v33, 0.0  ;;  %v7505_v19 = vunpack.c.l.s4 %v8877_v21 }
 0xaf9   :  { %v7320_v4 = vmax.f32 %v7300_v15, 0.0 }
 0xafb   :  { %v7334_v6 = vpack.c.bf16 %v7320_v4, %v7319_v27  ;;  %v7506_v4 = vunpack.c.0.s8 %v7505_v19 }
 0xafd   :  { %8152 = vmatmul.mubr.msk.bf16.vlgmr.msra.gmra.mrb[108].mxu1 %vm7367_vm4, %v7334_v6 }
 0xafe   :  { %8155 = vmatprep.mubr.msk.bf16.mxu1 %vm8872_vm1, %v8871_v42 }
 0xb4b   :  { %v7304_v51 = vpop.f32.mrb[112].mxu0 }
 0xb4c   :  { %v7305_v61 = vadd.f32 %v7675_v12, %v7304_v51  ;;  %v8137_v9 = vpop.f32.mrb[113].mxu0 }
 0xb4d   :  { %v7307_v53 = vpop.f32.mrb[114].mxu0 }
 0xb4e   :  { %v7308_v25 = vadd.f32 %v7675_v12, %v7307_v53  ;;  %v8138_v39 = vpop.f32.mrb[115].mxu0  ;;  %v7321_v40 = vmax.f32 %v7305_v61, 0.0  ;;  %v7509_v53 = vsub.s32 %v7506_v4, %v9276_v17 }
 0xb50   :  { %v7322_v24 = vmax.f32 %v7308_v25, 0.0 }
 0xb52   :  { %v7335_v20 = vpack.c.bf16 %v7322_v24, %v7321_v40 }
 0xb54   :  { %8156 = vmatmul.mubr.msk.bf16.gmra.mrb[112].mxu1 %vm7367_vm4, %v7335_v20 }
 0xb55   :  { %8159 = vmatprep.mubr.msk.bf16.mxu1 %vm8872_vm1, %v8871_v42 }
 0xb6b   :  { %v7312_v29 = vpop.f32.mrb[116].mxu0 }
 0xb6c   :  { %v7313_v56 = vadd.f32 %v7675_v12, %v7312_v29  ;;  %v8141_v54 = vpop.f32.mrb[117].mxu0 }
 0xb6d   :  { %v7315_v34 = vpop.f32.mrb[118].mxu0 }
 0xb6e   :  { %v7316_v47 = vadd.f32 %v7675_v12, %v7315_v34  ;;  %v8142_v1 = vpop.f32.mrb[119].mxu0  ;;  %v7323_v23 = vmax.f32 %v7313_v56, 0.0 }
 0xb70   :  { %v7324_v18 = vmax.f32 %v7316_v47, 0.0 }
 0xb72   :  { %v7336_v49 = vpack.c.bf16 %v7324_v18, %v7323_v23 }
 0xb74   :  { %8160 = vmatmul.mubr.msk.bf16.gmra.mrb[116].mxu1 %vm7367_vm4, %v7336_v49 }
 0xbd0   :  { %v7411_v16 = vpop.f32.mrb[108].mxu1 }
 0xbd1   :  { %v8153_v26 = vpop.f32.mrb[109].mxu1  ;;  %v7412_v36 = vadd.f32 %v7681_v35, %v7411_v16 }
 0xbd2   :  { %v7414_v28 = vpop.f32.mrb[110].mxu1 }
 0xbd3   :  { %v8154_v37 = vpop.f32.mrb[111].mxu1  ;;  %v7415_v44 = vadd.f32 %v7681_v35, %v7414_v28  ;;  %v7434_v52 = vadd.f32 %v7412_v36, %v9779_v50 }
 0xbd5   :  { %v7435_v63 = vadd.f32 %v7415_v44, %v9784_v8 }
 0xc27   :  { %v7419_v45 = vpop.f32.mrb[112].mxu1 }
 0xc28   :  { %v7420_v41 = vadd.f32 %v7681_v35, %v7419_v45  ;;  %v8157_v13 = vpop.f32.mrb[113].mxu1 }
 0xc29   :  { %v7422_v32 = vpop.f32.mrb[114].mxu1 }
 0xc2a   :  { %v7436_v38 = vadd.f32 %v7420_v41, %v9793_v7  ;;  %v7423_v59 = vadd.f32 %v7681_v35, %v7422_v32  ;;  %v8158_v57 = vpop.f32.mrb[115].mxu1 }
 0xc2c   :  { %v7440_v62 = vcombine.low %v7434_v52, %v7436_v38  ;;  %v7441_v55 = vcombine.high %v7434_v52, %v7436_v38  ;;  %v7437_v2 = vadd.f32 %v7423_v59, %v9798_v48 }
 0xc2e   :  { %v7456_v3 = vcombine.low %v7435_v63, %v7437_v2  ;;  %v7457_v11 = vcombine.high %v7435_v63, %v7437_v2  ;;  %v7448_v22 = vrot.slane %v7440_v62, %v7447_v0  ;;  %v7455_v5 = vrot.slane %v7441_v55, %v7447_v0 }
 0xc30   :  { %v7464_v30 = vrot.slane %v7456_v3, %v7447_v0  ;;  %v7471_v12 = vrot.slane %v7457_v11, %v7447_v0 }
 0xc32   :  { %v7502_v10 = vcombine.low %v7448_v22, %v7464_v30  ;;  %v7503_v50 = vcombine.high %v7448_v22, %v7464_v30  ;;  %v7518_v33 = vcombine.low %v7455_v5, %v7471_v12  ;;  %v7519_v7 = vcombine.high %v7455_v5, %v7471_v12 }
 0xc34   :  { %v7510_v54 = vrot.slane %v7502_v10, %v7509_v53  ;;  %v7517_v34 = vrot.slane %v7503_v50, %v7509_v53  ;;  %v7526_v18 = vrot.slane %v7518_v33, %v7509_v53  ;;  %v7533_v17 = vrot.slane %v7519_v7, %v7509_v53 }
 0xc47   :  { %v7427_v15 = vpop.f32.mrb[116].mxu1 }
 0xc48   :  { %v7428_v58 = vadd.f32 %v7681_v35, %v7427_v15  ;;  %v8161_v27 = vpop.f32.mrb[117].mxu1 }
 0xc49   :  { %v7430_v8 = vpop.f32.mrb[118].mxu1 }
 0xc4a   :  { %v7438_v6 = vadd.f32 %v7428_v58, %v9807_v43  ;;  %v7431_v48 = vadd.f32 %v7681_v35, %v7430_v8  ;;  %v8162_v51 = vpop.f32.mrb[119].mxu1 }
 0xc4c   :  { %v7472_v61 = vcombine.high %v7438_v6, %v8871_v42  ;;  %v7439_v9 = vadd.f32 %v7431_v48, %v9812_v46  ;;  %v7479_v25 = vrot.slane %v7438_v6, %v7447_v0 }
 0xc4e   :  { %v7487_v39 = vcombine.high %v7439_v9, %v8871_v42  ;;  %v7494_v40 = vrot.slane %v7439_v9, %v7447_v0  ;;  %v7486_v24 = vrot.slane %v7472_v61, %v7447_v0 }
 0xc50   :  { %v7501_v20 = vrot.slane %v7487_v39, %v7447_v0  ;;  %v7534_v29 = vcombine.low %v7479_v25, %v7494_v40  ;;  %v7535_v56 = vcombine.high %v7479_v25, %v7494_v40 }
 0xc52   :  { %v7542_v47 = vrot.slane %v7534_v29, %v7509_v53  ;;  %v7549_v43 = vrot.slane %v7535_v56, %v7509_v53  ;;  %v7550_v1 = vcombine.low %v7486_v24, %v7501_v20  ;;  %v7551_v23 = vcombine.high %v7486_v24, %v7501_v20 }
 0xc54   :  { %v7567_v49 = vcombine.high %v7510_v54, %v7542_v47  ;;  %v7558_v16 = vrot.slane %v7550_v1, %v7509_v53  ;;  %v7568_v46 = vcombine.low %v7517_v34, %v7549_v43  ;;  %v7569_v26 = vcombine.high %v7517_v34, %v7549_v43 }
 0xc55   :  { %v7565_v28 = vrot.slane %v7551_v23, %v7509_v53  ;;  %v7566_v37 = vcombine.low %v7510_v54, %v7542_v47 }
 0xc56   :  { %7575 = vrot.lane.b32.xlu1 %v7567_v49, %s8878_s13  ;;  %v7571_v42 = vcombine.high %v7526_v18, %v7558_v16  ;;  %v7570_v35 = vcombine.low %v7526_v18, %v7558_v16 }
 0xc57   :  { %v7572_v60 = vcombine.low %v7533_v17, %v7565_v28  ;;  %v7573_v14 = vcombine.high %v7533_v17, %v7565_v28 }
 0xc58   :  { %7587 = vrot.lane.b32.xlu0 %v7571_v42, %s8878_s13 }
 0xc5a   :  { %7579 = vrot.lane.b32.xlu1 %v7568_v46, %s8874_s5 }
 0xc5c   :  { %7583 = vrot.lane.b32.xlu0 %v7569_v26, %s8873_s16 }
 0xc5e   :  { %7591 = vrot.lane.b32.xlu1 %v7572_v60, %s8874_s5 }
 0xc62   :  { %7595 = vrot.lane.b32.xlu1 %v7573_v14, %s8873_s16 }
 0xcc8   :  { %v7576_v36 = vpop.permute.xlu1 %7575 }
 0xcc9   :  { %v7598_v31 = vsel %vm56_vm0, %v7566_v37, %v7576_v36 }
 0xcca   :  { %v7588_v45 = vpop.permute.xlu0 %7587 }
 0xccb   :  { %v7602_v38 = vsel %vm56_vm0, %v7570_v35, %v7588_v45 }
 0xccc   :  { %v7580_v44 = vpop.permute.xlu1 %7579 }
 0xccd   :  { %v7599_v41 = vsel %vm7367_vm4, %v7598_v31, %v7580_v44 }
 0xcce   :  { %v7584_v13 = vpop.permute.xlu0 %7583 }
 0xccf   :  { %v7601_v32 = vsel %vm7600_vm5, %v7599_v41, %v7584_v13 }
 0xcd0   :  { %7605 = vst [vmem:[%s9926_s14] sm:$0x3f] %v7601_v32  ;;  %v7592_v52 = vpop.permute.xlu1 %7591 }
 0xcd1   :  { %v7603_v59 = vsel %vm7367_vm4, %v7602_v38, %v7592_v52 }
 0xcd4   :  { %v7596_v57 = vpop.permute.xlu1 %7595 }
 0xcd5   :  { %v7604_v0 = vsel %vm7600_vm5, %v7603_v59, %v7596_v57 }
 0xcd6   :  { %7606 = vst [vmem:[%s9926_s14 + $0x8] sm:$0x3f] %v7604_v0 }

// kernel: _lambda_.11
= control target key start
LH: loop header
LB: loop body
LE: loop exit
PB: predicated region body
PF: predicated region fallthrough
CT: control target
= control target key end

     0   :  { %vm81_vm0 = vcmask 261120   ;;  %v6193_v14 = vmov 0.0   ;;  %vm6194_vm1 = vmmov 0   ;;  %s6196_s26 = smov 64   ;;  %vm1197_vm2 = vcmask 64512   ;;  %s6866_s0 = inlined_call_operand.vmem [shape: f32[2,8,32], index: 0, kind: input, shape index: {}]   ;;  %s6867_s5 = inlined_call_operand.vmem [shape: bf16[32,96], index: 5, kind: input, shape index: {}]   ;;  %s6868_s3 = inlined_call_operand.vmem [shape: f32[1,32], index: 3, kind: input, shape index: {}]   ;;  %s6869_s4 = inlined_call_operand.vmem [shape: f32[1,32], index: 4, kind: input, shape index: {}]   ;;  %s6870_s6 = inlined_call_operand.vmem [shape: f32[1,96], index: 6, kind: input, shape index: {}]   ;;  %s6871_s7 = inlined_call_operand.vmem [shape: bf16[32,32], index: 7, kind: input, shape index: {}]   ;;  %s6872_s8 = inlined_call_operand.vmem [shape: f32[1,32], index: 8, kind: input, shape index: {}]   ;;  %s6873_s13 = inlined_call_operand.vmem [shape: bf16[32,64], index: 13, kind: input, shape index: {}]   ;;  %s6874_s1 = inlined_call_operand.vmem [shape: f32[2,3,32], index: 1, kind: input, shape index: {}]   ;;  %s6875_s11 = inlined_call_operand.vmem [shape: bf16[32,32], index: 11, kind: input, shape index: {}]   ;;  %s6876_s9 = inlined_call_operand.vmem [shape: f32[1,32], index: 9, kind: input, shape index: {}]   ;;  %s6877_s10 = inlined_call_operand.vmem [shape: f32[1,32], index: 10, kind: input, shape index: {}]   ;;  %s6878_s14 = inlined_call_operand.vmem [shape: f32[1,64], index: 14, kind: input, shape index: {}]   ;;  %s6879_s12 = inlined_call_operand.vmem [shape: f32[1,32], index: 12, kind: input, shape index: {}]   ;;  %s6880_s2 = inlined_call_operand.vmem [shape: f32[8,3], index: 2, kind: input, shape index: {}]   ;;  %s6881_s15 = inlined_call_operand.vmem [shape: bf16[32,32], index: 15, kind: input, shape index: {}]   ;;  %s6882_s16 = inlined_call_operand.vmem [shape: f32[1,32], index: 16, kind: input, shape index: {}]   ;;  %s6883_s19 = inlined_call_operand.vmem [shape: bf16[32,64], index: 19, kind: input, shape index: {}]   ;;  %s6884_s17 = inlined_call_operand.vmem [shape: f32[1,32], index: 17, kind: input, shape index: {}]   ;;  %s6885_s18 = inlined_call_operand.vmem [shape: f32[1,32], index: 18, kind: input, shape index: {}]   ;;  %s6886_s21 = inlined_call_operand.vmem [shape: bf16[64,32], index: 21, kind: input, shape index: {}]   ;;  %s6887_s20 = inlined_call_operand.vmem [shape: f32[1,64], index: 20, kind: input, shape index: {}]   ;;  %s6888_s22 = inlined_call_operand.vmem [shape: f32[1,32], index: 22, kind: input, shape index: {}]   ;;  %s6889_s23 = inlined_call_operand.vmem [shape: f32[2,256], index: 23, kind: output, shape index: {}]  }
   0x1   :  { %6894 = sst [smem:[#allocation2_spill]] %s6866_s0  ;;  %5613 = vmatprep.subr.bf16.mxu1 %v6193_v14  ;;  %5617 = vmatprep.mubr.msk.bf16.mxu1 %vm6194_vm1, %v6193_v14  ;;  %vm1665_vm4 = vcmask 1043456   ;;  %vm4266_vm5 = vcmask 23552   ;;  %vm4350_vm6 = vcmask 1040384   ;;  %vm4351_vm7 = vcmask 1041408  }
   0x2   :  { %6895 = sst [smem:[#allocation3_spill]] %s6867_s5  ;;  %s6902_s24 = sld [smem:[#allocation2_spill]]  ;;  %5627 = vmatprep.subr.bf16.mxu0 %v6193_v14  ;;  %5629 = vmatprep.mubr.msk.bf16.mxu0 %vm6194_vm1, %v6193_v14  ;;  %vm5295_vm8 = vcmask 523264   ;;  %vm5434_vm9 = vcmask 785408  }
   0x3   :  { %6896 = sst [smem:[#allocation4_spill]] %s6868_s3  ;;  %s6903_s3 = sld [smem:[#allocation3_spill]] }
   0x4   :  { %6897 = sst [smem:[#allocation5_spill]] %s6869_s4  ;;  %s6904_s29 = sld [smem:[#allocation4_spill]] }
   0x5   :  { %6898 = sst [smem:[#allocation6_spill]] %s6870_s6  ;;  %s6905_s6 = sld [smem:[#allocation5_spill]] }
   0x6   :  { %6899 = sst [smem:[#allocation7_spill]] %s6871_s7  ;;  %s6906_s7 = sld [smem:[#allocation6_spill]] }
   0x7   :  { %6900 = sst [smem:[#allocation8_spill]] %s6872_s8  ;;  %s6195_s5 = smov 96  }
   0x8   :  { %6901 = sst [smem:[#allocation9_spill]] %s6873_s13  ;;  %v75_v0 = vld [vmem:[%s6902_s24] sm:$0xff]  ;;  %v76_v1 = vld [vmem:[%s6902_s24 + $0x8] sm:$0xff]  ;;  %s6907_s27 = sld [smem:[#allocation7_spill]] }
   0x9   :  { %v82_v2 = vsel %vm81_vm0, %v75_v0, 0.0  ;;  %v85_v3 = vsel %vm81_vm0, %v76_v1, 0.0  ;;  %v6094_v15 = vld [vmem:[%s6903_s3] sm:$0xff]   ;;  %v6095_v16 = vld [vmem:[%s6903_s3 + $0x8] sm:$0xff]   ;;  %s6908_s0 = sld [smem:[#allocation8_spill]] }
   0xa   :  { %83 = vadd.xlane.f32.xlu0 %v82_v2  ;;  %5614 = vmatpush3.bf16.msra.mxu1 %v6094_v15  ;;  %v5455_v25 = vld [vmem:[%s6904_s29] ss:$0 sm:$0xff] }
   0xb   :  { %5615 = vmatprep.subr.bf16.mxu1 %v6193_v14  ;;  %v5456_v29 = vld [vmem:[%s6905_s6] ss:$0 sm:$0xff] }
   0xc   :  { %v5457_v34 = vld [vmem:[%s6906_s7] ss:$0 sm:$0xff] }
   0xe   :  { %86 = vadd.xlane.f32.xlu0 %v85_v3  ;;  %5616 = vmatpush3.bf16.msra.mxu1 %v6095_v16 }
   0xf   :  { %5621 = vmatprep.subr.bf16.mxu1 %v6193_v14 }
  0x97   :  { %v84_v4 = vpop.xlane.xlu0 %83 }
  0x98   :  { %v89_v5 = vmul.f32 0.03125, %v84_v4 }
  0x9a   :  { %v91_v6 = vsub.f32 %v75_v0, %v89_v5 }
  0x9b   :  { %v87_v7 = vpop.xlane.xlu0 %86 }
  0x9c   :  { %v90_v8 = vmul.f32 0.03125, %v87_v7  ;;  %v93_v9 = vmul.f32 %v91_v6, %v91_v6 }
  0x9e   :  { %v92_v10 = vsub.f32 %v76_v1, %v90_v8  ;;  %v95_v11 = vsel %vm81_vm0, %v93_v9, 0.0 }
  0x9f   :  { %96 = vadd.xlane.f32.xlu1 %v95_v11 }
  0xa0   :  { %v94_v12 = vmul.f32 %v92_v10, %v92_v10 }
  0xa2   :  { %v98_v13 = vsel %vm81_vm0, %v94_v12, 0.0 }
  0xa3   :  { %99 = vadd.xlane.f32.xlu1 %v98_v13 }
 0x12c   :  { %v97_v17 = vpop.xlane.xlu1 %96 }
 0x12d   :  { %v101_v18 = vmul.f32 0.03125, %v97_v17 }
 0x12f   :  { %v103_v19 = vadd.f32 1e-05, %v101_v18 }
 0x130   :  { %v100_v20 = vpop.xlane.xlu1 %99 }
 0x131   :  { %6111 = vrsqrt.f32 %v103_v19  ;;  %v102_v21 = vmul.f32 0.03125, %v100_v20 }
 0x133   :  { %v104_v22 = vadd.f32 1e-05, %v102_v21 }
 0x135   :  { %6113 = vrsqrt.f32 %v104_v22 }
 0x13b   :  { %v6112_v23 = vpop.eup %6111 }
 0x13c   :  { %v107_v24 = vmul.f32 %v6112_v23, %v91_v6 }
 0x13e   :  { %v115_v28 = vmul.f32 %v5455_v25, %v107_v24 }
 0x13f   :  { %v6114_v26 = vpop.eup %6113 }
 0x140   :  { %v108_v27 = vmul.f32 %v6114_v26, %v92_v10  ;;  %v123_v31 = vadd.f32 %v5456_v29, %v115_v28 }
 0x142   :  { %v116_v30 = vmul.f32 %v5455_v25, %v108_v27 }
 0x144   :  { %v124_v32 = vadd.f32 %v5456_v29, %v116_v30 }
 0x146   :  { %v130_v33 = vpack.c.bf16 %v124_v32, %v123_v31 }
 0x148   :  { %5618 = vmatmul.mubr.msk.bf16.vlgmr.msra.gmra.mrb[0].mxu1 %vm81_vm0, %v130_v33 }
 0x149   :  { %5623 = vmatprep.mubr.msk.bf16.mxu1 %vm6194_vm1, %v6193_v14 }
 0x21b   :  { %v186_v35 = vpop.f32.mrb[0].mxu1 }
 0x21c   :  { %v187_v36 = vadd.f32 %v5457_v34, %v186_v35  ;;  %v5619_v37 = vpop.f32.mrb[1].mxu1 }
 0x21d   :  { %v189_v38 = vpop.f32.mrb[2].mxu1 }
 0x21e   :  { %v190_v39 = vadd.f32 %v5457_v34, %v189_v38  ;;  %529 = vrot.lane.b32.xlu0 %v187_v36, %s6195_s5  ;;  %v5620_v40 = vpop.f32.mrb[3].mxu1 }
 0x220   :  { %531 = vrot.lane.b32.xlu1 %v190_v39, %s6195_s5  ;;  %v5916_v1 = vpack.i.bf16 %v190_v39, %v187_v36 }
 0x23c   :  { %199 = vxpose.xlu0.b32.start.end [1/1] (short) (narrow) %v187_v36, 32 }
 0x290   :  { %v530_v41 = vpop.permute.xlu0 %529 }
 0x291   :  { %535 = vxpose.xlu1.b32.start.end [1/1] (short) (narrow) %v530_v41, 32 }
 0x292   :  { %v532_v42 = vpop.permute.xlu1 %531 }
 0x293   :  { %567 = vxpose.xlu0.b32.start.end [1/1] (short) (narrow) %v532_v42, 32 }
 0x29e   :  { %231 = vxpose.xlu1.b32.start.end [1/1] (short) (narrow) %v190_v39, 32 }
 0x2bc   :  { %v215_v43 = vpop.trf.xlu0 }
 0x2c0   :  { %v216_v44 = vpop.trf.xlu0 }
 0x2c4   :  { %v217_v45 = vpop.trf.xlu0 }
 0x2c8   :  { %v218_v46 = vpop.trf.xlu0 }
 0x311   :  { %v551_v47 = vpop.trf.xlu1 }
 0x312   :  { %599 = vxpose.xlu0.b32.start.end [1/1] (short) (narrow) %v551_v47, 8 }
 0x313   :  { %v583_v48 = vpop.trf.xlu0 }
 0x314   :  { %v5888_v50 = vpack.i.bf16 %v583_v48, %v217_v45 }
 0x315   :  { %v552_v49 = vpop.trf.xlu1 }
 0x316   :  { %631 = vxpose.xlu1.b32.start.end [1/1] (short) (narrow) %v552_v49, 8 }
 0x317   :  { %v584_v53 = vpop.trf.xlu0 }
 0x318   :  { %v5895_v58 = vpack.i.bf16 %v584_v53, %v218_v46 }
 0x319   :  { %v553_v51 = vpop.trf.xlu1 }
 0x31a   :  { %5889 = vxpose.xlu1.b32.start.end [1/1] (short) (narrow) %v5888_v50, 8  ;;  %v5874_v52 = vpack.i.bf16 %v553_v51, %v215_v43 }
 0x31b   :  { %v585_v56 = vpop.trf.xlu0 }
 0x31c   :  { %5875 = vxpose.xlu0.b32.start.end [1/1] (short) (narrow) %v5874_v52, 8 }
 0x31d   :  { %v554_v54 = vpop.trf.xlu1 }
 0x31e   :  { %v5881_v55 = vpack.i.bf16 %v554_v54, %v216_v44  ;;  %v193_v54 = vlaneseq }
 0x31f   :  { %v586_v60 = vpop.trf.xlu0 }
 0x320   :  { %5882 = vxpose.xlu0.b32.start.end [1/1] (short) (narrow) %v5881_v55, 8  ;;  %v6409_v55 = vshrl.u32 %v193_v54, 7 }
 0x321   :  { %v247_v57 = vpop.trf.xlu1 }
 0x322   :  { %v5902_v59 = vpack.i.bf16 %v585_v56, %v247_v57  ;;  %v196_v56 = vand.u32 127, %v193_v54 }
 0x324   :  { %5896 = vxpose.xlu0.b32.start.end [1/1] (short) (narrow) %v5895_v58, 8  ;;  %5903 = vxpose.xlu1.b32.start.end [1/1] (short) (narrow) %v5902_v59, 8  ;;  %vm197_vm3 = vcmp.gt.s32.totalorder %v196_v56, %v6409_v55 }
 0x325   :  { %v248_v61 = vpop.trf.xlu1  ;;  %v198_v58 = vsel %vm197_vm3, -1e+09, %v6193_v14 }
 0x326   :  { %v5909_v62 = vpack.i.bf16 %v586_v60, %v248_v61 }
 0x328   :  { %5910 = vxpose.xlu0.b32.start.end [1/1] (short) (narrow) %v5909_v62, 8 }
 0x329   :  { %v249_v63 = vpop.trf.xlu1 }
 0x32a   :  { %455 = vxpose.xlu1.b32.start.end [1/1] (short) (narrow) %v249_v63, 8 }
 0x32d   :  { %v250_v0 = vpop.trf.xlu1 }
 0x32e   :  { %487 = vxpose.xlu0.b32.start.end [1/1] (short) (narrow) %v250_v0, 8 }
 0x348   :  { %5917 = vrot.lane.b32.xlu1 %v5916_v1, %s6196_s26 }
 0x392   :  { %v615_v2 = vpop.trf.xlu0 }
 0x393   :  { %v855_v3 = vpack.c.bf16 %v615_v2, %v615_v2 }
 0x395   :  { %v1202_v4 = vsel %vm1197_vm2, %v855_v3, 0 }
 0x396   :  { %5622 = vmatpush3.bf16.xpose.msra.mxu1 %v1202_v4  ;;  %v647_v5 = vpop.trf.xlu1 }
 0x397   :  { %v856_v6 = vpack.c.bf16 %v647_v5, %v647_v5  ;;  %5633 = vmatprep.subr.bf16.mxu1 %v6193_v14 }
 0x399   :  { %v1248_v7 = vsel %vm1197_vm2, %v856_v6, 0 }
 0x39a   :  { %5628 = vmatpush3.bf16.xpose.msra.mxu0 %v1248_v7  ;;  %v5890_v8 = vpop.trf.xlu1 }
 0x39b   :  { %5639 = vmatprep.subr.bf16.mxu0 %v6193_v14  ;;  %v5894_v15 = vunpack.i.h.bf16 %v5890_v8  ;;  %v5891_v17 = vunpack.i.l.bf16 %v5890_v8 }
 0x39c   :  { %v5876_v9 = vpop.trf.xlu0 }
 0x39d   :  { %v5877_v10 = vunpack.i.l.bf16 %v5876_v9  ;;  %v5880_v11 = vunpack.i.h.bf16 %v5876_v9  ;;  %v859_v22 = vpack.c.bf16 %v5894_v15, %v5894_v15  ;;  %v521_v26 = vpack.c.bf16 %v5891_v17, %v5891_v17 }
 0x39f   :  { %v519_v12 = vpack.c.bf16 %v5877_v10, %v5877_v10  ;;  %v857_v13 = vpack.c.bf16 %v5880_v11, %v5880_v11  ;;  %v1386_v30 = vsel %vm1197_vm2, %v859_v22, 0 }
 0x3a0   :  { %v5883_v16 = vpop.trf.xlu0 }
 0x3a1   :  { %5624 = vmatmul.mubr.msk.bf16.vlgmr.msra.gmra.mrb[4].mxu1 %vm1197_vm2, %v519_v12  ;;  %v1294_v18 = vsel %vm1197_vm2, %v857_v13, 0  ;;  %v5884_v19 = vunpack.i.l.bf16 %v5883_v16  ;;  %v5887_v20 = vunpack.i.h.bf16 %v5883_v16 }
 0x3a2   :  { %5634 = vmatpush3.bf16.xpose.msra.mxu1 %v1294_v18  ;;  %5635 = vmatprep.mubr.msk.bf16.mxu1 %vm6194_vm1, %v6193_v14 }
 0x3a3   :  { %v520_v21 = vpack.c.bf16 %v5884_v19, %v5884_v19  ;;  %5645 = vmatprep.subr.bf16.mxu1 %v6193_v14  ;;  %v858_v23 = vpack.c.bf16 %v5887_v20, %v5887_v20 }
 0x3a4   :  { %v5897_v24 = vpop.trf.xlu0  ;;  %v5904_v25 = vpop.trf.xlu1 }
 0x3a5   :  { %5630 = vmatmul.mubr.msk.bf16.vlgmr.msra.gmra.mrb[0].mxu0 %vm1197_vm2, %v520_v21  ;;  %v1340_v27 = vsel %vm1197_vm2, %v858_v23, 0  ;;  %v5898_v28 = vunpack.i.l.bf16 %v5897_v24  ;;  %v5901_v29 = vunpack.i.h.bf16 %v5897_v24  ;;  %v5908_v31 = vunpack.i.h.bf16 %v5904_v25 }
 0x3a6   :  { %5641 = vmatprep.mubr.msk.bf16.mxu0 %vm6194_vm1, %v6193_v14  ;;  %5640 = vmatpush3.bf16.xpose.msra.mxu0 %v1340_v27  ;;  %v5905_v34 = vunpack.i.l.bf16 %v5904_v25 }
 0x3a7   :  { %5651 = vmatprep.subr.bf16.mxu0 %v6193_v14  ;;  %v860_v32 = vpack.c.bf16 %v5901_v29, %v5901_v29  ;;  %v522_v35 = vpack.c.bf16 %v5898_v28, %v5898_v28  ;;  %v861_v36 = vpack.c.bf16 %v5908_v31, %v5908_v31 }
 0x3a8   :  { %v5911_v33 = vpop.trf.xlu0  ;;  %v523_v39 = vpack.c.bf16 %v5905_v34, %v5905_v34 }
 0x3a9   :  { %5636 = vmatmul.mubr.msk.bf16.vlgmr.msra.gmra.mrb[8].mxu1 %vm1197_vm2, %v521_v26  ;;  %v1432_v37 = vsel %vm1197_vm2, %v860_v32, 0  ;;  %v5915_v38 = vunpack.i.h.bf16 %v5911_v33  ;;  %v5912_v40 = vunpack.i.l.bf16 %v5911_v33  ;;  %v1478_v41 = vsel %vm1197_vm2, %v861_v36, 0 }
 0x3aa   :  { %5646 = vmatpush3.bf16.xpose.msra.mxu1 %v1386_v30  ;;  %5647 = vmatprep.mubr.msk.bf16.mxu1 %vm6194_vm1, %v6193_v14  ;;  %v471_v44 = vpop.trf.xlu1 }
 0x3ab   :  { %5657 = vmatprep.subr.bf16.mxu1 %v6193_v14  ;;  %v862_v42 = vpack.c.bf16 %v5915_v38, %v5915_v38  ;;  %v524_v43 = vpack.c.bf16 %v5912_v40, %v5912_v40  ;;  %v525_v46 = vpack.c.bf16 %v471_v44, %v471_v44 }
 0x3ad   :  { %5642 = vmatmul.mubr.msk.bf16.vlgmr.msra.gmra.mrb[4].mxu0 %vm1197_vm2, %v522_v35  ;;  %v1524_v45 = vsel %vm1197_vm2, %v862_v42, 0 }
 0x3ae   :  { %5652 = vmatpush3.bf16.xpose.msra.mxu0 %v1432_v37  ;;  %5653 = vmatprep.mubr.msk.bf16.mxu0 %vm6194_vm1, %v6193_v14  ;;  %v503_v47 = vpop.trf.xlu0 }
 0x3af   :  { %5663 = vmatprep.subr.bf16.mxu0 %v6193_v14  ;;  %v526_v48 = vpack.c.bf16 %v503_v47, %v503_v47 }
 0x3b1   :  { %5648 = vmatmul.mubr.msk.bf16.vlgmr.msra.gmra.mrb[12].mxu1 %vm1197_vm2, %v523_v39 }
 0x3b2   :  { %5658 = vmatpush3.bf16.xpose.msra.mxu1 %v1478_v41  ;;  %5659 = vmatprep.mubr.msk.bf16.mxu1 %vm6194_vm1, %v6193_v14 }
 0x3b3   :  { %5669 = vmatprep.subr.bf16.mxu1 %v6193_v14 }
 0x3b5   :  { %5654 = vmatmul.mubr.msk.bf16.vlgmr.msra.gmra.mrb[8].mxu0 %vm1197_vm2, %v524_v43 }
 0x3b6   :  { %5664 = vmatpush3.bf16.xpose.msra.mxu0 %v1524_v45  ;;  %5665 = vmatprep.mubr.msk.bf16.mxu0 %vm6194_vm1, %v6193_v14 }
 0x3b7   :  { %5675 = vmatprep.subr.bf16.mxu0 %v6193_v14 }
 0x3b9   :  { %5660 = vmatmul.mubr.msk.bf16.vlgmr.msra.gmra.mrb[16].mxu1 %vm1197_vm2, %v525_v46 }
 0x3ba   :  { %v5918_v49 = vpop.permute.xlu1 %5917  ;;  %5671 = vmatprep.mubr.msk.bf16.mxu1 %vm6194_vm1, %v6193_v14 }
 0x3bb   :  { %5922 = vxpose.xlu0.b32.start.end [1/1] (short) (narrow) %v5918_v49, 32 }
 0x3bd   :  { %5666 = vmatmul.mubr.msk.bf16.vlgmr.msra.gmra.mrb[12].mxu0 %vm1197_vm2, %v526_v48 }
 0x3be   :  { %5677 = vmatprep.mubr.msk.bf16.mxu0 %vm6194_vm1, %v6193_v14 }
 0x43b   :  { %v6401_v50 = vpop.trf.xlu0 }
 0x43f   :  { %v6403_v51 = vpop.trf.xlu0 }
 0x440   :  { %v5929_v56 = vunpack.i.l.bf16 %v6403_v51 }
 0x443   :  { %v6405_v52 = vpop.trf.xlu0 }
 0x447   :  { %v6407_v53 = vpop.trf.xlu0 }
 0x474   :  { %v1238_v57 = vpop.f32.mrb[4].mxu1 }
 0x475   :  { %v1566_v59 = vmul.f32 0.35355338, %v1238_v57  ;;  %v5625_v60 = vpop.f32.mrb[5].mxu1  ;;  %v5934_v57 = vunpack.i.l.bf16 %v6405_v52 }
 0x476   :  { %v1241_v61 = vpop.f32.mrb[6].mxu1  ;;  %v5927_v60 = vunpack.i.h.bf16 %v6401_v50 }
 0x477   :  { %v5626_v62 = vpop.f32.mrb[7].mxu1  ;;  %v6413_v63 = vadd.f32 %v1566_v59, %v198_v58  ;;  %v5939_v59 = vunpack.i.l.bf16 %v6407_v53  ;;  %v5932_v61 = vunpack.i.h.bf16 %v6403_v51 }
 0x478   :  { %v1284_v0 = vpop.f32.mrb[0].mxu0  ;;  %v5924_v62 = vunpack.i.l.bf16 %v6401_v50 }
 0x479   :  { %v1567_v1 = vmul.f32 0.35355338, %v1284_v0  ;;  %v5631_v2 = vpop.f32.mrb[1].mxu0  ;;  %v1582_v3 = vsel %vm1197_vm2, %v6413_v63, -inf  ;;  %v5942_v0 = vunpack.i.h.bf16 %v6407_v53 }
 0x47a   :  { %v1287_v4 = vpop.f32.mrb[2].mxu0  ;;  %1583 = vmax.xlane.f32.xlu0 %v1582_v3 }
 0x47b   :  { %v5632_v5 = vpop.f32.mrb[3].mxu0  ;;  %v6417_v6 = vadd.f32 %v1567_v1, %v198_v58 }
 0x47c   :  { %v1330_v7 = vpop.f32.mrb[8].mxu1 }
 0x47d   :  { %v1568_v8 = vmul.f32 0.35355338, %v1330_v7  ;;  %v5637_v9 = vpop.f32.mrb[9].mxu1  ;;  %v1585_v10 = vsel %vm1197_vm2, %v6417_v6, -inf }
 0x47e   :  { %1586 = vmax.xlane.f32.xlu1 %v1585_v10  ;;  %v1333_v11 = vpop.f32.mrb[10].mxu1 }
 0x47f   :  { %v5638_v12 = vpop.f32.mrb[11].mxu1  ;;  %v6421_v13 = vadd.f32 %v1568_v8, %v198_v58 }
 0x480   :  { %v1376_v15 = vpop.f32.mrb[4].mxu0 }
 0x481   :  { %v1588_v16 = vsel %vm1197_vm2, %v6421_v13, -inf  ;;  %v1569_v17 = vmul.f32 0.35355338, %v1376_v15  ;;  %v5643_v18 = vpop.f32.mrb[5].mxu0 }
 0x482   :  { %1589 = vmax.xlane.f32.xlu0 %v1588_v16  ;;  %v1379_v19 = vpop.f32.mrb[6].mxu0 }
 0x483   :  { %v5644_v20 = vpop.f32.mrb[7].mxu0  ;;  %v6425_v22 = vadd.f32 %v1569_v17, %v198_v58 }
 0x484   :  { %v1422_v21 = vpop.f32.mrb[12].mxu1 }
 0x485   :  { %v1570_v23 = vmul.f32 0.35355338, %v1422_v21  ;;  %v5649_v24 = vpop.f32.mrb[13].mxu1  ;;  %v1591_v25 = vsel %vm1197_vm2, %v6425_v22, -inf }
 0x486   :  { %v1425_v26 = vpop.f32.mrb[14].mxu1  ;;  %1592 = vmax.xlane.f32.xlu0 %v1591_v25 }
 0x487   :  { %v5650_v27 = vpop.f32.mrb[15].mxu1  ;;  %v1578_v28 = vadd.f32 %v1570_v23, %v198_v58 }
 0x488   :  { %v1468_v29 = vpop.f32.mrb[8].mxu0 }
 0x489   :  { %v1594_v30 = vsel %vm1197_vm2, %v1578_v28, -inf  ;;  %v1571_v31 = vmul.f32 0.35355338, %v1468_v29  ;;  %v5655_v32 = vpop.f32.mrb[9].mxu0 }
 0x48a   :  { %1595 = vmax.xlane.f32.xlu1 %v1594_v30  ;;  %v1471_v33 = vpop.f32.mrb[10].mxu0 }
 0x48b   :  { %v5656_v34 = vpop.f32.mrb[11].mxu0  ;;  %v1579_v36 = vadd.f32 %v1571_v31, %v198_v58 }
 0x48c   :  { %v1514_v35 = vpop.f32.mrb[16].mxu1 }
 0x48d   :  { %v1572_v37 = vmul.f32 0.35355338, %v1514_v35  ;;  %v5661_v38 = vpop.f32.mrb[17].mxu1  ;;  %v1597_v39 = vsel %vm1197_vm2, %v1579_v36, -inf }
 0x48e   :  { %v1517_v40 = vpop.f32.mrb[18].mxu1  ;;  %1598 = vmax.xlane.f32.xlu1 %v1597_v39 }
 0x48f   :  { %v5662_v41 = vpop.f32.mrb[19].mxu1  ;;  %v1580_v42 = vadd.f32 %v1572_v37, %v198_v58 }
 0x490   :  { %v1560_v43 = vpop.f32.mrb[12].mxu0 }
 0x491   :  { %v1600_v44 = vsel %vm1197_vm2, %v1580_v42, -inf  ;;  %v1573_v45 = vmul.f32 0.35355338, %v1560_v43  ;;  %v5667_v46 = vpop.f32.mrb[13].mxu0 }
 0x492   :  { %v1563_v47 = vpop.f32.mrb[14].mxu0  ;;  %1601 = vmax.xlane.f32.xlu1 %v1600_v44 }
 0x493   :  { %v5668_v48 = vpop.f32.mrb[15].mxu0  ;;  %v1581_v49 = vadd.f32 %v1573_v45, %v198_v58  ;;  %v5937_v58 = vunpack.i.h.bf16 %v6405_v52 }
 0x495   :  { %v1603_v54 = vsel %vm1197_vm2, %v1581_v49, -inf }
 0x496   :  { %1604 = vmax.xlane.f32.xlu1 %v1603_v54 }
 0x4b3   :  { %965 = vxpose.xlu0.b32.start.end [1/1] (short) (narrow) %v5929_v56, 8 }
 0x4b7   :  { %997 = vxpose.xlu0.b32.start.end [1/1] (short) (narrow) %v5934_v57, 8 }
 0x4bb   :  { %1029 = vxpose.xlu0.b32.start.end [1/1] (short) (narrow) %v5939_v59, 8 }
 0x4bf   :  { %1061 = vxpose.xlu0.b32.start.end [1/1] (short) (narrow) %v5927_v60, 8 }
 0x4c3   :  { %1093 = vxpose.xlu0.b32.start.end [1/1] (short) (narrow) %v5932_v61, 8 }
 0x4c7   :  { %1125 = vxpose.xlu0.b32.start.end [1/1] (short) (narrow) %v5937_v58, 8 }
 0x4c9   :  { %933 = vxpose.xlu1.b32.start.end [1/1] (short) (narrow) %v5924_v62, 8 }
 0x4cb   :  { %1157 = vxpose.xlu0.b32.start.end [1/1] (short) (narrow) %v5942_v0, 8 }
 0x507   :  { %v1584_v1 = vpop.xlane.xlu0 %1583 }
 0x508   :  { %v1606_v2 = vsub.f32 %v6413_v63, %v1584_v1 }
 0x50a   :  { %v1614_v3 = vmul.f32 1.442695, %v1606_v2 }
 0x50b   :  { %v1587_v4 = vpop.xlane.xlu1 %1586 }
 0x50c   :  { %6115 = vpow2.f32 %v1614_v3  ;;  %v1607_v5 = vsub.f32 %v6417_v6, %v1587_v4 }
 0x50e   :  { %v1616_v7 = vmul.f32 1.442695, %v1607_v5 }
 0x50f   :  { %v1590_v51 = vpop.xlane.xlu0 %1589 }
 0x510   :  { %6117 = vpow2.f32 %v1616_v7  ;;  %v1608_v52 = vsub.f32 %v6421_v13, %v1590_v51 }
 0x512   :  { %v1618_v8 = vmul.f32 1.442695, %v1608_v52 }
 0x513   :  { %v1593_v10 = vpop.xlane.xlu0 %1592 }
 0x514   :  { %6119 = vpow2.f32 %v1618_v8  ;;  %v1609_v6 = vsub.f32 %v6425_v22, %v1593_v10 }
 0x516   :  { %v6444_v50 = vpop.eup %6115  ;;  %v1620_v18 = vmul.f32 1.442695, %v1609_v6 }
 0x517   :  { %v1596_v53 = vpop.xlane.xlu1 %1595  ;;  %v1630_v9 = vsel %vm1197_vm2, %v6444_v50, 0.0  ;;  %v1654_v1 = vpack.c.bf16 %v6444_v50, %v6444_v50 }
 0x518   :  { %v1610_v63 = vsub.f32 %v1578_v28, %v1596_v53  ;;  %1631 = vadd.xlane.f32.xlu1 %v1630_v9 }
 0x51a   :  { %v6118_v11 = vpop.eup %6117  ;;  %v1622_v12 = vmul.f32 1.442695, %v1610_v63 }
 0x51b   :  { %v1633_v15 = vsel %vm1197_vm2, %v6118_v11, 0.0  ;;  %v1599_v16 = vpop.xlane.xlu1 %1598  ;;  %v1655_v41 = vpack.c.bf16 %v6118_v11, %v6118_v11 }
 0x51c   :  { %6121 = vpow2.f32 %v1622_v12  ;;  %1634 = vadd.xlane.f32.xlu1 %v1633_v15  ;;  %v1611_v13 = vsub.f32 %v1579_v36, %v1599_v16 }
 0x51e   :  { %v6450_v17 = vpop.eup %6119  ;;  %v1624_v19 = vmul.f32 1.442695, %v1611_v13 }
 0x51f   :  { %v1636_v20 = vsel %vm1197_vm2, %v6450_v17, 0.0  ;;  %v1602_v21 = vpop.xlane.xlu1 %1601  ;;  %v1656_v7 = vpack.c.bf16 %v6450_v17, %v6450_v17 }
 0x520   :  { %1637 = vadd.xlane.f32.xlu1 %v1636_v20  ;;  %6123 = vpow2.f32 %v1624_v19  ;;  %v1612_v23 = vsub.f32 %v1580_v42, %v1602_v21 }
 0x521   :  { %6125 = vpow2.f32 %v1620_v18 }
 0x522   :  { %v1626_v24 = vmul.f32 1.442695, %v1612_v23 }
 0x523   :  { %v1605_v22 = vpop.xlane.xlu1 %1604 }
 0x524   :  { %6127 = vpow2.f32 %v1626_v24  ;;  %v1613_v25 = vsub.f32 %v1581_v49, %v1605_v22 }
 0x526   :  { %v6454_v26 = vpop.eup %6121  ;;  %v1628_v27 = vmul.f32 1.442695, %v1613_v25 }
 0x527   :  { %v1642_v28 = vsel %vm1197_vm2, %v6454_v26, 0.0  ;;  %v1658_v8 = vpack.c.bf16 %v6454_v26, %v6454_v26 }
 0x528   :  { %1643 = vadd.xlane.f32.xlu0 %v1642_v28  ;;  %6129 = vpow2.f32 %v1628_v27 }
 0x52a   :  { %v6124_v29 = vpop.eup %6123 }
 0x52b   :  { %v1645_v30 = vsel %vm1197_vm2, %v6124_v29, 0.0  ;;  %v6126_v31 = vpop.eup %6125  ;;  %v1659_v56 = vpack.c.bf16 %v6124_v29, %v6124_v29 }
 0x52c   :  { %1646 = vadd.xlane.f32.xlu1 %v1645_v30  ;;  %v1639_v33 = vsel %vm1197_vm2, %v6126_v31, 0.0  ;;  %v1657_v46 = vpack.c.bf16 %v6126_v31, %v6126_v31 }
 0x52e   :  { %v6459_v32 = vpop.eup %6127 }
 0x52f   :  { %v1648_v34 = vsel %vm1197_vm2, %v6459_v32, 0.0  ;;  %v1660_v50 = vpack.c.bf16 %v6459_v32, %v6459_v32 }
 0x530   :  { %1640 = vadd.xlane.f32.xlu1 %v1639_v33  ;;  %1649 = vadd.xlane.f32.xlu0 %v1648_v34 }
 0x532   :  { %v6130_v35 = vpop.eup %6129 }
 0x533   :  { %v981_v36 = vpop.trf.xlu0  ;;  %v1651_v37 = vsel %vm1197_vm2, %v6130_v35, 0.0  ;;  %v1661_v3 = vpack.c.bf16 %v6130_v35, %v6130_v35 }
 0x534   :  { %v1190_v38 = vpack.c.bf16 %v981_v36, %v981_v36  ;;  %1652 = vadd.xlane.f32.xlu0 %v1651_v37 }
 0x536   :  { %v1713_v39 = vsel %vm1665_vm4, %v1190_v38, 0 }
 0x537   :  { %5676 = vmatpush3.bf16.msra.mxu0 %v1713_v39  ;;  %v1013_v40 = vpop.trf.xlu0 }
 0x538   :  { %5687 = vmatprep.subr.bf16.mxu0 %v6193_v14  ;;  %v1191_v59 = vpack.c.bf16 %v1013_v40, %v1013_v40 }
 0x53a   :  { %5678 = vmatmul.mubr.msk.bf16.vlgmr.msra.gmra.mrb[16].mxu0 %vm1197_vm2, %v1655_v41  ;;  %v1759_v2 = vsel %vm1665_vm4, %v1191_v59, 0 }
 0x53b   :  { %v1045_v42 = vpop.trf.xlu0  ;;  %5689 = vmatprep.mubr.msk.bf16.mxu0 %vm6194_vm1, %v6193_v14 }
 0x53c   :  { %v1192_v43 = vpack.c.bf16 %v1045_v42, %v1045_v42 }
 0x53e   :  { %v1805_v44 = vsel %vm1665_vm4, %v1192_v43, 0 }
 0x53f   :  { %5688 = vmatpush3.bf16.msra.mxu0 %v1805_v44  ;;  %v1077_v45 = vpop.trf.xlu0 }
 0x540   :  { %5699 = vmatprep.subr.bf16.mxu0 %v6193_v14  ;;  %v1193_v4 = vpack.c.bf16 %v1077_v45, %v1077_v45 }
 0x542   :  { %5690 = vmatmul.mubr.msk.bf16.vlgmr.msra.gmra.mrb[20].mxu0 %vm1197_vm2, %v1657_v46  ;;  %v1851_v5 = vsel %vm1665_vm4, %v1193_v4, 0 }
 0x543   :  { %v1109_v47 = vpop.trf.xlu0  ;;  %5701 = vmatprep.mubr.msk.bf16.mxu0 %vm6194_vm1, %v6193_v14 }
 0x544   :  { %v1194_v48 = vpack.c.bf16 %v1109_v47, %v1109_v47 }
 0x546   :  { %v1897_v49 = vsel %vm1665_vm4, %v1194_v48, 0 }
 0x547   :  { %5700 = vmatpush3.bf16.msra.mxu0 %v1897_v49  ;;  %v1141_v54 = vpop.trf.xlu0 }
 0x548   :  { %5711 = vmatprep.subr.bf16.mxu0 %v6193_v14  ;;  %v1195_v51 = vpack.c.bf16 %v1141_v54, %v1141_v54 }
 0x549   :  { %v949_v57 = vpop.trf.xlu1 }
 0x54a   :  { %v1189_v60 = vpack.c.bf16 %v949_v57, %v949_v57  ;;  %5702 = vmatmul.mubr.msk.bf16.vlgmr.msra.gmra.mrb[24].mxu0 %vm1197_vm2, %v1659_v56  ;;  %v1943_v52 = vsel %vm1665_vm4, %v1195_v51, 0 }
 0x54b   :  { %v1173_v61 = vpop.trf.xlu0  ;;  %5713 = vmatprep.mubr.msk.bf16.mxu0 %vm6194_vm1, %v6193_v14 }
 0x54c   :  { %v1667_v58 = vsel %vm1665_vm4, %v1189_v60, 0  ;;  %v1196_v62 = vpack.c.bf16 %v1173_v61, %v1173_v61 }
 0x54d   :  { %5670 = vmatpush3.bf16.msra.mxu1 %v1667_v58 }
 0x54e   :  { %v1989_v0 = vsel %vm1665_vm4, %v1196_v62, 0  ;;  %5681 = vmatprep.subr.bf16.mxu1 %v6193_v14 }
 0x54f   :  { %5712 = vmatpush3.bf16.msra.mxu0 %v1989_v0 }
 0x550   :  { %5672 = vmatmul.mubr.msk.bf16.vlgmr.msra.gmra.mrb[20].mxu1 %vm1197_vm2, %v1654_v1  ;;  %5725 = vmatprep.subr.bf16.mxu0 %v6193_v14 }
 0x551   :  { %5682 = vmatpush3.bf16.msra.mxu1 %v1759_v2  ;;  %5683 = vmatprep.mubr.msk.bf16.mxu1 %vm6194_vm1, %v6193_v14 }
 0x552   :  { %5714 = vmatmul.mubr.msk.bf16.vlgmr.msra.gmra.mrb[28].mxu0 %vm1197_vm2, %v1661_v3  ;;  %5693 = vmatprep.subr.bf16.mxu1 %v6193_v14 }
 0x553   :  { %5729 = vmatprep.mubr.msk.bf16.mxu0 %vm6194_vm1, %v6193_v14 }
 0x558   :  { %5684 = vmatmul.mubr.msk.bf16.vlgmr.msra.gmra.mrb[24].mxu1 %vm1197_vm2, %v1656_v7 }
 0x559   :  { %5694 = vmatpush3.bf16.msra.mxu1 %v1851_v5  ;;  %5695 = vmatprep.mubr.msk.bf16.mxu1 %vm6194_vm1, %v6193_v14 }
 0x55a   :  { %5705 = vmatprep.subr.bf16.mxu1 %v6193_v14 }
 0x560   :  { %5696 = vmatmul.mubr.msk.bf16.vlgmr.msra.gmra.mrb[28].mxu1 %vm1197_vm2, %v1658_v8  ;;  %v6096_v8 = vld [vmem:[%s6907_s27] sm:$0xff]  }
 0x561   :  { %5706 = vmatpush3.bf16.msra.mxu1 %v1943_v52  ;;  %5707 = vmatprep.mubr.msk.bf16.mxu1 %vm6194_vm1, %v6193_v14 }
 0x562   :  { %5717 = vmatprep.subr.bf16.mxu1 %v6193_v14 }
 0x568   :  { %5708 = vmatmul.mubr.msk.bf16.vlgmr.msra.gmra.mrb[32].mxu1 %vm1197_vm2, %v1660_v50 }
 0x569   :  { %5721 = vmatprep.mubr.msk.bf16.mxu1 %vm6194_vm1, %v6193_v14  ;;  %5718 = vmatpush3.bf16.msra.mxu1 %v6096_v8 }
 0x56a   :  { %5719 = vmatprep.subr.bf16.mxu1 %v6193_v14 }
 0x5a5   :  { %v1632_v53 = vpop.xlane.xlu1 %1631 }
 0x5a9   :  { %v1635_v9 = vpop.xlane.xlu1 %1634 }
 0x5aa   :  { %6131 = vrcp.f32 %v1635_v9  ;;  %v6097_v9 = vld [vmem:[%s6907_s27 + $0x8] sm:$0xff]   ;;  %s6909_s27 = sld [smem:[#allocation9_spill]] }
 0x5ab   :  { %5720 = vmatpush3.bf16.msra.mxu1 %v6097_v9 }
 0x5ac   :  { %5733 = vmatprep.subr.bf16.mxu1 %v6193_v14 }
 0x5ad   :  { %v1638_v10 = vpop.xlane.xlu1 %1637 }
 0x5b4   :  { %v6132_v24 = vpop.eup %6131 }
 0x5b5   :  { %v1644_v11 = vpop.xlane.xlu0 %1643 }
 0x5b9   :  { %v1647_v15 = vpop.xlane.xlu1 %1646 }
 0x5ba   :  { %6133 = vrcp.f32 %v1647_v15 }
 0x5bd   :  { %v1650_v13 = vpop.xlane.xlu0 %1649  ;;  %v1641_v19 = vpop.xlane.xlu1 %1640 }
 0x5be   :  { %6135 = vrcp.f32 %v1641_v19 }
 0x5c1   :  { %v1653_v21 = vpop.xlane.xlu0 %1652 }
 0x5c2   :  { %6137 = vrcp.f32 %v1653_v21 }
 0x5c3   :  { %6139 = vrcp.f32 %v1632_v53 }
 0x5c4   :  { %v6134_v22 = vpop.eup %6133  ;;  %6141 = vrcp.f32 %v1644_v11 }
 0x5c5   :  { %6143 = vrcp.f32 %v1638_v10 }
 0x5c6   :  { %6145 = vrcp.f32 %v1650_v13 }
 0x5c8   :  { %v6136_v33 = vpop.eup %6135 }
 0x5cc   :  { %v6138_v35 = vpop.eup %6137 }
 0x5cd   :  { %v6140_v49 = vpop.eup %6139 }
 0x5ce   :  { %v6142_v54 = vpop.eup %6141 }
 0x5cf   :  { %v6144_v0 = vpop.eup %6143 }
 0x5d0   :  { %v6146_v1 = vpop.eup %6145 }
 0x60d   :  { %v1749_v63 = vpop.f32.mrb[16].mxu0 }
 0x60e   :  { %v5679_v12 = vpop.f32.mrb[17].mxu0  ;;  %v2040_v26 = vmul.f32 %v6132_v24, %v1749_v63 }
 0x60f   :  { %v1752_v6 = vpop.f32.mrb[18].mxu0 }
 0x610   :  { %v5680_v16 = vpop.f32.mrb[19].mxu0 }
 0x611   :  { %v5477_v16 = vld [vmem:[%s6908_s0] ss:$0 sm:$0xff] }
 0x615   :  { %v1841_v17 = vpop.f32.mrb[20].mxu0 }
 0x616   :  { %v5691_v18 = vpop.f32.mrb[21].mxu0  ;;  %v2042_v38 = vmul.f32 %v6136_v33, %v1841_v17 }
 0x617   :  { %v1844_v20 = vpop.f32.mrb[22].mxu0 }
 0x618   :  { %v5692_v23 = vpop.f32.mrb[23].mxu0  ;;  %v6191_v20 = vld [vmem:[%s6902_s24] sm:$0xff] }
 0x61d   :  { %v1933_v25 = vpop.f32.mrb[24].mxu0 }
 0x61e   :  { %v2044_v27 = vmul.f32 %v6134_v22, %v1933_v25  ;;  %v5703_v28 = vpop.f32.mrb[25].mxu0  ;;  %v6192_v22 = vld [vmem:[%s6902_s24 + $0x8] sm:$0xff] }
 0x61f   :  { %v1936_v29 = vpop.f32.mrb[26].mxu0  ;;  %v6098_v28 = vld [vmem:[%s6909_s27] sm:$0xff]  }
 0x620   :  { %v5950_v30 = vpack.i.bf16 %v2044_v27, %v2040_v26  ;;  %v5704_v31 = vpop.f32.mrb[27].mxu0  ;;  %v6099_v29 = vld [vmem:[%s6909_s27 + $0x8] sm:$0xff]  }
 0x622   :  { %5951 = vxpose.xlu0.b32.start.end [1/1] (short) (narrow) %v5950_v30, 8  ;;  %v6197_v30 = vmov 1966171168  }
 0x623   :  { %v1703_v32 = vpop.f32.mrb[20].mxu1  ;;  %v2560_v31 = vunpack.c.l.s4 %v6197_v30 }
 0x624   :  { %v5673_v34 = vpop.f32.mrb[21].mxu1  ;;  %v2039_v57 = vmul.f32 %v6140_v49, %v1703_v32 }
 0x625   :  { %v1706_v36 = vpop.f32.mrb[22].mxu1  ;;  %v2025_v37 = vpop.f32.mrb[28].mxu0  ;;  %v2561_v32 = vunpack.c.0.s8 %v2560_v31 }
 0x626   :  { %v2046_v39 = vmul.f32 %v6138_v35, %v2025_v37  ;;  %v5674_v40 = vpop.f32.mrb[23].mxu1  ;;  %v5715_v41 = vpop.f32.mrb[29].mxu0 }
 0x627   :  { %v2028_v42 = vpop.f32.mrb[30].mxu0 }
 0x628   :  { %v5716_v43 = vpop.f32.mrb[31].mxu0  ;;  %v5964_v44 = vpack.i.bf16 %v2046_v39, %v2042_v38  ;;  %v6551_v38 = vsub.s32 %v2561_v32, %v6409_v55 }
 0x629   :  { %v5487_v43 = vld.sshfl [vmem:[%s6874_s1] sm:$0x13 pattern:$0x75316420] }
 0x62b   :  { %v1795_v45 = vpop.f32.mrb[24].mxu1 }
 0x62c   :  { %v5685_v46 = vpop.f32.mrb[25].mxu1  ;;  %v2041_v3 = vmul.f32 %v6144_v0, %v1795_v45  ;;  %v2565_v45 = vrot.slane %v5487_v43, %v6551_v38 }
 0x62d   :  { %v1798_v47 = vpop.f32.mrb[26].mxu1  ;;  %v5488_v46 = vld.sshfl [vmem:[%s6874_s1 + $0x4] sm:$0x13 pattern:$0x75316420] }
 0x62e   :  { %v5686_v48 = vpop.f32.mrb[27].mxu1  ;;  %v2581_v49 = vcombine.high %v5488_v46, %v5488_v46 }
 0x62f   :  { %v2573_v48 = vcombine.high %v2565_v45, %v2565_v45 }
 0x633   :  { %v1887_v56 = vpop.f32.mrb[28].mxu1 }
 0x634   :  { %v2043_v59 = vmul.f32 %v6142_v54, %v1887_v56  ;;  %v5697_v60 = vpop.f32.mrb[29].mxu1  ;;  %v2588_v54 = vrot.slane %v5488_v46, %v6551_v38 }
 0x635   :  { %v1890_v61 = vpop.f32.mrb[30].mxu1 }
 0x636   :  { %v5943_v58 = vpack.i.bf16 %v2043_v59, %v2039_v57  ;;  %v5698_v62 = vpop.f32.mrb[31].mxu1  ;;  %v2595_v57 = vrot.slane %v2581_v49, %v6551_v38  ;;  %v2596_v59 = vcombine.high %v2588_v54, %v2588_v54  ;;  %v2603_v61 = vcombine.low %v2573_v48, %v2588_v54 }
 0x638   :  { %5944 = vxpose.xlu1.b32.start.end [1/1] (short) (narrow) %v5943_v58, 8  ;;  %v2604_v58 = vcombine.low %v2595_v57, %v2596_v59  ;;  %v2618_v0 = vrot.slane %v2603_v61, %v6551_v38 }
 0x63b   :  { %v1979_v2 = vpop.f32.mrb[32].mxu1 }
 0x63c   :  { %v2045_v4 = vmul.f32 %v6146_v1, %v1979_v2  ;;  %v5709_v5 = vpop.f32.mrb[33].mxu1  ;;  %v2625_v1 = vrot.slane %v2604_v58, %v6551_v38 }
 0x63d   :  { %v1982_v7 = vpop.f32.mrb[34].mxu1 }
 0x63e   :  { %v5710_v51 = vpop.f32.mrb[35].mxu1  ;;  %v5957_v52 = vpack.i.bf16 %v2045_v4, %v2041_v3  ;;  %v2640_v4 = vrot.slane %v2625_v1, %v6551_v38 }
 0x63f   :  { %v6100_v51 = vld [vmem:[%s6875_s11] sm:$0xff]  }
 0x640   :  { %5958 = vxpose.xlu0.b32.start.end [1/1] (short) (narrow) %v5957_v52, 8  ;;  %5726 = vmatpush3.bf16.msra.mxu0 %v6100_v51  ;;  %v6101_v52 = vld [vmem:[%s6875_s11 + $0x8] sm:$0xff]  }
 0x641   :  { %5727 = vmatprep.subr.bf16.mxu0 %v6193_v14 }
 0x644   :  { %5965 = vxpose.xlu0.b32.start.end [1/1] (short) (narrow) %v5964_v44, 8  ;;  %v2558_v44 = vcombine.high %v5487_v43, %v5487_v43  ;;  %5728 = vmatpush3.bf16.msra.mxu0 %v6101_v52 }
 0x645   :  { %5741 = vmatprep.subr.bf16.mxu0 %v6193_v14 }
 0x646   :  { %v2572_v47 = vrot.slane %v2558_v44, %v6551_v38 }
 0x648   :  { %v2602_v60 = vcombine.low %v2565_v45, %v2572_v47 }
 0x64a   :  { %v2611_v62 = vrot.slane %v2602_v60, %v6551_v38 }
 0x64c   :  { %v2626_v2 = vcombine.low %v2611_v62, %v2618_v0 }
 0x64e   :  { %v2633_v3 = vrot.slane %v2626_v2, %v6551_v38 }
 0x650   :  { %v2641_v5 = vcombine.low %v2633_v3, %v2640_v4 }
 0x652   :  { %v2643_v7 = vpack.c.bf16 %v2641_v5, %v2641_v5 }
 0x6a2   :  { %v5952_v50 = vpop.trf.xlu0 }
 0x6b8   :  { %v5945_v53 = vpop.trf.xlu1 }
 0x6b9   :  { %5972 = vxpose.xlu1.b32.start [1/4] (short) (narrow) %v5945_v53, 8 }
 0x6bd   :  { %5974 = vxpose.xlu1.b32.cont [2/4] (short) (narrow) %v5952_v50, 8 }
 0x6c0   :  { %v5959_v10 = vpop.trf.xlu0 }
 0x6c1   :  { %5976 = vxpose.xlu1.b32.cont [3/4] (short) (narrow) %v5959_v10, 8 }
 0x6c4   :  { %v5966_v63 = vpop.trf.xlu0 }
 0x6c5   :  { %5978 = vxpose.xlu1.b32.end [4/4] (short) (narrow) %v5966_v63, 8 }
 0x739   :  { %v5979_v11 = vpop.trf.xlu1 }
 0x73a   :  { %v5983_v12 = vunpack.i.h.bf16 %v5979_v11  ;;  %v5980_v6 = vunpack.i.l.bf16 %v5979_v11 }
 0x73c   :  { %v2372_v15 = vpack.c.bf16 %v5983_v12, %v5980_v6  ;;  %v5481_v6 = vld [vmem:[%s6876_s9] ss:$0 sm:$0xff] }
 0x73e   :  { %5722 = vmatmul.mubr.msk.bf16.vlgmr.msra.gmra.mrb[36].mxu1 %vm81_vm0, %v2372_v15 }
 0x73f   :  { %5737 = vmatprep.mubr.msk.bf16.mxu1 %vm6194_vm1, %v6193_v14  ;;  %5734 = vmatpush3.bf16.msra.mxu1 %v6098_v28 }
 0x740   :  { %5735 = vmatprep.subr.bf16.mxu1 %v6193_v14 }
 0x743   :  { %5736 = vmatpush3.bf16.msra.mxu1 %v6099_v29 }
 0x744   :  { %5747 = vmatprep.subr.bf16.mxu1 %v6193_v14 }
 0x746   :  { %5738 = vmatmul.mubr.msk.bf16.vlgmr.msra.gmra.mrb[40].mxu1 %vm81_vm0, %v2643_v7 }
 0x747   :  { %5749 = vmatprep.mubr.msk.bf16.mxu1 %vm6194_vm1, %v6193_v14 }
 0x811   :  { %v2428_v13 = vpop.f32.mrb[36].mxu1 }
 0x812   :  { %v2429_v17 = vadd.f32 %v5477_v16, %v2428_v13  ;;  %v5723_v18 = vpop.f32.mrb[37].mxu1 }
 0x813   :  { %v2431_v19 = vpop.f32.mrb[38].mxu1 }
 0x814   :  { %v6530_v21 = vadd.f32 %v6191_v20, %v2429_v17  ;;  %v2432_v23 = vadd.f32 %v5477_v16, %v2431_v19  ;;  %v5724_v24 = vpop.f32.mrb[39].mxu1  ;;  %v5482_v17 = vld [vmem:[%s6877_s10] ss:$0 sm:$0xff] }
 0x815   :  { %v5489_v24 = vld [vmem:[%s6878_s14] ss:$0 sm:$0xff] }
 0x816   :  { %v6535_v25 = vadd.f32 %v6192_v22, %v2432_v23  ;;  %v2439_v26 = vsel %vm81_vm0, %v6530_v21, 0.0 }
 0x817   :  { %2440 = vadd.xlane.f32.xlu0 %v2439_v26 }
 0x818   :  { %v2442_v27 = vsel %vm81_vm0, %v6535_v25, 0.0 }
 0x819   :  { %2443 = vadd.xlane.f32.xlu1 %v2442_v27  ;;  %v2699_v22 = vpop.f32.mrb[40].mxu1 }
 0x81a   :  { %v2700_v26 = vadd.f32 %v5489_v24, %v2699_v22  ;;  %v5739_v27 = vpop.f32.mrb[41].mxu1 }
 0x81b   :  { %v2702_v28 = vpop.f32.mrb[42].mxu1 }
 0x81c   :  { %v2706_v29 = vcombine.high %v2700_v26, %v2700_v26  ;;  %v2713_v30 = vrot.slane %v2700_v26, %v6551_v38  ;;  %v5740_v31 = vpop.f32.mrb[43].mxu1 }
 0x81e   :  { %v2720_v32 = vrot.slane %v2706_v29, %v6551_v38 }
 0x8a4   :  { %v2441_v33 = vpop.xlane.xlu0 %2440 }
 0x8a5   :  { %v2445_v34 = vmul.f32 0.03125, %v2441_v33  ;;  %v2721_v33 = vcombine.high %v2713_v30, %v2713_v30 }
 0x8a6   :  { %v2444_v35 = vpop.xlane.xlu1 %2443 }
 0x8a7   :  { %v2447_v36 = vsub.f32 %v6530_v21, %v2445_v34  ;;  %v2446_v37 = vmul.f32 0.03125, %v2444_v35  ;;  %v2729_v34 = vrot.slane %v2713_v30, %v6551_v38  ;;  %v2722_v35 = vcombine.high %v2720_v32, %v2720_v32 }
 0x8a9   :  { %v2448_v39 = vsub.f32 %v6535_v25, %v2446_v37  ;;  %v2449_v40 = vmul.f32 %v2447_v36, %v2447_v36  ;;  %v2743_v37 = vrot.slane %v2721_v33, %v6551_v38  ;;  %v2750_v44 = vrot.slane %v2722_v35, %v6551_v38 }
 0x8ab   :  { %v2451_v41 = vsel %vm81_vm0, %v2449_v40, 0.0  ;;  %v2450_v42 = vmul.f32 %v2448_v39, %v2448_v39  ;;  %v2752_v40 = vcombine.high %v2743_v37, %v2743_v37  ;;  %v3169_v48 = vrot.slane %v2750_v44, %v6551_v38 }
 0x8ac   :  { %2452 = vadd.xlane.f32.xlu0 %v2451_v41  ;;  %v3132_v41 = vcombine.low %v2729_v34, %v2743_v37 }
 0x8ad   :  { %v2454_v56 = vsel %vm81_vm0, %v2450_v42, 0.0 }
 0x8ae   :  { %v3139_v43 = vrot.slane %v3132_v41, %v6551_v38 }
 0x8b0   :  { %2455 = vadd.xlane.f32.xlu0 %v2454_v56  ;;  %v5483_v56 = vld [vmem:[%s6879_s12] ss:$0 sm:$0xff] }
 0x939   :  { %v2453_v8 = vpop.xlane.xlu0 %2452 }
 0x93a   :  { %v2457_v50 = vmul.f32 0.03125, %v2453_v8 }
 0x93c   :  { %v2459_v53 = vadd.f32 1e-05, %v2457_v50 }
 0x93d   :  { %v2456_v9 = vpop.xlane.xlu0 %2455 }
 0x93e   :  { %6147 = vrsqrt.f32 %v2459_v53  ;;  %v2458_v10 = vmul.f32 0.03125, %v2456_v9 }
 0x940   :  { %v2460_v63 = vadd.f32 1e-05, %v2458_v10 }
 0x942   :  { %6149 = vrsqrt.f32 %v2460_v63 }
 0x948   :  { %v6148_v11 = vpop.eup %6147 }
 0x949   :  { %v2463_v12 = vmul.f32 %v6148_v11, %v2447_v36  ;;  %v2736_v36 = vrot.slane %v2720_v32, %v6551_v38 }
 0x94b   :  { %v2471_v16 = vmul.f32 %v5481_v6, %v2463_v12  ;;  %v3155_v45 = vcombine.low %v2752_v40, %v2736_v36 }
 0x94c   :  { %v6150_v15 = vpop.eup %6149 }
 0x94d   :  { %v2464_v13 = vmul.f32 %v6150_v15, %v2448_v39  ;;  %v2479_v19 = vadd.f32 %v5482_v17, %v2471_v16  ;;  %v2751_v39 = vcombine.high %v2729_v34, %v2729_v34  ;;  %v3162_v47 = vrot.slane %v3155_v45, %v6551_v38 }
 0x94f   :  { %v2472_v18 = vmul.f32 %v5481_v6, %v2464_v13  ;;  %v3146_v42 = vrot.slane %v2751_v39, %v6551_v38  ;;  %v3170_v54 = vcombine.low %v3162_v47, %v3169_v48 }
 0x951   :  { %v2480_v20 = vadd.f32 %v5482_v17, %v2472_v18  ;;  %v3147_v46 = vcombine.low %v3139_v43, %v3146_v42  ;;  %v3177_v1 = vrot.slane %v3170_v54, %v6551_v38 }
 0x953   :  { %v2486_v23 = vpack.c.bf16 %v2480_v20, %v2479_v19  ;;  %v3154_v49 = vrot.slane %v3147_v46, %v6551_v38 }
 0x955   :  { %5730 = vmatmul.mubr.msk.bf16.vlgmr.msra.gmra.mrb[32].mxu0 %vm81_vm0, %v2486_v23  ;;  %3180 = vxpose.xlu1.b32.start.end [1/1] (short) (narrow) %v3154_v49, 32  ;;  %v6026_v27 = vpack.i.bf16 %v3177_v1, %v3154_v49 }
 0x956   :  { %5743 = vmatprep.mubr.msk.bf16.mxu0 %vm6194_vm1, %v6193_v14 }
 0x9d5   :  { %v3196_v0 = vpop.trf.xlu1 }
 0x9d9   :  { %v3197_v2 = vpop.trf.xlu1 }
 0x9dd   :  { %v3198_v3 = vpop.trf.xlu1 }
 0x9e1   :  { %v3199_v4 = vpop.trf.xlu1 }
 0xa28   :  { %v2542_v57 = vpop.f32.mrb[32].mxu0 }
 0xa29   :  { %v2543_v59 = vadd.f32 %v5483_v56, %v2542_v57  ;;  %v5731_v60 = vpop.f32.mrb[33].mxu0 }
 0xa2a   :  { %v2545_v61 = vpop.f32.mrb[34].mxu0 }
 0xa2b   :  { %v2546_v58 = vadd.f32 %v5483_v56, %v2545_v61  ;;  %2804 = vxpose.xlu0.b32.start.end [1/1] (short) (narrow) %v2543_v59, 32  ;;  %v5732_v62 = vpop.f32.mrb[35].mxu0 }
 0xa2d   :  { %2836 = vxpose.xlu1.b32.start.end [1/1] (short) (narrow) %v2546_v58, 32 }
 0xa38   :  { %3212 = vxpose.xlu0.b32.start.end [1/1] (short) (narrow) %v3177_v1, 32 }
 0xa3a   :  { %3276 = vxpose.xlu1.b32.start.end [1/1] (short) (narrow) %v3197_v2, 8 }
 0xa45   :  { %3244 = vxpose.xlu0.b32.start.end [1/1] (short) (narrow) %v3196_v0, 8 }
 0xaab   :  { %v2820_v5 = vpop.trf.xlu0 }
 0xaac   :  { %v5984_v7 = vpack.i.bf16 %v3198_v3, %v2820_v5 }
 0xaad   :  { %v2852_v51 = vpop.trf.xlu1 }
 0xaae   :  { %5985 = vxpose.xlu0.b32.start.end [1/1] (short) (narrow) %v5984_v7, 8 }
 0xaaf   :  { %v2821_v52 = vpop.trf.xlu0 }
 0xab0   :  { %v5991_v8 = vpack.i.bf16 %v3199_v4, %v2821_v52 }
 0xab1   :  { %v2853_v50 = vpop.trf.xlu1 }
 0xab2   :  { %5992 = vxpose.xlu0.b32.start.end [1/1] (short) (narrow) %v5991_v8, 8 }
 0xab3   :  { %v2822_v53 = vpop.trf.xlu0 }
 0xab5   :  { %v2854_v9 = vpop.trf.xlu1 }
 0xab7   :  { %v2823_v10 = vpop.trf.xlu0 }
 0xab9   :  { %v2855_v63 = vpop.trf.xlu1 }
 0xabb   :  { %v3228_v11 = vpop.trf.xlu0 }
 0xabc   :  { %v5998_v12 = vpack.i.bf16 %v3228_v11, %v2822_v53 }
 0xabd   :  { %v3292_v6 = vpop.trf.xlu1 }
 0xabe   :  { %5999 = vxpose.xlu1.b32.start.end [1/1] (short) (narrow) %v5998_v12, 8  ;;  %v3501_v15 = vpack.c.bf16 %v3292_v6, %v3292_v6  ;;  %v6662_v6 = vld [vmem:[%s6880_s2] sm:$0xff] }
 0xabf   :  { %v3229_v16 = vpop.trf.xlu0 }
 0xac0   :  { %v6005_v13 = vpack.i.bf16 %v3229_v16, %v2823_v10  ;;  %v3892_v17 = vsel %vm1197_vm2, %v3501_v15, 0  ;;  %v2762_v15 = vrot.slane %v6662_v6, %v6551_v38 }
 0xac1   :  { %5748 = vmatpush3.bf16.xpose.msra.mxu1 %v3892_v17 }
 0xac2   :  { %6006 = vxpose.xlu0.b32.start.end [1/1] (short) (narrow) %v6005_v13, 8  ;;  %5759 = vmatprep.subr.bf16.mxu1 %v6193_v14  ;;  %v2770_v16 = vcombine.high %v2762_v15, %v2762_v15  ;;  %v2778_v17 = vrot.slane %v2762_v15, %v6551_v38 }
 0xac3   :  { %v3230_v18 = vpop.trf.xlu0 }
 0xac4   :  { %v6012_v19 = vpack.i.bf16 %v3230_v18, %v2852_v51  ;;  %v2792_v13 = vrot.slane %v2770_v16, %v6551_v38 }
 0xac6   :  { %6013 = vxpose.xlu1.b32.start.end [1/1] (short) (narrow) %v6012_v19, 8  ;;  %v6669_v19 = vsub.s32 0, %v6409_v55 }
 0xac7   :  { %v3231_v20 = vpop.trf.xlu0 }
 0xac8   :  { %v6019_v23 = vpack.i.bf16 %v3231_v20, %v2853_v50 }
 0xaca   :  { %3060 = vxpose.xlu1.b32.start.end [1/1] (short) (narrow) %v2854_v9, 8  ;;  %6020 = vxpose.xlu0.b32.start.end [1/1] (short) (narrow) %v6019_v23, 8 }
 0xacb   :  { %v3260_v24 = vpop.trf.xlu0 }
 0xacc   :  { %v3500_v22 = vpack.c.bf16 %v3260_v24, %v3260_v24 }
 0xace   :  { %3092 = vxpose.xlu0.b32.start.end [1/1] (short) (narrow) %v2855_v63, 8  ;;  %v3846_v26 = vsel %vm1197_vm2, %v3500_v22, 0  ;;  %v4225_v22 = vrot.slane %v2792_v13, %v6669_v19 }
 0xacf   :  { %5742 = vmatpush3.bf16.xpose.msra.mxu0 %v3846_v26 }
 0xad0   :  { %5753 = vmatprep.subr.bf16.mxu0 %v6193_v14 }
 0xae8   :  { %6027 = vrot.lane.b32.xlu1 %v6026_v27, %s6195_s5  ;;  %v4221_v27 = vrot.slane %v2778_v17, %v6669_v19 }
 0xb2e   :  { %v5986_v28 = vpop.trf.xlu0 }
 0xb2f   :  { %v5990_v29 = vunpack.i.h.bf16 %v5986_v28  ;;  %v5987_v30 = vunpack.i.l.bf16 %v5986_v28 }
 0xb31   :  { %v3124_v31 = vpack.c.bf16 %v5987_v30, %v5987_v30  ;;  %v3502_v32 = vpack.c.bf16 %v5990_v29, %v5990_v29 }
 0xb32   :  { %v5993_v33 = vpop.trf.xlu0 }
 0xb33   :  { %v5997_v34 = vunpack.i.h.bf16 %v5993_v33  ;;  %v5994_v35 = vunpack.i.l.bf16 %v5993_v33  ;;  %5744 = vmatmul.mubr.msk.bf16.vlgmr.msra.gmra.mrb[36].mxu0 %vm1197_vm2, %v3124_v31  ;;  %v3938_v36 = vsel %vm1197_vm2, %v3502_v32, 0 }
 0xb34   :  { %5755 = vmatprep.mubr.msk.bf16.mxu0 %vm6194_vm1, %v6193_v14  ;;  %5754 = vmatpush3.bf16.xpose.msra.mxu0 %v3938_v36  ;;  %v2800_v36 = vcombine.high %v2778_v17, %v2778_v17 }
 0xb35   :  { %v3125_v37 = vpack.c.bf16 %v5994_v35, %v5994_v35  ;;  %v3503_v39 = vpack.c.bf16 %v5997_v34, %v5997_v34  ;;  %5765 = vmatprep.subr.bf16.mxu0 %v6193_v14 }
 0xb37   :  { %5750 = vmatmul.mubr.msk.bf16.vlgmr.msra.gmra.mrb[44].mxu1 %vm1197_vm2, %v3125_v37  ;;  %v3984_v40 = vsel %vm1197_vm2, %v3503_v39, 0  ;;  %v4229_v39 = vrot.slane %v2800_v36, %v6669_v19 }
 0xb38   :  { %5760 = vmatpush3.bf16.xpose.msra.mxu1 %v3984_v40  ;;  %5761 = vmatprep.mubr.msk.bf16.mxu1 %vm6194_vm1, %v6193_v14  ;;  %v2802_v40 = vcombine.high %v2792_v13, %v2792_v13 }
 0xb39   :  { %5771 = vmatprep.subr.bf16.mxu1 %v6193_v14 }
 0xb3e   :  { %v6000_v41 = vpop.trf.xlu1 }
 0xb3f   :  { %v6004_v42 = vunpack.i.h.bf16 %v6000_v41  ;;  %v6001_v43 = vunpack.i.l.bf16 %v6000_v41 }
 0xb41   :  { %v3126_v44 = vpack.c.bf16 %v6001_v43, %v6001_v43  ;;  %v3504_v45 = vpack.c.bf16 %v6004_v42, %v6004_v42 }
 0xb42   :  { %v6007_v46 = vpop.trf.xlu0 }
 0xb43   :  { %v6011_v47 = vunpack.i.h.bf16 %v6007_v46  ;;  %v6008_v48 = vunpack.i.l.bf16 %v6007_v46  ;;  %5756 = vmatmul.mubr.msk.bf16.vlgmr.msra.gmra.mrb[40].mxu0 %vm1197_vm2, %v3126_v44  ;;  %v4030_v49 = vsel %vm1197_vm2, %v3504_v45, 0  ;;  %v4233_v46 = vrot.slane %v2802_v40, %v6669_v19 }
 0xb44   :  { %5767 = vmatprep.mubr.msk.bf16.mxu0 %vm6194_vm1, %v6193_v14  ;;  %5766 = vmatpush3.bf16.xpose.msra.mxu0 %v4030_v49 }
 0xb45   :  { %v3127_v54 = vpack.c.bf16 %v6008_v48, %v6008_v48  ;;  %v3505_v56 = vpack.c.bf16 %v6011_v47, %v6011_v47  ;;  %5777 = vmatprep.subr.bf16.mxu0 %v6193_v14 }
 0xb46   :  { %v6014_v57 = vpop.trf.xlu1 }
 0xb47   :  { %5762 = vmatmul.mubr.msk.bf16.vlgmr.msra.gmra.mrb[48].mxu1 %vm1197_vm2, %v3127_v54  ;;  %v6018_v59 = vunpack.i.h.bf16 %v6014_v57  ;;  %v6015_v60 = vunpack.i.l.bf16 %v6014_v57  ;;  %v4076_v61 = vsel %vm1197_vm2, %v3505_v56, 0 }
 0xb48   :  { %5773 = vmatprep.mubr.msk.bf16.mxu1 %vm6194_vm1, %v6193_v14  ;;  %5772 = vmatpush3.bf16.xpose.msra.mxu1 %v4076_v61 }
 0xb49   :  { %v3128_v58 = vpack.c.bf16 %v6015_v60, %v6015_v60  ;;  %v3506_v62 = vpack.c.bf16 %v6018_v59, %v6018_v59  ;;  %5783 = vmatprep.subr.bf16.mxu1 %v6193_v14 }
 0xb4a   :  { %v6021_v0 = vpop.trf.xlu0  ;;  %v3076_v7 = vpop.trf.xlu1 }
 0xb4b   :  { %v6025_v1 = vunpack.i.h.bf16 %v6021_v0  ;;  %v6022_v2 = vunpack.i.l.bf16 %v6021_v0  ;;  %5768 = vmatmul.mubr.msk.bf16.vlgmr.msra.gmra.mrb[44].mxu0 %vm1197_vm2, %v3128_v58  ;;  %v4122_v3 = vsel %vm1197_vm2, %v3506_v62, 0  ;;  %v3130_v52 = vpack.c.bf16 %v3076_v7, %v3076_v7 }
 0xb4c   :  { %5778 = vmatpush3.bf16.xpose.msra.mxu0 %v4122_v3  ;;  %5779 = vmatprep.mubr.msk.bf16.mxu0 %vm6194_vm1, %v6193_v14 }
 0xb4d   :  { %v3507_v4 = vpack.c.bf16 %v6025_v1, %v6025_v1  ;;  %v3129_v5 = vpack.c.bf16 %v6022_v2, %v6022_v2  ;;  %5789 = vmatprep.subr.bf16.mxu0 %v6193_v14 }
 0xb4e   :  { %v3108_v8 = vpop.trf.xlu0 }
 0xb4f   :  { %v4168_v51 = vsel %vm1197_vm2, %v3507_v4, 0  ;;  %5774 = vmatmul.mubr.msk.bf16.vlgmr.msra.gmra.mrb[52].mxu1 %vm1197_vm2, %v3129_v5  ;;  %v3131_v50 = vpack.c.bf16 %v3108_v8, %v3108_v8 }
 0xb50   :  { %5784 = vmatpush3.bf16.xpose.msra.mxu1 %v4168_v51  ;;  %5785 = vmatprep.mubr.msk.bf16.mxu1 %vm6194_vm1, %v6193_v14 }
 0xb51   :  { %5795 = vmatprep.subr.bf16.mxu1 %v6193_v14 }
 0xb53   :  { %5780 = vmatmul.mubr.msk.bf16.vlgmr.msra.gmra.mrb[48].mxu0 %vm1197_vm2, %v3130_v52 }
 0xb54   :  { %5791 = vmatprep.mubr.msk.bf16.mxu0 %vm6194_vm1, %v6193_v14 }
 0xb57   :  { %5786 = vmatmul.mubr.msk.bf16.vlgmr.msra.gmra.mrb[56].mxu1 %vm1197_vm2, %v3131_v50 }
 0xb58   :  { %5797 = vmatprep.mubr.msk.bf16.mxu1 %vm6194_vm1, %v6193_v14 }
 0xb5a   :  { %v6028_v53 = vpop.permute.xlu1 %6027 }
 0xb5b   :  { %6032 = vxpose.xlu0.b32.start.end [1/1] (short) (narrow) %v6028_v53, 32 }
 0xbdb   :  { %v6650_v9 = vpop.trf.xlu0 }
 0xbdc   :  { %v6034_v16 = vunpack.i.l.bf16 %v6650_v9 }
 0xbdf   :  { %v6652_v10 = vpop.trf.xlu0 }
 0xbe0   :  { %v6039_v63 = vunpack.i.l.bf16 %v6652_v10 }
 0xbe2   :  { %3610 = vxpose.xlu0.b32.start.end [1/1] (short) (narrow) %v6039_v63, 8 }
 0xbe3   :  { %v6655_v11 = vpop.trf.xlu0 }
 0xbe4   :  { %v6044_v13 = vunpack.i.l.bf16 %v6655_v11 }
 0xbe7   :  { %v6657_v12 = vpop.trf.xlu0 }
 0xbe8   :  { %v6049_v17 = vunpack.i.l.bf16 %v6657_v12 }
 0xc06   :  { %v3882_v18 = vpop.f32.mrb[36].mxu0 }
 0xc07   :  { %v5745_v20 = vpop.f32.mrb[37].mxu0  ;;  %v4210_v26 = vmul.f32 0.35355338, %v3882_v18  ;;  %v6037_v18 = vunpack.i.h.bf16 %v6650_v9 }
 0xc08   :  { %v3885_v23 = vpop.f32.mrb[38].mxu0  ;;  %v2755_v20 = vcombine.high %v6662_v6, %v6662_v6 }
 0xc09   :  { %v5746_v24 = vpop.f32.mrb[39].mxu0  ;;  %v6675_v34 = vadd.f32 %v4221_v27, %v4210_v26  ;;  %v6042_v23 = vunpack.i.h.bf16 %v6652_v10 }
 0xc0a   :  { %v3928_v28 = vpop.f32.mrb[44].mxu1  ;;  %v2769_v24 = vrot.slane %v2755_v20, %v6551_v38 }
 0xc0b   :  { %v4211_v29 = vmul.f32 0.35355338, %v3928_v28  ;;  %v5751_v30 = vpop.f32.mrb[45].mxu1  ;;  %v4267_v37 = vsel %vm4266_vm5, %v6675_v34, -inf }
 0xc0c   :  { %v3931_v31 = vpop.f32.mrb[46].mxu1  ;;  %v2771_v26 = vcombine.high %v2769_v24, %v2769_v24  ;;  %v2785_v27 = vrot.slane %v2769_v24, %v6551_v38 }
 0xc0d   :  { %v5752_v32 = vpop.f32.mrb[47].mxu1  ;;  %v6673_v33 = vadd.f32 %v4225_v22, %v4211_v29  ;;  %v6047_v22 = vunpack.i.h.bf16 %v6655_v11 }
 0xc0e   :  { %v2799_v28 = vrot.slane %v2771_v26, %v6551_v38  ;;  %v4237_v9 = vrot.slane %v2785_v27, %v6669_v19  ;;  %v2801_v30 = vcombine.high %v2785_v27, %v2785_v27  ;;  %v6198_v32 = vmov 65535  }
 0xc0f   :  { %v4270_v35 = vsel %vm4266_vm5, %v6673_v33, -inf  ;;  %4268 = vmax.xlane.f32.xlu0 %v4267_v37 }
 0xc10   :  { %4271 = vmax.xlane.f32.xlu1 %v4270_v35  ;;  %v4241_v6 = vrot.slane %v2799_v28, %v6669_v19  ;;  %v4352_v35 = vsel %vm4350_vm6, 4294967295, %v6198_v32  ;;  %v4245_v11 = vrot.slane %v2801_v30, %v6669_v19  ;;  %v2803_v36 = vcombine.high %v2799_v28, %v2799_v28 }
 0xc11   :  { %v6707_v37 = vsel %vm4351_vm7, %v4352_v35, 0 }
 0xc16   :  { %v3974_v41 = vpop.f32.mrb[40].mxu0 }
 0xc17   :  { %v4212_v42 = vmul.f32 0.35355338, %v3974_v41  ;;  %v5757_v43 = vpop.f32.mrb[41].mxu0 }
 0xc18   :  { %v3977_v44 = vpop.f32.mrb[42].mxu0 }
 0xc19   :  { %v6682_v45 = vadd.f32 %v4229_v39, %v4212_v42  ;;  %v5758_v47 = vpop.f32.mrb[43].mxu0 }
 0xc1a   :  { %v4020_v48 = vpop.f32.mrb[48].mxu1 }
 0xc1b   :  { %v4213_v49 = vmul.f32 0.35355338, %v4020_v48  ;;  %v4273_v54 = vsel %vm4266_vm5, %v6682_v45, -inf  ;;  %v5763_v56 = vpop.f32.mrb[49].mxu1  ;;  %v4249_v48 = vrot.slane %v2803_v36, %v6669_v19 }
 0xc1c   :  { %4274 = vmax.xlane.f32.xlu0 %v4273_v54  ;;  %v4023_v57 = vpop.f32.mrb[50].mxu1 }
 0xc1d   :  { %v6687_v59 = vadd.f32 %v4233_v46, %v4213_v49  ;;  %v5764_v60 = vpop.f32.mrb[51].mxu1 }
 0xc1e   :  { %v4066_v58 = vpop.f32.mrb[44].mxu0 }
 0xc1f   :  { %v4276_v61 = vsel %vm4266_vm5, %v6687_v59, -inf  ;;  %v5769_v62 = vpop.f32.mrb[45].mxu0  ;;  %v4214_v29 = vmul.f32 0.35355338, %v4066_v58 }
 0xc20   :  { %4277 = vmax.xlane.f32.xlu0 %v4276_v61  ;;  %v4069_v0 = vpop.f32.mrb[46].mxu0 }
 0xc21   :  { %v5770_v1 = vpop.f32.mrb[47].mxu0  ;;  %v6704_v10 = vadd.f32 %v4237_v9, %v4214_v29  ;;  %v6052_v0 = vunpack.i.h.bf16 %v6657_v12 }
 0xc22   :  { %v4112_v2 = vpop.f32.mrb[52].mxu1 }
 0xc23   :  { %v5775_v3 = vpop.f32.mrb[53].mxu1  ;;  %v4215_v31 = vmul.f32 0.35355338, %v4112_v2  ;;  %v4279_v40 = vsel %vm4266_vm5, %v6704_v10, -inf }
 0xc24   :  { %v4115_v4 = vpop.f32.mrb[54].mxu1 }
 0xc25   :  { %v5776_v5 = vpop.f32.mrb[55].mxu1  ;;  %v6711_v41 = vadd.f32 %v4241_v6, %v4215_v31 }
 0xc26   :  { %v4158_v7 = vpop.f32.mrb[48].mxu0 }
 0xc27   :  { %v5781_v51 = vpop.f32.mrb[49].mxu0  ;;  %v4216_v38 = vmul.f32 0.35355338, %v4158_v7  ;;  %v4282_v46 = vsel %vm4266_vm5, %v6711_v41, -inf }
 0xc28   :  { %v4161_v52 = vpop.f32.mrb[50].mxu0 }
 0xc29   :  { %v5782_v8 = vpop.f32.mrb[51].mxu0  ;;  %v6716_v47 = vadd.f32 %v4245_v11, %v4216_v38 }
 0xc2a   :  { %v4204_v50 = vpop.f32.mrb[56].mxu1 }
 0xc2b   :  { %v5787_v53 = vpop.f32.mrb[57].mxu1  ;;  %v4217_v44 = vmul.f32 0.35355338, %v4204_v50  ;;  %v4285_v49 = vsel %vm4266_vm5, %v6716_v47, -inf }
 0xc2c   :  { %v4207_v63 = vpop.f32.mrb[58].mxu1 }
 0xc2d   :  { %v5788_v15 = vpop.f32.mrb[59].mxu1  ;;  %v6722_v54 = vadd.f32 %v4249_v48, %v4217_v44 }
 0xc2f   :  { %v4288_v56 = vsel %vm4266_vm5, %v6722_v54, -inf }
 0xc43   :  { %3578 = vxpose.xlu1.b32.start.end [1/1] (short) (narrow) %v6034_v16, 8 }
 0xc4d   :  { %3642 = vxpose.xlu0.b32.start.end [1/1] (short) (narrow) %v6044_v13, 8 }
 0xc51   :  { %3674 = vxpose.xlu0.b32.start.end [1/1] (short) (narrow) %v6049_v17, 8 }
 0xc55   :  { %3706 = vxpose.xlu0.b32.start.end [1/1] (short) (narrow) %v6037_v18, 8 }
 0xc59   :  { %3738 = vxpose.xlu0.b32.start.end [1/1] (short) (narrow) %v6042_v23, 8 }
 0xc5d   :  { %3770 = vxpose.xlu0.b32.start.end [1/1] (short) (narrow) %v6047_v22, 8 }
 0xc62   :  { %v3626_v39 = vpop.trf.xlu0 }
 0xc63   :  { %v3835_v42 = vpack.c.bf16 %v3626_v39, %v3626_v39 }
 0xc65   :  { %v4401_v43 = vand.u32 %v6707_v37, %v3835_v42 }
 0xc67   :  { %5796 = vmatpush3.bf16.msra.mxu1 %v4401_v43 }
 0xc68   :  { %5807 = vmatprep.subr.bf16.mxu1 %v6193_v14 }
 0xc6a   :  { %4280 = vmax.xlane.f32.xlu1 %v4279_v40 }
 0xc6e   :  { %4283 = vmax.xlane.f32.xlu1 %v4282_v46 }
 0xc72   :  { %4286 = vmax.xlane.f32.xlu1 %v4285_v49 }
 0xc76   :  { %4289 = vmax.xlane.f32.xlu1 %v4288_v56 }
 0xc9c   :  { %v4269_v58 = vpop.xlane.xlu0 %4268 }
 0xc9d   :  { %v4272_v57 = vpop.xlane.xlu1 %4271  ;;  %v4291_v19 = vsub.f32 %v6675_v34, %v4269_v58 }
 0xc9e   :  { %v4292_v60 = vsub.f32 %v6673_v33, %v4272_v57 }
 0xc9f   :  { %v4299_v62 = vmul.f32 1.442695, %v4291_v19 }
 0xca0   :  { %v4301_v61 = vmul.f32 1.442695, %v4292_v60 }
 0xca2   :  { %6151 = vpow2.f32 %v4301_v61 }
 0xca3   :  { %6153 = vpow2.f32 %v4299_v62 }
 0xca9   :  { %3802 = vxpose.xlu1.b32.start.end [1/1] (short) (narrow) %v6052_v0, 8  ;;  %v4275_v33 = vpop.xlane.xlu0 %4274 }
 0xcaa   :  { %v4293_v34 = vsub.f32 %v6682_v45, %v4275_v33 }
 0xcac   :  { %v6152_v1 = vpop.eup %6151  ;;  %v4303_v7 = vmul.f32 1.442695, %v4293_v34 }
 0xcad   :  { %v4340_v2 = vpack.c.bf16 %v6152_v1, %v6152_v1  ;;  %v6154_v3 = vpop.eup %6153  ;;  %v4278_v5 = vpop.xlane.xlu0 %4277 }
 0xcae   :  { %v4315_v4 = vsel %vm4266_vm5, %v6154_v3, 0.0  ;;  %v4294_v51 = vsub.f32 %v6687_v59, %v4278_v5  ;;  %6155 = vpow2.f32 %v4303_v7  ;;  %v4339_v53 = vpack.c.bf16 %v6154_v3, %v6154_v3 }
 0xcaf   :  { %5798 = vmatmul.mubr.msk.bf16.vlgmr.msra.gmra.mrb[60].mxu1 %vm4266_vm5, %v4340_v2  ;;  %4316 = vadd.xlane.f32.xlu0 %v4315_v4  ;;  %v4318_v59 = vsel %vm4266_vm5, %v6152_v1, 0.0 }
 0xcb0   :  { %5809 = vmatprep.mubr.msk.bf16.mxu1 %vm6194_vm1, %v6193_v14  ;;  %v4305_v8 = vmul.f32 1.442695, %v4294_v51 }
 0xcb2   :  { %6157 = vpow2.f32 %v4305_v8 }
 0xcb8   :  { %v6156_v15 = vpop.eup %6155 }
 0xcb9   :  { %v4341_v18 = vpack.c.bf16 %v6156_v15, %v6156_v15 }
 0xcbc   :  { %v6158_v20 = vpop.eup %6157 }
 0xcbd   :  { %v4342_v26 = vpack.c.bf16 %v6158_v20, %v6158_v20  ;;  %v4324_v58 = vsel %vm4266_vm5, %v6158_v20, 0.0 }
 0xcc3   :  { %v3594_v12 = vpop.trf.xlu1 }
 0xcc4   :  { %v3834_v52 = vpack.c.bf16 %v3594_v12, %v3594_v12 }
 0xcc6   :  { %v4355_v50 = vand.u32 %v6707_v37, %v3834_v52 }
 0xcc8   :  { %5790 = vmatpush3.bf16.msra.mxu0 %v4355_v50 }
 0xcc9   :  { %5801 = vmatprep.subr.bf16.mxu0 %v6193_v14 }
 0xccb   :  { %5792 = vmatmul.mubr.msk.bf16.vlgmr.msra.gmra.mrb[52].mxu0 %vm4266_vm5, %v4339_v53 }
 0xccc   :  { %5803 = vmatprep.mubr.msk.bf16.mxu0 %vm6194_vm1, %v6193_v14 }
 0xccd   :  { %v3658_v45 = vpop.trf.xlu0 }
 0xcce   :  { %v3836_v63 = vpack.c.bf16 %v3658_v45, %v3658_v45 }
 0xcd0   :  { %v4447_v16 = vand.u32 %v6707_v37, %v3836_v63  ;;  %4319 = vadd.xlane.f32.xlu1 %v4318_v59 }
 0xcd1   :  { %v3690_v13 = vpop.trf.xlu0 }
 0xcd2   :  { %v3837_v17 = vpack.c.bf16 %v3690_v13, %v3690_v13  ;;  %5802 = vmatpush3.bf16.msra.mxu0 %v4447_v16 }
 0xcd3   :  { %5813 = vmatprep.subr.bf16.mxu0 %v6193_v14 }
 0xcd4   :  { %v4493_v23 = vand.u32 %v6707_v37, %v3837_v17 }
 0xcd5   :  { %5804 = vmatmul.mubr.msk.bf16.vlgmr.msra.gmra.mrb[56].mxu0 %vm4266_vm5, %v4341_v18  ;;  %v3722_v24 = vpop.trf.xlu0 }
 0xcd6   :  { %5808 = vmatpush3.bf16.msra.mxu1 %v4493_v23  ;;  %v3838_v22 = vpack.c.bf16 %v3722_v24, %v3722_v24  ;;  %5815 = vmatprep.mubr.msk.bf16.mxu0 %vm6194_vm1, %v6193_v14 }
 0xcd7   :  { %5819 = vmatprep.subr.bf16.mxu1 %v6193_v14 }
 0xcd8   :  { %v4539_v27 = vand.u32 %v6707_v37, %v3838_v22 }
 0xcd9   :  { %5810 = vmatmul.mubr.msk.bf16.vlgmr.msra.gmra.mrb[64].mxu1 %vm4266_vm5, %v4342_v26  ;;  %v3754_v28 = vpop.trf.xlu0 }
 0xcda   :  { %v3839_v29 = vpack.c.bf16 %v3754_v28, %v3754_v28  ;;  %5814 = vmatpush3.bf16.msra.mxu0 %v4539_v27  ;;  %5821 = vmatprep.mubr.msk.bf16.mxu1 %vm6194_vm1, %v6193_v14 }
 0xcdb   :  { %5825 = vmatprep.subr.bf16.mxu0 %v6193_v14 }
 0xcdc   :  { %v4585_v9 = vand.u32 %v6707_v37, %v3839_v29 }
 0xcdd   :  { %v3786_v39 = vpop.trf.xlu0 }
 0xcde   :  { %5820 = vmatpush3.bf16.msra.mxu1 %v4585_v9  ;;  %v3840_v42 = vpack.c.bf16 %v3786_v39, %v3786_v39 }
 0xcdf   :  { %5831 = vmatprep.subr.bf16.mxu1 %v6193_v14 }
 0xcf7   :  { %v4281_v6 = vpop.xlane.xlu1 %4280 }
 0xcf8   :  { %v4295_v30 = vsub.f32 %v6704_v10, %v4281_v6  ;;  %v4631_v10 = vand.u32 %v6707_v37, %v3840_v42 }
 0xcfa   :  { %v4307_v31 = vmul.f32 1.442695, %v4295_v30 }
 0xcfb   :  { %v4284_v32 = vpop.xlane.xlu1 %4283 }
 0xcfc   :  { %6159 = vpow2.f32 %v4307_v31  ;;  %v4296_v35 = vsub.f32 %v6711_v41, %v4284_v32 }
 0xcfe   :  { %v4309_v11 = vmul.f32 1.442695, %v4296_v35 }
 0xcff   :  { %v4287_v36 = vpop.xlane.xlu1 %4286 }
 0xd00   :  { %6161 = vpow2.f32 %v4309_v11  ;;  %v4297_v38 = vsub.f32 %v6716_v47, %v4287_v36 }
 0xd02   :  { %v4311_v40 = vmul.f32 1.442695, %v4297_v38 }
 0xd03   :  { %v4290_v43 = vpop.xlane.xlu1 %4289 }
 0xd04   :  { %6163 = vpow2.f32 %v4311_v40  ;;  %v4298_v44 = vsub.f32 %v6722_v54, %v4290_v43  ;;  %v4321_v54 = vsel %vm4266_vm5, %v6156_v15, 0.0 }
 0xd06   :  { %v6160_v46 = vpop.eup %6159  ;;  %v4313_v48 = vmul.f32 1.442695, %v4298_v44 }
 0xd07   :  { %v4327_v49 = vsel %vm4266_vm5, %v6160_v46, 0.0  ;;  %v4343_v56 = vpack.c.bf16 %v6160_v46, %v6160_v46 }
 0xd08   :  { %6165 = vpow2.f32 %v4313_v48  ;;  %4328 = vadd.xlane.f32.xlu1 %v4327_v49 }
 0xd09   :  { %5816 = vmatmul.mubr.msk.bf16.vlgmr.msra.gmra.mrb[60].mxu0 %vm4266_vm5, %v4343_v56 }
 0xd0a   :  { %v6162_v41 = vpop.eup %6161  ;;  %5826 = vmatpush3.bf16.msra.mxu0 %v4631_v10  ;;  %5827 = vmatprep.mubr.msk.bf16.mxu0 %vm6194_vm1, %v6193_v14 }
 0xd0b   :  { %v4330_v47 = vsel %vm4266_vm5, %v6162_v41, 0.0  ;;  %v4344_v57 = vpack.c.bf16 %v6162_v41, %v6162_v41  ;;  %5837 = vmatprep.subr.bf16.mxu0 %v6193_v14 }
 0xd0c   :  { %4331 = vadd.xlane.f32.xlu0 %v4330_v47  ;;  %4322 = vadd.xlane.f32.xlu1 %v4321_v54 }
 0xd0d   :  { %5822 = vmatmul.mubr.msk.bf16.vlgmr.msra.gmra.mrb[68].mxu1 %vm4266_vm5, %v4344_v57 }
 0xd0e   :  { %v6164_v60 = vpop.eup %6163  ;;  %5833 = vmatprep.mubr.msk.bf16.mxu1 %vm6194_vm1, %v6193_v14 }
 0xd0f   :  { %v4333_v61 = vsel %vm4266_vm5, %v6164_v60, 0.0  ;;  %v4345_v19 = vpack.c.bf16 %v6164_v60, %v6164_v60 }
 0xd10   :  { %4334 = vadd.xlane.f32.xlu0 %v4333_v61  ;;  %4325 = vadd.xlane.f32.xlu1 %v4324_v58 }
 0xd11   :  { %5828 = vmatmul.mubr.msk.bf16.vlgmr.msra.gmra.mrb[64].mxu0 %vm4266_vm5, %v4345_v19 }
 0xd12   :  { %v6166_v62 = vpop.eup %6165  ;;  %5841 = vmatprep.mubr.msk.bf16.mxu0 %vm6194_vm1, %v6193_v14 }
 0xd13   :  { %v4336_v0 = vsel %vm4266_vm5, %v6166_v62, 0.0  ;;  %v4346_v4 = vpack.c.bf16 %v6166_v62, %v6166_v62 }
 0xd14   :  { %4337 = vadd.xlane.f32.xlu0 %v4336_v0 }
 0xd29   :  { %v3818_v1 = vpop.trf.xlu1 }
 0xd2a   :  { %v3841_v2 = vpack.c.bf16 %v3818_v1, %v3818_v1 }
 0xd2c   :  { %v4677_v3 = vand.u32 %v6707_v37, %v3841_v2 }
 0xd2e   :  { %5832 = vmatpush3.bf16.msra.mxu1 %v4677_v3 }
 0xd2f   :  { %5845 = vmatprep.subr.bf16.mxu1 %v6193_v14 }
 0xd31   :  { %5834 = vmatmul.mubr.msk.bf16.vlgmr.msra.gmra.mrb[72].mxu1 %vm4266_vm5, %v4346_v4 }
 0xd32   :  { %5849 = vmatprep.mubr.msk.bf16.mxu1 %vm6194_vm1, %v6193_v14 }
 0xd3c   :  { %v4317_v17 = vpop.xlane.xlu0 %4316 }
 0xd3d   :  { %6167 = vrcp.f32 %v4317_v17 }
 0xd47   :  { %v6168_v22 = vpop.eup %6167 }
 0xd5d   :  { %v4320_v13 = vpop.xlane.xlu1 %4319 }
 0xd82   :  { %v4437_v33 = vpop.f32.mrb[60].mxu1 }
 0xd83   :  { %v5799_v34 = vpop.f32.mrb[61].mxu1 }
 0xd84   :  { %v4440_v5 = vpop.f32.mrb[62].mxu1 }
 0xd85   :  { %v5800_v7 = vpop.f32.mrb[63].mxu1 }
 0xd95   :  { %v4329_v18 = vpop.xlane.xlu1 %4328 }
 0xd96   :  { %6169 = vrcp.f32 %v4329_v18 }
 0xd97   :  { %6171 = vrcp.f32 %v4320_v13 }
 0xd99   :  { %v4332_v20 = vpop.xlane.xlu0 %4331  ;;  %v4323_v23 = vpop.xlane.xlu1 %4322 }
 0xd9a   :  { %6173 = vrcp.f32 %v4332_v20 }
 0xd9b   :  { %6175 = vrcp.f32 %v4323_v23 }
 0xd9d   :  { %v4335_v24 = vpop.xlane.xlu0 %4334  ;;  %v4326_v57 = vpop.xlane.xlu1 %4325 }
 0xd9e   :  { %v4391_v51 = vpop.f32.mrb[52].mxu0  ;;  %6177 = vrcp.f32 %v4335_v24 }
 0xd9f   :  { %v5793_v12 = vpop.f32.mrb[53].mxu0  ;;  %v4727_v28 = vmul.f32 %v6168_v22, %v4391_v51  ;;  %6179 = vrcp.f32 %v4326_v57  ;;  %v6104_v51 = vld [vmem:[%s6881_s15 + $0x8] sm:$0xff]  }
 0xda0   :  { %v4394_v52 = vpop.f32.mrb[54].mxu0  ;;  %v6170_v26 = vpop.eup %6169  ;;  %v6108_v57 = vld [vmem:[%s6886_s21 + $0x8] sm:$0xff]  }
 0xda1   :  { %v5794_v8 = vpop.f32.mrb[55].mxu0  ;;  %v6172_v30 = vpop.eup %6171 }
 0xda2   :  { %v4728_v36 = vmul.f32 %v6172_v30, %v4437_v33  ;;  %v4338_v60 = vpop.xlane.xlu0 %4337  ;;  %v6103_v33 = vld [vmem:[%s6881_s15] sm:$0xff]  }
 0xda3   :  { %6181 = vrcp.f32 %v4338_v60  ;;  %5838 = vmatpush3.bf16.msra.mxu0 %v6103_v33  ;;  %v6105_v30 = vld [vmem:[%s6883_s19] sm:$0xff]   ;;  %v6109_v60 = vld [vmem:[%s6886_s21 + $0x10] sm:$0xff]  }
 0xda4   :  { %v6174_v35 = vpop.eup %6173  ;;  %5839 = vmatprep.subr.bf16.mxu0 %v6193_v14  ;;  %5846 = vmatpush3.bf16.msra.mxu1 %v6105_v30 }
 0xda5   :  { %v6176_v42 = vpop.eup %6175  ;;  %5847 = vmatprep.subr.bf16.mxu1 %v6193_v14 }
 0xda7   :  { %5840 = vmatpush3.bf16.msra.mxu0 %v6104_v51 }
 0xda8   :  { %v4483_v50 = vpop.f32.mrb[56].mxu0  ;;  %v6178_v46 = vpop.eup %6177  ;;  %5853 = vmatprep.subr.bf16.mxu0 %v6193_v14 }
 0xda9   :  { %v5805_v53 = vpop.f32.mrb[57].mxu0  ;;  %v4729_v10 = vmul.f32 %v6176_v42, %v4483_v50  ;;  %v6180_v61 = vpop.eup %6179 }
 0xdaa   :  { %v4486_v37 = vpop.f32.mrb[58].mxu0 }
 0xdab   :  { %v5806_v45 = vpop.f32.mrb[59].mxu0  ;;  %v5509_v37 = vld [vmem:[%s6882_s16] ss:$0 sm:$0xff] }
 0xdac   :  { %v4529_v63 = vpop.f32.mrb[64].mxu1 }
 0xdad   :  { %v5811_v59 = vpop.f32.mrb[65].mxu1  ;;  %v6182_v58 = vpop.eup %6181  ;;  %v4730_v62 = vmul.f32 %v6180_v61, %v4529_v63  ;;  %v6110_v61 = vld [vmem:[%s6886_s21 + $0x18] sm:$0xff]  }
 0xdae   :  { %v4532_v15 = vpop.f32.mrb[66].mxu1 }
 0xdaf   :  { %v5812_v16 = vpop.f32.mrb[67].mxu1 }
 0xddc   :  { %v4575_v27 = vpop.f32.mrb[60].mxu0 }
 0xddd   :  { %v4731_v29 = vmul.f32 %v6170_v26, %v4575_v27  ;;  %v5817_v9 = vpop.f32.mrb[61].mxu0 }
 0xdde   :  { %v4578_v6 = vpop.f32.mrb[62].mxu0 }
 0xddf   :  { %v6053_v31 = vpack.i.bf16 %v4731_v29, %v4727_v28  ;;  %v5818_v32 = vpop.f32.mrb[63].mxu0 }
 0xde0   :  { %v4621_v11 = vpop.f32.mrb[68].mxu1 }
 0xde1   :  { %v4732_v39 = vmul.f32 %v6174_v35, %v4621_v11  ;;  %6054 = vxpose.xlu1.b32.start.end [1/1] (short) (narrow) %v6053_v31, 8  ;;  %v5823_v38 = vpop.f32.mrb[69].mxu1  ;;  %v6106_v31 = vld [vmem:[%s6883_s19 + $0x8] sm:$0xff]  }
 0xde2   :  { %v4624_v40 = vpop.f32.mrb[70].mxu1  ;;  %5848 = vmatpush3.bf16.msra.mxu1 %v6106_v31 }
 0xde3   :  { %v6060_v43 = vpack.i.bf16 %v4732_v39, %v4728_v36  ;;  %v5824_v44 = vpop.f32.mrb[71].mxu1 }
 0xde4   :  { %v4667_v48 = vpop.f32.mrb[64].mxu0 }
 0xde5   :  { %v4733_v49 = vmul.f32 %v6178_v46, %v4667_v48  ;;  %v5829_v56 = vpop.f32.mrb[65].mxu0  ;;  %6061 = vxpose.xlu0.b32.start.end [1/1] (short) (narrow) %v6060_v43, 8  ;;  %v5513_v43 = vld [vmem:[%s6884_s17] ss:$0 sm:$0xff] }
 0xde6   :  { %v4670_v41 = vpop.f32.mrb[66].mxu0 }
 0xde7   :  { %v6067_v47 = vpack.i.bf16 %v4733_v49, %v4729_v10  ;;  %v5830_v54 = vpop.f32.mrb[67].mxu0  ;;  %v5514_v10 = vld [vmem:[%s6885_s18] ss:$0 sm:$0xff] }
 0xde8   :  { %v6107_v54 = vld [vmem:[%s6886_s21] sm:$0xff]  }
 0xde9   :  { %6068 = vxpose.xlu0.b32.start.end [1/1] (short) (narrow) %v6067_v47, 8 }
 0xe04   :  { %v4713_v19 = vpop.f32.mrb[72].mxu1 }
 0xe05   :  { %v4734_v0 = vmul.f32 %v6182_v58, %v4713_v19  ;;  %v5835_v1 = vpop.f32.mrb[73].mxu1  ;;  %v5515_v58 = vld [vmem:[%s6887_s20] ss:$0 sm:$0xff] }
 0xe06   :  { %v4716_v2 = vpop.f32.mrb[74].mxu1 }
 0xe07   :  { %v6074_v3 = vpack.i.bf16 %v4734_v0, %v4730_v62  ;;  %v5836_v4 = vpop.f32.mrb[75].mxu1 }
 0xe09   :  { %6075 = vxpose.xlu1.b32.start.end [1/1] (short) (narrow) %v6074_v3, 8 }
 0xe61   :  { %v6055_v34 = vpop.trf.xlu1 }
 0xe62   :  { %6082 = vxpose.xlu0.b32.start [1/4] (short) (narrow) %v6055_v34, 8 }
 0xe65   :  { %v6062_v5 = vpop.trf.xlu0 }
 0xe66   :  { %6084 = vxpose.xlu0.b32.cont [2/4] (short) (narrow) %v6062_v5, 8 }
 0xe69   :  { %v6069_v7 = vpop.trf.xlu0 }
 0xe6a   :  { %6086 = vxpose.xlu0.b32.cont [3/4] (short) (narrow) %v6069_v7, 8 }
 0xe89   :  { %v6076_v12 = vpop.trf.xlu1 }
 0xe8a   :  { %6088 = vxpose.xlu0.b32.end [4/4] (short) (narrow) %v6076_v12, 8 }
 0xefe   :  { %v6089_v52 = vpop.trf.xlu0 }
 0xeff   :  { %v6093_v8 = vunpack.i.h.bf16 %v6089_v52  ;;  %v6090_v50 = vunpack.i.l.bf16 %v6089_v52 }
 0xf01   :  { %v5060_v53 = vpack.c.bf16 %v6093_v8, %v6090_v50 }
 0xf03   :  { %5842 = vmatmul.mubr.msk.bf16.vlgmr.msra.gmra.mrb[68].mxu0 %vm81_vm0, %v5060_v53 }
 0xf04   :  { %5861 = vmatprep.mubr.msk.bf16.mxu0 %vm6194_vm1, %v6193_v14  ;;  %5854 = vmatpush3.bf16.msra.mxu0 %v6107_v54 }
 0xf05   :  { %5855 = vmatprep.subr.bf16.mxu0 %v6193_v14 }
 0xf08   :  { %5856 = vmatpush3.bf16.msra.mxu0 %v6108_v57 }
 0xf09   :  { %5857 = vmatprep.subr.bf16.mxu0 %v6193_v14 }
 0xf0c   :  { %5858 = vmatpush3.bf16.msra.mxu0 %v6109_v60 }
 0xf0d   :  { %5859 = vmatprep.subr.bf16.mxu0 %v6193_v14 }
 0xf10   :  { %5860 = vmatpush3.bf16.msra.mxu0 %v6110_v61 }
 0xfd6   :  { %v5116_v45 = vpop.f32.mrb[68].mxu0 }
 0xfd7   :  { %v5117_v63 = vadd.f32 %v5509_v37, %v5116_v45  ;;  %v5843_v59 = vpop.f32.mrb[69].mxu0 }
 0xfd8   :  { %v5119_v15 = vpop.f32.mrb[70].mxu0 }
 0xfd9   :  { %v6796_v16 = vadd.f32 %v5117_v63, %v6530_v21  ;;  %v5120_v13 = vadd.f32 %v5509_v37, %v5119_v15  ;;  %v5844_v17 = vpop.f32.mrb[71].mxu0 }
 0xfdb   :  { %v6799_v18 = vadd.f32 %v5120_v13, %v6535_v25  ;;  %v5127_v20 = vsel %vm81_vm0, %v6796_v16, 0.0 }
 0xfdc   :  { %5128 = vadd.xlane.f32.xlu1 %v5127_v20 }
 0xfdd   :  { %v5130_v23 = vsel %vm81_vm0, %v6799_v18, 0.0 }
 0xfde   :  { %5131 = vadd.xlane.f32.xlu0 %v5130_v23  ;;  %v6199_v23 = vmov 1983009808  }
0x1069   :  { %v5129_v24 = vpop.xlane.xlu1 %5128 }
0x106a   :  { %v5133_v22 = vmul.f32 0.03125, %v5129_v24  ;;  %v5344_v24 = vunpack.c.l.s4 %v6199_v23 }
0x106b   :  { %v5132_v26 = vpop.xlane.xlu0 %5131 }
0x106c   :  { %v5135_v27 = vsub.f32 %v6796_v16, %v5133_v22  ;;  %v5134_v21 = vmul.f32 0.03125, %v5132_v26  ;;  %v5519_v22 = vld [vmem:[%s6888_s22] ss:$0 sm:$0xff]  ;;  %v5345_v26 = vunpack.c.0.s8 %v5344_v24  ;;  %s6201_s22 = smov 32  }
0x106e   :  { %v5136_v28 = vsub.f32 %v6799_v18, %v5134_v21  ;;  %v5137_v29 = vmul.f32 %v5135_v27, %v5135_v27  ;;  %v5348_v30 = vsub.s32 %v5345_v26, %v6409_v55 }
0x1070   :  { %v5139_v25 = vsel %vm81_vm0, %v5137_v29, 0.0  ;;  %v5138_v9 = vmul.f32 %v5136_v28, %v5136_v28 }
0x1071   :  { %5140 = vadd.xlane.f32.xlu1 %v5139_v25 }
0x1072   :  { %v5142_v6 = vsel %vm81_vm0, %v5138_v9, 0.0 }
0x1075   :  { %5143 = vadd.xlane.f32.xlu1 %v5142_v6 }
0x10fe   :  { %v5141_v32 = vpop.xlane.xlu1 %5140 }
0x10ff   :  { %v5145_v35 = vmul.f32 0.03125, %v5141_v32 }
0x1101   :  { %v5147_v11 = vadd.f32 1e-05, %v5145_v35 }
0x1102   :  { %v5144_v36 = vpop.xlane.xlu1 %5143 }
0x1103   :  { %6183 = vrsqrt.f32 %v5147_v11  ;;  %v5146_v39 = vmul.f32 0.03125, %v5144_v36 }
0x1105   :  { %v5148_v38 = vadd.f32 1e-05, %v5146_v39 }
0x1107   :  { %6185 = vrsqrt.f32 %v5148_v38 }
0x110d   :  { %v6184_v40 = vpop.eup %6183 }
0x110e   :  { %v5151_v42 = vmul.f32 %v6184_v40, %v5135_v27  ;;  %v6200_v27 = vmov 1934713408  }
0x110f   :  { %v5375_v21 = vunpack.c.l.s4 %v6200_v27 }
0x1110   :  { %v5159_v46 = vmul.f32 %v5513_v43, %v5151_v42 }
0x1111   :  { %v6186_v44 = vpop.eup %6185  ;;  %v5376_v32 = vunpack.c.0.s8 %v5375_v21 }
0x1112   :  { %v5152_v48 = vmul.f32 %v6186_v44, %v5136_v28  ;;  %v5167_v56 = vadd.f32 %v5514_v10, %v5159_v46 }
0x1113   :  { %v5379_v42 = vsub.s32 %v5376_v32, %v6409_v55 }
0x1114   :  { %v5160_v49 = vmul.f32 %v5513_v43, %v5152_v48 }
0x1116   :  { %v5168_v41 = vadd.f32 %v5514_v10, %v5160_v49 }
0x1118   :  { %v5174_v47 = vpack.c.bf16 %v5168_v41, %v5167_v56 }
0x111a   :  { %5850 = vmatmul.mubr.msk.bf16.vlgmr.msra.gmra.mrb[76].mxu1 %vm81_vm0, %v5174_v47 }
0x11ed   :  { %v5230_v19 = vpop.f32.mrb[76].mxu1 }
0x11ee   :  { %v5231_v62 = vadd.f32 %v5515_v58, %v5230_v19  ;;  %v5851_v0 = vpop.f32.mrb[77].mxu1 }
0x11ef   :  { %v5233_v1 = vpop.f32.mrb[78].mxu1 }
0x11f0   :  { %v5239_v2 = vmul.f32 0.044715, %v5231_v62  ;;  %v5234_v3 = vadd.f32 %v5515_v58, %v5233_v1  ;;  %v5852_v4 = vpop.f32.mrb[79].mxu1  ;;  %v5237_v63 = vmul.f32 0.5, %v5231_v62 }
0x11f2   :  { %v5241_v33 = vmul.f32 %v5239_v2, %v5231_v62  ;;  %v5240_v34 = vmul.f32 0.044715, %v5234_v3  ;;  %v5238_v59 = vmul.f32 0.5, %v5234_v3 }
0x11f4   :  { %v5243_v5 = vmul.f32 %v5241_v33, %v5231_v62  ;;  %v5242_v7 = vmul.f32 %v5240_v34, %v5234_v3 }
0x11f6   :  { %v5245_v51 = vadd.f32 %v5243_v5, %v5231_v62  ;;  %v5244_v12 = vmul.f32 %v5242_v7, %v5234_v3 }
0x11f8   :  { %v5247_v52 = vmul.f32 0.7978846, %v5245_v51  ;;  %v5246_v8 = vadd.f32 %v5244_v12, %v5234_v3 }
0x11fa   :  { %6187 = vtanh.f32 %v5247_v52  ;;  %v5248_v50 = vmul.f32 0.7978846, %v5246_v8 }
0x11fc   :  { %6189 = vtanh.f32 %v5248_v50 }
0x1204   :  { %v6188_v53 = vpop.eup %6187 }
0x1205   :  { %v5251_v37 = vadd.f32 1.0, %v6188_v53 }
0x1206   :  { %v6190_v45 = vpop.eup %6189 }
0x1207   :  { %v5252_v15 = vadd.f32 1.0, %v6190_v45  ;;  %v5253_v13 = vmul.f32 %v5251_v37, %v5237_v63 }
0x1209   :  { %v5254_v17 = vmul.f32 %v5252_v15, %v5238_v59 }
0x120b   :  { %v5264_v20 = vpack.c.bf16 %v5254_v17, %v5253_v13 }
0x120d   :  { %5862 = vmatmul.mubr.msk.bf16.vlgmr.msra.gmra.mrb[72].mxu0 %vm5295_vm8, %v5264_v20 }
0x12e0   :  { %v5333_v28 = vpop.f32.mrb[72].mxu0 }
0x12e1   :  { %v5334_v29 = vadd.f32 %v5519_v22, %v5333_v28  ;;  %v5863_v25 = vpop.f32.mrb[73].mxu0 }
0x12e2   :  { %v5336_v9 = vpop.f32.mrb[74].mxu0 }
0x12e3   :  { %v5340_v6 = vadd.f32 %v5334_v29, %v6796_v16  ;;  %v5337_v31 = vadd.f32 %v5519_v22, %v5336_v9  ;;  %v5864_v35 = vpop.f32.mrb[75].mxu0 }
0x12e5   :  { %v5342_v11 = vcombine.high %v5340_v6, %v6193_v14  ;;  %v5341_v36 = vadd.f32 %v5337_v31, %v6799_v18  ;;  %v5349_v39 = vrot.slane %v5340_v6, %v5348_v30 }
0x12e7   :  { %v5357_v38 = vcombine.high %v5341_v36, %v6193_v14  ;;  %v5364_v40 = vrot.slane %v5341_v36, %v5348_v30  ;;  %v5356_v43 = vrot.slane %v5342_v11, %v5348_v30 }
0x12e9   :  { %v5371_v44 = vrot.slane %v5357_v38, %v5348_v30  ;;  %v5372_v46 = vcombine.low %v5349_v39, %v5364_v40  ;;  %v5373_v48 = vcombine.high %v5349_v39, %v5364_v40 }
0x12eb   :  { %v5380_v16 = vrot.slane %v5372_v46, %v5379_v42  ;;  %v5388_v10 = vcombine.low %v5356_v43, %v5371_v44  ;;  %v5389_v49 = vcombine.high %v5356_v43, %v5371_v44  ;;  %v5387_v47 = vrot.slane %v5373_v48, %v5379_v42 }
0x12ed   :  { %v5404_v56 = vcombine.high %v5380_v16, %v6193_v14  ;;  %v5396_v41 = vrot.slane %v5388_v10, %v5379_v42  ;;  %v5403_v54 = vrot.slane %v5389_v49, %v5379_v42  ;;  %v5405_v55 = vcombine.high %v5387_v47, %v6193_v14 }
0x12ef   :  { %5409 = vrot.lane.b32.xlu1 %v5404_v56, %s6201_s22  ;;  %v5406_v18 = vcombine.high %v5396_v41, %v6193_v14  ;;  %v5407_v57 = vcombine.high %v5403_v54, %v6193_v14 }
0x12f1   :  { %5421 = vrot.lane.b32.xlu0 %v5406_v18, %s6201_s22 }
0x12f3   :  { %5413 = vrot.lane.b32.xlu1 %v5387_v47, %s6196_s26 }
0x12f7   :  { %5425 = vrot.lane.b32.xlu1 %v5403_v54, %s6196_s26 }
0x12fb   :  { %5417 = vrot.lane.b32.xlu1 %v5405_v55, %s6195_s5 }
0x12ff   :  { %5429 = vrot.lane.b32.xlu1 %v5407_v57, %s6195_s5 }
0x1361   :  { %v5410_v60 = vpop.permute.xlu1 %5409 }
0x1362   :  { %v5432_v0 = vsel %vm81_vm0, %v5380_v16, %v5410_v60 }
0x1363   :  { %v5422_v19 = vpop.permute.xlu0 %5421 }
0x1364   :  { %v5436_v1 = vsel %vm81_vm0, %v5396_v41, %v5422_v19 }
0x1365   :  { %v5414_v61 = vpop.permute.xlu1 %5413 }
0x1366   :  { %v5433_v2 = vsel %vm5295_vm8, %v5432_v0, %v5414_v61 }
0x1369   :  { %v5426_v58 = vpop.permute.xlu1 %5425 }
0x136a   :  { %v5437_v3 = vsel %vm5295_vm8, %v5436_v1, %v5426_v58 }
0x136d   :  { %v5418_v62 = vpop.permute.xlu1 %5417 }
0x136e   :  { %v5435_v33 = vsel %vm5434_vm9, %v5433_v2, %v5418_v62 }
0x1371   :  { %v5430_v4 = vpop.permute.xlu1 %5429 }
0x1372   :  { %v5438_v34 = vsel %vm5434_vm9, %v5437_v3, %v5430_v4 }
0x1373   :  { %v5441_v14 = vcombine.low %v5435_v33, %v5438_v34 }
0x1375   :  { %5525 = vst.sshfl [vmem:[%s6889_s23] sm:$0x33 pattern:$0x76325410] %v5441_v14 }

</bundles_post_ra>
